<compile_context>
chip_gen: v5e
topology: v5e:2x2
jax: 0.10.0
libtpu: 0.0.40
codegen_flags: <defaults>
</compile_context>

<pallas_src>
import functools

import jax
import jax.numpy as jnp
from jax.experimental import pallas as pl
from jax.experimental.pallas import tpu as pltpu

EPS = 1e-5


# ------------------------------ in-kernel helpers ------------------------------

def _bn_train(y, gamma, beta, *, relu):
    """Train-mode BatchNorm over rows: one-pass sum/sumsq, biased variance, f32 math."""
    inv_m = 1.0 / y.shape[0]
    s = jnp.sum(y, axis=0, keepdims=True)
    ss = jnp.sum(y * y, axis=0, keepdims=True)
    mu = s * inv_m
    var = jnp.maximum(ss * inv_m - mu * mu, 0.0)        # biased var, as PyTorch BN uses
    scale = gamma * jax.lax.rsqrt(var + EPS)
    shift = beta - mu * scale
    out = y * scale + shift
    if relu:
        out = jnp.maximum(out, 0.0)
    return out


# ------------------------------ fused Pallas kernel ------------------------------

def _residual_block_kernel(*refs, dims, stride, has_sc_conv):
    N, H, W, Cin, Cd, Cout = dims
    M = N * H * W
    f32, bf16 = jnp.float32, jnp.bfloat16

    x_ref = refs[0]
    w1_ref, b1_ref, g1_ref, be1_ref = refs[1:5]
    w2_ref, g2_ref, be2_ref = refs[5:8]
    w3_ref, b3_ref, g3_ref, be3_ref = refs[8:12]
    i = 12
    if has_sc_conv:
        wsc_ref, bsc_ref, gsc_ref, besc_ref = refs[i:i + 4]
        i += 4
    if stride != 1:
        sel_ref = refs[i]
        i += 1
    o_ref, pad_ref = refs[i], refs[i + 1]

    # ---- conv1: 1x1 (bias) + BN + ReLU ------------------------------------------
    x2 = x_ref[...]                                     # (M, Cin) f32, rows = (n, h, w)
    y1 = jnp.dot(x2.astype(bf16), w1_ref[...], preferred_element_type=f32)
    h1 = _bn_train(y1 + b1_ref[...], g1_ref[...], be1_ref[...], relu=True)   # (M, Cd)

    # ---- conv2: 3x3, pad=1, no bias -- 9 shifted taps from a padded VMEM scratch --
    pad_ref[...] = jnp.zeros(pad_ref.shape, f32)
    pad_ref[:, 1:H + 1, 1:W + 1, :] = h1.reshape(N, H, W, Cd)
    acc = jnp.zeros((M, Cd), f32)
    for ky in range(3):
        for kx in range(3):
            tap = pad_ref[:, ky:ky + H, kx:kx + W, :].reshape(M, Cd)
            acc = acc + jnp.dot(tap.astype(bf16), w2_ref[3 * ky + kx],
                                preferred_element_type=f32)

    # stride-2 spatial subsample via an exact one-hot row selection (done on the MXU)
    if stride != 1:
        sel = sel_ref[...]                              # (Ms, M) f32 one-hot
        y2 = jnp.dot(sel, acc, preferred_element_type=f32)
        x_sc = jnp.dot(sel, x2, preferred_element_type=f32)
    else:
        y2, x_sc = acc, x2

    h2 = _bn_train(y2, g2_ref[...], be2_ref[...], relu=True)                # (Ms, Cd)

    # ---- conv3: 1x1 (bias) + BN (no ReLU) ----------------------------------------
    y3 = jnp.dot(h2.astype(bf16), w3_ref[...], preferred_element_type=f32)
    out = _bn_train(y3 + b3_ref[...], g3_ref[...], be3_ref[...], relu=False)  # (Ms, Cout)

    # ---- shortcut: conv1x1(stride) + BN, or identity ------------------------------
    if has_sc_conv:
        ysc = jnp.dot(x_sc.astype(bf16), wsc_ref[...], preferred_element_type=f32)
        sc = _bn_train(ysc + bsc_ref[...], gsc_ref[...], besc_ref[...], relu=False)
    else:
        sc = x_sc                                       # identity (Cin == Cout, stride == 1)

    # ---- residual add + ReLU, fused into the single output store ------------------
    o_ref[...] = jnp.maximum(out + sc, 0.0)


# ------------------------------ host-side wrapper ------------------------------

def _full_spec(shape):
    nd = len(shape)
    return pl.BlockSpec(shape, lambda: (0,) * nd)


def residual_block2_forward(x_nchw, p, *, downsample):
    N, Cin, H, W = x_nchw.shape
    Cd = p["w1"].shape[1]
    Cout = p["w3"].shape[1]
    stride = 2 if downsample else 1
    has_sc_conv = downsample or (Cin != Cout)
    Ho = (H + 2 - 3) // stride + 1
    Wo = (W + 2 - 3) // stride + 1
    M, Ms = N * H * W, N * Ho * Wo
    f32, bf16 = jnp.float32, jnp.bfloat16

    # NCHW -> NHWC -> (rows = n*h*w, cols = channels)
    x2d = jnp.transpose(x_nchw, (0, 2, 3, 1)).astype(f32).reshape(M, Cin)
    row = lambda v: v.astype(f32).reshape(1, -1)

    inputs = [
        x2d,
        p["w1"].astype(bf16), row(p["b1"]), row(p["g1"]), row(p["be1"]),
        p["w2"].reshape(9, Cd, Cd).astype(bf16), row(p["g2"]), row(p["be2"]),
        p["w3"].astype(bf16), row(p["b3"]), row(p["g3"]), row(p["be3"]),
    ]
    if has_sc_conv:
        inputs += [p["wsc"].astype(bf16), row(p["bsc"]), row(p["gsc"]), row(p["besc"])]
    if stride != 1:
        # exact one-hot selection: output row (n, ho, wo) <- input row (n, ho*s, wo*s)
        r = jnp.arange(Ms)
        n_i, rem = r // (Ho * Wo), r % (Ho * Wo)
        src = (n_i * H + (rem // Wo) * stride) * W + (rem % Wo) * stride
        inputs.append((src[:, None] == jnp.arange(M)[None, :]).astype(f32))

    kernel = functools.partial(
        _residual_block_kernel,
        dims=(N, H, W, Cin, Cd, Cout), stride=stride, has_sc_conv=has_sc_conv)

    y2d = pl.pallas_call(
        kernel,
        out_shape=jax.ShapeDtypeStruct((Ms, Cout), f32),
        in_specs=[_full_spec(a.shape) for a in inputs],
        out_specs=_full_spec((Ms, Cout)),
        scratch_shapes=[pltpu.VMEM((N, H + 2, W + 2, Cd), f32)],   # padded h1 for the 9 taps
        compiler_params=pltpu.CompilerParams(vmem_limit_bytes=32 * 1024 * 1024),
    )(*inputs)

    y = y2d.reshape(N, Ho, Wo, Cout)
    return jnp.transpose(y, (0, 3, 1, 2))               # NHWC -> NCHW


# ------------------------------ parameter init ------------------------------

def init_params(key, in_c, down_c, out_c):
    ks = jax.random.split(key, 12)
    f32 = jnp.float32
    return {
        # forwardPath: conv1x1 (bias) -> BN -> ReLU -> conv3x3 (no bias) -> BN -> ReLU
        #              -> conv1x1 (bias) -> BN
        "w1": 0.1 * jax.random.normal(ks[0], (in_c, down_c), f32),
        "b1": 0.1 * jax.random.normal(ks[1], (down_c,), f32),
        "g1": 1.0 + 0.05 * jax.random.normal(ks[2], (down_c,), f32),
        "be1": 0.05 * jax.random.normal(ks[3], (down_c,), f32),
        "w2": 0.1 * jax.random.normal(ks[4], (3, 3, down_c, down_c), f32),  # (ky, kx, cin, cout)
        "g2": 1.0 + 0.05 * jax.random.normal(ks[5], (down_c,), f32),
        "be2": 0.05 * jax.random.normal(ks[6], (down_c,), f32),
        "w3": 0.1 * jax.random.normal(ks[7], (down_c, out_c), f32),
        "b3": 0.1 * jax.random.normal(ks[8], (out_c,), f32),
        "g3": jnp.ones((out_c,), f32),
        "be3": jnp.zeros((out_c,), f32),
        # shortcut convX: conv1x1 (bias, stride) -> BN
        "wsc": 0.1 * jax.random.normal(ks[9], (in_c, out_c), f32),
        "bsc": 0.1 * jax.random.normal(ks[10], (out_c,), f32),
        "gsc": 1.0 + 0.05 * jax.random.normal(ks[11], (out_c,), f32),
        "besc": jnp.zeros((out_c,), f32),
    }


# ----------------------------------- main -----------------------------------

if __name__ == "__main__":
    key = jax.random.PRNGKey(0)
    kx, kp = jax.random.split(key)

    N, in_c, H, W = 2, 4, 16, 16
    down_c, out_c = 8, 16
    downsample = True  # stride = 2, shortcut conv active

    x = jax.random.normal(kx, (N, in_c, H, W), jnp.float32)
    params = init_params(kp, in_c, down_c, out_c)

    y = residual_block2_forward(x, params, downsample=downsample)
    jax.block_until_ready(y)
    assert y.shape == (N, out_c, H // 2, W // 2)
    print("KERNEL_OK")
</pallas_src>

<mosaic_0001>
module attributes {stable_mosaic.version = 11 : i64} {
  func.func @_residual_block_kernel(%arg0: memref<512x4xf32, #tpu.memory_space<vmem>>, %arg1: memref<4x8xbf16, #tpu.memory_space<vmem>>, %arg2: memref<1x8xf32, #tpu.memory_space<vmem>>, %arg3: memref<1x8xf32, #tpu.memory_space<vmem>>, %arg4: memref<1x8xf32, #tpu.memory_space<vmem>>, %arg5: memref<9x8x8xbf16, #tpu.memory_space<vmem>>, %arg6: memref<1x8xf32, #tpu.memory_space<vmem>>, %arg7: memref<1x8xf32, #tpu.memory_space<vmem>>, %arg8: memref<8x16xbf16, #tpu.memory_space<vmem>>, %arg9: memref<1x16xf32, #tpu.memory_space<vmem>>, %arg10: memref<1x16xf32, #tpu.memory_space<vmem>>, %arg11: memref<1x16xf32, #tpu.memory_space<vmem>>, %arg12: memref<4x16xbf16, #tpu.memory_space<vmem>>, %arg13: memref<1x16xf32, #tpu.memory_space<vmem>>, %arg14: memref<1x16xf32, #tpu.memory_space<vmem>>, %arg15: memref<1x16xf32, #tpu.memory_space<vmem>>, %arg16: memref<128x512xf32, #tpu.memory_space<vmem>>, %arg17: memref<128x16xf32, #tpu.memory_space<vmem>>, %arg18: memref<2x18x18x8xf32, #tpu.memory_space<vmem>>) attributes {dimension_semantics = [], scalar_prefetch = 0 : i64, scratch_operands = 1 : i64, tpu.core_type = #tpu.core_type<tc>} {
    %c0 = arith.constant 0 : index
    %c0_0 = arith.constant 0 : index
    %0 = vector.load %arg0[%c0, %c0_0] : memref<512x4xf32, #tpu.memory_space<vmem>>, vector<512x4xf32>
    %1 = arith.truncf %0 : vector<512x4xf32> to vector<512x4xbf16>
    %c0_1 = arith.constant 0 : index
    %c0_2 = arith.constant 0 : index
    %2 = vector.load %arg1[%c0_1, %c0_2] : memref<4x8xbf16, #tpu.memory_space<vmem>>, vector<4x8xbf16>
    %cst = arith.constant dense<0.000000e+00> : vector<512x8xf32>
    %3 = tpu.matmul %1, %2, %cst {dimension_numbers = #tpu.dot_dimension_numbers<[1], [0], [0], [1], [0, 0, 1, 1], [], []>} : vector<512x4xbf16>, vector<4x8xbf16>, vector<512x8xf32> -> vector<512x8xf32>
    %c0_3 = arith.constant 0 : index
    %c0_4 = arith.constant 0 : index
    %4 = vector.load %arg2[%c0_3, %c0_4] : memref<1x8xf32, #tpu.memory_space<vmem>>, vector<1x8xf32>
    %5 = vector.broadcast %4 : vector<1x8xf32> to vector<512x8xf32>
    %6 = arith.addf %3, %5 : vector<512x8xf32>
    %c0_5 = arith.constant 0 : index
    %c0_6 = arith.constant 0 : index
    %7 = vector.load %arg3[%c0_5, %c0_6] : memref<1x8xf32, #tpu.memory_space<vmem>>, vector<1x8xf32>
    %c0_7 = arith.constant 0 : index
    %c0_8 = arith.constant 0 : index
    %8 = vector.load %arg4[%c0_7, %c0_8] : memref<1x8xf32, #tpu.memory_space<vmem>>, vector<1x8xf32>
    %cst_9 = arith.constant dense<0.000000e+00> : vector<8xf32>
    %9 = vector.multi_reduction <add>, %6, %cst_9 [0] : vector<512x8xf32> to vector<8xf32>
    %10 = vector.shape_cast %9 : vector<8xf32> to vector<1x8xf32>
    %11 = arith.mulf %6, %6 : vector<512x8xf32>
    %cst_10 = arith.constant dense<0.000000e+00> : vector<8xf32>
    %12 = vector.multi_reduction <add>, %11, %cst_10 [0] : vector<512x8xf32> to vector<8xf32>
    %13 = vector.shape_cast %12 : vector<8xf32> to vector<1x8xf32>
    %cst_11 = arith.constant 0.001953125 : f32
    %14 = vector.broadcast %cst_11 : f32 to vector<1x8xf32>
    %15 = arith.mulf %10, %14 : vector<1x8xf32>
    %cst_12 = arith.constant 0.001953125 : f32
    %16 = vector.broadcast %cst_12 : f32 to vector<1x8xf32>
    %17 = arith.mulf %13, %16 : vector<1x8xf32>
    %18 = arith.mulf %15, %15 : vector<1x8xf32>
    %19 = arith.subf %17, %18 : vector<1x8xf32>
    %cst_13 = arith.constant 0.000000e+00 : f32
    %20 = vector.broadcast %cst_13 : f32 to vector<1x8xf32>
    %21 = arith.maximumf %19, %20 : vector<1x8xf32>
    %cst_14 = arith.constant 9.99999974E-6 : f32
    %22 = vector.broadcast %cst_14 : f32 to vector<1x8xf32>
    %23 = arith.addf %21, %22 : vector<1x8xf32>
    %24 = math.rsqrt %23 : vector<1x8xf32>
    %25 = arith.mulf %7, %24 : vector<1x8xf32>
    %26 = arith.mulf %15, %25 : vector<1x8xf32>
    %27 = arith.subf %8, %26 : vector<1x8xf32>
    %28 = vector.broadcast %25 : vector<1x8xf32> to vector<512x8xf32>
    %29 = arith.mulf %6, %28 : vector<512x8xf32>
    %30 = vector.broadcast %27 : vector<1x8xf32> to vector<512x8xf32>
    %31 = arith.addf %29, %30 : vector<512x8xf32>
    %cst_15 = arith.constant 0.000000e+00 : f32
    %32 = vector.broadcast %cst_15 : f32 to vector<512x8xf32>
    %33 = arith.maximumf %31, %32 : vector<512x8xf32>
    %cst_16 = arith.constant 0.000000e+00 : f32
    %34 = vector.broadcast %cst_16 : f32 to vector<2x18x18x8xf32>
    %c0_17 = arith.constant 0 : index
    %c0_18 = arith.constant 0 : index
    %c0_19 = arith.constant 0 : index
    %c0_20 = arith.constant 0 : index
    %35 = vector.load %arg18[%c0_17, %c0_18, %c0_19, %c0_20] : memref<2x18x18x8xf32, #tpu.memory_space<vmem>>, vector<2x18x18x8xf32>
    tpu.vector_store %arg18[%c0_17, %c0_18, %c0_19, %c0_20], %34 {strides = array<i32>} : memref<2x18x18x8xf32, #tpu.memory_space<vmem>>, vector<2x18x18x8xf32>,
    %36 = vector.shape_cast %33 : vector<512x8xf32> to vector<2x16x16x8xf32>
    %c0_21 = arith.constant 0 : index
    %c1 = arith.constant 1 : index
    %c1_22 = arith.constant 1 : index
    %c0_23 = arith.constant 0 : index
    %37 = vector.load %arg18[%c0_21, %c1, %c1_22, %c0_23] : memref<2x18x18x8xf32, #tpu.memory_space<vmem>>, vector<2x16x16x8xf32>
    tpu.vector_store %arg18[%c0_21, %c1, %c1_22, %c0_23], %36 {strides = array<i32>} : memref<2x18x18x8xf32, #tpu.memory_space<vmem>>, vector<2x16x16x8xf32>,
    %cst_24 = arith.constant 0.000000e+00 : f32
    %38 = vector.broadcast %cst_24 : f32 to vector<512x8xf32>
    %c0_25 = arith.constant 0 : index
    %c0_26 = arith.constant 0 : index
    %c0_27 = arith.constant 0 : index
    %c0_28 = arith.constant 0 : index
    %39 = vector.load %arg18[%c0_25, %c0_26, %c0_27, %c0_28] : memref<2x18x18x8xf32, #tpu.memory_space<vmem>>, vector<2x16x16x8xf32>
    %40 = vector.shape_cast %39 : vector<2x16x16x8xf32> to vector<512x8xf32>
    %41 = arith.truncf %40 : vector<512x8xf32> to vector<512x8xbf16>
    %c0_29 = arith.constant 0 : index
    %c0_30 = arith.constant 0 : index
    %c0_31 = arith.constant 0 : index
    %42 = vector.load %arg5[%c0_29, %c0_30, %c0_31] : memref<9x8x8xbf16, #tpu.memory_space<vmem>>, vector<1x8x8xbf16>
    %43 = vector.shape_cast %42 : vector<1x8x8xbf16> to vector<8x8xbf16>
    %cst_32 = arith.constant dense<0.000000e+00> : vector<512x8xf32>
    %44 = tpu.matmul %41, %43, %cst_32 {dimension_numbers = #tpu.dot_dimension_numbers<[1], [0], [0], [1], [0, 0, 1, 1], [], []>} : vector<512x8xbf16>, vector<8x8xbf16>, vector<512x8xf32> -> vector<512x8xf32>
    %45 = arith.addf %38, %44 : vector<512x8xf32>
    %c0_33 = arith.constant 0 : index
    %c0_34 = arith.constant 0 : index
    %c1_35 = arith.constant 1 : index
    %c0_36 = arith.constant 0 : index
    %46 = vector.load %arg18[%c0_33, %c0_34, %c1_35, %c0_36] : memref<2x18x18x8xf32, #tpu.memory_space<vmem>>, vector<2x16x16x8xf32>
    %47 = vector.shape_cast %46 : vector<2x16x16x8xf32> to vector<512x8xf32>
    %48 = arith.truncf %47 : vector<512x8xf32> to vector<512x8xbf16>
    %c1_37 = arith.constant 1 : index
    %c0_38 = arith.constant 0 : index
    %c0_39 = arith.constant 0 : index
    %49 = vector.load %arg5[%c1_37, %c0_38, %c0_39] : memref<9x8x8xbf16, #tpu.memory_space<vmem>>, vector<1x8x8xbf16>
    %50 = vector.shape_cast %49 : vector<1x8x8xbf16> to vector<8x8xbf16>
    %cst_40 = arith.constant dense<0.000000e+00> : vector<512x8xf32>
    %51 = tpu.matmul %48, %50, %cst_40 {dimension_numbers = #tpu.dot_dimension_numbers<[1], [0], [0], [1], [0, 0, 1, 1], [], []>} : vector<512x8xbf16>, vector<8x8xbf16>, vector<512x8xf32> -> vector<512x8xf32>
    %52 = arith.addf %45, %51 : vector<512x8xf32>
    %c0_41 = arith.constant 0 : index
    %c0_42 = arith.constant 0 : index
    %c2 = arith.constant 2 : index
    %c0_43 = arith.constant 0 : index
    %53 = vector.load %arg18[%c0_41, %c0_42, %c2, %c0_43] : memref<2x18x18x8xf32, #tpu.memory_space<vmem>>, vector<2x16x16x8xf32>
    %54 = vector.shape_cast %53 : vector<2x16x16x8xf32> to vector<512x8xf32>
    %55 = arith.truncf %54 : vector<512x8xf32> to vector<512x8xbf16>
    %c2_44 = arith.constant 2 : index
    %c0_45 = arith.constant 0 : index
    %c0_46 = arith.constant 0 : index
    %56 = vector.load %arg5[%c2_44, %c0_45, %c0_46] : memref<9x8x8xbf16, #tpu.memory_space<vmem>>, vector<1x8x8xbf16>
    %57 = vector.shape_cast %56 : vector<1x8x8xbf16> to vector<8x8xbf16>
    %cst_47 = arith.constant dense<0.000000e+00> : vector<512x8xf32>
    %58 = tpu.matmul %55, %57, %cst_47 {dimension_numbers = #tpu.dot_dimension_numbers<[1], [0], [0], [1], [0, 0, 1, 1], [], []>} : vector<512x8xbf16>, vector<8x8xbf16>, vector<512x8xf32> -> vector<512x8xf32>
    %59 = arith.addf %52, %58 : vector<512x8xf32>
    %c0_48 = arith.constant 0 : index
    %c1_49 = arith.constant 1 : index
    %c0_50 = arith.constant 0 : index
    %c0_51 = arith.constant 0 : index
    %60 = vector.load %arg18[%c0_48, %c1_49, %c0_50, %c0_51] : memref<2x18x18x8xf32, #tpu.memory_space<vmem>>, vector<2x16x16x8xf32>
    %61 = vector.shape_cast %60 : vector<2x16x16x8xf32> to vector<512x8xf32>
    %62 = arith.truncf %61 : vector<512x8xf32> to vector<512x8xbf16>
    %c3 = arith.constant 3 : index
    %c0_52 = arith.constant 0 : index
    %c0_53 = arith.constant 0 : index
    %63 = vector.load %arg5[%c3, %c0_52, %c0_53] : memref<9x8x8xbf16, #tpu.memory_space<vmem>>, vector<1x8x8xbf16>
    %64 = vector.shape_cast %63 : vector<1x8x8xbf16> to vector<8x8xbf16>
    %cst_54 = arith.constant dense<0.000000e+00> : vector<512x8xf32>
    %65 = tpu.matmul %62, %64, %cst_54 {dimension_numbers = #tpu.dot_dimension_numbers<[1], [0], [0], [1], [0, 0, 1, 1], [], []>} : vector<512x8xbf16>, vector<8x8xbf16>, vector<512x8xf32> -> vector<512x8xf32>
    %66 = arith.addf %59, %65 : vector<512x8xf32>
    %c0_55 = arith.constant 0 : index
    %c1_56 = arith.constant 1 : index
    %c1_57 = arith.constant 1 : index
    %c0_58 = arith.constant 0 : index
    %67 = vector.load %arg18[%c0_55, %c1_56, %c1_57, %c0_58] : memref<2x18x18x8xf32, #tpu.memory_space<vmem>>, vector<2x16x16x8xf32>
    %68 = vector.shape_cast %67 : vector<2x16x16x8xf32> to vector<512x8xf32>
    %69 = arith.truncf %68 : vector<512x8xf32> to vector<512x8xbf16>
    %c4 = arith.constant 4 : index
    %c0_59 = arith.constant 0 : index
    %c0_60 = arith.constant 0 : index
    %70 = vector.load %arg5[%c4, %c0_59, %c0_60] : memref<9x8x8xbf16, #tpu.memory_space<vmem>>, vector<1x8x8xbf16>
    %71 = vector.shape_cast %70 : vector<1x8x8xbf16> to vector<8x8xbf16>
    %cst_61 = arith.constant dense<0.000000e+00> : vector<512x8xf32>
    %72 = tpu.matmul %69, %71, %cst_61 {dimension_numbers = #tpu.dot_dimension_numbers<[1], [0], [0], [1], [0, 0, 1, 1], [], []>} : vector<512x8xbf16>, vector<8x8xbf16>, vector<512x8xf32> -> vector<512x8xf32>
    %73 = arith.addf %66, %72 : vector<512x8xf32>
    %c0_62 = arith.constant 0 : index
    %c1_63 = arith.constant 1 : index
    %c2_64 = arith.constant 2 : index
    %c0_65 = arith.constant 0 : index
    %74 = vector.load %arg18[%c0_62, %c1_63, %c2_64, %c0_65] : memref<2x18x18x8xf32, #tpu.memory_space<vmem>>, vector<2x16x16x8xf32>
    %75 = vector.shape_cast %74 : vector<2x16x16x8xf32> to vector<512x8xf32>
    %76 = arith.truncf %75 : vector<512x8xf32> to vector<512x8xbf16>
    %c5 = arith.constant 5 : index
    %c0_66 = arith.constant 0 : index
    %c0_67 = arith.constant 0 : index
    %77 = vector.load %arg5[%c5, %c0_66, %c0_67] : memref<9x8x8xbf16, #tpu.memory_space<vmem>>, vector<1x8x8xbf16>
    %78 = vector.shape_cast %77 : vector<1x8x8xbf16> to vector<8x8xbf16>
    %cst_68 = arith.constant dense<0.000000e+00> : vector<512x8xf32>
    %79 = tpu.matmul %76, %78, %cst_68 {dimension_numbers = #tpu.dot_dimension_numbers<[1], [0], [0], [1], [0, 0, 1, 1], [], []>} : vector<512x8xbf16>, vector<8x8xbf16>, vector<512x8xf32> -> vector<512x8xf32>
    %80 = arith.addf %73, %79 : vector<512x8xf32>
    %c0_69 = arith.constant 0 : index
    %c2_70 = arith.constant 2 : index
    %c0_71 = arith.constant 0 : index
    %c0_72 = arith.constant 0 : index
    %81 = vector.load %arg18[%c0_69, %c2_70, %c0_71, %c0_72] : memref<2x18x18x8xf32, #tpu.memory_space<vmem>>, vector<2x16x16x8xf32>
    %82 = vector.shape_cast %81 : vector<2x16x16x8xf32> to vector<512x8xf32>
    %83 = arith.truncf %82 : vector<512x8xf32> to vector<512x8xbf16>
    %c6 = arith.constant 6 : index
    %c0_73 = arith.constant 0 : index
    %c0_74 = arith.constant 0 : index
    %84 = vector.load %arg5[%c6, %c0_73, %c0_74] : memref<9x8x8xbf16, #tpu.memory_space<vmem>>, vector<1x8x8xbf16>
    %85 = vector.shape_cast %84 : vector<1x8x8xbf16> to vector<8x8xbf16>
    %cst_75 = arith.constant dense<0.000000e+00> : vector<512x8xf32>
    %86 = tpu.matmul %83, %85, %cst_75 {dimension_numbers = #tpu.dot_dimension_numbers<[1], [0], [0], [1], [0, 0, 1, 1], [], []>} : vector<512x8xbf16>, vector<8x8xbf16>, vector<512x8xf32> -> vector<512x8xf32>
    %87 = arith.addf %80, %86 : vector<512x8xf32>
    %c0_76 = arith.constant 0 : index
    %c2_77 = arith.constant 2 : index
    %c1_78 = arith.constant 1 : index
    %c0_79 = arith.constant 0 : index
    %88 = vector.load %arg18[%c0_76, %c2_77, %c1_78, %c0_79] : memref<2x18x18x8xf32, #tpu.memory_space<vmem>>, vector<2x16x16x8xf32>
    %89 = vector.shape_cast %88 : vector<2x16x16x8xf32> to vector<512x8xf32>
    %90 = arith.truncf %89 : vector<512x8xf32> to vector<512x8xbf16>
    %c7 = arith.constant 7 : index
    %c0_80 = arith.constant 0 : index
    %c0_81 = arith.constant 0 : index
    %91 = vector.load %arg5[%c7, %c0_80, %c0_81] : memref<9x8x8xbf16, #tpu.memory_space<vmem>>, vector<1x8x8xbf16>
    %92 = vector.shape_cast %91 : vector<1x8x8xbf16> to vector<8x8xbf16>
    %cst_82 = arith.constant dense<0.000000e+00> : vector<512x8xf32>
    %93 = tpu.matmul %90, %92, %cst_82 {dimension_numbers = #tpu.dot_dimension_numbers<[1], [0], [0], [1], [0, 0, 1, 1], [], []>} : vector<512x8xbf16>, vector<8x8xbf16>, vector<512x8xf32> -> vector<512x8xf32>
    %94 = arith.addf %87, %93 : vector<512x8xf32>
    %c0_83 = arith.constant 0 : index
    %c2_84 = arith.constant 2 : index
    %c2_85 = arith.constant 2 : index
    %c0_86 = arith.constant 0 : index
    %95 = vector.load %arg18[%c0_83, %c2_84, %c2_85, %c0_86] : memref<2x18x18x8xf32, #tpu.memory_space<vmem>>, vector<2x16x16x8xf32>
    %96 = vector.shape_cast %95 : vector<2x16x16x8xf32> to vector<512x8xf32>
    %97 = arith.truncf %96 : vector<512x8xf32> to vector<512x8xbf16>
    %c8 = arith.constant 8 : index
    %c0_87 = arith.constant 0 : index
    %c0_88 = arith.constant 0 : index
    %98 = vector.load %arg5[%c8, %c0_87, %c0_88] : memref<9x8x8xbf16, #tpu.memory_space<vmem>>, vector<1x8x8xbf16>
    %99 = vector.shape_cast %98 : vector<1x8x8xbf16> to vector<8x8xbf16>
    %cst_89 = arith.constant dense<0.000000e+00> : vector<512x8xf32>
    %100 = tpu.matmul %97, %99, %cst_89 {dimension_numbers = #tpu.dot_dimension_numbers<[1], [0], [0], [1], [0, 0, 1, 1], [], []>} : vector<512x8xbf16>, vector<8x8xbf16>, vector<512x8xf32> -> vector<512x8xf32>
    %101 = arith.addf %94, %100 : vector<512x8xf32>
    %c0_90 = arith.constant 0 : index
    %c0_91 = arith.constant 0 : index
    %102 = vector.load %arg16[%c0_90, %c0_91] : memref<128x512xf32, #tpu.memory_space<vmem>>, vector<128x512xf32>
    %cst_92 = arith.constant dense<0.000000e+00> : vector<128x8xf32>
    %103 = tpu.matmul %102, %101, %cst_92 {dimension_numbers = #tpu.dot_dimension_numbers<[1], [0], [0], [1], [0, 0, 1, 1], [], []>} : vector<128x512xf32>, vector<512x8xf32>, vector<128x8xf32> -> vector<128x8xf32>
    %cst_93 = arith.constant dense<0.000000e+00> : vector<128x4xf32>
    %104 = tpu.matmul %102, %0, %cst_93 {dimension_numbers = #tpu.dot_dimension_numbers<[1], [0], [0], [1], [0, 0, 1, 1], [], []>} : vector<128x512xf32>, vector<512x4xf32>, vector<128x4xf32> -> vector<128x4xf32>
    %c0_94 = arith.constant 0 : index
    %c0_95 = arith.constant 0 : index
    %105 = vector.load %arg6[%c0_94, %c0_95] : memref<1x8xf32, #tpu.memory_space<vmem>>, vector<1x8xf32>
    %c0_96 = arith.constant 0 : index
    %c0_97 = arith.constant 0 : index
    %106 = vector.load %arg7[%c0_96, %c0_97] : memref<1x8xf32, #tpu.memory_space<vmem>>, vector<1x8xf32>
    %cst_98 = arith.constant dense<0.000000e+00> : vector<8xf32>
    %107 = vector.multi_reduction <add>, %103, %cst_98 [0] : vector<128x8xf32> to vector<8xf32>
    %108 = vector.shape_cast %107 : vector<8xf32> to vector<1x8xf32>
    %109 = arith.mulf %103, %103 : vector<128x8xf32>
    %cst_99 = arith.constant dense<0.000000e+00> : vector<8xf32>
    %110 = vector.multi_reduction <add>, %109, %cst_99 [0] : vector<128x8xf32> to vector<8xf32>
    %111 = vector.shape_cast %110 : vector<8xf32> to vector<1x8xf32>
    %cst_100 = arith.constant 7.812500e-03 : f32
    %112 = vector.broadcast %cst_100 : f32 to vector<1x8xf32>
    %113 = arith.mulf %108, %112 : vector<1x8xf32>
    %cst_101 = arith.constant 7.812500e-03 : f32
    %114 = vector.broadcast %cst_101 : f32 to vector<1x8xf32>
    %115 = arith.mulf %111, %114 : vector<1x8xf32>
    %116 = arith.mulf %113, %113 : vector<1x8xf32>
    %117 = arith.subf %115, %116 : vector<1x8xf32>
    %cst_102 = arith.constant 0.000000e+00 : f32
    %118 = vector.broadcast %cst_102 : f32 to vector<1x8xf32>
    %119 = arith.maximumf %117, %118 : vector<1x8xf32>
    %cst_103 = arith.constant 9.99999974E-6 : f32
    %120 = vector.broadcast %cst_103 : f32 to vector<1x8xf32>
    %121 = arith.addf %119, %120 : vector<1x8xf32>
    %122 = math.rsqrt %121 : vector<1x8xf32>
    %123 = arith.mulf %105, %122 : vector<1x8xf32>
    %124 = arith.mulf %113, %123 : vector<1x8xf32>
    %125 = arith.subf %106, %124 : vector<1x8xf32>
    %126 = vector.broadcast %123 : vector<1x8xf32> to vector<128x8xf32>
    %127 = arith.mulf %103, %126 : vector<128x8xf32>
    %128 = vector.broadcast %125 : vector<1x8xf32> to vector<128x8xf32>
    %129 = arith.addf %127, %128 : vector<128x8xf32>
    %cst_104 = arith.constant 0.000000e+00 : f32
    %130 = vector.broadcast %cst_104 : f32 to vector<128x8xf32>
    %131 = arith.maximumf %129, %130 : vector<128x8xf32>
    %132 = arith.truncf %131 : vector<128x8xf32> to vector<128x8xbf16>
    %c0_105 = arith.constant 0 : index
    %c0_106 = arith.constant 0 : index
    %133 = vector.load %arg8[%c0_105, %c0_106] : memref<8x16xbf16, #tpu.memory_space<vmem>>, vector<8x16xbf16>
    %cst_107 = arith.constant dense<0.000000e+00> : vector<128x16xf32>
    %134 = tpu.matmul %132, %133, %cst_107 {dimension_numbers = #tpu.dot_dimension_numbers<[1], [0], [0], [1], [0, 0, 1, 1], [], []>} : vector<128x8xbf16>, vector<8x16xbf16>, vector<128x16xf32> -> vector<128x16xf32>
    %c0_108 = arith.constant 0 : index
    %c0_109 = arith.constant 0 : index
    %135 = vector.load %arg9[%c0_108, %c0_109] : memref<1x16xf32, #tpu.memory_space<vmem>>, vector<1x16xf32>
    %136 = vector.broadcast %135 : vector<1x16xf32> to vector<128x16xf32>
    %137 = arith.addf %134, %136 : vector<128x16xf32>
    %c0_110 = arith.constant 0 : index
    %c0_111 = arith.constant 0 : index
    %138 = vector.load %arg10[%c0_110, %c0_111] : memref<1x16xf32, #tpu.memory_space<vmem>>, vector<1x16xf32>
    %c0_112 = arith.constant 0 : index
    %c0_113 = arith.constant 0 : index
    %139 = vector.load %arg11[%c0_112, %c0_113] : memref<1x16xf32, #tpu.memory_space<vmem>>, vector<1x16xf32>
    %cst_114 = arith.constant dense<0.000000e+00> : vector<16xf32>
    %140 = vector.multi_reduction <add>, %137, %cst_114 [0] : vector<128x16xf32> to vector<16xf32>
    %141 = vector.shape_cast %140 : vector<16xf32> to vector<1x16xf32>
    %142 = arith.mulf %137, %137 : vector<128x16xf32>
    %cst_115 = arith.constant dense<0.000000e+00> : vector<16xf32>
    %143 = vector.multi_reduction <add>, %142, %cst_115 [0] : vector<128x16xf32> to vector<16xf32>
    %144 = vector.shape_cast %143 : vector<16xf32> to vector<1x16xf32>
    %cst_116 = arith.constant 7.812500e-03 : f32
    %145 = vector.broadcast %cst_116 : f32 to vector<1x16xf32>
    %146 = arith.mulf %141, %145 : vector<1x16xf32>
    %cst_117 = arith.constant 7.812500e-03 : f32
    %147 = vector.broadcast %cst_117 : f32 to vector<1x16xf32>
    %148 = arith.mulf %144, %147 : vector<1x16xf32>
    %149 = arith.mulf %146, %146 : vector<1x16xf32>
    %150 = arith.subf %148, %149 : vector<1x16xf32>
    %cst_118 = arith.constant 0.000000e+00 : f32
    %151 = vector.broadcast %cst_118 : f32 to vector<1x16xf32>
    %152 = arith.maximumf %150, %151 : vector<1x16xf32>
    %cst_119 = arith.constant 9.99999974E-6 : f32
    %153 = vector.broadcast %cst_119 : f32 to vector<1x16xf32>
    %154 = arith.addf %152, %153 : vector<1x16xf32>
    %155 = math.rsqrt %154 : vector<1x16xf32>
    %156 = arith.mulf %138, %155 : vector<1x16xf32>
    %157 = arith.mulf %146, %156 : vector<1x16xf32>
    %158 = arith.subf %139, %157 : vector<1x16xf32>
    %159 = vector.broadcast %156 : vector<1x16xf32> to vector<128x16xf32>
    %160 = arith.mulf %137, %159 : vector<128x16xf32>
    %161 = vector.broadcast %158 : vector<1x16xf32> to vector<128x16xf32>
    %162 = arith.addf %160, %161 : vector<128x16xf32>
    %163 = arith.truncf %104 : vector<128x4xf32> to vector<128x4xbf16>
    %c0_120 = arith.constant 0 : index
    %c0_121 = arith.constant 0 : index
    %164 = vector.load %arg12[%c0_120, %c0_121] : memref<4x16xbf16, #tpu.memory_space<vmem>>, vector<4x16xbf16>
    %cst_122 = arith.constant dense<0.000000e+00> : vector<128x16xf32>
    %165 = tpu.matmul %163, %164, %cst_122 {dimension_numbers = #tpu.dot_dimension_numbers<[1], [0], [0], [1], [0, 0, 1, 1], [], []>} : vector<128x4xbf16>, vector<4x16xbf16>, vector<128x16xf32> -> vector<128x16xf32>
    %c0_123 = arith.constant 0 : index
    %c0_124 = arith.constant 0 : index
    %166 = vector.load %arg13[%c0_123, %c0_124] : memref<1x16xf32, #tpu.memory_space<vmem>>, vector<1x16xf32>
    %167 = vector.broadcast %166 : vector<1x16xf32> to vector<128x16xf32>
    %168 = arith.addf %165, %167 : vector<128x16xf32>
    %c0_125 = arith.constant 0 : index
    %c0_126 = arith.constant 0 : index
    %169 = vector.load %arg14[%c0_125, %c0_126] : memref<1x16xf32, #tpu.memory_space<vmem>>, vector<1x16xf32>
    %c0_127 = arith.constant 0 : index
    %c0_128 = arith.constant 0 : index
    %170 = vector.load %arg15[%c0_127, %c0_128] : memref<1x16xf32, #tpu.memory_space<vmem>>, vector<1x16xf32>
    %cst_129 = arith.constant dense<0.000000e+00> : vector<16xf32>
    %171 = vector.multi_reduction <add>, %168, %cst_129 [0] : vector<128x16xf32> to vector<16xf32>
    %172 = vector.shape_cast %171 : vector<16xf32> to vector<1x16xf32>
    %173 = arith.mulf %168, %168 : vector<128x16xf32>
    %cst_130 = arith.constant dense<0.000000e+00> : vector<16xf32>
    %174 = vector.multi_reduction <add>, %173, %cst_130 [0] : vector<128x16xf32> to vector<16xf32>
    %175 = vector.shape_cast %174 : vector<16xf32> to vector<1x16xf32>
    %cst_131 = arith.constant 7.812500e-03 : f32
    %176 = vector.broadcast %cst_131 : f32 to vector<1x16xf32>
    %177 = arith.mulf %172, %176 : vector<1x16xf32>
    %cst_132 = arith.constant 7.812500e-03 : f32
    %178 = vector.broadcast %cst_132 : f32 to vector<1x16xf32>
    %179 = arith.mulf %175, %178 : vector<1x16xf32>
    %180 = arith.mulf %177, %177 : vector<1x16xf32>
    %181 = arith.subf %179, %180 : vector<1x16xf32>
    %cst_133 = arith.constant 0.000000e+00 : f32
    %182 = vector.broadcast %cst_133 : f32 to vector<1x16xf32>
    %183 = arith.maximumf %181, %182 : vector<1x16xf32>
    %cst_134 = arith.constant 9.99999974E-6 : f32
    %184 = vector.broadcast %cst_134 : f32 to vector<1x16xf32>
    %185 = arith.addf %183, %184 : vector<1x16xf32>
    %186 = math.rsqrt %185 : vector<1x16xf32>
    %187 = arith.mulf %169, %186 : vector<1x16xf32>
    %188 = arith.mulf %177, %187 : vector<1x16xf32>
    %189 = arith.subf %170, %188 : vector<1x16xf32>
    %190 = vector.broadcast %187 : vector<1x16xf32> to vector<128x16xf32>
    %191 = arith.mulf %168, %190 : vector<128x16xf32>
    %192 = vector.broadcast %189 : vector<1x16xf32> to vector<128x16xf32>
    %193 = arith.addf %191, %192 : vector<128x16xf32>
    %194 = arith.addf %162, %193 : vector<128x16xf32>
    %cst_135 = arith.constant 0.000000e+00 : f32
    %195 = vector.broadcast %cst_135 : f32 to vector<128x16xf32>
    %196 = arith.maximumf %194, %195 : vector<128x16xf32>
    %c0_136 = arith.constant 0 : index
    %c0_137 = arith.constant 0 : index
    %197 = vector.load %arg17[%c0_136, %c0_137] : memref<128x16xf32, #tpu.memory_space<vmem>>, vector<128x16xf32>
    tpu.vector_store %arg17[%c0_136, %c0_137], %196 {strides = array<i32>} : memref<128x16xf32, #tpu.memory_space<vmem>>, vector<128x16xf32>,
    return
  }
}

</mosaic_0001>

<bundles_post_ra>
// kernel: tpu_custom_call.1
= control target key start
LH: loop header
LB: loop body
LE: loop exit
PB: predicated region body
PF: predicated region fallthrough
CT: control target
= control target key end

     0   :  { %vm255_vm0 = vcmask 1041408   ;;  %vm158_vm1 = vcmask 31744   ;;  %vm430_vm2 = vcmask 64512   ;;  %v6595_v23 = vmov 0.0   ;;  %s11499_s1 = inlined_call_operand.vmem [shape: bf16[4,8], index: 1, kind: input, shape index: {}]   ;;  %s11500_s0 = inlined_call_operand.vmem [shape: f32[512,4], index: 0, kind: input, shape index: {}]   ;;  %s11501_s2 = inlined_call_operand.vmem [shape: f32[1,8], index: 2, kind: input, shape index: {}]   ;;  %s11502_s5 = inlined_call_operand.vmem [shape: bf16[9,8,8], index: 5, kind: input, shape index: {}]   ;;  %s11503_s3 = inlined_call_operand.vmem [shape: f32[1,8], index: 3, kind: input, shape index: {}]   ;;  %s11504_s4 = inlined_call_operand.vmem [shape: f32[1,8], index: 4, kind: input, shape index: {}]   ;;  %s11505_s12 = inlined_call_operand.vmem [shape: bf16[4,16], index: 12, kind: input, shape index: {}]   ;;  %s11506_s16 = inlined_call_operand.vmem [shape: f32[128,512], index: 16, kind: input, shape index: {}]   ;;  %s11507_s8 = inlined_call_operand.vmem [shape: bf16[8,16], index: 8, kind: input, shape index: {}]   ;;  %s11508_s6 = inlined_call_operand.vmem [shape: f32[1,8], index: 6, kind: input, shape index: {}]   ;;  %s11509_s7 = inlined_call_operand.vmem [shape: f32[1,8], index: 7, kind: input, shape index: {}]   ;;  %s11510_s9 = inlined_call_operand.vmem [shape: f32[1,16], index: 9, kind: input, shape index: {}]   ;;  %s11511_s13 = inlined_call_operand.vmem [shape: f32[1,16], index: 13, kind: input, shape index: {}]   ;;  %s11512_s10 = inlined_call_operand.vmem [shape: f32[1,16], index: 10, kind: input, shape index: {}]   ;;  %s11513_s11 = inlined_call_operand.vmem [shape: f32[1,16], index: 11, kind: input, shape index: {}]   ;;  %s11514_s14 = inlined_call_operand.vmem [shape: f32[1,16], index: 14, kind: input, shape index: {}]   ;;  %s11515_s15 = inlined_call_operand.vmem [shape: f32[1,16], index: 15, kind: input, shape index: {}]   ;;  %s11516_s17 = inlined_call_operand.vmem [shape: f32[128,16], index: 17, kind: output, shape index: {}]  }
   0x1   :  { %11593 = sst [smem:[#allocation94_spill]] %s11499_s1  ;;  %982 = vst.msk [vmem:[#allocation2 + $0x18] sm:$0xff] %vm430_vm2, %v6595_v23  ;;  %vm980_vm3 = vcmask 58368   ;;  %vm1443_vm4 = vcmask 1043456   ;;  %vm5735_vm11 = vcmask 130048  }
   0x2   :  { %11594 = sst [smem:[#allocation95_spill]] %s11500_s0  ;;  %983 = vst.msk [vmem:[#allocation2 + $0x20] sm:$0xff] %vm430_vm2, %v6595_v23 }
   0x3   :  { %s11595_s26 = sld [smem:[#allocation94_spill]]  ;;  %978 = vst.msk [vmem:[#allocation2] sm:$0xff] %vm430_vm2, %v6595_v23 }
   0x4   :  { %s11596_s29 = sld [smem:[#allocation95_spill]]  ;;  %979 = vst.msk [vmem:[#allocation2 + $0x8] sm:$0xff] %vm430_vm2, %v6595_v23 }
   0x5   :  { %985 = vst.msk [vmem:[#allocation2 + $0x30] sm:$0xff] %vm430_vm2, %v6595_v23 }
   0x6   :  { %986 = vst.msk [vmem:[#allocation2 + $0x38] sm:$0xff] %vm430_vm2, %v6595_v23 }
   0x7   :  { %988 = vst.msk [vmem:[#allocation2 + $0x48] sm:$0xff] %vm430_vm2, %v6595_v23 }
   0x8   :  { %989 = vst.msk [vmem:[#allocation2 + $0x50] sm:$0xff] %vm430_vm2, %v6595_v23 }
   0x9   :  { %v153_v0 = vld [vmem:[%s11595_s26] sm:$0x3]  ;;  %991 = vst.msk [vmem:[#allocation2 + $0x60] sm:$0xff] %vm430_vm2, %v6595_v23 }
   0xa   :  { %v57_v1 = vld [vmem:[%s11596_s29] sm:$0xff]  ;;  %v257_v2 = vsel %vm255_vm0, %v153_v0, 0  ;;  %v58_v3 = vld [vmem:[%s11596_s29 + $0x8] sm:$0xff]  ;;  %v59_v5 = vld [vmem:[%s11596_s29 + $0x10] sm:$0xff]  ;;  %992 = vst.msk [vmem:[#allocation2 + $0x68] sm:$0xff] %vm430_vm2, %v6595_v23 }
   0xb   :  { %266 = vmatpush.bf16.msra.mxu0 %v257_v2  ;;  %v121_v4 = vpack.c.bf16 %v58_v3, %v57_v1  ;;  %6517 = vmatpush.bf16.msra.mxu2 %v257_v2  ;;  %v60_v6 = vld [vmem:[%s11596_s29 + $0x18] sm:$0xff]  ;;  %v61_v8 = vld [vmem:[%s11596_s29 + $0x20] sm:$0xff]  ;;  %v62_v9 = vld [vmem:[%s11596_s29 + $0x28] sm:$0xff]  ;;  %994 = vst.msk [vmem:[#allocation2 + $0x78] sm:$0xff] %vm430_vm2, %v6595_v23 }
   0xc   :  { %v122_v7 = vpack.c.bf16 %v60_v6, %v59_v5  ;;  %v123_v10 = vpack.c.bf16 %v62_v9, %v61_v8  ;;  %v63_v11 = vld [vmem:[%s11596_s29 + $0x30] sm:$0xff]  ;;  %v64_v12 = vld [vmem:[%s11596_s29 + $0x38] sm:$0xff]  ;;  %v65_v14 = vld [vmem:[%s11596_s29 + $0x40] sm:$0xff]  ;;  %995 = vst.msk [vmem:[#allocation2 + $0x80] sm:$0xff] %vm430_vm2, %v6595_v23 }
   0xd   :  { %v124_v13 = vpack.c.bf16 %v64_v12, %v63_v11  ;;  %v66_v15 = vld [vmem:[%s11596_s29 + $0x48] sm:$0xff]  ;;  %v67_v17 = vld [vmem:[%s11596_s29 + $0x50] sm:$0xff]  ;;  %v68_v18 = vld [vmem:[%s11596_s29 + $0x58] sm:$0xff]  ;;  %997 = vst.msk [vmem:[#allocation2 + $0x90] sm:$0xff] %vm430_vm2, %v6595_v23 }
   0xe   :  { %6173 = vmatmul.msk.bf16.vlgmr.msra.gmra.mxu0 %vm158_vm1, %v121_v4  ;;  %v125_v16 = vpack.c.bf16 %v66_v15, %v65_v14  ;;  %v126_v19 = vpack.c.bf16 %v68_v18, %v67_v17  ;;  %v69_v20 = vld [vmem:[%s11596_s29 + $0x60] sm:$0xff]  ;;  %v70_v21 = vld [vmem:[%s11596_s29 + $0x68] sm:$0xff]  ;;  %v71_v24 = vld [vmem:[%s11596_s29 + $0x70] sm:$0xff]  ;;  %998 = vst.msk [vmem:[#allocation2 + $0x98] sm:$0xff] %vm430_vm2, %v6595_v23 }
   0xf   :  { %v127_v22 = vpack.c.bf16 %v70_v21, %v69_v20  ;;  %v72_v25 = vld [vmem:[%s11596_s29 + $0x78] sm:$0xff]  ;;  %1000 = vst.msk [vmem:[#allocation2 + $0xa8] sm:$0xff] %vm430_vm2, %v6595_v23  ;;  %v73_v27 = vld [vmem:[%s11596_s29 + $0x80] sm:$0xff]  ;;  %v74_v28 = vld [vmem:[%s11596_s29 + $0x88] sm:$0xff] }
  0x10   :  { %v128_v26 = vpack.c.bf16 %v72_v25, %v71_v24  ;;  %1001 = vst.msk [vmem:[#allocation2 + $0xb0] sm:$0xff] %vm430_vm2, %v6595_v23  ;;  %v129_v29 = vpack.c.bf16 %v74_v28, %v73_v27  ;;  %v75_v32 = vld [vmem:[%s11596_s29 + $0x90] sm:$0xff]  ;;  %v76_v33 = vld [vmem:[%s11596_s29 + $0x98] sm:$0xff]  ;;  %v77_v37 = vld [vmem:[%s11596_s29 + $0xa0] sm:$0xff] }
  0x11   :  { %1003 = vst.msk [vmem:[#allocation2 + $0xc0] sm:$0xff] %vm430_vm2, %v6595_v23  ;;  %v130_v34 = vpack.c.bf16 %v76_v33, %v75_v32  ;;  %v78_v38 = vld [vmem:[%s11596_s29 + $0xa8] sm:$0xff]  ;;  %v79_v42 = vld [vmem:[%s11596_s29 + $0xb0] sm:$0xff]  ;;  %v80_v43 = vld [vmem:[%s11596_s29 + $0xb8] sm:$0xff] }
  0x12   :  { %1004 = vst.msk [vmem:[#allocation2 + $0xc8] sm:$0xff] %vm430_vm2, %v6595_v23  ;;  %v131_v39 = vpack.c.bf16 %v78_v38, %v77_v37  ;;  %v132_v44 = vpack.c.bf16 %v80_v43, %v79_v42  ;;  %v81_v47 = vld [vmem:[%s11596_s29 + $0xc0] sm:$0xff]  ;;  %v82_v48 = vld [vmem:[%s11596_s29 + $0xc8] sm:$0xff]  ;;  %v83_v52 = vld [vmem:[%s11596_s29 + $0xd0] sm:$0xff] }
  0x13   :  { %1006 = vst.msk [vmem:[#allocation2 + $0xd8] sm:$0xff] %vm430_vm2, %v6595_v23  ;;  %v133_v49 = vpack.c.bf16 %v82_v48, %v81_v47  ;;  %v84_v53 = vld [vmem:[%s11596_s29 + $0xd8] sm:$0xff]  ;;  %v85_v57 = vld [vmem:[%s11596_s29 + $0xe0] sm:$0xff]  ;;  %v86_v58 = vld [vmem:[%s11596_s29 + $0xe8] sm:$0xff] }
  0x14   :  { %1007 = vst.msk [vmem:[#allocation2 + $0xe0] sm:$0xff] %vm430_vm2, %v6595_v23  ;;  %v134_v54 = vpack.c.bf16 %v84_v53, %v83_v52  ;;  %v135_v59 = vpack.c.bf16 %v86_v58, %v85_v57  ;;  %v87_v62 = vld [vmem:[%s11596_s29 + $0xf0] sm:$0xff]  ;;  %v88_v63 = vld [vmem:[%s11596_s29 + $0xf8] sm:$0xff]  ;;  %v89_v3 = vld [vmem:[%s11596_s29 + $0x100] sm:$0xff] }
  0x15   :  { %1009 = vst.msk [vmem:[#allocation2 + $0xf0] sm:$0xff] %vm430_vm2, %v6595_v23  ;;  %v136_v0 = vpack.c.bf16 %v88_v63, %v87_v62  ;;  %v90_v4 = vld [vmem:[%s11596_s29 + $0x108] sm:$0xff]  ;;  %v91_v8 = vld [vmem:[%s11596_s29 + $0x110] sm:$0xff]  ;;  %v92_v9 = vld [vmem:[%s11596_s29 + $0x118] sm:$0xff] }
  0x16   :  { %1010 = vst.msk [vmem:[#allocation2 + $0xf8] sm:$0xff] %vm430_vm2, %v6595_v23  ;;  %v137_v5 = vpack.c.bf16 %v90_v4, %v89_v3  ;;  %v94_v14 = vld [vmem:[%s11596_s29 + $0x128] sm:$0xff]  ;;  %v95_v18 = vld [vmem:[%s11596_s29 + $0x130] sm:$0xff]  ;;  %v101_v37 = vld [vmem:[%s11596_s29 + $0x160] sm:$0xff] }
  0x17   :  { %1012 = vst.msk [vmem:[#allocation2 + $0x108] sm:$0xff] %vm430_vm2, %v6595_v23  ;;  %v98_v24 = vld [vmem:[%s11596_s29 + $0x148] sm:$0xff]  ;;  %v99_v28 = vld [vmem:[%s11596_s29 + $0x150] sm:$0xff]  ;;  %v113_v43 = vld [vmem:[%s11596_s29 + $0x1c0] sm:$0xff] }
  0x18   :  { %1013 = vst.msk [vmem:[#allocation2 + $0x110] sm:$0xff] %vm430_vm2, %v6595_v23  ;;  %v102_v38 = vld [vmem:[%s11596_s29 + $0x168] sm:$0xff]  ;;  %v104_v52 = vld [vmem:[%s11596_s29 + $0x178] sm:$0xff]  ;;  %v115_v57 = vld [vmem:[%s11596_s29 + $0x1d0] sm:$0xff] }
  0x19   :  { %1015 = vst.msk [vmem:[#allocation2 + $0x120] sm:$0xff] %vm430_vm2, %v6595_v23  ;;  %v116_v58 = vld [vmem:[%s11596_s29 + $0x1d8] sm:$0xff]  ;;  %v105_v63 = vld [vmem:[%s11596_s29 + $0x180] sm:$0xff] }
  0x1a   :  { %1016 = vst.msk [vmem:[#allocation2 + $0x128] sm:$0xff] %vm430_vm2, %v6595_v23 }
  0x1b   :  { %1018 = vst.msk [vmem:[#allocation2 + $0x138] sm:$0xff] %vm430_vm2, %v6595_v23 }
  0x1c   :  { %1019 = vst.msk [vmem:[#allocation2 + $0x140] sm:$0xff] %vm430_vm2, %v6595_v23 }
  0x1d   :  { %1021 = vst.msk [vmem:[#allocation2 + $0x150] sm:$0xff] %vm430_vm2, %v6595_v23 }
  0x1e   :  { %6174 = vmatmul.msk.bf16.gmra.mxu0 %vm158_vm1, %v122_v7  ;;  %1022 = vst.msk [vmem:[#allocation2 + $0x158] sm:$0xff] %vm430_vm2, %v6595_v23 }
  0x1f   :  { %1024 = vst.msk [vmem:[#allocation2 + $0x168] sm:$0xff] %vm430_vm2, %v6595_v23 }
  0x20   :  { %1025 = vst.msk [vmem:[#allocation2 + $0x170] sm:$0xff] %vm430_vm2, %v6595_v23 }
  0x21   :  { %1027 = vst.msk [vmem:[#allocation2 + $0x180] sm:$0xff] %vm430_vm2, %v6595_v23 }
  0x22   :  { %1028 = vst.msk [vmem:[#allocation2 + $0x188] sm:$0xff] %vm430_vm2, %v6595_v23 }
  0x23   :  { %1030 = vst.msk [vmem:[#allocation2 + $0x198] sm:$0xff] %vm430_vm2, %v6595_v23 }
  0x24   :  { %1031 = vst.msk [vmem:[#allocation2 + $0x1a0] sm:$0xff] %vm430_vm2, %v6595_v23 }
  0x25   :  { %1033 = vst.msk [vmem:[#allocation2 + $0x1b0] sm:$0xff] %vm430_vm2, %v6595_v23 }
  0x26   :  { %1034 = vst.msk [vmem:[#allocation2 + $0x1b8] sm:$0xff] %vm430_vm2, %v6595_v23 }
  0x27   :  { %1036 = vst.msk [vmem:[#allocation2 + $0x1c8] sm:$0xff] %vm430_vm2, %v6595_v23 }
  0x28   :  { %1037 = vst.msk [vmem:[#allocation2 + $0x1d0] sm:$0xff] %vm430_vm2, %v6595_v23 }
  0x29   :  { %1039 = vst.msk [vmem:[#allocation2 + $0x1e0] sm:$0xff] %vm430_vm2, %v6595_v23 }
  0x2a   :  { %1040 = vst.msk [vmem:[#allocation2 + $0x1e8] sm:$0xff] %vm430_vm2, %v6595_v23 }
  0x2b   :  { %1042 = vst.msk [vmem:[#allocation2 + $0x1f8] sm:$0xff] %vm430_vm2, %v6595_v23 }
  0x2c   :  { %1043 = vst.msk [vmem:[#allocation2 + $0x200] sm:$0xff] %vm430_vm2, %v6595_v23 }
  0x2d   :  { %1045 = vst.msk [vmem:[#allocation2 + $0x210] sm:$0xff] %vm430_vm2, %v6595_v23 }
  0x2e   :  { %6175 = vmatmul.msk.bf16.gmra.mxu0 %vm158_vm1, %v123_v10  ;;  %1046 = vst.msk [vmem:[#allocation2 + $0x218] sm:$0xff] %vm430_vm2, %v6595_v23  ;;  %v138_v10 = vpack.c.bf16 %v92_v9, %v91_v8  ;;  %v118_v8 = vld [vmem:[%s11596_s29 + $0x1e8] sm:$0xff] }
  0x2f   :  { %1048 = vst.msk [vmem:[#allocation2 + $0x228] sm:$0xff] %vm430_vm2, %v6595_v23 }
  0x30   :  { %1049 = vst.msk [vmem:[#allocation2 + $0x230] sm:$0xff] %vm430_vm2, %v6595_v23 }
  0x31   :  { %1051 = vst.msk [vmem:[#allocation2 + $0x240] sm:$0xff] %vm430_vm2, %v6595_v23 }
  0x32   :  { %1052 = vst.msk [vmem:[#allocation2 + $0x248] sm:$0xff] %vm430_vm2, %v6595_v23 }
  0x33   :  { %1054 = vst.msk [vmem:[#allocation2 + $0x258] sm:$0xff] %vm430_vm2, %v6595_v23 }
  0x34   :  { %1055 = vst.msk [vmem:[#allocation2 + $0x260] sm:$0xff] %vm430_vm2, %v6595_v23 }
  0x35   :  { %1057 = vst.msk [vmem:[#allocation2 + $0x270] sm:$0xff] %vm430_vm2, %v6595_v23 }
  0x36   :  { %1058 = vst.msk [vmem:[#allocation2 + $0x278] sm:$0xff] %vm430_vm2, %v6595_v23 }
  0x37   :  { %1060 = vst.msk [vmem:[#allocation2 + $0x288] sm:$0xff] %vm430_vm2, %v6595_v23 }
  0x38   :  { %1061 = vst.msk [vmem:[#allocation2 + $0x290] sm:$0xff] %vm430_vm2, %v6595_v23 }
  0x39   :  { %1063 = vst.msk [vmem:[#allocation2 + $0x2a0] sm:$0xff] %vm430_vm2, %v6595_v23 }
  0x3a   :  { %1064 = vst.msk [vmem:[#allocation2 + $0x2a8] sm:$0xff] %vm430_vm2, %v6595_v23 }
  0x3b   :  { %1066 = vst.msk [vmem:[#allocation2 + $0x2b8] sm:$0xff] %vm430_vm2, %v6595_v23 }
  0x3c   :  { %1067 = vst.msk [vmem:[#allocation2 + $0x2c0] sm:$0xff] %vm430_vm2, %v6595_v23 }
  0x3d   :  { %1069 = vst.msk [vmem:[#allocation2 + $0x2d0] sm:$0xff] %vm430_vm2, %v6595_v23 }
  0x3e   :  { %6176 = vmatmul.msk.bf16.gmra.mxu0 %vm158_vm1, %v124_v13  ;;  %1070 = vst.msk [vmem:[#allocation2 + $0x2d8] sm:$0xff] %vm430_vm2, %v6595_v23  ;;  %v93_v13 = vld [vmem:[%s11596_s29 + $0x120] sm:$0xff] }
  0x3f   :  { %1072 = vst.msk [vmem:[#allocation2 + $0x2e8] sm:$0xff] %vm430_vm2, %v6595_v23  ;;  %v139_v15 = vpack.c.bf16 %v94_v14, %v93_v13  ;;  %v107_v13 = vld [vmem:[%s11596_s29 + $0x190] sm:$0xff]  ;;  %v108_v14 = vld [vmem:[%s11596_s29 + $0x198] sm:$0xff] }
  0x40   :  { %1073 = vst.msk [vmem:[#allocation2 + $0x2f0] sm:$0xff] %vm430_vm2, %v6595_v23 }
  0x41   :  { %1075 = vst.msk [vmem:[#allocation2 + $0x300] sm:$0xff] %vm430_vm2, %v6595_v23 }
  0x42   :  { %1076 = vst.msk [vmem:[#allocation2 + $0x308] sm:$0xff] %vm430_vm2, %v6595_v23 }
  0x43   :  { %1078 = vst.msk [vmem:[#allocation2 + $0x318] sm:$0xff] %vm430_vm2, %v6595_v23 }
  0x44   :  { %1079 = vst.msk [vmem:[#allocation2 + $0x320] sm:$0xff] %vm430_vm2, %v6595_v23 }
  0x45   :  { %1081 = vst.msk [vmem:[#allocation2 + $0x330] sm:$0xff] %vm430_vm2, %v6595_v23 }
  0x46   :  { %1082 = vst.msk [vmem:[#allocation2 + $0x338] sm:$0xff] %vm430_vm2, %v6595_v23 }
  0x47   :  { %1084 = vst.msk [vmem:[#allocation2 + $0x348] sm:$0xff] %vm430_vm2, %v6595_v23 }
  0x48   :  { %1085 = vst.msk [vmem:[#allocation2 + $0x350] sm:$0xff] %vm430_vm2, %v6595_v23 }
  0x49   :  { %984 = vst.msk [vmem:[#allocation2 + $0x28] sm:$0x3] %vm980_vm3, %v6595_v23 }
  0x4a   :  { %981 = vst.msk [vmem:[#allocation2 + $0x10] sm:$0x3] %vm980_vm3, %v6595_v23 }
  0x4b   :  { %987 = vst.msk [vmem:[#allocation2 + $0x40] sm:$0x3] %vm980_vm3, %v6595_v23 }
  0x4c   :  { %990 = vst.msk [vmem:[#allocation2 + $0x58] sm:$0x3] %vm980_vm3, %v6595_v23 }
  0x4d   :  { %993 = vst.msk [vmem:[#allocation2 + $0x70] sm:$0x3] %vm980_vm3, %v6595_v23 }
  0x4e   :  { %6177 = vmatmul.msk.bf16.gmra.mxu0 %vm158_vm1, %v125_v16  ;;  %996 = vst.msk [vmem:[#allocation2 + $0x88] sm:$0x3] %vm980_vm3, %v6595_v23 }
  0x4f   :  { %999 = vst.msk [vmem:[#allocation2 + $0xa0] sm:$0x3] %vm980_vm3, %v6595_v23 }
  0x50   :  { %1002 = vst.msk [vmem:[#allocation2 + $0xb8] sm:$0x3] %vm980_vm3, %v6595_v23 }
  0x51   :  { %1005 = vst.msk [vmem:[#allocation2 + $0xd0] sm:$0x3] %vm980_vm3, %v6595_v23 }
  0x52   :  { %1008 = vst.msk [vmem:[#allocation2 + $0xe8] sm:$0x3] %vm980_vm3, %v6595_v23 }
  0x53   :  { %1011 = vst.msk [vmem:[#allocation2 + $0x100] sm:$0x3] %vm980_vm3, %v6595_v23 }
  0x54   :  { %1014 = vst.msk [vmem:[#allocation2 + $0x118] sm:$0x3] %vm980_vm3, %v6595_v23 }
  0x55   :  { %1017 = vst.msk [vmem:[#allocation2 + $0x130] sm:$0x3] %vm980_vm3, %v6595_v23 }
  0x56   :  { %1020 = vst.msk [vmem:[#allocation2 + $0x148] sm:$0x3] %vm980_vm3, %v6595_v23 }
  0x57   :  { %1023 = vst.msk [vmem:[#allocation2 + $0x160] sm:$0x3] %vm980_vm3, %v6595_v23 }
  0x58   :  { %1026 = vst.msk [vmem:[#allocation2 + $0x178] sm:$0x3] %vm980_vm3, %v6595_v23 }
  0x59   :  { %1029 = vst.msk [vmem:[#allocation2 + $0x190] sm:$0x3] %vm980_vm3, %v6595_v23 }
  0x5a   :  { %1032 = vst.msk [vmem:[#allocation2 + $0x1a8] sm:$0x3] %vm980_vm3, %v6595_v23 }
  0x5b   :  { %1035 = vst.msk [vmem:[#allocation2 + $0x1c0] sm:$0x3] %vm980_vm3, %v6595_v23 }
  0x5c   :  { %1038 = vst.msk [vmem:[#allocation2 + $0x1d8] sm:$0x3] %vm980_vm3, %v6595_v23 }
  0x5d   :  { %1041 = vst.msk [vmem:[#allocation2 + $0x1f0] sm:$0x3] %vm980_vm3, %v6595_v23 }
  0x5e   :  { %6178 = vmatmul.msk.bf16.gmra.mxu0 %vm158_vm1, %v126_v19  ;;  %1044 = vst.msk [vmem:[#allocation2 + $0x208] sm:$0x3] %vm980_vm3, %v6595_v23  ;;  %v96_v19 = vld [vmem:[%s11596_s29 + $0x138] sm:$0xff] }
  0x5f   :  { %1047 = vst.msk [vmem:[#allocation2 + $0x220] sm:$0x3] %vm980_vm3, %v6595_v23  ;;  %v140_v20 = vpack.c.bf16 %v96_v19, %v95_v18  ;;  %v119_v19 = vld [vmem:[%s11596_s29 + $0x1f0] sm:$0xff] }
  0x60   :  { %1050 = vst.msk [vmem:[#allocation2 + $0x238] sm:$0x3] %vm980_vm3, %v6595_v23 }
  0x61   :  { %1053 = vst.msk [vmem:[#allocation2 + $0x250] sm:$0x3] %vm980_vm3, %v6595_v23 }
  0x62   :  { %1056 = vst.msk [vmem:[#allocation2 + $0x268] sm:$0x3] %vm980_vm3, %v6595_v23 }
  0x63   :  { %1059 = vst.msk [vmem:[#allocation2 + $0x280] sm:$0x3] %vm980_vm3, %v6595_v23 }
  0x64   :  { %1062 = vst.msk [vmem:[#allocation2 + $0x298] sm:$0x3] %vm980_vm3, %v6595_v23 }
  0x65   :  { %1065 = vst.msk [vmem:[#allocation2 + $0x2b0] sm:$0x3] %vm980_vm3, %v6595_v23 }
  0x66   :  { %1068 = vst.msk [vmem:[#allocation2 + $0x2c8] sm:$0x3] %vm980_vm3, %v6595_v23 }
  0x67   :  { %1071 = vst.msk [vmem:[#allocation2 + $0x2e0] sm:$0x3] %vm980_vm3, %v6595_v23 }
  0x68   :  { %1074 = vst.msk [vmem:[#allocation2 + $0x2f8] sm:$0x3] %vm980_vm3, %v6595_v23 }
  0x69   :  { %1077 = vst.msk [vmem:[#allocation2 + $0x310] sm:$0x3] %vm980_vm3, %v6595_v23 }
  0x6a   :  { %1080 = vst.msk [vmem:[#allocation2 + $0x328] sm:$0x3] %vm980_vm3, %v6595_v23 }
  0x6b   :  { %1083 = vst.msk [vmem:[#allocation2 + $0x340] sm:$0x3] %vm980_vm3, %v6595_v23 }
  0x6c   :  { %1086 = vst.msk [vmem:[#allocation2 + $0x358] sm:$0x3] %vm980_vm3, %v6595_v23  ;;  %v97_v23 = vld [vmem:[%s11596_s29 + $0x140] sm:$0xff] }
  0x6d   :  { %v141_v25 = vpack.c.bf16 %v98_v24, %v97_v23 }
  0x6e   :  { %6179 = vmatmul.msk.bf16.gmra.mxu0 %vm158_vm1, %v127_v22 }
  0x7e   :  { %6180 = vmatmul.msk.bf16.gmra.mxu0 %vm158_vm1, %v128_v26 }
  0x8b   :  { %v6804_v30 = vpop.f32.mrf.mxu0 }
  0x8e   :  { %6181 = vmatmul.msk.bf16.gmra.mxu0 %vm158_vm1, %v129_v29  ;;  %v100_v29 = vld [vmem:[%s11596_s29 + $0x158] sm:$0xff] }
  0x8f   :  { %v142_v32 = vpack.c.bf16 %v100_v29, %v99_v28  ;;  %v110_v28 = vld [vmem:[%s11596_s29 + $0x1a8] sm:$0xff] }
  0x93   :  { %v6825_v31 = vpop.f32.mrf.mxu0 }
  0x9b   :  { %v6849_v35 = vpop.f32.mrf.mxu0 }
  0x9e   :  { %6182 = vmatmul.msk.bf16.gmra.mxu0 %vm158_vm1, %v130_v34 }
  0xa3   :  { %v6868_v36 = vpop.f32.mrf.mxu0 }
  0xab   :  { %v6892_v40 = vpop.f32.mrf.mxu0 }
  0xae   :  { %6183 = vmatmul.msk.bf16.gmra.mxu0 %vm158_vm1, %v131_v39  ;;  %v143_v39 = vpack.c.bf16 %v102_v38, %v101_v37  ;;  %v111_v38 = vld [vmem:[%s11596_s29 + $0x1b0] sm:$0xff] }
  0xb3   :  { %v6911_v41 = vpop.f32.mrf.mxu0 }
  0xbb   :  { %v6935_v45 = vpop.f32.mrf.mxu0 }
  0xbe   :  { %6184 = vmatmul.msk.bf16.gmra.mxu0 %vm158_vm1, %v132_v44  ;;  %v114_v44 = vld [vmem:[%s11596_s29 + $0x1c8] sm:$0xff] }
  0xbf   :  { %v149_v47 = vpack.c.bf16 %v114_v44, %v113_v43 }
  0xc1   :  { %6201 = vmatmul.msk.bf16.vlgmr.msra.gmra.mxu2 %vm158_vm1, %v149_v47 }
  0xc3   :  { %v6954_v46 = vpop.f32.mrf.mxu0 }
  0xcb   :  { %v6978_v50 = vpop.f32.mrf.mxu0 }
  0xce   :  { %6185 = vmatmul.msk.bf16.gmra.mxu0 %vm158_vm1, %v133_v49  ;;  %v103_v49 = vld [vmem:[%s11596_s29 + $0x170] sm:$0xff] }
  0xcf   :  { %v144_v53 = vpack.c.bf16 %v104_v52, %v103_v49  ;;  %v7215_v52 = vld [vmem:[%s11501_s2] ss:$0 sm:$0xff] }
  0xd3   :  { %v6997_v51 = vpop.f32.mrf.mxu0 }
  0xdb   :  { %v7021_v55 = vpop.f32.mrf.mxu0 }
  0xde   :  { %6186 = vmatmul.msk.bf16.gmra.mxu0 %vm158_vm1, %v134_v54 }
  0xe3   :  { %v7026_v56 = vpop.f32.mrf.mxu0 }
  0xeb   :  { %v7034_v60 = vpop.f32.mrf.mxu0 }
  0xee   :  { %6187 = vmatmul.msk.bf16.gmra.mxu0 %vm158_vm1, %v135_v59  ;;  %v150_v59 = vpack.c.bf16 %v116_v58, %v115_v57  ;;  %v7223_v57 = vadd.f32 %v7215_v52, %v6804_v30 }
  0xf0   :  { %6202 = vmatmul.msk.bf16.gmra.mxu2 %vm158_vm1, %v150_v59  ;;  %v7229_v59 = vadd.f32 %v7215_v52, %v6849_v35  ;;  %v7245_v35 = vadd.f32 %v7215_v52, %v6892_v40 }
  0xf3   :  { %v7037_v61 = vpop.f32.mrf.mxu0 }
  0xfb   :  { %v7045_v1 = vpop.f32.mrf.mxu0 }
  0xfe   :  { %6188 = vmatmul.msk.bf16.gmra.mxu0 %vm158_vm1, %v136_v0  ;;  %v106_v0 = vld [vmem:[%s11596_s29 + $0x188] sm:$0xff] }
  0xff   :  { %v145_v3 = vpack.c.bf16 %v106_v0, %v105_v63  ;;  %v7235_v0 = vadd.f32 %v7215_v52, %v6868_v36  ;;  %v434_v36 = vsel %vm430_vm2, %v7229_v59, 0.0 }
 0x103   :  { %v7048_v2 = vpop.f32.mrf.mxu0 }
 0x10b   :  { %v7056_v6 = vpop.f32.mrf.mxu0 }
 0x10e   :  { %6189 = vmatmul.msk.bf16.gmra.mxu0 %vm158_vm1, %v137_v5  ;;  %v117_v5 = vld [vmem:[%s11596_s29 + $0x1e0] sm:$0xff] }
 0x10f   :  { %v151_v9 = vpack.c.bf16 %v118_v8, %v117_v5  ;;  %v431_v5 = vsel %vm430_vm2, %v7223_v57, 0.0 }
 0x111   :  { %6203 = vmatmul.msk.bf16.gmra.mxu2 %vm158_vm1, %v151_v9  ;;  %v567_v9 = vmul.f32 %v7235_v0, %v7235_v0 }
 0x113   :  { %v7059_v7 = vpop.f32.mrf.mxu0 }
 0x11b   :  { %v7067_v11 = vpop.f32.mrf.mxu0 }
 0x11e   :  { %6190 = vmatmul.msk.bf16.gmra.mxu0 %vm158_vm1, %v138_v10 }
 0x123   :  { %v7070_v12 = vpop.f32.mrf.mxu0 }
 0x12b   :  { %v7078_v16 = vpop.f32.mrf.mxu0 }
 0x12e   :  { %6191 = vmatmul.msk.bf16.gmra.mxu0 %vm158_vm1, %v139_v15  ;;  %v146_v15 = vpack.c.bf16 %v108_v14, %v107_v13  ;;  %v7256_v13 = vadd.f32 %v7215_v52, %v6911_v41 }
 0x133   :  { %v7081_v17 = vpop.f32.mrf.mxu0 }
 0x13b   :  { %v7089_v21 = vpop.f32.mrf.mxu0 }
 0x13e   :  { %6192 = vmatmul.msk.bf16.gmra.mxu0 %vm158_vm1, %v140_v20  ;;  %v120_v20 = vld [vmem:[%s11596_s29 + $0x1f8] sm:$0xff] }
 0x13f   :  { %v152_v23 = vpack.c.bf16 %v120_v20, %v119_v19  ;;  %v436_v20 = vsel %vm430_vm2, %v7235_v0, 0.0 }
 0x141   :  { %6204 = vmatmul.msk.bf16.gmra.mxu2 %vm158_vm1, %v152_v23  ;;  %v568_v23 = vmul.f32 %v7245_v35, %v7245_v35 }
 0x143   :  { %v7092_v22 = vpop.f32.mrf.mxu0 }
 0x14b   :  { %v7100_v26 = vpop.f32.mrf.mxu0 }
 0x14e   :  { %6193 = vmatmul.msk.bf16.gmra.mxu0 %vm158_vm1, %v141_v25  ;;  %v109_v25 = vld [vmem:[%s11596_s29 + $0x1a0] sm:$0xff] }
 0x14f   :  { %v147_v29 = vpack.c.bf16 %v110_v28, %v109_v25  ;;  %v7268_v25 = vadd.f32 %v7215_v52, %v6935_v45  ;;  %v440_v45 = vsel %vm430_vm2, %v7256_v13, 0.0 }
 0x153   :  { %v7103_v27 = vpop.f32.mrf.mxu0 }
 0x15b   :  { %v7111_v33 = vpop.f32.mrf.mxu0 }
 0x15e   :  { %6194 = vmatmul.msk.bf16.gmra.mxu0 %vm158_vm1, %v142_v32 }
 0x163   :  { %v7114_v34 = vpop.f32.mrf.mxu0 }
 0x16b   :  { %v7122_v42 = vpop.f32.mrf.mxu0 }
 0x16e   :  { %6195 = vmatmul.msk.bf16.gmra.mxu0 %vm158_vm1, %v143_v39  ;;  %v112_v39 = vld [vmem:[%s11596_s29 + $0x1b8] sm:$0xff] }
 0x16f   :  { %v148_v43 = vpack.c.bf16 %v112_v39, %v111_v38  ;;  %v438_v38 = vsel %vm430_vm2, %v7245_v35, 0.0  ;;  %v569_v39 = vmul.f32 %v7256_v13, %v7256_v13 }
 0x173   :  { %v7132_v48 = vpop.f32.mrf.mxu0 }
 0x17b   :  { %v7140_v54 = vpop.f32.mrf.mxu0 }
 0x17e   :  { %6196 = vmatmul.msk.bf16.gmra.mxu0 %vm158_vm1, %v144_v53  ;;  %v7219_v53 = vadd.f32 %v7215_v52, %v6825_v31  ;;  %v564_v31 = vmul.f32 %v7223_v57, %v7223_v57 }
 0x180   :  { %v565_v63 = vmul.f32 %v7219_v53, %v7219_v53  ;;  %v432_v30 = vsel %vm430_vm2, %v7219_v53, 0.0  ;;  %v628_v14 = vsel %vm430_vm2, %v564_v31, 0.0 }
 0x182   :  { %v629_v8 = vsel %vm430_vm2, %v565_v63, 0.0 }
 0x183   :  { %v7150_v62 = vpop.f32.mrf.mxu0  ;;  %v630_v28 = vadd.f32 %v629_v8, %v628_v14 }
 0x18b   :  { %v7158_v4 = vpop.f32.mrf.mxu0 }
 0x18e   :  { %6197 = vmatmul.msk.bf16.gmra.mxu0 %vm158_vm1, %v145_v3  ;;  %v566_v3 = vmul.f32 %v7229_v59, %v7229_v59 }
 0x190   :  { %v631_v19 = vsel %vm430_vm2, %v566_v3, 0.0  ;;  %v570_v3 = vmul.f32 %v7268_v25, %v7268_v25 }
 0x191   :  { %v632_v63 = vadd.f32 %v631_v19, %v630_v28 }
 0x193   :  { %v7168_v10 = vpop.f32.mrf.mxu0 }
 0x19b   :  { %v7176_v18 = vpop.f32.mrf.mxu0 }
 0x19e   :  { %6198 = vmatmul.msk.bf16.gmra.mxu0 %vm158_vm1, %v146_v15  ;;  %v433_v15 = vadd.f32 %v432_v30, %v431_v5  ;;  %v635_v30 = vsel %vm430_vm2, %v568_v23, 0.0  ;;  %v7286_v5 = vadd.f32 %v7215_v52, %v6978_v50  ;;  %v639_v50 = vsel %vm430_vm2, %v570_v3, 0.0 }
 0x1a0   :  { %v435_v41 = vadd.f32 %v434_v36, %v433_v15  ;;  %v7295_v15 = vadd.f32 %v7215_v52, %v6997_v51 }
 0x1a2   :  { %v437_v31 = vadd.f32 %v436_v20, %v435_v41  ;;  %v572_v41 = vmul.f32 %v7286_v5, %v7286_v5 }
 0x1a3   :  { %v7186_v24 = vpop.f32.mrf.mxu0 }
 0x1a4   :  { %v439_v36 = vadd.f32 %v438_v38, %v437_v31  ;;  %v573_v31 = vmul.f32 %v7295_v15, %v7295_v15 }
 0x1a6   :  { %v441_v20 = vadd.f32 %v440_v45, %v439_v36 }
 0x1ab   :  { %v7194_v32 = vpop.f32.mrf.mxu0 }
 0x1ae   :  { %6199 = vmatmul.msk.bf16.gmra.mxu0 %vm158_vm1, %v147_v29  ;;  %v633_v29 = vsel %vm430_vm2, %v567_v9, 0.0  ;;  %v637_v9 = vsel %vm430_vm2, %v569_v39, 0.0 }
 0x1af   :  { %v634_v8 = vadd.f32 %v633_v29, %v632_v63  ;;  %v7306_v29 = vadd.f32 %v7215_v52, %v7021_v55  ;;  %v446_v63 = vsel %vm430_vm2, %v7286_v5, 0.0  ;;  %v448_v55 = vsel %vm430_vm2, %v7295_v15, 0.0 }
 0x1b1   :  { %v636_v19 = vadd.f32 %v635_v30, %v634_v8  ;;  %v7315_v30 = vadd.f32 %v7215_v52, %v7026_v56  ;;  %v643_v8 = vsel %vm430_vm2, %v572_v41, 0.0  ;;  %v574_v36 = vmul.f32 %v7306_v29, %v7306_v29 }
 0x1b2   :  { %v450_v56 = vsel %vm430_vm2, %v7306_v29, 0.0 }
 0x1b3   :  { %v7197_v37 = vpop.f32.mrf.mxu0  ;;  %v638_v38 = vadd.f32 %v637_v9, %v636_v19  ;;  %v7324_v9 = vadd.f32 %v7215_v52, %v7034_v60  ;;  %v645_v19 = vsel %vm430_vm2, %v573_v31, 0.0  ;;  %v647_v60 = vsel %vm430_vm2, %v574_v36, 0.0 }
 0x1b5   :  { %v640_v45 = vadd.f32 %v639_v50, %v638_v38  ;;  %v7333_v50 = vadd.f32 %v7215_v52, %v7037_v61 }
 0x1bb   :  { %v7205_v44 = vpop.f32.mrf.mxu0 }
 0x1be   :  { %6200 = vmatmul.msk.bf16.gmra.mxu0 %vm158_vm1, %v148_v43  ;;  %v7277_v43 = vadd.f32 %v7215_v52, %v6954_v46  ;;  %v442_v46 = vsel %vm430_vm2, %v7268_v25, 0.0 }
 0x1bf   :  { %v443_v39 = vadd.f32 %v442_v46, %v441_v20  ;;  %v575_v20 = vmul.f32 %v7315_v30, %v7315_v30 }
 0x1c0   :  { %v571_v14 = vmul.f32 %v7277_v43, %v7277_v43  ;;  %v444_v28 = vsel %vm430_vm2, %v7277_v43, 0.0 }
 0x1c1   :  { %v445_v3 = vadd.f32 %v444_v28, %v443_v39  ;;  %v452_v39 = vsel %vm430_vm2, %v7315_v30, 0.0  ;;  %v649_v61 = vsel %vm430_vm2, %v575_v20, 0.0 }
 0x1c2   :  { %v641_v51 = vsel %vm430_vm2, %v571_v14, 0.0 }
 0x1c3   :  { %v7208_v47 = vpop.f32.mrf.mxu0  ;;  %v642_v46 = vadd.f32 %v641_v51, %v640_v45  ;;  %v447_v14 = vadd.f32 %v446_v63, %v445_v3  ;;  %v576_v51 = vmul.f32 %v7324_v9, %v7324_v9  ;;  %v7344_v63 = vadd.f32 %v7215_v52, %v7045_v1 }
 0x1c4   :  { %v454_v3 = vsel %vm430_vm2, %v7324_v9, 0.0  ;;  %v456_v1 = vsel %vm430_vm2, %v7333_v50, 0.0 }
 0x1c5   :  { %v644_v28 = vadd.f32 %v643_v8, %v642_v46  ;;  %v449_v41 = vadd.f32 %v448_v55, %v447_v14  ;;  %v577_v8 = vmul.f32 %v7333_v50, %v7333_v50  ;;  %v7353_v55 = vadd.f32 %v7215_v52, %v7048_v2 }
 0x1c6   :  { %v651_v14 = vsel %vm430_vm2, %v576_v51, 0.0  ;;  %v458_v2 = vsel %vm430_vm2, %v7344_v63, 0.0 }
 0x1c7   :  { %v646_v31 = vadd.f32 %v645_v19, %v644_v28  ;;  %v451_v45 = vadd.f32 %v450_v56, %v449_v41  ;;  %11597 = vst [vmem:[#allocation3_spill] sm:$0xff] %v7353_v55  ;;  %v578_v19 = vmul.f32 %v7344_v63, %v7344_v63  ;;  %v7362_v56 = vadd.f32 %v7215_v52, %v7056_v6 }
 0x1c8   :  { %v653_v41 = vsel %vm430_vm2, %v577_v8, 0.0  ;;  %v7382_v8 = vadd.f32 %v7215_v52, %v7067_v11 }
 0x1c9   :  { %v648_v36 = vadd.f32 %v647_v60, %v646_v31  ;;  %v453_v46 = vadd.f32 %v452_v39, %v451_v45  ;;  %11598 = vst [vmem:[#allocation4_spill] sm:$0xff] %v7362_v56  ;;  %v579_v60 = vmul.f32 %v7353_v55, %v7353_v55  ;;  %v7371_v39 = vadd.f32 %v7215_v52, %v7059_v7 }
 0x1ca   :  { %v655_v6 = vsel %vm430_vm2, %v578_v19, 0.0  ;;  %11600 = vst [vmem:[#allocation6_spill] sm:$0xff] %v7382_v8  ;;  %v7391_v19 = vadd.f32 %v7215_v52, %v7070_v12  ;;  %v466_v12 = vsel %vm430_vm2, %v7382_v8, 0.0 }
 0x1cb   :  { %v7210_v49 = vpop.f32.mrf.mxu0  ;;  %v650_v20 = vadd.f32 %v649_v61, %v648_v36  ;;  %v455_v28 = vadd.f32 %v454_v3, %v453_v46  ;;  %11599 = vst [vmem:[#allocation5_spill] sm:$0xff] %v7371_v39  ;;  %v460_v61 = vsel %vm430_vm2, %v7353_v55, 0.0  ;;  %v580_v3 = vmul.f32 %v7362_v56, %v7362_v56 }
 0x1cc   :  { %v657_v7 = vsel %vm430_vm2, %v579_v60, 0.0  ;;  %11601 = vst [vmem:[#allocation7_spill] sm:$0xff] %v7391_v19  ;;  %v464_v11 = vsel %vm430_vm2, %v7371_v39, 0.0 }
 0x1cd   :  { %v652_v51 = vadd.f32 %v651_v14, %v650_v20  ;;  %v457_v31 = vadd.f32 %v456_v1, %v455_v28  ;;  %v462_v14 = vsel %vm430_vm2, %v7362_v56, 0.0  ;;  %v581_v1 = vmul.f32 %v7371_v39, %v7371_v39 }
 0x1ce   :  { %v659_v55 = vsel %vm430_vm2, %v580_v3, 0.0 }
 0x1cf   :  { %v654_v36 = vadd.f32 %v653_v41, %v652_v51  ;;  %v459_v46 = vadd.f32 %v458_v2, %v457_v31  ;;  %v582_v41 = vmul.f32 %v7382_v8, %v7382_v8  ;;  %v7400_v2 = vadd.f32 %v7215_v52, %v7078_v16 }
 0x1d0   :  { %v661_v31 = vsel %vm430_vm2, %v581_v1, 0.0  ;;  %v7420_v1 = vadd.f32 %v7215_v52, %v7089_v21 }
 0x1d1   :  { %v656_v20 = vadd.f32 %v655_v6, %v654_v36  ;;  %v461_v28 = vadd.f32 %v460_v61, %v459_v46  ;;  %11602 = vst [vmem:[#allocation8_spill] sm:$0xff] %v7400_v2  ;;  %v583_v6 = vmul.f32 %v7391_v19, %v7391_v19  ;;  %v7409_v61 = vadd.f32 %v7215_v52, %v7081_v17 }
 0x1d2   :  { %v663_v16 = vsel %vm430_vm2, %v582_v41, 0.0  ;;  %11604 = vst [vmem:[#allocation10_spill] sm:$0xff] %v7420_v1  ;;  %v7429_v41 = vadd.f32 %v7215_v52, %v7092_v22  ;;  %v474_v22 = vsel %vm430_vm2, %v7420_v1, 0.0 }
 0x1d3   :  { %v7225_v58 = vpop.f32.mrf.mxu0  ;;  %v658_v60 = vadd.f32 %v657_v7, %v656_v20  ;;  %v463_v51 = vadd.f32 %v462_v14, %v461_v28  ;;  %11603 = vst [vmem:[#allocation9_spill] sm:$0xff] %v7409_v61  ;;  %v468_v7 = vsel %vm430_vm2, %v7391_v19, 0.0  ;;  %v584_v14 = vmul.f32 %v7400_v2, %v7400_v2 }
 0x1d4   :  { %v665_v17 = vsel %vm430_vm2, %v583_v6, 0.0  ;;  %11605 = vst [vmem:[#allocation11_spill] sm:$0xff] %v7429_v41  ;;  %v472_v21 = vsel %vm430_vm2, %v7409_v61, 0.0 }
 0x1d5   :  { %v660_v3 = vadd.f32 %v659_v55, %v658_v60  ;;  %v465_v36 = vadd.f32 %v464_v11, %v463_v51  ;;  %v470_v55 = vsel %vm430_vm2, %v7400_v2, 0.0  ;;  %v585_v11 = vmul.f32 %v7409_v61, %v7409_v61 }
 0x1d6   :  { %v667_v19 = vsel %vm430_vm2, %v584_v14, 0.0 }
 0x1d7   :  { %v662_v20 = vadd.f32 %v661_v31, %v660_v3  ;;  %v467_v28 = vadd.f32 %v466_v12, %v465_v36  ;;  %v586_v31 = vmul.f32 %v7420_v1, %v7420_v1  ;;  %v7438_v12 = vadd.f32 %v7215_v52, %v7100_v26 }
 0x1d8   :  { %v669_v36 = vsel %vm430_vm2, %v585_v11, 0.0  ;;  %v7458_v11 = vadd.f32 %v7215_v52, %v7111_v33 }
 0x1d9   :  { %v664_v60 = vadd.f32 %v663_v16, %v662_v20  ;;  %v469_v51 = vadd.f32 %v468_v7, %v467_v28  ;;  %11606 = vst [vmem:[#allocation12_spill] sm:$0xff] %v7438_v12  ;;  %v587_v16 = vmul.f32 %v7429_v41, %v7429_v41  ;;  %v7447_v7 = vadd.f32 %v7215_v52, %v7103_v27 }
 0x1da   :  { %v671_v26 = vsel %vm430_vm2, %v586_v31, 0.0  ;;  %11608 = vst [vmem:[#allocation14_spill] sm:$0xff] %v7458_v11  ;;  %v7467_v31 = vadd.f32 %v7215_v52, %v7114_v34 }
 0x1db   :  { %v7259_v40 = vpop.f32.mrf.mxu0  ;;  %v666_v6 = vadd.f32 %v665_v17, %v664_v60  ;;  %v471_v3 = vadd.f32 %v470_v55, %v469_v51  ;;  %11607 = vst [vmem:[#allocation13_spill] sm:$0xff] %v7447_v7  ;;  %v476_v17 = vsel %vm430_vm2, %v7429_v41, 0.0  ;;  %v588_v55 = vmul.f32 %v7438_v12, %v7438_v12  ;;  %v7469_v41 = vpop.f32.mrf.mxu2 }
 0x1dc   :  { %v673_v27 = vsel %vm430_vm2, %v587_v16, 0.0  ;;  %11609 = vst [vmem:[#allocation15_spill] sm:$0xff] %v7467_v31  ;;  %v7478_v16 = vadd.f32 %v7215_v52, %v7122_v42 }
 0x1dd   :  { %v668_v14 = vadd.f32 %v667_v19, %v666_v6  ;;  %v473_v20 = vadd.f32 %v472_v21, %v471_v3  ;;  %v478_v19 = vsel %vm430_vm2, %v7438_v12, 0.0  ;;  %v589_v21 = vmul.f32 %v7447_v7, %v7447_v7 }
 0x1de   :  { %v675_v33 = vsel %vm430_vm2, %v588_v55, 0.0  ;;  %11610 = vst [vmem:[#allocation16_spill] sm:$0xff] %v7478_v16  ;;  %v7487_v55 = vadd.f32 %v7215_v52, %v7132_v48 }
 0x1df   :  { %v670_v60 = vadd.f32 %v669_v36, %v668_v14  ;;  %v475_v51 = vadd.f32 %v474_v22, %v473_v20  ;;  %v480_v36 = vsel %vm430_vm2, %v7447_v7, 0.0  ;;  %v590_v22 = vmul.f32 %v7458_v11, %v7458_v11 }
 0x1e0   :  { %v677_v34 = vsel %vm430_vm2, %v589_v21, 0.0  ;;  %11611 = vst [vmem:[#allocation17_spill] sm:$0xff] %v7487_v55  ;;  %v7498_v21 = vadd.f32 %v7215_v52, %v7140_v54  ;;  %v488_v54 = vsel %vm430_vm2, %v7487_v55, 0.0 }
 0x1e1   :  { %v672_v6 = vadd.f32 %v671_v26, %v670_v60  ;;  %v477_v3 = vadd.f32 %v476_v17, %v475_v51  ;;  %v482_v26 = vsel %vm430_vm2, %v7458_v11, 0.0  ;;  %v591_v17 = vmul.f32 %v7467_v31, %v7467_v31 }
 0x1e2   :  { %v679_v42 = vsel %vm430_vm2, %v590_v22, 0.0  ;;  %11612 = vst [vmem:[#allocation18_spill] sm:$0xff] %v7498_v21  ;;  %v7507_v22 = vadd.f32 %v7215_v52, %v7150_v62 }
 0x1e3   :  { %v7297_v23 = vpop.f32.mrf.mxu0  ;;  %v674_v14 = vadd.f32 %v673_v27, %v672_v6  ;;  %v479_v20 = vadd.f32 %v478_v19, %v477_v3  ;;  %v484_v27 = vsel %vm430_vm2, %v7467_v31, 0.0  ;;  %v592_v19 = vmul.f32 %v7478_v16, %v7478_v16 }
 0x1e4   :  { %v681_v48 = vsel %vm430_vm2, %v591_v17, 0.0  ;;  %11613 = vst [vmem:[#allocation19_spill] sm:$0xff] %v7507_v22 }
 0x1e5   :  { %v676_v60 = vadd.f32 %v675_v33, %v674_v14  ;;  %v481_v51 = vadd.f32 %v480_v36, %v479_v20  ;;  %v486_v33 = vsel %vm430_vm2, %v7478_v16, 0.0  ;;  %v593_v36 = vmul.f32 %v7487_v55, %v7487_v55 }
 0x1e6   :  { %v683_v31 = vsel %vm430_vm2, %v592_v19, 0.0  ;;  %v7527_v19 = vadd.f32 %v7215_v52, %v7168_v10 }
 0x1e7   :  { %v678_v6 = vadd.f32 %v677_v34, %v676_v60  ;;  %v483_v3 = vadd.f32 %v482_v26, %v481_v51  ;;  %v594_v34 = vmul.f32 %v7498_v21, %v7498_v21  ;;  %v7516_v26 = vadd.f32 %v7215_v52, %v7158_v4  ;;  %v7518_v51 = vpop.f32.mrf.mxu2 }
 0x1e8   :  { %v685_v62 = vsel %vm430_vm2, %v593_v36, 0.0  ;;  %11615 = vst [vmem:[#allocation21_spill] sm:$0xff] %v7527_v19 }
 0x1e9   :  { %v680_v14 = vadd.f32 %v679_v42, %v678_v6  ;;  %v485_v20 = vadd.f32 %v484_v27, %v483_v3  ;;  %11614 = vst [vmem:[#allocation20_spill] sm:$0xff] %v7516_v26  ;;  %v490_v42 = vsel %vm430_vm2, %v7498_v21, 0.0  ;;  %v595_v27 = vmul.f32 %v7507_v22, %v7507_v22 }
 0x1ea   :  { %v596_v36 = vmul.f32 %v7516_v26, %v7516_v26 }
 0x1eb   :  { %v7335_v38 = vpop.f32.mrf.mxu0  ;;  %v682_v17 = vadd.f32 %v681_v48, %v680_v14  ;;  %v487_v60 = vadd.f32 %v486_v33, %v485_v20  ;;  %v687_v48 = vsel %vm430_vm2, %v594_v34, 0.0  ;;  %v492_v33 = vsel %vm430_vm2, %v7507_v22, 0.0 }
 0x1ec   :  { %v7538_v14 = vadd.f32 %v7215_v52, %v7176_v18  ;;  %v689_v10 = vsel %vm430_vm2, %v595_v27, 0.0  ;;  %v7547_v34 = vadd.f32 %v7215_v52, %v7186_v24  ;;  %v691_v22 = vsel %vm430_vm2, %v596_v36, 0.0 }
 0x1ed   :  { %v684_v6 = vadd.f32 %v683_v31, %v682_v17  ;;  %v489_v3 = vadd.f32 %v488_v54, %v487_v60  ;;  %v494_v31 = vsel %vm430_vm2, %v7516_v26, 0.0  ;;  %v597_v54 = vmul.f32 %v7527_v19, %v7527_v19 }
 0x1ee   :  { %11616 = vst [vmem:[#allocation22_spill] sm:$0xff] %v7538_v14  ;;  %v496_v18 = vsel %vm430_vm2, %v7527_v19, 0.0  ;;  %v498_v24 = vsel %vm430_vm2, %v7538_v14, 0.0 }
 0x1ef   :  { %v686_v20 = vadd.f32 %v685_v62, %v684_v6  ;;  %v491_v21 = vadd.f32 %v490_v42, %v489_v3  ;;  %11617 = vst [vmem:[#allocation23_spill] sm:$0xff] %v7547_v34  ;;  %v598_v62 = vmul.f32 %v7538_v14, %v7538_v14  ;;  %v7556_v42 = vadd.f32 %v7215_v52, %v7194_v32  ;;  %v7569_v32 = vpop.f32.mrf.mxu2 }
 0x1f0   :  { %v693_v3 = vsel %vm430_vm2, %v597_v54, 0.0 }
 0x1f1   :  { %v688_v17 = vadd.f32 %v687_v48, %v686_v20  ;;  %v493_v60 = vadd.f32 %v492_v33, %v491_v21  ;;  %11618 = vst [vmem:[#allocation24_spill] sm:$0xff] %v7556_v42  ;;  %v599_v21 = vmul.f32 %v7547_v34, %v7547_v34  ;;  %v7565_v48 = vadd.f32 %v7215_v52, %v7197_v37 }
 0x1f2   :  { %v600_v54 = vmul.f32 %v7556_v42, %v7556_v42 }
 0x1f3   :  { %v7373_v45 = vpop.f32.mrf.mxu0  ;;  %v690_v27 = vadd.f32 %v689_v10, %v688_v17  ;;  %v495_v6 = vadd.f32 %v494_v31, %v493_v60  ;;  %v695_v10 = vsel %vm430_vm2, %v598_v62, 0.0  ;;  %v500_v31 = vsel %vm430_vm2, %v7547_v34, 0.0 }
 0x1f4   :  { %v7578_v17 = vadd.f32 %v7215_v52, %v7205_v44  ;;  %v601_v62 = vmul.f32 %v7565_v48, %v7565_v48  ;;  %v699_v14 = vsel %vm430_vm2, %v600_v54, 0.0  ;;  %v504_v44 = vsel %vm430_vm2, %v7565_v48, 0.0 }
 0x1f5   :  { %v692_v33 = vadd.f32 %v691_v22, %v690_v27  ;;  %v497_v36 = vadd.f32 %v496_v18, %v495_v6  ;;  %v697_v22 = vsel %vm430_vm2, %v599_v21, 0.0  ;;  %v502_v18 = vsel %vm430_vm2, %v7556_v42, 0.0 }
 0x1f6   :  { %v7587_v27 = vadd.f32 %v7215_v52, %v7208_v47  ;;  %v506_v47 = vsel %vm430_vm2, %v7578_v17, 0.0 }
 0x1f7   :  { %v694_v37 = vadd.f32 %v693_v3, %v692_v33  ;;  %v499_v60 = vadd.f32 %v498_v24, %v497_v36  ;;  %v602_v3 = vmul.f32 %v7578_v17, %v7578_v17  ;;  %v7596_v24 = vadd.f32 %v7215_v52, %v7210_v49  ;;  %v7616_v42 = vpop.f32.mrf.mxu2 }
 0x1f8   :  { %v701_v36 = vsel %vm430_vm2, %v601_v62, 0.0 }
 0x1f9   :  { %v696_v6 = vadd.f32 %v695_v10, %v694_v37  ;;  %v501_v34 = vadd.f32 %v500_v31, %v499_v60  ;;  %v603_v10 = vmul.f32 %v7587_v27, %v7587_v27  ;;  %v7605_v31 = vadd.f32 %v7215_v52, %v7225_v58 }
 0x1fa   :  { %v703_v49 = vsel %vm430_vm2, %v602_v3, 0.0  ;;  %v7625_v3 = vadd.f32 %v7215_v52, %v7297_v23 }
 0x1fb   :  { %v7411_v46 = vpop.f32.mrf.mxu0  ;;  %v698_v21 = vadd.f32 %v697_v22, %v696_v6  ;;  %v503_v33 = vadd.f32 %v502_v18, %v501_v34  ;;  %v508_v34 = vsel %vm430_vm2, %v7587_v27, 0.0  ;;  %v604_v22 = vmul.f32 %v7596_v24, %v7596_v24 }
 0x1fc   :  { %v7614_v18 = vadd.f32 %v7215_v52, %v7259_v40  ;;  %v705_v58 = vsel %vm430_vm2, %v603_v10, 0.0  ;;  %v7634_v10 = vadd.f32 %v7215_v52, %v7335_v38 }
 0x1fd   :  { %v700_v54 = vadd.f32 %v699_v14, %v698_v21  ;;  %v505_v37 = vadd.f32 %v504_v44, %v503_v33  ;;  %v510_v14 = vsel %vm430_vm2, %v7596_v24, 0.0  ;;  %v605_v44 = vmul.f32 %v7605_v31, %v7605_v31 }
 0x1fe   :  { %v707_v40 = vsel %vm430_vm2, %v604_v22, 0.0  ;;  %v514_v23 = vsel %vm430_vm2, %v7614_v18, 0.0 }
 0x1ff   :  { %v702_v62 = vadd.f32 %v701_v36, %v700_v54  ;;  %v507_v6 = vadd.f32 %v506_v47, %v505_v37  ;;  %v512_v36 = vsel %vm430_vm2, %v7605_v31, 0.0  ;;  %v606_v47 = vmul.f32 %v7614_v18, %v7614_v18  ;;  %v7663_v26 = vpop.f32.mrf.mxu2 }
 0x200   :  { %v709_v19 = vsel %vm430_vm2, %v605_v44, 0.0  ;;  %v7652_v44 = vadd.f32 %v7215_v52, %v7411_v46 }
 0x201   :  { %v704_v21 = vadd.f32 %v703_v49, %v702_v62  ;;  %v509_v33 = vadd.f32 %v508_v34, %v507_v6  ;;  %v607_v49 = vmul.f32 %v7625_v3, %v7625_v3  ;;  %v7643_v34 = vadd.f32 %v7215_v52, %v7373_v45 }
 0x202   :  { %v711_v38 = vsel %vm430_vm2, %v606_v47, 0.0 }
 0x203   :  { %v7449_v28 = vpop.f32.mrf.mxu0  ;;  %v706_v54 = vadd.f32 %v705_v58, %v704_v21  ;;  %v511_v37 = vadd.f32 %v510_v14, %v509_v33  ;;  %v516_v58 = vsel %vm430_vm2, %v7625_v3, 0.0  ;;  %v608_v14 = vmul.f32 %v7634_v10, %v7634_v10 }
 0x204   :  { %v713_v45 = vsel %vm430_vm2, %v607_v49, 0.0  ;;  %v7661_v47 = vadd.f32 %v7215_v52, %v7449_v28 }
 0x205   :  { %v708_v22 = vadd.f32 %v707_v40, %v706_v54  ;;  %v513_v62 = vadd.f32 %v512_v36, %v511_v37  ;;  %v518_v40 = vsel %vm430_vm2, %v7634_v10, 0.0  ;;  %v609_v36 = vmul.f32 %v7643_v34, %v7643_v34 }
 0x206   :  { %v715_v46 = vsel %vm430_vm2, %v608_v14, 0.0 }
 0x207   :  { %v710_v21 = vadd.f32 %v709_v19, %v708_v22  ;;  %v515_v33 = vadd.f32 %v514_v23, %v513_v62  ;;  %v520_v19 = vsel %vm430_vm2, %v7643_v34, 0.0  ;;  %v610_v23 = vmul.f32 %v7652_v44, %v7652_v44 }
 0x208   :  { %v717_v28 = vsel %vm430_vm2, %v609_v36, 0.0 }
 0x209   :  { %v712_v54 = vadd.f32 %v711_v38, %v710_v21  ;;  %v517_v37 = vadd.f32 %v516_v58, %v515_v33  ;;  %v522_v38 = vsel %vm430_vm2, %v7652_v44, 0.0  ;;  %v611_v58 = vmul.f32 %v7661_v47, %v7661_v47 }
 0x20b   :  { %v7489_v7 = vpop.f32.mrf.mxu0  ;;  %v714_v22 = vadd.f32 %v713_v45, %v712_v54  ;;  %v519_v62 = vadd.f32 %v518_v40, %v517_v37  ;;  %v524_v45 = vsel %vm430_vm2, %v7661_v47, 0.0 }
 0x20c   :  { %v7672_v49 = vadd.f32 %v7215_v52, %v7489_v7  ;;  %v719_v7 = vsel %vm430_vm2, %v610_v23, 0.0 }
 0x20d   :  { %v716_v21 = vadd.f32 %v715_v46, %v714_v22  ;;  %v521_v33 = vadd.f32 %v520_v19, %v519_v62 }
 0x20e   :  { %v612_v40 = vmul.f32 %v7672_v49, %v7672_v49  ;;  %v526_v46 = vsel %vm430_vm2, %v7672_v49, 0.0 }
 0x20f   :  { %v718_v54 = vadd.f32 %v717_v28, %v716_v21  ;;  %v523_v37 = vadd.f32 %v522_v38, %v521_v33  ;;  %v420_v33 = vpop.f32.mrf.mxu2 }
 0x210   :  { %v723_v16 = vsel %vm430_vm2, %v612_v40, 0.0 }
 0x211   :  { %v720_v22 = vadd.f32 %v719_v7, %v718_v54  ;;  %v525_v62 = vadd.f32 %v524_v45, %v523_v37 }
 0x213   :  { %v7529_v4 = vpop.f32.mrf.mxu0  ;;  %v527_v21 = vadd.f32 %v526_v46, %v525_v62 }
 0x214   :  { %v7681_v14 = vadd.f32 %v7215_v52, %v7529_v4  ;;  %v721_v4 = vsel %vm430_vm2, %v611_v58, 0.0 }
 0x215   :  { %v722_v58 = vadd.f32 %v721_v4, %v720_v22 }
 0x216   :  { %v613_v19 = vmul.f32 %v7681_v14, %v7681_v14 }
 0x217   :  { %v724_v40 = vadd.f32 %v723_v16, %v722_v58 }
 0x218   :  { %v725_v11 = vsel %vm430_vm2, %v613_v19, 0.0 }
 0x219   :  { %v726_v22 = vadd.f32 %v725_v11, %v724_v40 }
 0x21b   :  { %v7567_v20 = vpop.f32.mrf.mxu0 }
 0x21c   :  { %v7690_v36 = vadd.f32 %v7215_v52, %v7567_v20  ;;  %v528_v20 = vsel %vm430_vm2, %v7681_v14, 0.0 }
 0x21d   :  { %v529_v54 = vadd.f32 %v528_v20, %v527_v21 }
 0x21e   :  { %v614_v28 = vmul.f32 %v7690_v36, %v7690_v36 }
 0x223   :  { %v395_v60 = vpop.f32.mrf.mxu0 }
 0x224   :  { %v7698_v23 = vadd.f32 %v7215_v52, %v395_v60  ;;  %v530_v60 = vsel %vm430_vm2, %v7690_v36, 0.0 }
 0x225   :  { %v531_v62 = vadd.f32 %v530_v60, %v529_v54 }
 0x226   :  { %v615_v7 = vmul.f32 %v7698_v23, %v7698_v23  ;;  %v532_v4 = vsel %vm430_vm2, %v7698_v23, 0.0 }
 0x228   :  { %v729_v12 = vsel %vm430_vm2, %v615_v7, 0.0  ;;  %v7736_v7 = vadd.f32 %v7215_v52, %v7469_v41 }
 0x22b   :  { %v398_v6 = vpop.f32.mrf.mxu0 }
 0x22c   :  { %v7706_v38 = vadd.f32 %v7215_v52, %v398_v6  ;;  %v727_v6 = vsel %vm430_vm2, %v614_v28, 0.0  ;;  %v533_v28 = vadd.f32 %v532_v4, %v531_v62  ;;  %v7743_v62 = vadd.f32 %v7215_v52, %v7518_v51 }
 0x22d   :  { %v728_v20 = vadd.f32 %v727_v6, %v726_v22  ;;  %v423_v22 = vpop.f32.mrf.mxu2 }
 0x22e   :  { %v616_v46 = vmul.f32 %v7706_v38, %v7706_v38  ;;  %v534_v16 = vsel %vm430_vm2, %v7706_v38, 0.0 }
 0x22f   :  { %v730_v11 = vadd.f32 %v729_v12, %v728_v20  ;;  %v535_v60 = vadd.f32 %v534_v16, %v533_v28  ;;  %v7753_v28 = vadd.f32 %v7215_v52, %v7569_v32 }
 0x230   :  { %v731_v58 = vsel %vm430_vm2, %v616_v46, 0.0 }
 0x231   :  { %v732_v6 = vadd.f32 %v731_v58, %v730_v11  ;;  %v542_v11 = vsel %vm430_vm2, %v7736_v7, 0.0 }
 0x233   :  { %v400_v55 = vpop.f32.mrf.mxu0 }
 0x234   :  { %v7714_v45 = vadd.f32 %v7215_v52, %v400_v55 }
 0x236   :  { %v617_v55 = vmul.f32 %v7714_v45, %v7714_v45  ;;  %v536_v21 = vsel %vm430_vm2, %v7714_v45, 0.0 }
 0x237   :  { %v537_v4 = vadd.f32 %v536_v21, %v535_v60  ;;  %v621_v60 = vmul.f32 %v7743_v62, %v7743_v62 }
 0x238   :  { %v733_v40 = vsel %vm430_vm2, %v617_v55, 0.0  ;;  %v620_v55 = vmul.f32 %v7736_v7, %v7736_v7 }
 0x239   :  { %v734_v41 = vadd.f32 %v733_v40, %v732_v6  ;;  %v7765_v40 = vadd.f32 %v7215_v52, %v7616_v42  ;;  %v741_v42 = vsel %vm430_vm2, %v621_v60, 0.0 }
 0x23b   :  { %v403_v37 = vpop.f32.mrf.mxu0 }
 0x23c   :  { %v7722_v19 = vadd.f32 %v7215_v52, %v403_v37 }
 0x23e   :  { %v618_v37 = vmul.f32 %v7722_v19, %v7722_v19  ;;  %v538_v54 = vsel %vm430_vm2, %v7722_v19, 0.0 }
 0x23f   :  { %v539_v20 = vadd.f32 %v538_v54, %v537_v4  ;;  %v739_v4 = vsel %vm430_vm2, %v620_v55, 0.0  ;;  %v623_v55 = vmul.f32 %v7765_v40, %v7765_v40 }
 0x240   :  { %v735_v12 = vsel %vm430_vm2, %v618_v37, 0.0 }
 0x241   :  { %v736_v21 = vadd.f32 %v735_v12, %v734_v41  ;;  %v622_v12 = vmul.f32 %v7753_v28, %v7753_v28  ;;  %v7775_v41 = vadd.f32 %v7215_v52, %v7663_v26  ;;  %v548_v26 = vsel %vm430_vm2, %v7765_v40, 0.0 }
 0x243   :  { %v405_v46 = vpop.f32.mrf.mxu0  ;;  %v743_v1 = vsel %vm430_vm2, %v622_v12, 0.0  ;;  %v624_v60 = vmul.f32 %v7775_v41, %v7775_v41 }
 0x244   :  { %v7747_v16 = vadd.f32 %v7215_v52, %v405_v46  ;;  %v544_v46 = vsel %vm430_vm2, %v7743_v62, 0.0 }
 0x246   :  { %v540_v58 = vsel %vm430_vm2, %v7747_v16, 0.0  ;;  %v619_v51 = vmul.f32 %v7747_v16, %v7747_v16 }
 0x247   :  { %v541_v37 = vadd.f32 %v540_v58, %v539_v20 }
 0x248   :  { %v737_v32 = vsel %vm430_vm2, %v619_v51, 0.0  ;;  %v546_v51 = vsel %vm430_vm2, %v7753_v28, 0.0 }
 0x249   :  { %v543_v54 = vadd.f32 %v542_v11, %v541_v37  ;;  %v738_v6 = vadd.f32 %v737_v32, %v736_v21  ;;  %v7783_v21 = vadd.f32 %v7215_v52, %v420_v33  ;;  %v425_v32 = vpop.f32.mrf.mxu2  ;;  %v550_v33 = vsel %vm430_vm2, %v7775_v41, 0.0 }
 0x24a   :  { %v7799_v12 = vadd.f32 %v7215_v52, %v425_v32 }
 0x24b   :  { %v545_v20 = vadd.f32 %v544_v46, %v543_v54  ;;  %v740_v58 = vadd.f32 %v739_v4, %v738_v6  ;;  %v7791_v54 = vadd.f32 %v7215_v52, %v423_v22  ;;  %v745_v46 = vsel %vm430_vm2, %v623_v55, 0.0 }
 0x24c   :  { %v552_v22 = vsel %vm430_vm2, %v7783_v21, 0.0  ;;  %v627_v52 = vmul.f32 %v7799_v12, %v7799_v12 }
 0x24d   :  { %v547_v37 = vadd.f32 %v546_v51, %v545_v20  ;;  %v742_v11 = vadd.f32 %v741_v42, %v740_v58  ;;  %v625_v20 = vmul.f32 %v7783_v21, %v7783_v21  ;;  %v747_v51 = vsel %vm430_vm2, %v624_v60, 0.0 }
 0x24f   :  { %v744_v6 = vadd.f32 %v743_v1, %v742_v11  ;;  %v549_v4 = vadd.f32 %v548_v26, %v547_v37  ;;  %v626_v1 = vmul.f32 %v7791_v54, %v7791_v54  ;;  %v749_v11 = vsel %vm430_vm2, %v625_v20, 0.0 }
 0x250   :  { %v554_v26 = vsel %vm430_vm2, %v7791_v54, 0.0 }
 0x251   :  { %v551_v58 = vadd.f32 %v550_v33, %v549_v4  ;;  %v746_v42 = vadd.f32 %v745_v46, %v744_v6  ;;  %v751_v60 = vsel %vm430_vm2, %v626_v1, 0.0  ;;  %v556_v4 = vsel %vm430_vm2, %v7799_v12, 0.0  ;;  %v1248_v1 = vld [vmem:[%s11502_s5] sm:$0xf] }
 0x253   :  { %v553_v55 = vadd.f32 %v552_v22, %v551_v58  ;;  %v748_v37 = vadd.f32 %v747_v51, %v746_v42  ;;  %v753_v58 = vsel %vm430_vm2, %v627_v52, 0.0  ;;  %v1713_v52 = vsel %vm1443_vm4, %v1248_v1, 0 }
 0x254   :  { %1722 = vmatpush.bf16.msrb.mxu2 %v1713_v52 }
 0x255   :  { %v555_v32 = vadd.f32 %v554_v26, %v553_v55  ;;  %v750_v6 = vadd.f32 %v749_v11, %v748_v37 }
 0x257   :  { %v752_v46 = vadd.f32 %v751_v60, %v750_v6  ;;  %v557_v33 = vadd.f32 %v556_v4, %v555_v32 }
 0x259   :  { %v558_v42 = vrot.slane %v557_v33, 4  ;;  %v754_v51 = vadd.f32 %v753_v58, %v752_v46 }
 0x25b   :  { %v559_v20 = vadd.f32 %v558_v42, %v557_v33  ;;  %v755_v22 = vrot.slane %v754_v51, 4  ;;  %v1152_v33 = vld [vmem:[#allocation2] sm:$0xff] }
 0x25d   :  { %v560_v61 = vrot.slane %v559_v20, 2  ;;  %v756_v2 = vadd.f32 %v755_v22, %v754_v51 }
 0x25f   :  { %v561_v8 = vadd.f32 %v560_v61, %v559_v20  ;;  %v757_v39 = vrot.slane %v756_v2, 2  ;;  %v428_v20 = vld [vmem:[%s11503_s3] sm:$0x1] }
 0x261   :  { %v562_v56 = vrot.slane %v561_v8, 1  ;;  %v758_v55 = vadd.f32 %v757_v39, %v756_v2  ;;  %v1153_v39 = vld [vmem:[#allocation2 + $0x8] sm:$0xff] }
 0x263   :  { %v563_v37 = vadd.f32 %v562_v56, %v561_v8  ;;  %v759_v11 = vrot.slane %v758_v55, 1  ;;  %v1216_v56 = vpack.c.bf16 %v1153_v39, %v1152_v33 }
 0x265   :  { %v760_v26 = vadd.f32 %v759_v11, %v758_v55  ;;  %v761_v32 = vmul.f32 0.001953125, %v563_v37  ;;  %6238 = vmatmul.msk.bf16.vlgmr.msrb.gmra.mxu2 %vm430_vm2, %v1216_v56  ;;  %v429_v11 = vld [vmem:[%s11504_s4] sm:$0x1] }
 0x267   :  { %v762_v6 = vmul.f32 0.001953125, %v760_v26  ;;  %v763_v60 = vmul.f32 %v761_v32, %v761_v32 }
 0x269   :  { %v764_v4 = vsub.f32 %v762_v6, %v763_v60 }
 0x26b   :  { %v765_v46 = vmax.f32 %v764_v4, 0.0 }
 0x26d   :  { %v766_v61 = vadd.f32 1e-05, %v765_v46 }
 0x26f   :  { %6523 = vrsqrt.f32 %v766_v61  ;;  %vm773_vm6 = vweird.f32 %v766_v61 }
 0x275   :  { %v6524_v8 = vpop.eup %6523 }
 0x276   :  { %v768_v2 = vmul.f32 %v6524_v8, %v766_v61  ;;  %vm774_vm5 = vweird.f32 %v6524_v8 }
 0x277   :  { %vm775_vm7 = vmor %vm773_vm6, %vm774_vm5 }
 0x278   :  { %v769_v58 = vmul.f32 %v6524_v8, %v768_v2 }
 0x27a   :  { %v770_v42 = vmul.f32 0.5, %v769_v58 }
 0x27c   :  { %v771_v51 = vsub.f32 1.5, %v770_v42 }
 0x27e   :  { %v772_v22 = vmul.f32 %v6524_v8, %v771_v51 }
 0x280   :  { %v776_v55 = vsel %vm775_vm7, %v6524_v8, %v772_v22 }
 0x281   :  { %v777_v37 = vmul.f32 %v776_v55, %v428_v20 }
 0x283   :  { %v778_v1 = vmul.f32 %v777_v37, %v761_v32  ;;  %v7826_v26 = vperm.slane %v777_v37, 0 }
 0x285   :  { %v779_v52 = vsub.f32 %v429_v11, %v778_v1  ;;  %v846_v6 = vmul.f32 %v7826_v26, %v7799_v12  ;;  %v783_v61 = vmul.f32 %v7826_v26, %v7223_v57  ;;  %v784_v33 = vmul.f32 %v7826_v26, %v7219_v53 }
 0x286   :  { %v785_v32 = vmul.f32 %v7826_v26, %v7229_v59  ;;  %v786_v39 = vmul.f32 %v7826_v26, %v7235_v0  ;;  %v787_v12 = vmul.f32 %v7826_v26, %v7245_v35  ;;  %v788_v56 = vmul.f32 %v7826_v26, %v7256_v13 }
 0x287   :  { %v7830_v60 = vperm.slane %v779_v52, 0  ;;  %v789_v8 = vmul.f32 %v7826_v26, %v7268_v25  ;;  %v7850_v57 = vmul.f32 %v7826_v26, %v7277_v43  ;;  %v7854_v53 = vmul.f32 %v7826_v26, %v7286_v5 }
 0x288   :  { %v7858_v59 = vmul.f32 %v7826_v26, %v7295_v15  ;;  %v820_v0 = vmul.f32 %v7826_v26, %v7565_v48  ;;  %v821_v35 = vmul.f32 %v7826_v26, %v7578_v17  ;;  %v822_v13 = vmul.f32 %v7826_v26, %v7587_v27 }
 0x289   :  { %v913_v4 = vadd.f32 %v7830_v60, %v846_v6  ;;  %v823_v25 = vmul.f32 %v7826_v26, %v7596_v24  ;;  %v824_v43 = vmul.f32 %v7826_v26, %v7605_v31  ;;  %v825_v5 = vmul.f32 %v7826_v26, %v7614_v18 }
 0x28a   :  { %v826_v15 = vmul.f32 %v7826_v26, %v7625_v3  ;;  %v827_v48 = vmul.f32 %v7826_v26, %v7634_v10  ;;  %v828_v17 = vmul.f32 %v7826_v26, %v7643_v34  ;;  %v829_v27 = vmul.f32 %v7826_v26, %v7652_v44 }
 0x28b   :  { %v977_v46 = vmax.f32 %v913_v4, 0.0  ;;  %v830_v24 = vmul.f32 %v7826_v26, %v7661_v47  ;;  %v831_v31 = vmul.f32 %v7826_v26, %v7672_v49  ;;  %v832_v18 = vmul.f32 %v7826_v26, %v7681_v14 }
 0x28c   :  { %v833_v3 = vmul.f32 %v7826_v26, %v7690_v36  ;;  %v834_v10 = vmul.f32 %v7826_v26, %v7698_v23  ;;  %v835_v34 = vmul.f32 %v7826_v26, %v7706_v38  ;;  %v836_v44 = vmul.f32 %v7826_v26, %v7714_v45 }
 0x28d   :  { %1151 = vst.msk [vmem:[#allocation2 + $0x339] sm:$0xff] %vm430_vm2, %v977_v46  ;;  %v837_v47 = vmul.f32 %v7826_v26, %v7722_v19  ;;  %v838_v49 = vmul.f32 %v7826_v26, %v7747_v16  ;;  %v839_v14 = vmul.f32 %v7826_v26, %v7736_v7  ;;  %v840_v36 = vmul.f32 %v7826_v26, %v7743_v62 }
 0x28e   :  { %v841_v23 = vmul.f32 %v7826_v26, %v7753_v28  ;;  %v842_v38 = vmul.f32 %v7826_v26, %v7765_v40  ;;  %v843_v45 = vmul.f32 %v7826_v26, %v7775_v41  ;;  %v844_v19 = vmul.f32 %v7826_v26, %v7783_v21 }
 0x28f   :  { %v845_v16 = vmul.f32 %v7826_v26, %v7791_v54  ;;  %v850_v7 = vadd.f32 %v7830_v60, %v783_v61  ;;  %v851_v2 = vadd.f32 %v7830_v60, %v784_v33  ;;  %v852_v62 = vadd.f32 %v7830_v60, %v785_v32 }
 0x290   :  { %v853_v28 = vadd.f32 %v7830_v60, %v786_v39  ;;  %v854_v58 = vadd.f32 %v7830_v60, %v787_v12  ;;  %v855_v40 = vadd.f32 %v7830_v60, %v788_v56  ;;  %v856_v41 = vadd.f32 %v7830_v60, %v789_v8 }
 0x291   :  { %v7920_v42 = vadd.f32 %v7830_v60, %v820_v0  ;;  %v7923_v21 = vadd.f32 %v7830_v60, %v821_v35  ;;  %v7926_v54 = vadd.f32 %v7830_v60, %v822_v13  ;;  %v7929_v51 = vadd.f32 %v7830_v60, %v823_v25 }
 0x292   :  { %v7932_v20 = vadd.f32 %v7830_v60, %v824_v43  ;;  %v7935_v22 = vadd.f32 %v7830_v60, %v825_v5  ;;  %v7938_v55 = vadd.f32 %v7830_v60, %v826_v15  ;;  %v7941_v37 = vadd.f32 %v7830_v60, %v827_v48 }
 0x293   :  { %v7944_v11 = vadd.f32 %v7830_v60, %v828_v17  ;;  %v7947_v1 = vadd.f32 %v7830_v60, %v829_v27  ;;  %v7950_v52 = vadd.f32 %v7830_v60, %v830_v24  ;;  %v7953_v6 = vadd.f32 %v7830_v60, %v831_v31 }
 0x294   :  { %v7956_v4 = vadd.f32 %v7830_v60, %v832_v18  ;;  %v7959_v46 = vadd.f32 %v7830_v60, %v833_v3  ;;  %v7962_v61 = vadd.f32 %v7830_v60, %v834_v10  ;;  %v7965_v33 = vadd.f32 %v7830_v60, %v835_v34 }
 0x295   :  { %v7968_v32 = vadd.f32 %v7830_v60, %v836_v44  ;;  %v7971_v39 = vadd.f32 %v7830_v60, %v837_v47  ;;  %v7974_v12 = vadd.f32 %v7830_v60, %v838_v49  ;;  %v7977_v56 = vadd.f32 %v7830_v60, %v839_v14 }
 0x296   :  { %v7980_v8 = vadd.f32 %v7830_v60, %v840_v36  ;;  %v7983_v0 = vadd.f32 %v7830_v60, %v841_v23  ;;  %v7986_v35 = vadd.f32 %v7830_v60, %v842_v38  ;;  %v7989_v13 = vadd.f32 %v7830_v60, %v843_v45 }
 0x297   :  { %v7992_v25 = vadd.f32 %v7830_v60, %v844_v19  ;;  %v7995_v43 = vadd.f32 %v7830_v60, %v845_v16  ;;  %v914_v5 = vmax.f32 %v850_v7, 0.0  ;;  %v857_v15 = vadd.f32 %v7830_v60, %v7850_v57 }
 0x298   :  { %v915_v48 = vmax.f32 %v851_v2, 0.0  ;;  %v916_v17 = vmax.f32 %v852_v62, 0.0  ;;  %v917_v27 = vmax.f32 %v853_v28, 0.0  ;;  %v793_v24 = vmul.f32 %v7826_v26, %v7306_v29  ;;  %v11622_v28 = vld [vmem:[#allocation6_spill] sm:$0xff] }
 0x299   :  { %v858_v31 = vadd.f32 %v7830_v60, %v7854_v53  ;;  %v918_v18 = vmax.f32 %v854_v58, 0.0  ;;  %1088 = vst.msk [vmem:[#allocation2 + $0x19] sm:$0xff] %vm430_vm2, %v914_v5  ;;  %v794_v3 = vmul.f32 %v7826_v26, %v7315_v30  ;;  %v859_v10 = vadd.f32 %v7830_v60, %v7858_v59  ;;  %v11623_v5 = vld [vmem:[#allocation7_spill] sm:$0xff] }
 0x29a   :  { %v919_v34 = vmax.f32 %v855_v40, 0.0  ;;  %1089 = vst.msk [vmem:[#allocation2 + $0x21] sm:$0xff] %vm430_vm2, %v915_v48  ;;  %v795_v57 = vmul.f32 %v7826_v26, %v7324_v9  ;;  %v860_v29 = vadd.f32 %v7830_v60, %v793_v24  ;;  %v920_v44 = vmax.f32 %v856_v41, 0.0  ;;  %v11619_v9 = vld [vmem:[#allocation3_spill] sm:$0xff] }
 0x29b   :  { %1090 = vst.msk [vmem:[#allocation2 + $0x31] sm:$0xff] %vm430_vm2, %v916_v17  ;;  %v796_v53 = vmul.f32 %v7826_v26, %v7333_v50  ;;  %v861_v47 = vadd.f32 %v7830_v60, %v794_v3  ;;  %v921_v30 = vmax.f32 %v857_v15, 0.0  ;;  %v797_v59 = vmul.f32 %v7826_v26, %v7344_v63  ;;  %v11620_v50 = vld [vmem:[#allocation4_spill] sm:$0xff]  ;;  %v11621_v63 = vld [vmem:[#allocation5_spill] sm:$0xff] }
 0x29c   :  { %1091 = vst.msk [vmem:[#allocation2 + $0x39] sm:$0xff] %vm430_vm2, %v917_v27  ;;  %v862_v49 = vadd.f32 %v7830_v60, %v795_v57  ;;  %v922_v14 = vmax.f32 %v858_v31, 0.0  ;;  %v798_v36 = vmul.f32 %v7826_v26, %v11619_v9  ;;  %v923_v38 = vmax.f32 %v859_v10, 0.0  ;;  %v11624_v27 = vld [vmem:[#allocation8_spill] sm:$0xff]  ;;  %v11625_v3 = vld [vmem:[#allocation9_spill] sm:$0xff] }
 0x29d   :  { %1092 = vst.msk [vmem:[#allocation2 + $0x49] sm:$0xff] %vm430_vm2, %v918_v18  ;;  %v863_v23 = vadd.f32 %v7830_v60, %v796_v53  ;;  %v799_v45 = vmul.f32 %v7826_v26, %v11620_v50  ;;  %v864_v19 = vadd.f32 %v7830_v60, %v797_v59  ;;  %v924_v16 = vmax.f32 %v860_v29, 0.0  ;;  %v11626_v29 = vld [vmem:[#allocation10_spill] sm:$0xff]  ;;  %v1249_v9 = vld [vmem:[#allocation2 + $0x1] sm:$0xff] }
 0x29e   :  { %1093 = vst.msk [vmem:[#allocation2 + $0x51] sm:$0xff] %vm430_vm2, %v919_v34  ;;  %v800_v7 = vmul.f32 %v7826_v26, %v11621_v63  ;;  %v865_v2 = vadd.f32 %v7830_v60, %v798_v36  ;;  %v925_v62 = vmax.f32 %v861_v47, 0.0  ;;  %v801_v58 = vmul.f32 %v7826_v26, %v11622_v28  ;;  %v11628_v36 = vld [vmem:[#allocation12_spill] sm:$0xff] }
 0x29f   :  { %1094 = vst.msk [vmem:[#allocation2 + $0x61] sm:$0xff] %vm430_vm2, %v920_v44  ;;  %v866_v40 = vadd.f32 %v7830_v60, %v799_v45  ;;  %v926_v41 = vmax.f32 %v862_v49, 0.0  ;;  %v802_v15 = vmul.f32 %v7826_v26, %v11623_v5  ;;  %v927_v17 = vmax.f32 %v863_v23, 0.0  ;;  %v1250_v63 = vld [vmem:[#allocation2 + $0x9] sm:$0xff] }
 0x2a0   :  { %1095 = vst.msk [vmem:[#allocation2 + $0x69] sm:$0xff] %vm430_vm2, %v921_v30  ;;  %v867_v48 = vadd.f32 %v7830_v60, %v800_v7  ;;  %v803_v24 = vmul.f32 %v7826_v26, %v11624_v27  ;;  %v868_v31 = vadd.f32 %v7830_v60, %v801_v58  ;;  %v928_v18 = vmax.f32 %v864_v19, 0.0  ;;  %v11627_v30 = vld [vmem:[#allocation11_spill] sm:$0xff]  ;;  %v11630_v58 = vld [vmem:[#allocation14_spill] sm:$0xff] }
 0x2a1   :  { %1096 = vst.msk [vmem:[#allocation2 + $0x79] sm:$0xff] %vm430_vm2, %v922_v14  ;;  %v804_v10 = vmul.f32 %v7826_v26, %v11625_v3  ;;  %v869_v34 = vadd.f32 %v7830_v60, %v802_v15  ;;  %v929_v57 = vmax.f32 %v865_v2, 0.0  ;;  %v805_v44 = vmul.f32 %v7826_v26, %v11626_v29  ;;  %v11631_v15 = vld [vmem:[#allocation15_spill] sm:$0xff] }
 0x2a2   :  { %1097 = vst.msk [vmem:[#allocation2 + $0x81] sm:$0xff] %vm430_vm2, %v923_v38  ;;  %v870_v53 = vadd.f32 %v7830_v60, %v803_v24  ;;  %v930_v47 = vmax.f32 %v866_v40, 0.0  ;;  %v806_v59 = vmul.f32 %v7826_v26, %v11627_v30  ;;  %v931_v14 = vmax.f32 %v867_v48, 0.0  ;;  %v11629_v38 = vld [vmem:[#allocation13_spill] sm:$0xff]  ;;  %v11632_v24 = vld [vmem:[#allocation16_spill] sm:$0xff] }
 0x2a3   :  { %1098 = vst.msk [vmem:[#allocation2 + $0x91] sm:$0xff] %vm430_vm2, %v924_v16  ;;  %v871_v49 = vadd.f32 %v7830_v60, %v804_v10  ;;  %v807_v23 = vmul.f32 %v7826_v26, %v11628_v36  ;;  %v808_v50 = vmul.f32 %v7826_v26, %v11629_v38  ;;  %v872_v45 = vadd.f32 %v7830_v60, %v805_v44  ;;  %v6205_v16 = vld [vmem:[%s11502_s5 + $0x4] sm:$0xf]  ;;  %v11633_v10 = vld [vmem:[#allocation17_spill] sm:$0xff]  ;;  %v11634_v44 = vld [vmem:[#allocation18_spill] sm:$0xff] }
 0x2a4   :  { %1099 = vst.msk [vmem:[#allocation2 + $0x99] sm:$0xff] %vm430_vm2, %v925_v62  ;;  %v932_v19 = vmax.f32 %v868_v31, 0.0  ;;  %v873_v7 = vadd.f32 %v7830_v60, %v806_v59  ;;  %v933_v2 = vmax.f32 %v869_v34, 0.0  ;;  %v1445_v62 = vsel %vm1443_vm4, %v6205_v16, 0  ;;  %v11635_v59 = vld [vmem:[#allocation19_spill] sm:$0xff]  ;;  %v11636_v36 = vld [vmem:[#allocation20_spill] sm:$0xff] }
 0x2a5   :  { %1100 = vst.msk [vmem:[#allocation2 + $0xa9] sm:$0xff] %vm430_vm2, %v926_v41  ;;  %v1313_v28 = vpack.c.bf16 %v1250_v63, %v1249_v9  ;;  %v809_v40 = vmul.f32 %v7826_v26, %v11630_v58  ;;  %v874_v41 = vadd.f32 %v7830_v60, %v807_v23  ;;  %v934_v5 = vmax.f32 %v870_v53, 0.0  ;;  %1454 = vmatpush.bf16.msra.mxu1 %v1445_v62  ;;  %v11639_v58 = vld [vmem:[#allocation23_spill] sm:$0xff] }
 0x2a6   :  { %1101 = vst.msk [vmem:[#allocation2 + $0xb1] sm:$0xff] %vm430_vm2, %v927_v17  ;;  %6518 = vmatpush.bf16.msra.mxu3 %v1445_v62  ;;  %v810_v48 = vmul.f32 %v7826_v26, %v11631_v15  ;;  %v875_v17 = vadd.f32 %v7830_v60, %v808_v50  ;;  %v935_v27 = vmax.f32 %v871_v49, 0.0  ;;  %v811_v31 = vmul.f32 %v7826_v26, %v11632_v24  ;;  %v11640_v15 = vld [vmem:[#allocation24_spill] sm:$0xff] }
 0x2a7   :  { %1102 = vst.msk [vmem:[#allocation2 + $0xc1] sm:$0xff] %vm430_vm2, %v928_v18  ;;  %v876_v18 = vadd.f32 %v7830_v60, %v809_v40  ;;  %v936_v3 = vmax.f32 %v872_v45, 0.0  ;;  %v812_v34 = vmul.f32 %v7826_v26, %v11633_v10  ;;  %v937_v29 = vmax.f32 %v873_v7, 0.0  ;;  %v11637_v45 = vld [vmem:[#allocation21_spill] sm:$0xff]  ;;  %v11638_v7 = vld [vmem:[#allocation22_spill] sm:$0xff] }
 0x2a8   :  { %1103 = vst.msk [vmem:[#allocation2 + $0xc9] sm:$0xff] %vm430_vm2, %v929_v57  ;;  %v877_v57 = vadd.f32 %v7830_v60, %v810_v48  ;;  %6206 = vmatmul.msk.bf16.vlgmr.msra.gmra.mxu1 %vm430_vm2, %v1313_v28  ;;  %v813_v53 = vmul.f32 %v7826_v26, %v11634_v44  ;;  %v938_v30 = vmax.f32 %v874_v41, 0.0  ;;  %v814_v49 = vmul.f32 %v7826_v26, %v11635_v59  ;;  %v1154_v59 = vld [vmem:[#allocation2 + $0x18] sm:$0xff] }
 0x2a9   :  { %1104 = vst.msk [vmem:[#allocation2 + $0xd9] sm:$0xff] %vm430_vm2, %v930_v47  ;;  %v878_v47 = vadd.f32 %v7830_v60, %v811_v31  ;;  %v939_v9 = vmax.f32 %v875_v17, 0.0  ;;  %v815_v23 = vmul.f32 %v7826_v26, %v11636_v36  ;;  %v940_v50 = vmax.f32 %v876_v18, 0.0 }
 0x2aa   :  { %1105 = vst.msk [vmem:[#allocation2 + $0xe1] sm:$0xff] %vm430_vm2, %v931_v14  ;;  %v879_v14 = vadd.f32 %v7830_v60, %v812_v34  ;;  %v880_v38 = vadd.f32 %v7830_v60, %v813_v53  ;;  %v881_v16 = vadd.f32 %v7830_v60, %v814_v49  ;;  %v941_v63 = vmax.f32 %v877_v57, 0.0  ;;  %v1251_v57 = vld [vmem:[#allocation2 + $0x19] sm:$0xff] }
 0x2ab   :  { %1106 = vst.msk [vmem:[#allocation2 + $0xf1] sm:$0xff] %vm430_vm2, %v932_v19  ;;  %v816_v19 = vmul.f32 %v7826_v26, %v11637_v45  ;;  %v882_v62 = vadd.f32 %v7830_v60, %v815_v23  ;;  %v942_v28 = vmax.f32 %v878_v47, 0.0  ;;  %v818_v40 = vmul.f32 %v7826_v26, %v11639_v58  ;;  %v1155_v49 = vld [vmem:[#allocation2 + $0x20] sm:$0xff] }
 0x2ac   :  { %1107 = vst.msk [vmem:[#allocation2 + $0xf9] sm:$0xff] %vm430_vm2, %v933_v2  ;;  %v817_v2 = vmul.f32 %v7826_v26, %v11638_v7  ;;  %v819_v48 = vmul.f32 %v7826_v26, %v11640_v15  ;;  %v945_v31 = vmax.f32 %v881_v16, 0.0  ;;  %v6303_v26 = vld [vmem:[%s11502_s5 + $0xc] sm:$0xf]  ;;  %v953_v36 = vmax.f32 %v7926_v54, 0.0 }
 0x2ad   :  { %1108 = vst.msk [vmem:[#allocation2 + $0x109] sm:$0xff] %vm430_vm2, %v934_v5  ;;  %v883_v41 = vadd.f32 %v7830_v60, %v816_v19  ;;  %v943_v5 = vmax.f32 %v879_v14, 0.0  ;;  %v885_v24 = vadd.f32 %v7830_v60, %v818_v40  ;;  %v952_v14 = vmax.f32 %v7923_v21, 0.0  ;;  %v1157_v19 = vld [vmem:[#allocation2 + $0x38] sm:$0xff]  ;;  %v1258_v15 = vld [vmem:[#allocation2 + $0x69] sm:$0xff] }
 0x2ae   :  { %1109 = vst.msk [vmem:[#allocation2 + $0x111] sm:$0xff] %vm430_vm2, %v935_v27  ;;  %v884_v17 = vadd.f32 %v7830_v60, %v817_v2  ;;  %v944_v27 = vmax.f32 %v880_v38, 0.0  ;;  %v886_v18 = vadd.f32 %v7830_v60, %v819_v48  ;;  %v2509_v60 = vsel %vm1443_vm4, %v6303_v26, 0  ;;  %v1256_v2 = vld [vmem:[#allocation2 + $0x51] sm:$0xff]  ;;  %v1259_v26 = vld [vmem:[#allocation2 + $0x79] sm:$0xff] }
 0x2af   :  { %1110 = vst.msk [vmem:[#allocation2 + $0x121] sm:$0xff] %vm430_vm2, %v936_v3  ;;  %v946_v3 = vmax.f32 %v882_v62, 0.0  ;;  %v947_v10 = vmax.f32 %v883_v41, 0.0  ;;  %v949_v44 = vmax.f32 %v885_v24, 0.0  ;;  %2518 = vmatpush.bf16.msrb.mxu0 %v2509_v60  ;;  %v954_v23 = vmax.f32 %v7929_v51, 0.0  ;;  %v1163_v60 = vld [vmem:[#allocation2 + $0x80] sm:$0xff] }
 0x2b0   :  { %1111 = vst.msk [vmem:[#allocation2 + $0x129] sm:$0xff] %vm430_vm2, %v937_v29  ;;  %v948_v34 = vmax.f32 %v884_v17, 0.0  ;;  %v1252_v29 = vld [vmem:[#allocation2 + $0x21] sm:$0xff]  ;;  %v950_v47 = vmax.f32 %v886_v18, 0.0  ;;  %v956_v21 = vmax.f32 %v7935_v22, 0.0  ;;  %v957_v54 = vmax.f32 %v7938_v55, 0.0 }
 0x2b1   :  { %1112 = vst.msk [vmem:[#allocation2 + $0x139] sm:$0xff] %vm430_vm2, %v938_v30  ;;  %v1314_v53 = vpack.c.bf16 %v1252_v29, %v1251_v57  ;;  %v951_v30 = vmax.f32 %v7920_v42, 0.0  ;;  %v955_v42 = vmax.f32 %v7932_v20, 0.0  ;;  %v958_v51 = vmax.f32 %v7941_v37, 0.0  ;;  %v1160_v17 = vld [vmem:[#allocation2 + $0x60] sm:$0xff] }
 0x2b2   :  { %1113 = vst.msk [vmem:[#allocation2 + $0x141] sm:$0xff] %vm430_vm2, %v939_v9  ;;  %v1217_v9 = vpack.c.bf16 %v1155_v49, %v1154_v59  ;;  %v959_v38 = vmax.f32 %v7944_v11, 0.0  ;;  %v960_v20 = vmax.f32 %v7947_v1, 0.0  ;;  %v961_v22 = vmax.f32 %v7950_v52, 0.0  ;;  %v1254_v1 = vld [vmem:[#allocation2 + $0x39] sm:$0xff]  ;;  %v1156_v52 = vld [vmem:[#allocation2 + $0x30] sm:$0xff] }
 0x2b3   :  { %1114 = vst.msk [vmem:[#allocation2 + $0x151] sm:$0xff] %vm430_vm2, %v940_v50  ;;  %v962_v55 = vmax.f32 %v7953_v6, 0.0  ;;  %v963_v37 = vmax.f32 %v7956_v4, 0.0  ;;  %v964_v11 = vmax.f32 %v7959_v46, 0.0  ;;  %v1253_v50 = vld [vmem:[#allocation2 + $0x31] sm:$0xff]  ;;  %v965_v45 = vmax.f32 %v7962_v61, 0.0 }
 0x2b4   :  { %1115 = vst.msk [vmem:[#allocation2 + $0x159] sm:$0xff] %vm430_vm2, %v941_v63  ;;  %6239 = vmatmul.msk.bf16.gmra.mxu2 %vm430_vm2, %v1217_v9  ;;  %6304 = vmatmul.msk.bf16.vlgmr.msrb.gmra.mxu0 %vm430_vm2, %v1217_v9  ;;  %v966_v6 = vmax.f32 %v7965_v33, 0.0  ;;  %v967_v4 = vmax.f32 %v7968_v32, 0.0  ;;  %v1315_v16 = vpack.c.bf16 %v1254_v1, %v1253_v50  ;;  %v968_v46 = vmax.f32 %v7971_v39, 0.0  ;;  %v1260_v57 = vld [vmem:[#allocation2 + $0x81] sm:$0xff]  ;;  %v1261_v49 = vld [vmem:[#allocation2 + $0x91] sm:$0xff] }
 0x2b5   :  { %1116 = vst.msk [vmem:[#allocation2 + $0x169] sm:$0xff] %vm430_vm2, %v942_v28  ;;  %v1218_v63 = vpack.c.bf16 %v1157_v19, %v1156_v52  ;;  %v969_v61 = vmax.f32 %v7974_v12, 0.0  ;;  %v970_v33 = vmax.f32 %v7977_v56, 0.0  ;;  %v971_v32 = vmax.f32 %v7980_v8, 0.0  ;;  %v1159_v28 = vld [vmem:[#allocation2 + $0x50] sm:$0xff]  ;;  %v1886_v1 = vld [vmem:[#allocation2 + $0x1a] sm:$0xff] }
 0x2b6   :  { %1117 = vst.msk [vmem:[#allocation2 + $0x171] sm:$0xff] %vm430_vm2, %v943_v5  ;;  %v972_v39 = vmax.f32 %v7983_v0, 0.0  ;;  %v973_v12 = vmax.f32 %v7986_v35, 0.0  ;;  %v974_v56 = vmax.f32 %v7989_v13, 0.0  ;;  %v975_v7 = vmax.f32 %v7992_v25, 0.0  ;;  %v1255_v13 = vld [vmem:[#allocation2 + $0x49] sm:$0xff] }
 0x2b7   :  { %1118 = vst.msk [vmem:[#allocation2 + $0x181] sm:$0xff] %vm430_vm2, %v944_v27  ;;  %v976_v8 = vmax.f32 %v7995_v43, 0.0  ;;  %v1158_v25 = vld [vmem:[#allocation2 + $0x48] sm:$0xff]  ;;  %v1316_v43 = vpack.c.bf16 %v1256_v2, %v1255_v13  ;;  %v1170_v2 = vld [vmem:[#allocation2 + $0xd8] sm:$0xff] }
 0x2b8   :  { %1119 = vst.msk [vmem:[#allocation2 + $0x189] sm:$0xff] %vm430_vm2, %v945_v31  ;;  %6207 = vmatmul.msk.bf16.gmra.mxu1 %vm430_vm2, %v1314_v53  ;;  %v1219_v58 = vpack.c.bf16 %v1159_v28, %v1158_v25  ;;  %v1257_v5 = vld [vmem:[#allocation2 + $0x61] sm:$0xff]  ;;  %v1318_v53 = vpack.c.bf16 %v1260_v57, %v1259_v26 }
 0x2b9   :  { %1120 = vst.msk [vmem:[#allocation2 + $0x1c9] sm:$0xff] %vm430_vm2, %v946_v3  ;;  %v1161_v27 = vld [vmem:[#allocation2 + $0x68] sm:$0xff]  ;;  %v1317_v24 = vpack.c.bf16 %v1258_v15, %v1257_v5 }
 0x2ba   :  { %1121 = vst.msk [vmem:[#allocation2 + $0x1d1] sm:$0xff] %vm430_vm2, %v947_v10  ;;  %v6270_v31 = vld [vmem:[%s11502_s5 + $0x8] sm:$0xf]  ;;  %v1220_v18 = vpack.c.bf16 %v1161_v27, %v1160_v17  ;;  %v1891_v17 = vld [vmem:[#allocation2 + $0x52] sm:$0xff] }
 0x2bb   :  { %1122 = vst.msk [vmem:[#allocation2 + $0x1e1] sm:$0xff] %vm430_vm2, %v948_v34  ;;  %v2079_v3 = vsel %vm1443_vm4, %v6270_v31, 0  ;;  %v1265_v19 = vld [vmem:[#allocation2 + $0xc1] sm:$0xff]  ;;  %v1269_v27 = vld [vmem:[#allocation2 + $0xf1] sm:$0xff] }
 0x2bc   :  { %1123 = vst.msk [vmem:[#allocation2 + $0x1e9] sm:$0xff] %vm430_vm2, %v949_v44  ;;  %2088 = vmatpush.bf16.msrb.mxu3 %v2079_v3  ;;  %v1162_v44 = vld [vmem:[#allocation2 + $0x78] sm:$0xff]  ;;  %v1172_v3 = vld [vmem:[#allocation2 + $0xf0] sm:$0xff] }
 0x2bd   :  { %1124 = vst.msk [vmem:[#allocation2 + $0x1f9] sm:$0xff] %vm430_vm2, %v950_v47  ;;  %v1221_v47 = vpack.c.bf16 %v1163_v60, %v1162_v44 }
 0x2be   :  { %1125 = vst.msk [vmem:[#allocation2 + $0x201] sm:$0xff] %vm430_vm2, %v951_v30 }
 0x2bf   :  { %1126 = vst.msk [vmem:[#allocation2 + $0x211] sm:$0xff] %vm430_vm2, %v952_v14  ;;  %v1262_v14 = vld [vmem:[#allocation2 + $0x99] sm:$0xff] }
 0x2c0   :  { %1127 = vst.msk [vmem:[#allocation2 + $0x219] sm:$0xff] %vm430_vm2, %v953_v36  ;;  %v1164_v36 = vld [vmem:[#allocation2 + $0x90] sm:$0xff] }
 0x2c1   :  { %1128 = vst.msk [vmem:[#allocation2 + $0x229] sm:$0xff] %vm430_vm2, %v954_v23  ;;  %v1165_v23 = vld [vmem:[#allocation2 + $0x98] sm:$0xff] }
 0x2c2   :  { %1129 = vst.msk [vmem:[#allocation2 + $0x231] sm:$0xff] %vm430_vm2, %v955_v42  ;;  %v1319_v42 = vpack.c.bf16 %v1262_v14, %v1261_v49  ;;  %v1893_v49 = vld [vmem:[#allocation2 + $0x6a] sm:$0xff] }
 0x2c3   :  { %1130 = vst.msk [vmem:[#allocation2 + $0x241] sm:$0xff] %vm430_vm2, %v956_v21  ;;  %v1222_v21 = vpack.c.bf16 %v1165_v23, %v1164_v36  ;;  %v1271_v14 = vld [vmem:[#allocation2 + $0x109] sm:$0xff] }
 0x2c4   :  { %1131 = vst.msk [vmem:[#allocation2 + $0x249] sm:$0xff] %vm430_vm2, %v957_v54  ;;  %6240 = vmatmul.msk.bf16.gmra.mxu2 %vm430_vm2, %v1218_v63  ;;  %6305 = vmatmul.msk.bf16.gmra.mxu0 %vm430_vm2, %v1218_v63  ;;  %v1884_v54 = vld [vmem:[#allocation2 + $0x2] sm:$0xff] }
 0x2c5   :  { %1132 = vst.msk [vmem:[#allocation2 + $0x259] sm:$0xff] %vm430_vm2, %v958_v51  ;;  %v1885_v51 = vld [vmem:[#allocation2 + $0xa] sm:$0xff] }
 0x2c6   :  { %1133 = vst.msk [vmem:[#allocation2 + $0x261] sm:$0xff] %vm430_vm2, %v959_v38  ;;  %v1948_v38 = vpack.c.bf16 %v1885_v51, %v1884_v54 }
 0x2c7   :  { %1134 = vst.msk [vmem:[#allocation2 + $0x271] sm:$0xff] %vm430_vm2, %v960_v20  ;;  %v1263_v20 = vld [vmem:[#allocation2 + $0xa9] sm:$0xff] }
 0x2c8   :  { %1135 = vst.msk [vmem:[#allocation2 + $0x279] sm:$0xff] %vm430_vm2, %v961_v22  ;;  %6208 = vmatmul.msk.bf16.gmra.mxu1 %vm430_vm2, %v1315_v16  ;;  %v1264_v22 = vld [vmem:[#allocation2 + $0xb1] sm:$0xff]  ;;  %v1168_v16 = vld [vmem:[#allocation2 + $0xc0] sm:$0xff] }
 0x2c9   :  { %1136 = vst.msk [vmem:[#allocation2 + $0x289] sm:$0xff] %vm430_vm2, %v962_v55  ;;  %v1166_v55 = vld [vmem:[#allocation2 + $0xa8] sm:$0xff] }
 0x2ca   :  { %1137 = vst.msk [vmem:[#allocation2 + $0x291] sm:$0xff] %vm430_vm2, %v963_v37  ;;  %v1167_v37 = vld [vmem:[#allocation2 + $0xb0] sm:$0xff] }
 0x2cb   :  { %1138 = vst.msk [vmem:[#allocation2 + $0x2a1] sm:$0xff] %vm430_vm2, %v964_v11  ;;  %v1320_v11 = vpack.c.bf16 %v1264_v22, %v1263_v20  ;;  %v1223_v50 = vpack.c.bf16 %v1167_v37, %v1166_v55 }
 0x2cc   :  { %1139 = vst.msk [vmem:[#allocation2 + $0x2a9] sm:$0xff] %vm430_vm2, %v965_v45  ;;  %v1887_v45 = vld [vmem:[#allocation2 + $0x22] sm:$0xff] }
 0x2cd   :  { %1140 = vst.msk [vmem:[#allocation2 + $0x2b9] sm:$0xff] %vm430_vm2, %v966_v6  ;;  %v1266_v6 = vld [vmem:[#allocation2 + $0xc9] sm:$0xff] }
 0x2ce   :  { %1141 = vst.msk [vmem:[#allocation2 + $0x2c1] sm:$0xff] %vm430_vm2, %v967_v4  ;;  %v1949_v4 = vpack.c.bf16 %v1887_v45, %v1886_v1 }
 0x2cf   :  { %1142 = vst.msk [vmem:[#allocation2 + $0x2d1] sm:$0xff] %vm430_vm2, %v968_v46  ;;  %v1169_v46 = vld [vmem:[#allocation2 + $0xc8] sm:$0xff] }
 0x2d0   :  { %1143 = vst.msk [vmem:[#allocation2 + $0x2d9] sm:$0xff] %vm430_vm2, %v969_v61 }
 0x2d1   :  { %1144 = vst.msk [vmem:[#allocation2 + $0x2e9] sm:$0xff] %vm430_vm2, %v970_v33  ;;  %v1321_v33 = vpack.c.bf16 %v1266_v6, %v1265_v19  ;;  %v1895_v19 = vld [vmem:[#allocation2 + $0x82] sm:$0xff] }
 0x2d2   :  { %1145 = vst.msk [vmem:[#allocation2 + $0x2f1] sm:$0xff] %vm430_vm2, %v971_v32  ;;  %v1224_v32 = vpack.c.bf16 %v1169_v46, %v1168_v16  ;;  %v1273_v6 = vld [vmem:[#allocation2 + $0x121] sm:$0xff] }
 0x2d3   :  { %1146 = vst.msk [vmem:[#allocation2 + $0x301] sm:$0xff] %vm430_vm2, %v972_v39 }
 0x2d4   :  { %1147 = vst.msk [vmem:[#allocation2 + $0x309] sm:$0xff] %vm430_vm2, %v973_v12  ;;  %6241 = vmatmul.msk.bf16.gmra.mxu2 %vm430_vm2, %v1219_v58  ;;  %6306 = vmatmul.msk.bf16.gmra.mxu0 %vm430_vm2, %v1219_v58 }
 0x2d5   :  { %1148 = vst.msk [vmem:[#allocation2 + $0x319] sm:$0xff] %vm430_vm2, %v974_v56 }
 0x2d6   :  { %1149 = vst.msk [vmem:[#allocation2 + $0x321] sm:$0xff] %vm430_vm2, %v975_v7  ;;  %v1305_v0 = vld [vmem:[#allocation2 + $0x2d1] sm:$0xff] }
 0x2d7   :  { %1150 = vst.msk [vmem:[#allocation2 + $0x331] sm:$0xff] %vm430_vm2, %v976_v8  ;;  %v1306_v35 = vld [vmem:[#allocation2 + $0x2d9] sm:$0xff] }
 0x2d8   :  { %v1341_v62 = vpack.c.bf16 %v1306_v35, %v1305_v0  ;;  %6209 = vmatmul.msk.bf16.gmra.mxu1 %vm430_vm2, %v1316_v43  ;;  %v1307_v40 = vld [vmem:[#allocation2 + $0x2e9] sm:$0xff]  ;;  %v1888_v7 = vld [vmem:[#allocation2 + $0x32] sm:$0xff]  ;;  %v1889_v8 = vld [vmem:[#allocation2 + $0x3a] sm:$0xff] }
 0x2d9   :  { %v1308_v41 = vld [vmem:[#allocation2 + $0x2f1] sm:$0xff]  ;;  %v1267_v0 = vld [vmem:[#allocation2 + $0xd9] sm:$0xff]  ;;  %v1268_v35 = vld [vmem:[#allocation2 + $0xe1] sm:$0xff]  ;;  %v1950_v13 = vpack.c.bf16 %v1889_v8, %v1888_v7 }
 0x2da   :  { %6234 = vmatmul.msk.bf16.vlgmr.msra.gmra.mxu3 %vm430_vm2, %v1341_v62  ;;  %v1342_v48 = vpack.c.bf16 %v1308_v41, %v1307_v40  ;;  %v1309_v10 = vld [vmem:[#allocation2 + $0x301] sm:$0xff]  ;;  %v1322_v43 = vpack.c.bf16 %v1268_v35, %v1267_v0 }
 0x2db   :  { %v1310_v34 = vld [vmem:[#allocation2 + $0x309] sm:$0xff]  ;;  %v1171_v62 = vld [vmem:[#allocation2 + $0xe0] sm:$0xff] }
 0x2dc   :  { %v1343_v29 = vpack.c.bf16 %v1310_v34, %v1309_v10  ;;  %v1311_v30 = vld [vmem:[#allocation2 + $0x319] sm:$0xff]  ;;  %v1225_v58 = vpack.c.bf16 %v1171_v62, %v1170_v2 }
 0x2dd   :  { %v1312_v59 = vld [vmem:[#allocation2 + $0x321] sm:$0xff]  ;;  %v1173_v10 = vld [vmem:[#allocation2 + $0xf8] sm:$0xff] }
 0x2de   :  { %v1344_v9 = vpack.c.bf16 %v1312_v59, %v1311_v30  ;;  %v1226_v44 = vpack.c.bf16 %v1173_v10, %v1172_v3  ;;  %v1892_v59 = vld [vmem:[#allocation2 + $0x62] sm:$0xff] }
 0x2df   :  { %v1952_v36 = vpack.c.bf16 %v1893_v49, %v1892_v59 }
 0x2e4   :  { %6242 = vmatmul.msk.bf16.gmra.mxu2 %vm430_vm2, %v1220_v18  ;;  %6307 = vmatmul.msk.bf16.gmra.mxu0 %vm430_vm2, %v1220_v18 }
 0x2e8   :  { %6210 = vmatmul.msk.bf16.gmra.mxu1 %vm430_vm2, %v1317_v24  ;;  %v1724_v52 = vpop.f32.mrf.mxu2  ;;  %v1270_v24 = vld [vmem:[#allocation2 + $0xf9] sm:$0xff] }
 0x2ea   :  { %6235 = vmatmul.msk.bf16.gmra.mxu3 %vm430_vm2, %v1342_v48  ;;  %v1890_v48 = vld [vmem:[#allocation2 + $0x4a] sm:$0xff] }
 0x2eb   :  { %v1951_v31 = vpack.c.bf16 %v1891_v17, %v1890_v48 }
 0x2f0   :  { %v1726_v39 = vpop.f32.mrf.mxu2 }
 0x2f4   :  { %6243 = vmatmul.msk.bf16.gmra.mxu2 %vm430_vm2, %v1221_v47  ;;  %6308 = vmatmul.msk.bf16.gmra.mxu0 %vm430_vm2, %v1221_v47 }
 0x2f8   :  { %6211 = vmatmul.msk.bf16.gmra.mxu1 %vm430_vm2, %v1318_v53 }
 0x2fa   :  { %6236 = vmatmul.msk.bf16.gmra.mxu3 %vm430_vm2, %v1343_v29  ;;  %v1323_v29 = vpack.c.bf16 %v1270_v24, %v1269_v27  ;;  %v1178_v27 = vld [vmem:[#allocation2 + $0x138] sm:$0xff]  ;;  %v1179_v24 = vld [vmem:[#allocation2 + $0x140] sm:$0xff] }
 0x304   :  { %6244 = vmatmul.msk.bf16.gmra.mxu2 %vm430_vm2, %v1222_v21  ;;  %6309 = vmatmul.msk.bf16.gmra.mxu0 %vm430_vm2, %v1222_v21  ;;  %v1175_v21 = vld [vmem:[#allocation2 + $0x110] sm:$0xff] }
 0x308   :  { %6212 = vmatmul.msk.bf16.gmra.mxu1 %vm430_vm2, %v1319_v42  ;;  %v1174_v42 = vld [vmem:[#allocation2 + $0x108] sm:$0xff] }
 0x309   :  { %v1227_v22 = vpack.c.bf16 %v1175_v21, %v1174_v42 }
 0x30a   :  { %6237 = vmatmul.msk.bf16.gmra.mxu3 %vm430_vm2, %v1344_v9  ;;  %v1272_v9 = vld [vmem:[#allocation2 + $0x111] sm:$0xff] }
 0x30b   :  { %v1324_v20 = vpack.c.bf16 %v1272_v9, %v1271_v14  ;;  %v1898_v14 = vld [vmem:[#allocation2 + $0xaa] sm:$0xff]  ;;  %v1899_v9 = vld [vmem:[#allocation2 + $0xb2] sm:$0xff] }
 0x30c   :  { %v1955_v42 = vpack.c.bf16 %v1899_v9, %v1898_v14 }
 0x314   :  { %6245 = vmatmul.msk.bf16.gmra.mxu2 %vm430_vm2, %v1223_v50  ;;  %6310 = vmatmul.msk.bf16.gmra.mxu0 %vm430_vm2, %v1223_v50 }
 0x318   :  { %6213 = vmatmul.msk.bf16.gmra.mxu1 %vm430_vm2, %v1320_v11 }
 0x31a   :  { %6271 = vmatmul.msk.bf16.vlgmr.msrb.gmra.mxu3 %vm430_vm2, %v1948_v38 }
 0x324   :  { %6246 = vmatmul.msk.bf16.gmra.mxu2 %vm430_vm2, %v1224_v32  ;;  %6311 = vmatmul.msk.bf16.gmra.mxu0 %vm430_vm2, %v1224_v32 }
 0x325   :  { %v1456_v63 = vpop.f32.mrf.mxu1 }
 0x326   :  { %v8213_v61 = vadd.f32 %v1724_v52, %v1456_v63  ;;  %v1894_v52 = vld [vmem:[#allocation2 + $0x7a] sm:$0xff] }
 0x327   :  { %v1953_v16 = vpack.c.bf16 %v1895_v19, %v1894_v52  ;;  %v1176_v63 = vld [vmem:[#allocation2 + $0x120] sm:$0xff] }
 0x328   :  { %6214 = vmatmul.msk.bf16.gmra.mxu1 %vm430_vm2, %v1321_v33  ;;  %v1177_v33 = vld [vmem:[#allocation2 + $0x128] sm:$0xff] }
 0x329   :  { %v1228_v8 = vpack.c.bf16 %v1177_v33, %v1176_v63 }
 0x32a   :  { %6272 = vmatmul.msk.bf16.gmra.mxu3 %vm430_vm2, %v1949_v4  ;;  %v1274_v4 = vld [vmem:[#allocation2 + $0x129] sm:$0xff] }
 0x32b   :  { %v1325_v7 = vpack.c.bf16 %v1274_v4, %v1273_v6 }
 0x32d   :  { %v1458_v12 = vpop.f32.mrf.mxu1 }
 0x32e   :  { %v8218_v56 = vadd.f32 %v1726_v39, %v1458_v12 }
 0x331   :  { %v8221_v28 = vpop.f32.mrf.mxu0 }
 0x334   :  { %6247 = vmatmul.msk.bf16.gmra.mxu2 %vm430_vm2, %v1225_v58  ;;  %6312 = vmatmul.msk.bf16.gmra.mxu0 %vm430_vm2, %v1225_v58  ;;  %v1897_v58 = vld [vmem:[#allocation2 + $0x9a] sm:$0xff] }
 0x335   :  { %v1461_v25 = vpop.f32.mrf.mxu1 }
 0x337   :  { %v1729_v40 = vpop.f32.mrf.mxu2 }
 0x338   :  { %6215 = vmatmul.msk.bf16.gmra.mxu1 %vm430_vm2, %v1322_v43  ;;  %v8226_v41 = vadd.f32 %v1729_v40, %v1461_v25  ;;  %v1896_v43 = vld [vmem:[#allocation2 + $0x92] sm:$0xff] }
 0x339   :  { %v8228_v15 = vpop.f32.mrf.mxu0  ;;  %v1275_v40 = vld [vmem:[#allocation2 + $0x139] sm:$0xff]  ;;  %v1954_v48 = vpack.c.bf16 %v1897_v58, %v1896_v43  ;;  %v1182_v58 = vld [vmem:[#allocation2 + $0x168] sm:$0xff] }
 0x33a   :  { %6273 = vmatmul.msk.bf16.gmra.mxu3 %vm430_vm2, %v1950_v13 }
 0x33d   :  { %v1463_v5 = vpop.f32.mrf.mxu1 }
 0x33f   :  { %v1731_v18 = vpop.f32.mrf.mxu2 }
 0x340   :  { %v8230_v34 = vadd.f32 %v1731_v18, %v1463_v5  ;;  %v1276_v5 = vld [vmem:[#allocation2 + $0x141] sm:$0xff] }
 0x341   :  { %v8233_v57 = vpop.f32.mrf.mxu0  ;;  %v1326_v10 = vpack.c.bf16 %v1276_v5, %v1275_v40  ;;  %v1183_v40 = vld [vmem:[#allocation2 + $0x170] sm:$0xff] }
 0x344   :  { %6248 = vmatmul.msk.bf16.gmra.mxu2 %vm430_vm2, %v1226_v44  ;;  %6313 = vmatmul.msk.bf16.gmra.mxu0 %vm430_vm2, %v1226_v44 }
 0x345   :  { %v1466_v26 = vpop.f32.mrf.mxu1 }
 0x347   :  { %v1734_v60 = vpop.f32.mrf.mxu2 }
 0x348   :  { %6216 = vmatmul.msk.bf16.gmra.mxu1 %vm430_vm2, %v1323_v29  ;;  %v8238_v53 = vadd.f32 %v1734_v60, %v1466_v26  ;;  %v1229_v26 = vpack.c.bf16 %v1179_v24, %v1178_v27  ;;  %v1231_v24 = vpack.c.bf16 %v1183_v40, %v1182_v58 }
 0x349   :  { %v8240_v30 = vpop.f32.mrf.mxu0 }
 0x34a   :  { %6274 = vmatmul.msk.bf16.gmra.mxu3 %vm430_vm2, %v1951_v31 }
 0x34d   :  { %v1468_v47 = vpop.f32.mrf.mxu1 }
 0x34f   :  { %v1736_v23 = vpop.f32.mrf.mxu2 }
 0x350   :  { %v8242_v54 = vadd.f32 %v1736_v23, %v1468_v47  ;;  %v1278_v23 = vld [vmem:[#allocation2 + $0x159] sm:$0xff] }
 0x351   :  { %v8245_v38 = vpop.f32.mrf.mxu0 }
 0x354   :  { %6249 = vmatmul.msk.bf16.gmra.mxu2 %vm430_vm2, %v1227_v22  ;;  %6314 = vmatmul.msk.bf16.gmra.mxu0 %vm430_vm2, %v1227_v22 }
 0x355   :  { %v1471_v51 = vpop.f32.mrf.mxu1 }
 0x357   :  { %v1739_v37 = vpop.f32.mrf.mxu2 }
 0x358   :  { %6217 = vmatmul.msk.bf16.gmra.mxu1 %vm430_vm2, %v1324_v20  ;;  %v8252_v11 = vadd.f32 %v1739_v37, %v1471_v51  ;;  %v1180_v51 = vld [vmem:[#allocation2 + $0x150] sm:$0xff]  ;;  %v1181_v20 = vld [vmem:[#allocation2 + $0x158] sm:$0xff] }
 0x359   :  { %v8254_v1 = vpop.f32.mrf.mxu0  ;;  %v1230_v19 = vpack.c.bf16 %v1181_v20, %v1180_v51  ;;  %v1282_v51 = vld [vmem:[#allocation2 + $0x1b9] sm:$0xff]  ;;  %v1184_v20 = vld [vmem:[#allocation2 + $0x1b0] sm:$0xff] }
 0x35a   :  { %6275 = vmatmul.msk.bf16.gmra.mxu3 %vm430_vm2, %v1952_v36  ;;  %v1277_v36 = vld [vmem:[#allocation2 + $0x151] sm:$0xff] }
 0x35b   :  { %v1327_v52 = vpack.c.bf16 %v1278_v23, %v1277_v36  ;;  %v1902_v36 = vld [vmem:[#allocation2 + $0xda] sm:$0xff]  ;;  %v1903_v23 = vld [vmem:[#allocation2 + $0xe2] sm:$0xff] }
 0x35d   :  { %v8248_v55 = vpop.f32.mrf.mxu3  ;;  %v1473_v50 = vpop.f32.mrf.mxu1 }
 0x35e   :  { %11641 = vst [vmem:[#allocation3_spill] sm:$0xff] %v8248_v55 }
 0x35f   :  { %v1741_v46 = vpop.f32.mrf.mxu2 }
 0x360   :  { %v8258_v32 = vadd.f32 %v1741_v46, %v1473_v50 }
 0x361   :  { %v8261_v12 = vpop.f32.mrf.mxu0 }
 0x364   :  { %6250 = vmatmul.msk.bf16.gmra.mxu2 %vm430_vm2, %v1228_v8  ;;  %6315 = vmatmul.msk.bf16.gmra.mxu0 %vm430_vm2, %v1228_v8  ;;  %v1279_v8 = vld [vmem:[#allocation2 + $0x169] sm:$0xff] }
 0x365   :  { %v8256_v45 = vpop.f32.mrf.mxu3  ;;  %v1476_v39 = vpop.f32.mrf.mxu1 }
 0x366   :  { %11642 = vst [vmem:[#allocation4_spill] sm:$0xff] %v8256_v45  ;;  %v1201_v45 = vld [vmem:[#allocation2 + $0x278] sm:$0xff] }
 0x367   :  { %v1744_v35 = vpop.f32.mrf.mxu2 }
 0x368   :  { %6218 = vmatmul.msk.bf16.gmra.mxu1 %vm430_vm2, %v1325_v7  ;;  %v8268_v13 = vadd.f32 %v1744_v35, %v1476_v39  ;;  %v1900_v39 = vld [vmem:[#allocation2 + $0xc2] sm:$0xff]  ;;  %v1901_v7 = vld [vmem:[#allocation2 + $0xca] sm:$0xff] }
 0x369   :  { %v8270_v62 = vpop.f32.mrf.mxu0  ;;  %v1280_v35 = vld [vmem:[#allocation2 + $0x171] sm:$0xff] }
 0x36a   :  { %6276 = vmatmul.msk.bf16.gmra.mxu3 %vm430_vm2, %v1953_v16  ;;  %v1328_v27 = vpack.c.bf16 %v1280_v35, %v1279_v8 }
 0x36d   :  { %v8264_v0 = vpop.f32.mrf.mxu3  ;;  %v1478_v2 = vpop.f32.mrf.mxu1 }
 0x36e   :  { %11643 = vst [vmem:[#allocation5_spill] sm:$0xff] %v8264_v0  ;;  %v1198_v0 = vld [vmem:[#allocation2 + $0x258] sm:$0xff] }
 0x36f   :  { %v1746_v17 = vpop.f32.mrf.mxu2 }
 0x370   :  { %v8274_v31 = vadd.f32 %v1746_v17, %v1478_v2  ;;  %v1956_v2 = vpack.c.bf16 %v1901_v7, %v1900_v39 }
 0x371   :  { %v8277_v3 = vpop.f32.mrf.mxu0 }
 0x374   :  { %6251 = vmatmul.msk.bf16.gmra.mxu2 %vm430_vm2, %v1229_v26  ;;  %6316 = vmatmul.msk.bf16.gmra.mxu0 %vm430_vm2, %v1229_v26 }
 0x375   :  { %v8272_v25 = vpop.f32.mrf.mxu3  ;;  %v1481_v18 = vpop.f32.mrf.mxu1 }
 0x376   :  { %11644 = vst [vmem:[#allocation6_spill] sm:$0xff] %v8272_v25  ;;  %v1197_v25 = vld [vmem:[#allocation2 + $0x248] sm:$0xff] }
 0x377   :  { %v1749_v44 = vpop.f32.mrf.mxu2 }
 0x378   :  { %6219 = vmatmul.msk.bf16.gmra.mxu1 %vm430_vm2, %v1326_v10  ;;  %v8284_v60 = vadd.f32 %v1749_v44, %v1481_v18 }
 0x379   :  { %v8286_v59 = vpop.f32.mrf.mxu0 }
 0x37a   :  { %6277 = vmatmul.msk.bf16.gmra.mxu3 %vm430_vm2, %v1954_v48 }
 0x37d   :  { %v8280_v29 = vpop.f32.mrf.mxu3  ;;  %v1483_v47 = vpop.f32.mrf.mxu1 }
 0x37e   :  { %11645 = vst [vmem:[#allocation7_spill] sm:$0xff] %v8280_v29  ;;  %v1195_v29 = vld [vmem:[#allocation2 + $0x230] sm:$0xff] }
 0x37f   :  { %v1751_v21 = vpop.f32.mrf.mxu2 }
 0x380   :  { %v8290_v22 = vadd.f32 %v1751_v21, %v1483_v47  ;;  %v1281_v21 = vld [vmem:[#allocation2 + $0x1b1] sm:$0xff] }
 0x381   :  { %v8293_v50 = vpop.f32.mrf.mxu0 }
 0x384   :  { %6252 = vmatmul.msk.bf16.gmra.mxu2 %vm430_vm2, %v1230_v19  ;;  %6317 = vmatmul.msk.bf16.gmra.mxu0 %vm430_vm2, %v1230_v19 }
 0x385   :  { %v8288_v49 = vpop.f32.mrf.mxu3  ;;  %v1486_v37 = vpop.f32.mrf.mxu1 }
 0x386   :  { %11646 = vst [vmem:[#allocation8_spill] sm:$0xff] %v8288_v49  ;;  %v1193_v49 = vld [vmem:[#allocation2 + $0x218] sm:$0xff] }
 0x387   :  { %v1754_v4 = vpop.f32.mrf.mxu2 }
 0x388   :  { %6220 = vmatmul.msk.bf16.gmra.mxu1 %vm430_vm2, %v1327_v52  ;;  %v8300_v16 = vadd.f32 %v1754_v4, %v1486_v37  ;;  %v1185_v37 = vld [vmem:[#allocation2 + $0x1b8] sm:$0xff]  ;;  %v1957_v52 = vpack.c.bf16 %v1903_v23, %v1902_v36  ;;  %v2344_v4 = vld [vmem:[#allocation2 + $0x180] sm:$0xff] }
 0x389   :  { %v8302_v63 = vpop.f32.mrf.mxu0  ;;  %v1232_v8 = vpack.c.bf16 %v1185_v37, %v1184_v20  ;;  %v1284_v36 = vld [vmem:[#allocation2 + $0x1d1] sm:$0xff] }
 0x38a   :  { %6278 = vmatmul.msk.bf16.gmra.mxu3 %vm430_vm2, %v1955_v42  ;;  %v1187_v20 = vld [vmem:[#allocation2 + $0x1d0] sm:$0xff] }
 0x38d   :  { %v8296_v6 = vpop.f32.mrf.mxu3  ;;  %v1488_v46 = vpop.f32.mrf.mxu1 }
 0x38e   :  { %11647 = vst [vmem:[#allocation9_spill] sm:$0xff] %v8296_v6 }
 0x38f   :  { %v1756_v43 = vpop.f32.mrf.mxu2 }
 0x390   :  { %v8306_v5 = vadd.f32 %v1756_v43, %v1488_v46  ;;  %v2345_v46 = vld [vmem:[#allocation2 + $0x188] sm:$0xff] }
 0x391   :  { %v8309_v17 = vpop.f32.mrf.mxu0 }
 0x394   :  { %6253 = vmatmul.msk.bf16.gmra.mxu2 %vm430_vm2, %v1231_v24  ;;  %6318 = vmatmul.msk.bf16.gmra.mxu0 %vm430_vm2, %v1231_v24 }
 0x395   :  { %v8304_v33 = vpop.f32.mrf.mxu3  ;;  %v1491_v48 = vpop.f32.mrf.mxu1 }
 0x396   :  { %11648 = vst [vmem:[#allocation10_spill] sm:$0xff] %v8304_v33 }
 0x397   :  { %v1759_v26 = vpop.f32.mrf.mxu2 }
 0x398   :  { %6221 = vmatmul.msk.bf16.gmra.mxu1 %vm430_vm2, %v1328_v27  ;;  %v8317_v44 = vadd.f32 %v1759_v26, %v1491_v48  ;;  %v1905_v26 = vld [vmem:[#allocation2 + $0xfa] sm:$0xff] }
 0x399   :  { %v8319_v14 = vpop.f32.mrf.mxu0 }
 0x39a   :  { %6279 = vmatmul.msk.bf16.gmra.mxu3 %vm430_vm2, %v1956_v2  ;;  %v2393_v2 = vpack.c.bf16 %v2345_v46, %v2344_v4 }
 0x39d   :  { %v2090_v18 = vpop.f32.mrf.mxu3  ;;  %v1493_v47 = vpop.f32.mrf.mxu1 }
 0x39e   :  { %v8315_v10 = vadd.f32 %v2090_v18, %v8213_v61  ;;  %v1329_v61 = vpack.c.bf16 %v1282_v51, %v1281_v21  ;;  %v1904_v18 = vld [vmem:[#allocation2 + $0xf2] sm:$0xff]  ;;  %v1186_v51 = vld [vmem:[#allocation2 + $0x1c8] sm:$0xff] }
 0x39f   :  { %v1761_v19 = vpop.f32.mrf.mxu2  ;;  %v1958_v23 = vpack.c.bf16 %v1905_v26, %v1904_v18  ;;  %v1285_v18 = vld [vmem:[#allocation2 + $0x1e1] sm:$0xff]  ;;  %v1286_v26 = vld [vmem:[#allocation2 + $0x1e9] sm:$0xff] }
 0x3a0   :  { %v8324_v39 = vadd.f32 %v1761_v19, %v1493_v47 }
 0x3a1   :  { %v8327_v35 = vpop.f32.mrf.mxu0 }
 0x3a2   :  { %11649 = vst [vmem:[#allocation11_spill] sm:$0xff] %v8327_v35  ;;  %v3179_v35 = vld [vmem:[#allocation2 + $0x52] sm:$0xff] }
 0x3a4   :  { %6254 = vmatmul.msk.bf16.gmra.mxu2 %vm430_vm2, %v1232_v8  ;;  %6319 = vmatmul.msk.bf16.gmra.mxu0 %vm430_vm2, %v2393_v2 }
 0x3a5   :  { %v2092_v9 = vpop.f32.mrf.mxu3  ;;  %v1496_v7 = vpop.f32.mrf.mxu1 }
 0x3a6   :  { %v8322_v42 = vadd.f32 %v2092_v9, %v8218_v56  ;;  %v1283_v9 = vld [vmem:[#allocation2 + $0x1c9] sm:$0xff] }
 0x3a7   :  { %v1764_v58 = vpop.f32.mrf.mxu2  ;;  %v1330_v19 = vpack.c.bf16 %v1284_v36, %v1283_v9 }
 0x3a8   :  { %6222 = vmatmul.msk.bf16.gmra.mxu1 %vm430_vm2, %v1329_v61  ;;  %v8335_v40 = vadd.f32 %v1764_v58, %v1496_v7  ;;  %v1233_v61 = vpack.c.bf16 %v1187_v20, %v1186_v51  ;;  %v1906_v58 = vld [vmem:[#allocation2 + $0x10a] sm:$0xff] }
 0x3a9   :  { %v8337_v27 = vpop.f32.mrf.mxu0 }
 0x3aa   :  { %6280 = vmatmul.msk.bf16.gmra.mxu3 %vm430_vm2, %v1957_v52  ;;  %11650 = vst [vmem:[#allocation12_spill] sm:$0xff] %v8337_v27  ;;  %v1213_v27 = vld [vmem:[#allocation2 + $0x308] sm:$0xff] }
 0x3ad   :  { %v2095_v56 = vpop.f32.mrf.mxu3  ;;  %v1498_v48 = vpop.f32.mrf.mxu1 }
 0x3ae   :  { %v8333_v43 = vadd.f32 %v2095_v56, %v8226_v41 }
 0x3af   :  { %v1766_v21 = vpop.f32.mrf.mxu2 }
 0x3b0   :  { %v8342_v41 = vadd.f32 %v1766_v21, %v1498_v48  ;;  %v1907_v48 = vld [vmem:[#allocation2 + $0x112] sm:$0xff]  ;;  %v1189_v21 = vld [vmem:[#allocation2 + $0x1e8] sm:$0xff] }
 0x3b1   :  { %v8345_v52 = vpop.f32.mrf.mxu0  ;;  %v1959_v9 = vpack.c.bf16 %v1907_v48, %v1906_v58  ;;  %v1908_v48 = vld [vmem:[#allocation2 + $0x122] sm:$0xff] }
 0x3b2   :  { %11651 = vst [vmem:[#allocation13_spill] sm:$0xff] %v8345_v52 }
 0x3b4   :  { %6255 = vmatmul.msk.bf16.gmra.mxu2 %vm430_vm2, %v1233_v61  ;;  %6320 = vmatmul.msk.bf16.gmra.mxu0 %vm430_vm2, %v1233_v61 }
 0x3b5   :  { %v2097_v24 = vpop.f32.mrf.mxu3  ;;  %v1501_v37 = vpop.f32.mrf.mxu1 }
 0x3b6   :  { %v8340_v47 = vadd.f32 %v2097_v24, %v8230_v34 }
 0x3b7   :  { %v1769_v46 = vpop.f32.mrf.mxu2 }
 0x3b8   :  { %6223 = vmatmul.msk.bf16.gmra.mxu1 %vm430_vm2, %v1330_v19  ;;  %v8353_v7 = vadd.f32 %v1769_v46, %v1501_v37  ;;  %v1331_v37 = vpack.c.bf16 %v1286_v26, %v1285_v18  ;;  %v1909_v18 = vld [vmem:[#allocation2 + $0x12a] sm:$0xff] }
 0x3b9   :  { %v8355_v2 = vpop.f32.mrf.mxu0 }
 0x3ba   :  { %6281 = vmatmul.msk.bf16.gmra.mxu3 %vm430_vm2, %v1958_v23  ;;  %11652 = vst [vmem:[#allocation14_spill] sm:$0xff] %v8355_v2  ;;  %v1188_v23 = vld [vmem:[#allocation2 + $0x1e0] sm:$0xff] }
 0x3bb   :  { %v1234_v19 = vpack.c.bf16 %v1189_v21, %v1188_v23  ;;  %v1960_v23 = vpack.c.bf16 %v1909_v18, %v1908_v48  ;;  %v1296_v2 = vld [vmem:[#allocation2 + $0x261] sm:$0xff] }
 0x3bd   :  { %v2100_v4 = vpop.f32.mrf.mxu3  ;;  %v1503_v8 = vpop.f32.mrf.mxu1 }
 0x3be   :  { %v8351_v34 = vadd.f32 %v2100_v4, %v8238_v53 }
 0x3bf   :  { %v1771_v36 = vpop.f32.mrf.mxu2 }
 0x3c0   :  { %v8360_v53 = vadd.f32 %v1771_v36, %v1503_v8  ;;  %v1288_v36 = vld [vmem:[#allocation2 + $0x201] sm:$0xff] }
 0x3c1   :  { %v8363_v20 = vpop.f32.mrf.mxu0 }
 0x3c2   :  { %11653 = vst [vmem:[#allocation15_spill] sm:$0xff] %v8363_v20 }
 0x3c4   :  { %6256 = vmatmul.msk.bf16.gmra.mxu2 %vm430_vm2, %v1234_v19  ;;  %6321 = vmatmul.msk.bf16.gmra.mxu0 %vm430_vm2, %v1234_v19  ;;  %v1191_v19 = vld [vmem:[#allocation2 + $0x200] sm:$0xff] }
 0x3c5   :  { %v2102_v56 = vpop.f32.mrf.mxu3  ;;  %v1506_v51 = vpop.f32.mrf.mxu1 }
 0x3c6   :  { %v8358_v24 = vadd.f32 %v2102_v56, %v8242_v54 }
 0x3c7   :  { %v1774_v4 = vpop.f32.mrf.mxu2 }
 0x3c8   :  { %6224 = vmatmul.msk.bf16.gmra.mxu1 %vm430_vm2, %v1331_v37  ;;  %v8371_v46 = vadd.f32 %v1774_v4, %v1506_v51  ;;  %v1190_v37 = vld [vmem:[#allocation2 + $0x1f8] sm:$0xff] }
 0x3c9   :  { %v8373_v56 = vpop.f32.mrf.mxu0  ;;  %v1235_v33 = vpack.c.bf16 %v1191_v19, %v1190_v37  ;;  %v1289_v37 = vld [vmem:[#allocation2 + $0x211] sm:$0xff]  ;;  %v1290_v19 = vld [vmem:[#allocation2 + $0x219] sm:$0xff] }
 0x3ca   :  { %6282 = vmatmul.msk.bf16.gmra.mxu3 %vm430_vm2, %v1959_v9  ;;  %11654 = vst [vmem:[#allocation16_spill] sm:$0xff] %v8373_v56  ;;  %v1287_v9 = vld [vmem:[#allocation2 + $0x1f9] sm:$0xff] }
 0x3cb   :  { %v1332_v4 = vpack.c.bf16 %v1288_v36, %v1287_v9  ;;  %v1911_v9 = vld [vmem:[#allocation2 + $0x142] sm:$0xff] }
 0x3cd   :  { %v2105_v61 = vpop.f32.mrf.mxu3  ;;  %v1508_v8 = vpop.f32.mrf.mxu1 }
 0x3ce   :  { %v8369_v54 = vadd.f32 %v2105_v61, %v8252_v11 }
 0x3cf   :  { %v1776_v21 = vpop.f32.mrf.mxu2 }
 0x3d0   :  { %v8378_v11 = vadd.f32 %v1776_v21, %v1508_v8  ;;  %v1910_v21 = vld [vmem:[#allocation2 + $0x13a] sm:$0xff] }
 0x3d1   :  { %v8381_v51 = vpop.f32.mrf.mxu0 }
 0x3d2   :  { %11655 = vst [vmem:[#allocation17_spill] sm:$0xff] %v8381_v51 }
 0x3d4   :  { %6257 = vmatmul.msk.bf16.gmra.mxu2 %vm430_vm2, %v1235_v33  ;;  %6322 = vmatmul.msk.bf16.gmra.mxu0 %vm430_vm2, %v1235_v33  ;;  %v1192_v33 = vld [vmem:[#allocation2 + $0x210] sm:$0xff] }
 0x3d5   :  { %v2107_v58 = vpop.f32.mrf.mxu3  ;;  %v1511_v61 = vpop.f32.mrf.mxu1 }
 0x3d6   :  { %v8376_v26 = vadd.f32 %v2107_v58, %v8258_v32 }
 0x3d7   :  { %v1779_v58 = vpop.f32.mrf.mxu2 }
 0x3d8   :  { %6225 = vmatmul.msk.bf16.gmra.mxu1 %vm430_vm2, %v1332_v4  ;;  %v8389_v8 = vadd.f32 %v1779_v58, %v1511_v61  ;;  %v1961_v4 = vpack.c.bf16 %v1911_v9, %v1910_v21  ;;  %v1333_v58 = vpack.c.bf16 %v1290_v19, %v1289_v37  ;;  %v1913_v37 = vld [vmem:[#allocation2 + $0x15a] sm:$0xff]  ;;  %v1291_v19 = vld [vmem:[#allocation2 + $0x229] sm:$0xff] }
 0x3d9   :  { %v8391_v18 = vpop.f32.mrf.mxu0 }
 0x3da   :  { %6283 = vmatmul.msk.bf16.gmra.mxu3 %vm430_vm2, %v1960_v23  ;;  %11656 = vst [vmem:[#allocation18_spill] sm:$0xff] %v8391_v18  ;;  %v1236_v18 = vpack.c.bf16 %v1193_v49, %v1192_v33  ;;  %v1292_v33 = vld [vmem:[#allocation2 + $0x231] sm:$0xff] }
 0x3dd   :  { %v2110_v6 = vpop.f32.mrf.mxu3  ;;  %v1513_v48 = vpop.f32.mrf.mxu1 }
 0x3de   :  { %v8387_v32 = vadd.f32 %v2110_v6, %v8268_v13 }
 0x3df   :  { %v1781_v51 = vpop.f32.mrf.mxu2 }
 0x3e0   :  { %v8396_v13 = vadd.f32 %v1781_v51, %v1513_v48 }
 0x3e1   :  { %v8399_v61 = vpop.f32.mrf.mxu0 }
 0x3e2   :  { %11657 = vst [vmem:[#allocation19_spill] sm:$0xff] %v8399_v61 }
 0x3e4   :  { %6258 = vmatmul.msk.bf16.gmra.mxu2 %vm430_vm2, %v1236_v18  ;;  %6323 = vmatmul.msk.bf16.gmra.mxu0 %vm430_vm2, %v1236_v18  ;;  %v1194_v18 = vld [vmem:[#allocation2 + $0x228] sm:$0xff] }
 0x3e5   :  { %v2112_v23 = vpop.f32.mrf.mxu3  ;;  %v1516_v6 = vpop.f32.mrf.mxu1 }
 0x3e6   :  { %v8394_v36 = vadd.f32 %v2112_v23, %v8274_v31 }
 0x3e7   :  { %v1784_v23 = vpop.f32.mrf.mxu2 }
 0x3e8   :  { %6226 = vmatmul.msk.bf16.gmra.mxu1 %vm430_vm2, %v1333_v58  ;;  %v8407_v51 = vadd.f32 %v1784_v23, %v1516_v6  ;;  %v1334_v23 = vpack.c.bf16 %v1292_v33, %v1291_v19  ;;  %v1915_v19 = vld [vmem:[#allocation2 + $0x172] sm:$0xff]  ;;  %v1293_v33 = vld [vmem:[#allocation2 + $0x241] sm:$0xff] }
 0x3e9   :  { %v8409_v21 = vpop.f32.mrf.mxu0 }
 0x3ea   :  { %6284 = vmatmul.msk.bf16.gmra.mxu3 %vm430_vm2, %v1961_v4  ;;  %11658 = vst [vmem:[#allocation20_spill] sm:$0xff] %v8409_v21  ;;  %v1912_v4 = vld [vmem:[#allocation2 + $0x152] sm:$0xff]  ;;  %v1237_v21 = vpack.c.bf16 %v1195_v29, %v1194_v18  ;;  %v1294_v18 = vld [vmem:[#allocation2 + $0x249] sm:$0xff] }
 0x3eb   :  { %v1962_v58 = vpack.c.bf16 %v1913_v37, %v1912_v4 }
 0x3ed   :  { %v2115_v56 = vpop.f32.mrf.mxu3  ;;  %v1518_v48 = vpop.f32.mrf.mxu1 }
 0x3ee   :  { %v8405_v31 = vadd.f32 %v2115_v56, %v8284_v60 }
 0x3ef   :  { %v1786_v61 = vpop.f32.mrf.mxu2 }
 0x3f0   :  { %v8414_v60 = vadd.f32 %v1786_v61, %v1518_v48 }
 0x3f1   :  { %v8417_v6 = vpop.f32.mrf.mxu0 }
 0x3f2   :  { %11659 = vst [vmem:[#allocation21_spill] sm:$0xff] %v8417_v6 }
 0x3f4   :  { %6259 = vmatmul.msk.bf16.gmra.mxu2 %vm430_vm2, %v1237_v21  ;;  %6324 = vmatmul.msk.bf16.gmra.mxu0 %vm430_vm2, %v1237_v21  ;;  %v1196_v21 = vld [vmem:[#allocation2 + $0x240] sm:$0xff] }
 0x3f5   :  { %v2117_v9 = vpop.f32.mrf.mxu3  ;;  %v1521_v56 = vpop.f32.mrf.mxu1 }
 0x3f6   :  { %v8412_v49 = vadd.f32 %v2117_v9, %v8290_v22 }
 0x3f7   :  { %v1789_v9 = vpop.f32.mrf.mxu2 }
 0x3f8   :  { %6227 = vmatmul.msk.bf16.gmra.mxu1 %vm430_vm2, %v1334_v23  ;;  %v8425_v61 = vadd.f32 %v1789_v9, %v1521_v56  ;;  %v1335_v9 = vpack.c.bf16 %v1294_v18, %v1293_v33 }
 0x3f9   :  { %v8427_v4 = vpop.f32.mrf.mxu0 }
 0x3fa   :  { %6285 = vmatmul.msk.bf16.gmra.mxu3 %vm430_vm2, %v1962_v58  ;;  %11660 = vst [vmem:[#allocation22_spill] sm:$0xff] %v8427_v4  ;;  %v1914_v58 = vld [vmem:[#allocation2 + $0x16a] sm:$0xff] }
 0x3fb   :  { %v1963_v23 = vpack.c.bf16 %v1915_v19, %v1914_v58  ;;  %v6336_v4 = vld [vmem:[%s11502_s5 + $0x10] sm:$0xf] }
 0x3fd   :  { %v2120_v20 = vpop.f32.mrf.mxu3  ;;  %v1523_v48 = vpop.f32.mrf.mxu1 }
 0x3fe   :  { %v8423_v22 = vadd.f32 %v2120_v20, %v8300_v16 }
 0x3ff   :  { %v1791_v6 = vpop.f32.mrf.mxu2 }
 0x400   :  { %v8432_v16 = vadd.f32 %v1791_v6, %v1523_v48 }
 0x401   :  { %v8435_v56 = vpop.f32.mrf.mxu0 }
 0x402   :  { %11661 = vst [vmem:[#allocation23_spill] sm:$0xff] %v8435_v56  ;;  %v1295_v56 = vld [vmem:[#allocation2 + $0x259] sm:$0xff] }
 0x405   :  { %v2122_v37 = vpop.f32.mrf.mxu3  ;;  %v1526_v20 = vpop.f32.mrf.mxu1 }
 0x406   :  { %v8430_v29 = vadd.f32 %v2122_v37, %v8306_v5  ;;  %v1238_v5 = vpack.c.bf16 %v1197_v25, %v1196_v21  ;;  %v2939_v37 = vsel %vm1443_vm4, %v6336_v4, 0  ;;  %v1916_v25 = vld [vmem:[#allocation2 + $0x1b2] sm:$0xff] }
 0x407   :  { %2948 = vmatpush.bf16.msrb.mxu1 %v2939_v37  ;;  %v1794_v48 = vpop.f32.mrf.mxu2 }
 0x408   :  { %6228 = vmatmul.msk.bf16.gmra.mxu1 %vm430_vm2, %v1335_v9  ;;  %6260 = vmatmul.msk.bf16.gmra.mxu2 %vm430_vm2, %v1238_v5  ;;  %v8447_v19 = vadd.f32 %v1794_v48, %v1526_v20  ;;  %v1336_v48 = vpack.c.bf16 %v1296_v2, %v1295_v56  ;;  %v1919_v2 = vld [vmem:[#allocation2 + $0x1d2] sm:$0xff] }
 0x409   :  { %6325 = vmatmul.msk.bf16.gmra.mxu0 %vm430_vm2, %v1238_v5  ;;  %v8449_v18 = vpop.f32.mrf.mxu0  ;;  %v1297_v56 = vld [vmem:[#allocation2 + $0x271] sm:$0xff] }
 0x40a   :  { %6286 = vmatmul.msk.bf16.gmra.mxu3 %vm430_vm2, %v1963_v23  ;;  %11662 = vst [vmem:[#allocation24_spill] sm:$0xff] %v8449_v18  ;;  %v1917_v23 = vld [vmem:[#allocation2 + $0x1ba] sm:$0xff] }
 0x40b   :  { %v1964_v9 = vpack.c.bf16 %v1917_v23, %v1916_v25 }
 0x40d   :  { %v2125_v58 = vpop.f32.mrf.mxu3  ;;  %v1528_v33 = vpop.f32.mrf.mxu1 }
 0x40e   :  { %v8445_v6 = vadd.f32 %v2125_v58, %v8317_v44  ;;  %v1199_v44 = vld [vmem:[#allocation2 + $0x260] sm:$0xff] }
 0x40f   :  { %v1796_v5 = vpop.f32.mrf.mxu2  ;;  %v1239_v18 = vpack.c.bf16 %v1199_v44, %v1198_v0  ;;  %v1298_v44 = vld [vmem:[#allocation2 + $0x279] sm:$0xff] }
 0x410   :  { %v8454_v58 = vadd.f32 %v1796_v5, %v1528_v33  ;;  %v1918_v5 = vld [vmem:[#allocation2 + $0x1ca] sm:$0xff] }
 0x411   :  { %v8457_v20 = vpop.f32.mrf.mxu0 }
 0x412   :  { %11664 = vst [vmem:[#allocation26_spill] sm:$0xff] %v8457_v20 }
 0x415   :  { %v2127_v4 = vpop.f32.mrf.mxu3  ;;  %v1531_v37 = vpop.f32.mrf.mxu1 }
 0x416   :  { %v8452_v21 = vadd.f32 %v2127_v4, %v8324_v39 }
 0x417   :  { %v1799_v25 = vpop.f32.mrf.mxu2 }
 0x418   :  { %11663 = vst [vmem:[#allocation25_spill] sm:$0xff] %v8452_v21  ;;  %6229 = vmatmul.msk.bf16.gmra.mxu1 %vm430_vm2, %v1336_v48  ;;  %6261 = vmatmul.msk.bf16.gmra.mxu2 %vm430_vm2, %v1239_v18  ;;  %v8465_v33 = vadd.f32 %v1799_v25, %v1531_v37  ;;  %v1965_v48 = vpack.c.bf16 %v1919_v2, %v1918_v5  ;;  %v1215_v21 = vld [vmem:[#allocation2 + $0x320] sm:$0xff] }
 0x419   :  { %6326 = vmatmul.msk.bf16.gmra.mxu0 %vm430_vm2, %v1239_v18  ;;  %v8467_v4 = vpop.f32.mrf.mxu0  ;;  %v1200_v18 = vld [vmem:[#allocation2 + $0x270] sm:$0xff]  ;;  %v1337_v25 = vpack.c.bf16 %v1298_v44, %v1297_v56 }
 0x41a   :  { %6287 = vmatmul.msk.bf16.gmra.mxu3 %vm430_vm2, %v1964_v9  ;;  %11666 = vst [vmem:[#allocation28_spill] sm:$0xff] %v8467_v4  ;;  %v1240_v4 = vpack.c.bf16 %v1201_v45, %v1200_v18  ;;  %v1921_v56 = vld [vmem:[#allocation2 + $0x1ea] sm:$0xff] }
 0x41b   :  { %v1299_v44 = vld [vmem:[#allocation2 + $0x289] sm:$0xff]  ;;  %v1300_v18 = vld [vmem:[#allocation2 + $0x291] sm:$0xff] }
 0x41d   :  { %v2130_v52 = vpop.f32.mrf.mxu3  ;;  %v1533_v23 = vpop.f32.mrf.mxu1 }
 0x41e   :  { %v8463_v39 = vadd.f32 %v2130_v52, %v8335_v40 }
 0x41f   :  { %v1801_v20 = vpop.f32.mrf.mxu2 }
 0x420   :  { %11665 = vst [vmem:[#allocation27_spill] sm:$0xff] %v8463_v39  ;;  %v8472_v40 = vadd.f32 %v1801_v20, %v1533_v23 }
 0x421   :  { %v8475_v37 = vpop.f32.mrf.mxu0 }
 0x422   :  { %11668 = vst [vmem:[#allocation30_spill] sm:$0xff] %v8475_v37 }
 0x425   :  { %v2132_v9 = vpop.f32.mrf.mxu3  ;;  %v1536_v52 = vpop.f32.mrf.mxu1 }
 0x426   :  { %v8470_v0 = vadd.f32 %v2132_v9, %v8342_v41 }
 0x427   :  { %v1804_v9 = vpop.f32.mrf.mxu2 }
 0x428   :  { %11667 = vst [vmem:[#allocation29_spill] sm:$0xff] %v8470_v0  ;;  %6230 = vmatmul.msk.bf16.gmra.mxu1 %vm430_vm2, %v1337_v25  ;;  %6262 = vmatmul.msk.bf16.gmra.mxu2 %vm430_vm2, %v1240_v4  ;;  %v8483_v20 = vadd.f32 %v1804_v9, %v1536_v52  ;;  %v1203_v0 = vld [vmem:[#allocation2 + $0x290] sm:$0xff]  ;;  %v1338_v9 = vpack.c.bf16 %v1300_v18, %v1299_v44  ;;  %v1923_v44 = vld [vmem:[#allocation2 + $0x202] sm:$0xff] }
 0x429   :  { %6327 = vmatmul.msk.bf16.gmra.mxu0 %vm430_vm2, %v1240_v4  ;;  %v8485_v5 = vpop.f32.mrf.mxu0  ;;  %v1202_v4 = vld [vmem:[#allocation2 + $0x288] sm:$0xff] }
 0x42a   :  { %6288 = vmatmul.msk.bf16.gmra.mxu3 %vm430_vm2, %v1965_v48  ;;  %11670 = vst [vmem:[#allocation32_spill] sm:$0xff] %v8485_v5  ;;  %v1920_v48 = vld [vmem:[#allocation2 + $0x1e2] sm:$0xff]  ;;  %v1241_v5 = vpack.c.bf16 %v1203_v0, %v1202_v4 }
 0x42b   :  { %v1966_v25 = vpack.c.bf16 %v1921_v56, %v1920_v48  ;;  %v1301_v18 = vld [vmem:[#allocation2 + $0x2a1] sm:$0xff]  ;;  %v1302_v4 = vld [vmem:[#allocation2 + $0x2a9] sm:$0xff] }
 0x42d   :  { %v2135_v39 = vpop.f32.mrf.mxu3  ;;  %v1538_v23 = vpop.f32.mrf.mxu1 }
 0x42e   :  { %v8481_v41 = vadd.f32 %v2135_v39, %v8353_v7 }
 0x42f   :  { %v1806_v37 = vpop.f32.mrf.mxu2 }
 0x430   :  { %11669 = vst [vmem:[#allocation31_spill] sm:$0xff] %v8481_v41  ;;  %v8490_v7 = vadd.f32 %v1806_v37, %v1538_v23 }
 0x431   :  { %v8493_v52 = vpop.f32.mrf.mxu0 }
 0x432   :  { %11672 = vst [vmem:[#allocation34_spill] sm:$0xff] %v8493_v52 }
 0x435   :  { %v2137_v2 = vpop.f32.mrf.mxu3  ;;  %v1541_v39 = vpop.f32.mrf.mxu1 }
 0x436   :  { %v8488_v45 = vadd.f32 %v2137_v2, %v8360_v53 }
 0x437   :  { %v1809_v2 = vpop.f32.mrf.mxu2 }
 0x438   :  { %11671 = vst [vmem:[#allocation33_spill] sm:$0xff] %v8488_v45  ;;  %6231 = vmatmul.msk.bf16.gmra.mxu1 %vm430_vm2, %v1338_v9  ;;  %6263 = vmatmul.msk.bf16.gmra.mxu2 %vm430_vm2, %v1241_v5  ;;  %v8501_v37 = vadd.f32 %v1809_v2, %v1541_v39  ;;  %v1205_v45 = vld [vmem:[#allocation2 + $0x2a8] sm:$0xff]  ;;  %v1339_v2 = vpack.c.bf16 %v1302_v4, %v1301_v18  ;;  %v1925_v18 = vld [vmem:[#allocation2 + $0x21a] sm:$0xff] }
 0x439   :  { %6328 = vmatmul.msk.bf16.gmra.mxu0 %vm430_vm2, %v1241_v5  ;;  %v8503_v48 = vpop.f32.mrf.mxu0  ;;  %v1204_v5 = vld [vmem:[#allocation2 + $0x2a0] sm:$0xff] }
 0x43a   :  { %6289 = vmatmul.msk.bf16.gmra.mxu3 %vm430_vm2, %v1966_v25  ;;  %11674 = vst [vmem:[#allocation36_spill] sm:$0xff] %v8503_v48  ;;  %v1922_v25 = vld [vmem:[#allocation2 + $0x1fa] sm:$0xff]  ;;  %v1242_v48 = vpack.c.bf16 %v1205_v45, %v1204_v5 }
 0x43b   :  { %v1967_v9 = vpack.c.bf16 %v1923_v44, %v1922_v25  ;;  %v1303_v4 = vld [vmem:[#allocation2 + $0x2b9] sm:$0xff]  ;;  %v1304_v5 = vld [vmem:[#allocation2 + $0x2c1] sm:$0xff] }
 0x43d   :  { %v2140_v41 = vpop.f32.mrf.mxu3  ;;  %v1543_v23 = vpop.f32.mrf.mxu1 }
 0x43e   :  { %v8499_v53 = vadd.f32 %v2140_v41, %v8371_v46 }
 0x43f   :  { %v1811_v52 = vpop.f32.mrf.mxu2 }
 0x440   :  { %11673 = vst [vmem:[#allocation35_spill] sm:$0xff] %v8499_v53  ;;  %v8508_v46 = vadd.f32 %v1811_v52, %v1543_v23 }
 0x441   :  { %v8511_v39 = vpop.f32.mrf.mxu0 }
 0x442   :  { %11676 = vst [vmem:[#allocation38_spill] sm:$0xff] %v8511_v39 }
 0x445   :  { %v2142_v56 = vpop.f32.mrf.mxu3  ;;  %v1546_v41 = vpop.f32.mrf.mxu1 }
 0x446   :  { %v8506_v0 = vadd.f32 %v2142_v56, %v8378_v11 }
 0x447   :  { %v1814_v56 = vpop.f32.mrf.mxu2 }
 0x448   :  { %11675 = vst [vmem:[#allocation37_spill] sm:$0xff] %v8506_v0  ;;  %6232 = vmatmul.msk.bf16.gmra.mxu1 %vm430_vm2, %v1339_v2  ;;  %6264 = vmatmul.msk.bf16.gmra.mxu2 %vm430_vm2, %v1242_v48  ;;  %v8519_v52 = vadd.f32 %v1814_v56, %v1546_v41  ;;  %v1207_v0 = vld [vmem:[#allocation2 + $0x2c0] sm:$0xff]  ;;  %v1340_v56 = vpack.c.bf16 %v1304_v5, %v1303_v4  ;;  %v1927_v4 = vld [vmem:[#allocation2 + $0x232] sm:$0xff] }
 0x449   :  { %6329 = vmatmul.msk.bf16.gmra.mxu0 %vm430_vm2, %v1242_v48  ;;  %v8521_v25 = vpop.f32.mrf.mxu0  ;;  %v1206_v48 = vld [vmem:[#allocation2 + $0x2b8] sm:$0xff] }
 0x44a   :  { %6290 = vmatmul.msk.bf16.gmra.mxu3 %vm430_vm2, %v1967_v9  ;;  %11678 = vst [vmem:[#allocation40_spill] sm:$0xff] %v8521_v25  ;;  %v1924_v9 = vld [vmem:[#allocation2 + $0x212] sm:$0xff]  ;;  %v1243_v25 = vpack.c.bf16 %v1207_v0, %v1206_v48  ;;  %v2745_v48 = vld [vmem:[#allocation2 + $0x21] sm:$0xff] }
 0x44b   :  { %v1968_v2 = vpack.c.bf16 %v1925_v18, %v1924_v9  ;;  %v2744_v5 = vld [vmem:[#allocation2 + $0x19] sm:$0xff] }
 0x44d   :  { %v2145_v53 = vpop.f32.mrf.mxu3  ;;  %v1548_v23 = vpop.f32.mrf.mxu1 }
 0x44e   :  { %v8517_v11 = vadd.f32 %v2145_v53, %v8389_v8 }
 0x44f   :  { %v1816_v39 = vpop.f32.mrf.mxu2 }
 0x450   :  { %11677 = vst [vmem:[#allocation39_spill] sm:$0xff] %v8517_v11  ;;  %v8526_v8 = vadd.f32 %v1816_v39, %v1548_v23 }
 0x451   :  { %v8529_v41 = vpop.f32.mrf.mxu0 }
 0x452   :  { %11680 = vst [vmem:[#allocation42_spill] sm:$0xff] %v8529_v41 }
 0x455   :  { %v2147_v44 = vpop.f32.mrf.mxu3  ;;  %v1551_v53 = vpop.f32.mrf.mxu1 }
 0x456   :  { %v8524_v45 = vadd.f32 %v2147_v44, %v8396_v13 }
 0x457   :  { %v1819_v44 = vpop.f32.mrf.mxu2 }
 0x458   :  { %11679 = vst [vmem:[#allocation41_spill] sm:$0xff] %v8524_v45  ;;  %6233 = vmatmul.msk.bf16.gmra.mxu1 %vm430_vm2, %v1340_v56  ;;  %6265 = vmatmul.msk.bf16.gmra.mxu2 %vm430_vm2, %v1243_v25  ;;  %v8537_v39 = vadd.f32 %v1819_v44, %v1551_v53  ;;  %v1209_v45 = vld [vmem:[#allocation2 + $0x2d8] sm:$0xff]  ;;  %v2808_v44 = vpack.c.bf16 %v2745_v48, %v2744_v5  ;;  %v1929_v5 = vld [vmem:[#allocation2 + $0x24a] sm:$0xff] }
 0x459   :  { %6330 = vmatmul.msk.bf16.gmra.mxu0 %vm430_vm2, %v1243_v25  ;;  %v8539_v9 = vpop.f32.mrf.mxu0  ;;  %v1208_v25 = vld [vmem:[#allocation2 + $0x2d0] sm:$0xff] }
 0x45a   :  { %6291 = vmatmul.msk.bf16.gmra.mxu3 %vm430_vm2, %v1968_v2  ;;  %11682 = vst [vmem:[#allocation44_spill] sm:$0xff] %v8539_v9  ;;  %v1926_v2 = vld [vmem:[#allocation2 + $0x22a] sm:$0xff]  ;;  %v1244_v9 = vpack.c.bf16 %v1209_v45, %v1208_v25  ;;  %v2747_v25 = vld [vmem:[#allocation2 + $0x39] sm:$0xff] }
 0x45b   :  { %v1969_v56 = vpack.c.bf16 %v1927_v4, %v1926_v2  ;;  %v2746_v48 = vld [vmem:[#allocation2 + $0x31] sm:$0xff] }
 0x45d   :  { %v2150_v11 = vpop.f32.mrf.mxu3  ;;  %v1553_v23 = vpop.f32.mrf.mxu1 }
 0x45e   :  { %v8535_v13 = vadd.f32 %v2150_v11, %v8407_v51 }
 0x45f   :  { %v1821_v41 = vpop.f32.mrf.mxu2 }
 0x460   :  { %11681 = vst [vmem:[#allocation43_spill] sm:$0xff] %v8535_v13  ;;  %v8544_v51 = vadd.f32 %v1821_v41, %v1553_v23 }
 0x461   :  { %v8547_v53 = vpop.f32.mrf.mxu0 }
 0x462   :  { %11684 = vst [vmem:[#allocation46_spill] sm:$0xff] %v8547_v53 }
 0x465   :  { %v2152_v18 = vpop.f32.mrf.mxu3  ;;  %v1556_v11 = vpop.f32.mrf.mxu1 }
 0x466   :  { %v8542_v0 = vadd.f32 %v2152_v18, %v8414_v60 }
 0x467   :  { %v1824_v18 = vpop.f32.mrf.mxu2 }
 0x468   :  { %11683 = vst [vmem:[#allocation45_spill] sm:$0xff] %v8542_v0  ;;  %6337 = vmatmul.msk.bf16.vlgmr.msrb.gmra.mxu1 %vm430_vm2, %v2808_v44  ;;  %6266 = vmatmul.msk.bf16.gmra.mxu2 %vm430_vm2, %v1244_v9  ;;  %v8555_v41 = vadd.f32 %v1824_v18, %v1556_v11  ;;  %v1211_v0 = vld [vmem:[#allocation2 + $0x2f0] sm:$0xff]  ;;  %v8567_v18 = vpack.c.bf16 %v2747_v25, %v2746_v48  ;;  %v1930_v25 = vld [vmem:[#allocation2 + $0x25a] sm:$0xff] }
 0x469   :  { %6331 = vmatmul.msk.bf16.gmra.mxu0 %vm430_vm2, %v1244_v9  ;;  %v8557_v2 = vpop.f32.mrf.mxu0  ;;  %v1210_v9 = vld [vmem:[#allocation2 + $0x2e8] sm:$0xff] }
 0x46a   :  { %6292 = vmatmul.msk.bf16.gmra.mxu3 %vm430_vm2, %v1969_v56  ;;  %11686 = vst [vmem:[#allocation48_spill] sm:$0xff] %v8557_v2  ;;  %v1928_v56 = vld [vmem:[#allocation2 + $0x242] sm:$0xff]  ;;  %v1245_v2 = vpack.c.bf16 %v1211_v0, %v1210_v9 }
 0x46b   :  { %v1970_v44 = vpack.c.bf16 %v1929_v5, %v1928_v56  ;;  %v1931_v0 = vld [vmem:[#allocation2 + $0x262] sm:$0xff] }
 0x46c   :  { %v2748_v9 = vld [vmem:[#allocation2 + $0x49] sm:$0xff] }
 0x46d   :  { %v2155_v13 = vpop.f32.mrf.mxu3  ;;  %v1558_v23 = vpop.f32.mrf.mxu1 }
 0x46e   :  { %v8553_v60 = vadd.f32 %v2155_v13, %v8425_v61 }
 0x46f   :  { %v1826_v53 = vpop.f32.mrf.mxu2 }
 0x470   :  { %11685 = vst [vmem:[#allocation47_spill] sm:$0xff] %v8553_v60  ;;  %v8562_v61 = vadd.f32 %v1826_v53, %v1558_v23 }
 0x471   :  { %v8565_v11 = vpop.f32.mrf.mxu0 }
 0x472   :  { %11688 = vst [vmem:[#allocation50_spill] sm:$0xff] %v8565_v11  ;;  %v2749_v11 = vld [vmem:[#allocation2 + $0x51] sm:$0xff] }
 0x475   :  { %v2157_v4 = vpop.f32.mrf.mxu3  ;;  %v1561_v13 = vpop.f32.mrf.mxu1 }
 0x476   :  { %v8560_v45 = vadd.f32 %v2157_v4, %v8432_v16 }
 0x477   :  { %v1829_v53 = vpop.f32.mrf.mxu2 }
 0x478   :  { %11687 = vst [vmem:[#allocation49_spill] sm:$0xff] %v8560_v45  ;;  %6338 = vmatmul.msk.bf16.gmra.mxu1 %vm430_vm2, %v8567_v18  ;;  %6267 = vmatmul.msk.bf16.gmra.mxu2 %vm430_vm2, %v1245_v2  ;;  %v8576_v23 = vadd.f32 %v1829_v53, %v1561_v13  ;;  %v1971_v45 = vpack.c.bf16 %v1931_v0, %v1930_v25  ;;  %v1932_v0 = vld [vmem:[#allocation2 + $0x272] sm:$0xff] }
 0x479   :  { %6332 = vmatmul.msk.bf16.gmra.mxu0 %vm430_vm2, %v1245_v2  ;;  %v8578_v5 = vpop.f32.mrf.mxu0  ;;  %v1212_v2 = vld [vmem:[#allocation2 + $0x300] sm:$0xff]  ;;  %v8588_v53 = vpack.c.bf16 %v2749_v11, %v2748_v9 }
 0x47a   :  { %6293 = vmatmul.msk.bf16.gmra.mxu3 %vm430_vm2, %v1970_v44  ;;  %11690 = vst [vmem:[#allocation52_spill] sm:$0xff] %v8578_v5  ;;  %v1246_v5 = vpack.c.bf16 %v1213_v27, %v1212_v2  ;;  %v1933_v27 = vld [vmem:[#allocation2 + $0x27a] sm:$0xff] }
 0x47b   :  { %v2750_v2 = vld [vmem:[#allocation2 + $0x61] sm:$0xff] }
 0x47d   :  { %v2160_v16 = vpop.f32.mrf.mxu3  ;;  %v1563_v56 = vpop.f32.mrf.mxu1 }
 0x47e   :  { %v8574_v4 = vadd.f32 %v2160_v16, %v8447_v19 }
 0x47f   :  { %v1831_v60 = vpop.f32.mrf.mxu2 }
 0x480   :  { %11689 = vst [vmem:[#allocation51_spill] sm:$0xff] %v8574_v4  ;;  %v8583_v19 = vadd.f32 %v1831_v60, %v1563_v56 }
 0x485   :  { %v2162_v48 = vpop.f32.mrf.mxu3  ;;  %v1566_v16 = vpop.f32.mrf.mxu1 }
 0x486   :  { %v8581_v44 = vadd.f32 %v2162_v48, %v8454_v58  ;;  %v8586_v13 = vpop.f32.mrf.mxu0 }
 0x487   :  { %11692 = vst [vmem:[#allocation54_spill] sm:$0xff] %v8586_v13  ;;  %v2751_v13 = vld [vmem:[#allocation2 + $0x69] sm:$0xff] }
 0x488   :  { %11691 = vst [vmem:[#allocation53_spill] sm:$0xff] %v8581_v44  ;;  %6339 = vmatmul.msk.bf16.gmra.mxu1 %vm430_vm2, %v8588_v53  ;;  %6268 = vmatmul.msk.bf16.gmra.mxu2 %vm430_vm2, %v1246_v5  ;;  %v1972_v44 = vpack.c.bf16 %v1933_v27, %v1932_v0  ;;  %v1934_v27 = vld [vmem:[#allocation2 + $0x28a] sm:$0xff] }
 0x489   :  { %6333 = vmatmul.msk.bf16.gmra.mxu0 %vm430_vm2, %v1246_v5  ;;  %v1214_v5 = vld [vmem:[#allocation2 + $0x318] sm:$0xff] }
 0x48a   :  { %6294 = vmatmul.msk.bf16.gmra.mxu3 %vm430_vm2, %v1971_v45 }
 0x48b   :  { %v1834_v60 = vpop.f32.mrf.mxu2 }
 0x48c   :  { %v8597_v56 = vadd.f32 %v1834_v60, %v1566_v16  ;;  %v8609_v60 = vpack.c.bf16 %v2751_v13, %v2750_v2 }
 0x48d   :  { %v2165_v58 = vpop.f32.mrf.mxu3  ;;  %v1568_v45 = vpop.f32.mrf.mxu1 }
 0x48e   :  { %v8595_v48 = vadd.f32 %v2165_v58, %v8465_v33  ;;  %v8599_v25 = vpop.f32.mrf.mxu0 }
 0x48f   :  { %11694 = vst [vmem:[#allocation56_spill] sm:$0xff] %v8599_v25  ;;  %v1247_v25 = vpack.c.bf16 %v1215_v21, %v1214_v5  ;;  %v1935_v21 = vld [vmem:[#allocation2 + $0x292] sm:$0xff] }
 0x490   :  { %11693 = vst [vmem:[#allocation55_spill] sm:$0xff] %v8595_v48  ;;  %v6369_v5 = vld [vmem:[%s11502_s5 + $0x14] sm:$0xf] }
 0x493   :  { %v1836_v4 = vpop.f32.mrf.mxu2 }
 0x494   :  { %v8604_v33 = vadd.f32 %v1836_v4, %v1568_v45 }
 0x495   :  { %v2167_v11 = vpop.f32.mrf.mxu3  ;;  %v1571_v58 = vpop.f32.mrf.mxu1 }
 0x496   :  { %v8602_v9 = vadd.f32 %v2167_v11, %v8472_v40  ;;  %v8607_v16 = vpop.f32.mrf.mxu0 }
 0x497   :  { %11696 = vst [vmem:[#allocation58_spill] sm:$0xff] %v8607_v16  ;;  %v2753_v16 = vld [vmem:[#allocation2 + $0x81] sm:$0xff] }
 0x498   :  { %11695 = vst [vmem:[#allocation57_spill] sm:$0xff] %v8602_v9  ;;  %6340 = vmatmul.msk.bf16.gmra.mxu1 %vm430_vm2, %v8609_v60  ;;  %6269 = vmatmul.msk.bf16.gmra.mxu2 %vm430_vm2, %v1247_v25  ;;  %v3175_v9 = vld [vmem:[#allocation2 + $0x22] sm:$0xff] }
 0x499   :  { %6334 = vmatmul.msk.bf16.gmra.mxu0 %vm430_vm2, %v1247_v25  ;;  %v3369_v25 = vsel %vm1443_vm4, %v6369_v5, 0 }
 0x49a   :  { %6295 = vmatmul.msk.bf16.gmra.mxu3 %vm430_vm2, %v1972_v44  ;;  %3378 = vmatpush.bf16.msra.mxu2 %v3369_v25 }
 0x49b   :  { %v1839_v4 = vpop.f32.mrf.mxu2 }
 0x49c   :  { %v8618_v45 = vadd.f32 %v1839_v4, %v1571_v58  ;;  %v1973_v58 = vpack.c.bf16 %v1935_v21, %v1934_v27 }
 0x49d   :  { %v2170_v40 = vpop.f32.mrf.mxu3  ;;  %v1573_v44 = vpop.f32.mrf.mxu1 }
 0x49e   :  { %v8616_v11 = vadd.f32 %v2170_v40, %v8483_v20  ;;  %v8620_v0 = vpop.f32.mrf.mxu0  ;;  %v2376_v20 = vld [vmem:[#allocation2 + $0x330] sm:$0xff]  ;;  %v2752_v40 = vld [vmem:[#allocation2 + $0x79] sm:$0xff] }
 0x49f   :  { %11698 = vst [vmem:[#allocation60_spill] sm:$0xff] %v8620_v0  ;;  %v3174_v0 = vld [vmem:[#allocation2 + $0x1a] sm:$0xff] }
 0x4a0   :  { %11697 = vst [vmem:[#allocation59_spill] sm:$0xff] %v8616_v11  ;;  %v2377_v11 = vld [vmem:[#allocation2 + $0x338] sm:$0xff]  ;;  %v3238_v5 = vpack.c.bf16 %v3175_v9, %v3174_v0  ;;  %v1937_v9 = vld [vmem:[#allocation2 + $0x2aa] sm:$0xff] }
 0x4a3   :  { %v1841_v4 = vpop.f32.mrf.mxu2 }
 0x4a4   :  { %v8629_v48 = vadd.f32 %v1841_v4, %v1573_v44 }
 0x4a5   :  { %v2172_v13 = vpop.f32.mrf.mxu3  ;;  %v1576_v55 = vpop.f32.mrf.mxu1 }
 0x4a6   :  { %v8623_v2 = vadd.f32 %v2172_v13, %v8490_v7  ;;  %v8632_v7 = vpop.f32.mrf.mxu0  ;;  %v8634_v13 = vpack.c.bf16 %v2753_v16, %v2752_v40  ;;  %v2755_v40 = vld [vmem:[#allocation2 + $0x99] sm:$0xff] }
 0x4a7   :  { %11700 = vst [vmem:[#allocation62_spill] sm:$0xff] %v8632_v7 }
 0x4a8   :  { %11699 = vst [vmem:[#allocation61_spill] sm:$0xff] %v8623_v2  ;;  %v2409_v2 = vpack.c.bf16 %v2377_v11, %v2376_v20  ;;  %6341 = vmatmul.msk.bf16.gmra.mxu1 %vm430_vm2, %v8634_v13  ;;  %6370 = vmatmul.msk.bf16.vlgmr.msra.gmra.mxu2 %vm430_vm2, %v3238_v5  ;;  %v1936_v11 = vld [vmem:[#allocation2 + $0x2a2] sm:$0xff] }
 0x4a9   :  { %v1974_v5 = vpack.c.bf16 %v1937_v9, %v1936_v11 }
 0x4aa   :  { %6296 = vmatmul.msk.bf16.gmra.mxu3 %vm430_vm2, %v1973_v58  ;;  %6335 = vmatmul.msk.bf16.gmra.mxu0 %vm430_vm2, %v2409_v2  ;;  %v6435_v2 = vld [vmem:[%s11502_s5 + $0x1c] sm:$0xf] }
 0x4ab   :  { %v1844_v21 = vpop.f32.mrf.mxu2  ;;  %v4230_v20 = vsel %vm1443_vm4, %v6435_v2, 0 }
 0x4ac   :  { %v8643_v25 = vadd.f32 %v1844_v21, %v1576_v55  ;;  %4239 = vmatpush.bf16.msra.mxu0 %v4230_v20  ;;  %v3177_v21 = vld [vmem:[#allocation2 + $0x3a] sm:$0xff] }
 0x4ad   :  { %v2175_v27 = vpop.f32.mrf.mxu3  ;;  %v1578_v58 = vpop.f32.mrf.mxu1 }
 0x4ae   :  { %v8641_v44 = vadd.f32 %v2175_v27, %v8501_v37  ;;  %v8645_v4 = vpop.f32.mrf.mxu0  ;;  %v2754_v37 = vld [vmem:[#allocation2 + $0x91] sm:$0xff] }
 0x4af   :  { %11702 = vst [vmem:[#allocation64_spill] sm:$0xff] %v8645_v4  ;;  %v3176_v27 = vld [vmem:[#allocation2 + $0x32] sm:$0xff] }
 0x4b0   :  { %11701 = vst [vmem:[#allocation63_spill] sm:$0xff] %v8641_v44 }
 0x4b3   :  { %v1846_v55 = vpop.f32.mrf.mxu2 }
 0x4b4   :  { %v8654_v4 = vadd.f32 %v1846_v55, %v1578_v58  ;;  %v1939_v55 = vld [vmem:[#allocation2 + $0x2c2] sm:$0xff] }
 0x4b5   :  { %v2177_v16 = vpop.f32.mrf.mxu3  ;;  %v1581_v7 = vpop.f32.mrf.mxu1 }
 0x4b6   :  { %v8648_v0 = vadd.f32 %v2177_v16, %v8508_v46  ;;  %v8657_v46 = vpop.f32.mrf.mxu0  ;;  %v8659_v16 = vpack.c.bf16 %v2755_v40, %v2754_v37  ;;  %v1938_v40 = vld [vmem:[#allocation2 + $0x2ba] sm:$0xff] }
 0x4b7   :  { %11704 = vst [vmem:[#allocation66_spill] sm:$0xff] %v8657_v46  ;;  %v1975_v46 = vpack.c.bf16 %v1939_v55, %v1938_v40 }
 0x4b8   :  { %11703 = vst [vmem:[#allocation65_spill] sm:$0xff] %v8648_v0  ;;  %v3239_v0 = vpack.c.bf16 %v3177_v21, %v3176_v27  ;;  %6342 = vmatmul.msk.bf16.gmra.mxu1 %vm430_vm2, %v8659_v16  ;;  %v2756_v21 = vld [vmem:[#allocation2 + $0xa9] sm:$0xff] }
 0x4ba   :  { %6297 = vmatmul.msk.bf16.gmra.mxu3 %vm430_vm2, %v1974_v5  ;;  %6371 = vmatmul.msk.bf16.gmra.mxu2 %vm430_vm2, %v3239_v0  ;;  %v2757_v0 = vld [vmem:[#allocation2 + $0xb1] sm:$0xff] }
 0x4bb   :  { %6436 = vmatmul.msk.bf16.vlgmr.msra.gmra.mxu0 %vm430_vm2, %v8567_v18  ;;  %v1849_v11 = vpop.f32.mrf.mxu2  ;;  %v3178_v18 = vld [vmem:[#allocation2 + $0x4a] sm:$0xff] }
 0x4bc   :  { %v8669_v9 = vadd.f32 %v1849_v11, %v1581_v7  ;;  %v8681_v11 = vpack.c.bf16 %v2757_v0, %v2756_v21  ;;  %v1941_v21 = vld [vmem:[#allocation2 + $0x2da] sm:$0xff] }
 0x4bd   :  { %v2180_v2 = vpop.f32.mrf.mxu3  ;;  %v1583_v20 = vpop.f32.mrf.mxu1 }
 0x4be   :  { %v8667_v58 = vadd.f32 %v2180_v2, %v8519_v52  ;;  %v8671_v5 = vpop.f32.mrf.mxu0 }
 0x4bf   :  { %11706 = vst [vmem:[#allocation68_spill] sm:$0xff] %v8671_v5  ;;  %v3240_v5 = vpack.c.bf16 %v3179_v35, %v3178_v18  ;;  %v1940_v35 = vld [vmem:[#allocation2 + $0x2d2] sm:$0xff]  ;;  %v2758_v18 = vld [vmem:[#allocation2 + $0xc1] sm:$0xff] }
 0x4c0   :  { %11705 = vst [vmem:[#allocation67_spill] sm:$0xff] %v8667_v58  ;;  %v3181_v58 = vld [vmem:[#allocation2 + $0x6a] sm:$0xff] }
 0x4c3   :  { %v1851_v44 = vpop.f32.mrf.mxu2 }
 0x4c4   :  { %v8676_v52 = vadd.f32 %v1851_v44, %v1583_v20 }
 0x4c5   :  { %v2182_v37 = vpop.f32.mrf.mxu3  ;;  %v1586_v2 = vpop.f32.mrf.mxu1 }
 0x4c6   :  { %v8674_v27 = vadd.f32 %v2182_v37, %v8526_v8  ;;  %v8679_v7 = vpop.f32.mrf.mxu0 }
 0x4c7   :  { %11708 = vst [vmem:[#allocation70_spill] sm:$0xff] %v8679_v7  ;;  %v1976_v7 = vpack.c.bf16 %v1941_v21, %v1940_v35 }
 0x4c8   :  { %11707 = vst [vmem:[#allocation69_spill] sm:$0xff] %v8674_v27  ;;  %6343 = vmatmul.msk.bf16.gmra.mxu1 %vm430_vm2, %v8681_v11 }
 0x4ca   :  { %6298 = vmatmul.msk.bf16.gmra.mxu3 %vm430_vm2, %v1975_v46  ;;  %6372 = vmatmul.msk.bf16.gmra.mxu2 %vm430_vm2, %v3240_v5  ;;  %v2759_v5 = vld [vmem:[#allocation2 + $0xc9] sm:$0xff] }
 0x4cb   :  { %6437 = vmatmul.msk.bf16.gmra.mxu0 %vm430_vm2, %v8588_v53  ;;  %v1854_v20 = vpop.f32.mrf.mxu2  ;;  %v3180_v53 = vld [vmem:[#allocation2 + $0x62] sm:$0xff] }
 0x4cc   :  { %v8691_v37 = vadd.f32 %v1854_v20, %v1586_v2  ;;  %v8703_v20 = vpack.c.bf16 %v2759_v5, %v2758_v18  ;;  %v1943_v18 = vld [vmem:[#allocation2 + $0x2f2] sm:$0xff] }
 0x4cd   :  { %v2185_v8 = vpop.f32.mrf.mxu3  ;;  %v1588_v46 = vpop.f32.mrf.mxu1 }
 0x4ce   :  { %v8689_v44 = vadd.f32 %v2185_v8, %v8537_v39  ;;  %v8693_v40 = vpop.f32.mrf.mxu0 }
 0x4cf   :  { %11709 = vst [vmem:[#allocation71_spill] sm:$0xff] %v8693_v40  ;;  %v3241_v40 = vpack.c.bf16 %v3181_v58, %v3180_v53  ;;  %v1942_v58 = vld [vmem:[#allocation2 + $0x2ea] sm:$0xff]  ;;  %v2760_v53 = vld [vmem:[#allocation2 + $0xd9] sm:$0xff] }
 0x4d3   :  { %v1856_v27 = vpop.f32.mrf.mxu2 }
 0x4d4   :  { %v8698_v39 = vadd.f32 %v1856_v27, %v1588_v46 }
 0x4d5   :  { %v2187_v55 = vpop.f32.mrf.mxu3  ;;  %v1591_v8 = vpop.f32.mrf.mxu1 }
 0x4d6   :  { %v8696_v0 = vadd.f32 %v2187_v55, %v8544_v51  ;;  %v8701_v2 = vpop.f32.mrf.mxu0 }
 0x4d7   :  { %11711 = vst [vmem:[#allocation73_spill] sm:$0xff] %v8701_v2  ;;  %v1977_v2 = vpack.c.bf16 %v1943_v18, %v1942_v58 }
 0x4d8   :  { %11710 = vst [vmem:[#allocation72_spill] sm:$0xff] %v8696_v0  ;;  %6344 = vmatmul.msk.bf16.gmra.mxu1 %vm430_vm2, %v8703_v20 }
 0x4da   :  { %6299 = vmatmul.msk.bf16.gmra.mxu3 %vm430_vm2, %v1976_v7  ;;  %6373 = vmatmul.msk.bf16.gmra.mxu2 %vm430_vm2, %v3241_v40  ;;  %v2761_v40 = vld [vmem:[#allocation2 + $0xe1] sm:$0xff] }
 0x4db   :  { %6438 = vmatmul.msk.bf16.gmra.mxu0 %vm430_vm2, %v8609_v60  ;;  %v1859_v46 = vpop.f32.mrf.mxu2  ;;  %v3182_v60 = vld [vmem:[#allocation2 + $0x7a] sm:$0xff] }
 0x4dc   :  { %v8713_v55 = vadd.f32 %v1859_v46, %v1591_v8 }
 0x4dd   :  { %v2190_v51 = vpop.f32.mrf.mxu3  ;;  %v1593_v7 = vpop.f32.mrf.mxu1 }
 0x4de   :  { %v8711_v27 = vadd.f32 %v2190_v51, %v8555_v41  ;;  %v8715_v35 = vpop.f32.mrf.mxu0  ;;  %v2680_v41 = vadd.f32 %v8221_v28, %v8315_v10  ;;  %v3183_v51 = vld [vmem:[#allocation2 + $0x82] sm:$0xff] }
 0x4df   :  { %11713 = vst [vmem:[#allocation75_spill] sm:$0xff] %v8715_v35 }
 0x4e0   :  { %11712 = vst [vmem:[#allocation74_spill] sm:$0xff] %v8711_v27 }
 0x4e3   :  { %v1861_v0 = vpop.f32.mrf.mxu2 }
 0x4e4   :  { %v8722_v8 = vadd.f32 %v1861_v0, %v1593_v7  ;;  %v2681_v0 = vadd.f32 %v8228_v15, %v8322_v42 }
 0x4e5   :  { %v2192_v21 = vpop.f32.mrf.mxu3  ;;  %v2950_v46 = vpop.f32.mrf.mxu1 }
 0x4e6   :  { %v8718_v5 = vadd.f32 %v2192_v21, %v8562_v61  ;;  %v8725_v35 = vpop.f32.mrf.mxu0  ;;  %v8727_v27 = vadd.f32 %v2950_v46, %v2680_v41  ;;  %v8729_v61 = vpack.c.bf16 %v2761_v40, %v2760_v53  ;;  %v3242_v21 = vpack.c.bf16 %v3183_v51, %v3182_v60  ;;  %v1944_v40 = vld [vmem:[#allocation2 + $0x302] sm:$0xff]  ;;  %v1945_v41 = vld [vmem:[#allocation2 + $0x30a] sm:$0xff]  ;;  %v2763_v46 = vld [vmem:[#allocation2 + $0xf9] sm:$0xff] }
 0x4e7   :  { %v2762_v51 = vld [vmem:[#allocation2 + $0xf1] sm:$0xff]  ;;  %v1978_v15 = vpack.c.bf16 %v1945_v41, %v1944_v40  ;;  %v2683_v41 = vadd.f32 %v8240_v30, %v8340_v47 }
 0x4e8   :  { %6345 = vmatmul.msk.bf16.gmra.mxu1 %vm430_vm2, %v8729_v61  ;;  %v3186_v30 = vld [vmem:[#allocation2 + $0xaa] sm:$0xff]  ;;  %v3187_v47 = vld [vmem:[#allocation2 + $0xb2] sm:$0xff] }
 0x4ea   :  { %6300 = vmatmul.msk.bf16.gmra.mxu3 %vm430_vm2, %v1977_v2  ;;  %6374 = vmatmul.msk.bf16.gmra.mxu2 %vm430_vm2, %v3242_v21  ;;  %v2682_v21 = vadd.f32 %v8233_v57, %v8333_v43 }
 0x4eb   :  { %6439 = vmatmul.msk.bf16.gmra.mxu0 %vm430_vm2, %v8634_v13  ;;  %v8739_v10 = vpop.f32.mrf.mxu2 }
 0x4ed   :  { %v2195_v58 = vpop.f32.mrf.mxu3  ;;  %v2952_v2 = vpop.f32.mrf.mxu1 }
 0x4ee   :  { %v8737_v28 = vadd.f32 %v2195_v58, %v8576_v23  ;;  %v8743_v7 = vpop.f32.mrf.mxu0  ;;  %v8745_v18 = vadd.f32 %v2952_v2, %v2681_v0  ;;  %v6402_v23 = vld [vmem:[%s11502_s5 + $0x18] sm:$0xf] }
 0x4ef   :  { %11714 = vst [vmem:[#allocation76_spill] sm:$0xff] %v8743_v7  ;;  %v3800_v13 = vsel %vm1443_vm4, %v6402_v23, 0  ;;  %v3184_v58 = vld [vmem:[#allocation2 + $0x92] sm:$0xff]  ;;  %v3185_v0 = vld [vmem:[#allocation2 + $0x9a] sm:$0xff]  ;;  %v8763_v7 = vpack.c.bf16 %v2763_v46, %v2762_v51 }
 0x4f0   :  { %3809 = vmatpush.bf16.msra.mxu3 %v3800_v13  ;;  %v3243_v23 = vpack.c.bf16 %v3185_v0, %v3184_v58  ;;  %v1947_v58 = vld [vmem:[#allocation2 + $0x322] sm:$0xff] }
 0x4f3   :  { %v8754_v42 = vpop.f32.mrf.mxu2 }
 0x4f5   :  { %v2197_v53 = vpop.f32.mrf.mxu3  ;;  %v2955_v2 = vpop.f32.mrf.mxu1 }
 0x4f6   :  { %v8748_v60 = vadd.f32 %v2197_v53, %v8583_v19  ;;  %v8759_v19 = vpop.f32.mrf.mxu0  ;;  %v8761_v53 = vadd.f32 %v2955_v2, %v2682_v21  ;;  %v1946_v21 = vld [vmem:[#allocation2 + $0x31a] sm:$0xff]  ;;  %v2765_v2 = vld [vmem:[#allocation2 + $0x111] sm:$0xff] }
 0x4f7   :  { %11715 = vst [vmem:[#allocation77_spill] sm:$0xff] %v8759_v19 }
 0x4f8   :  { %6346 = vmatmul.msk.bf16.gmra.mxu1 %vm430_vm2, %v8763_v7 }
 0x4fa   :  { %6301 = vmatmul.msk.bf16.gmra.mxu3 %vm430_vm2, %v1978_v15  ;;  %6375 = vmatmul.msk.bf16.gmra.mxu2 %vm430_vm2, %v3243_v23 }
 0x4fb   :  { %6440 = vmatmul.msk.bf16.gmra.mxu0 %vm430_vm2, %v8659_v16  ;;  %v8773_v43 = vpop.f32.mrf.mxu2  ;;  %v2764_v16 = vld [vmem:[#allocation2 + $0x109] sm:$0xff] }
 0x4fd   :  { %v2200_v40 = vpop.f32.mrf.mxu3  ;;  %v2957_v13 = vpop.f32.mrf.mxu1 }
 0x4fe   :  { %v8771_v57 = vadd.f32 %v2200_v40, %v8597_v56  ;;  %v8777_v51 = vpop.f32.mrf.mxu0  ;;  %v8779_v46 = vadd.f32 %v2957_v13, %v2683_v41  ;;  %v1979_v56 = vpack.c.bf16 %v1947_v58, %v1946_v21  ;;  %v2684_v40 = vadd.f32 %v8245_v38, %v8351_v34 }
 0x4ff   :  { %11716 = vst [vmem:[#allocation78_spill] sm:$0xff] %v8777_v51  ;;  %v8793_v51 = vpack.c.bf16 %v2765_v2, %v2764_v16 }
 0x503   :  { %v8784_v23 = vpop.f32.mrf.mxu2 }
 0x505   :  { %v2202_v15 = vpop.f32.mrf.mxu3  ;;  %v2960_v19 = vpop.f32.mrf.mxu1 }
 0x506   :  { %v8782_v0 = vadd.f32 %v2202_v15, %v8604_v33  ;;  %v8789_v41 = vpop.f32.mrf.mxu0  ;;  %v8791_v13 = vadd.f32 %v2960_v19, %v2684_v40  ;;  %v3244_v33 = vpack.c.bf16 %v3187_v47, %v3186_v30  ;;  %v2685_v19 = vadd.f32 %v8254_v1, %v8358_v24  ;;  %v3606_v40 = vld [vmem:[#allocation2 + $0x38] sm:$0xff]  ;;  %v2767_v47 = vld [vmem:[#allocation2 + $0x129] sm:$0xff] }
 0x507   :  { %11717 = vst [vmem:[#allocation79_spill] sm:$0xff] %v8789_v41  ;;  %v3188_v1 = vld [vmem:[#allocation2 + $0xc2] sm:$0xff]  ;;  %v3189_v24 = vld [vmem:[#allocation2 + $0xca] sm:$0xff] }
 0x508   :  { %6347 = vmatmul.msk.bf16.gmra.mxu1 %vm430_vm2, %v8793_v51 }
 0x50a   :  { %6302 = vmatmul.msk.bf16.gmra.mxu3 %vm430_vm2, %v1979_v56  ;;  %6376 = vmatmul.msk.bf16.gmra.mxu2 %vm430_vm2, %v3244_v33  ;;  %v3605_v56 = vld [vmem:[#allocation2 + $0x30] sm:$0xff] }
 0x50b   :  { %6441 = vmatmul.msk.bf16.gmra.mxu0 %vm430_vm2, %v8681_v11  ;;  %v8803_v34 = vpop.f32.mrf.mxu2  ;;  %v2766_v11 = vld [vmem:[#allocation2 + $0x121] sm:$0xff] }
 0x50d   :  { %v2205_v15 = vpop.f32.mrf.mxu3  ;;  %v2962_v21 = vpop.f32.mrf.mxu1 }
 0x50e   :  { %v8801_v38 = vadd.f32 %v2205_v15, %v8618_v45  ;;  %v8807_v58 = vpop.f32.mrf.mxu0  ;;  %v8809_v16 = vadd.f32 %v2962_v21, %v2685_v19  ;;  %v3669_v45 = vpack.c.bf16 %v3606_v40, %v3605_v56  ;;  %v2686_v15 = vadd.f32 %v8261_v12, %v8369_v54 }
 0x50f   :  { %11718 = vst [vmem:[#allocation80_spill] sm:$0xff] %v8807_v58  ;;  %v8823_v58 = vpack.c.bf16 %v2767_v47, %v2766_v11 }
 0x513   :  { %v8814_v33 = vpop.f32.mrf.mxu2 }
 0x515   :  { %v2207_v2 = vpop.f32.mrf.mxu3  ;;  %v2965_v41 = vpop.f32.mrf.mxu1 }
 0x516   :  { %v8812_v30 = vadd.f32 %v2207_v2, %v8629_v48  ;;  %v8819_v19 = vpop.f32.mrf.mxu0  ;;  %v8821_v21 = vadd.f32 %v2965_v41, %v2686_v15  ;;  %v3245_v48 = vpack.c.bf16 %v3189_v24, %v3188_v1  ;;  %v2687_v41 = vadd.f32 %v8270_v62, %v8376_v26  ;;  %v3608_v15 = vld [vmem:[#allocation2 + $0x50] sm:$0xff]  ;;  %v2769_v24 = vld [vmem:[#allocation2 + $0x141] sm:$0xff] }
 0x517   :  { %11719 = vst [vmem:[#allocation81_spill] sm:$0xff] %v8819_v19  ;;  %v3190_v62 = vld [vmem:[#allocation2 + $0xda] sm:$0xff]  ;;  %v3191_v26 = vld [vmem:[#allocation2 + $0xe2] sm:$0xff] }
 0x518   :  { %6348 = vmatmul.msk.bf16.gmra.mxu1 %vm430_vm2, %v8823_v58 }
 0x51a   :  { %6403 = vmatmul.msk.bf16.vlgmr.msra.gmra.mxu3 %vm430_vm2, %v3669_v45  ;;  %6377 = vmatmul.msk.bf16.gmra.mxu2 %vm430_vm2, %v3245_v48  ;;  %v3607_v45 = vld [vmem:[#allocation2 + $0x48] sm:$0xff] }
 0x51b   :  { %6442 = vmatmul.msk.bf16.gmra.mxu0 %vm430_vm2, %v8703_v20  ;;  %v8833_v54 = vpop.f32.mrf.mxu2  ;;  %v2768_v20 = vld [vmem:[#allocation2 + $0x139] sm:$0xff] }
 0x51d   :  { %v2210_v2 = vpop.f32.mrf.mxu3  ;;  %v2967_v56 = vpop.f32.mrf.mxu1 }
 0x51e   :  { %v8831_v12 = vadd.f32 %v2210_v2, %v8643_v25  ;;  %v8837_v40 = vpop.f32.mrf.mxu0  ;;  %v8839_v11 = vadd.f32 %v2967_v56, %v2687_v41  ;;  %v3670_v25 = vpack.c.bf16 %v3608_v15, %v3607_v45  ;;  %v2688_v2 = vadd.f32 %v8277_v3, %v8387_v32 }
 0x51f   :  { %11720 = vst [vmem:[#allocation82_spill] sm:$0xff] %v8837_v40  ;;  %v8853_v40 = vpack.c.bf16 %v2769_v24, %v2768_v20 }
 0x523   :  { %v8844_v48 = vpop.f32.mrf.mxu2 }
 0x525   :  { %v2212_v47 = vpop.f32.mrf.mxu3  ;;  %v2970_v19 = vpop.f32.mrf.mxu1 }
 0x526   :  { %v8842_v1 = vadd.f32 %v2212_v47, %v8654_v4  ;;  %v8851_v56 = vadd.f32 %v2970_v19, %v2688_v2  ;;  %v3246_v4 = vpack.c.bf16 %v3191_v26, %v3190_v62  ;;  %v2689_v19 = vadd.f32 %v8286_v59, %v8394_v36  ;;  %v3609_v2 = vld [vmem:[#allocation2 + $0x60] sm:$0xff]  ;;  %v3610_v62 = vld [vmem:[#allocation2 + $0x68] sm:$0xff]  ;;  %v3192_v36 = vld [vmem:[#allocation2 + $0xf2] sm:$0xff] }
 0x527   :  { %v8849_v41 = vpop.f32.mrf.mxu0  ;;  %v2771_v26 = vld [vmem:[#allocation2 + $0x159] sm:$0xff]  ;;  %v2690_v59 = vadd.f32 %v8293_v50, %v8405_v31 }
 0x528   :  { %11721 = vst [vmem:[#allocation83_spill] sm:$0xff] %v8849_v41  ;;  %6349 = vmatmul.msk.bf16.gmra.mxu1 %vm430_vm2, %v8853_v40 }
 0x52a   :  { %6404 = vmatmul.msk.bf16.gmra.mxu3 %vm430_vm2, %v3670_v25  ;;  %6378 = vmatmul.msk.bf16.gmra.mxu2 %vm430_vm2, %v3246_v4  ;;  %v3671_v4 = vpack.c.bf16 %v3610_v62, %v3609_v2 }
 0x52b   :  { %6443 = vmatmul.msk.bf16.gmra.mxu0 %vm430_vm2, %v8729_v61  ;;  %v3380_v32 = vpop.f32.mrf.mxu2 }
 0x52c   :  { %v8866_v45 = vadd.f32 %v3380_v32, %v8727_v27  ;;  %v3193_v27 = vld [vmem:[#allocation2 + $0xfa] sm:$0xff] }
 0x52d   :  { %v2215_v47 = vpop.f32.mrf.mxu3  ;;  %v2972_v15 = vpop.f32.mrf.mxu1 }
 0x52e   :  { %v8861_v3 = vadd.f32 %v2215_v47, %v8669_v9  ;;  %v8870_v24 = vadd.f32 %v2972_v15, %v2689_v19  ;;  %v2770_v9 = vld [vmem:[#allocation2 + $0x151] sm:$0xff] }
 0x52f   :  { %v8868_v20 = vpop.f32.mrf.mxu0 }
 0x530   :  { %11722 = vst [vmem:[#allocation84_spill] sm:$0xff] %v8868_v20 }
 0x533   :  { %v3382_v47 = vpop.f32.mrf.mxu2 }
 0x534   :  { %v8878_v32 = vadd.f32 %v3382_v47, %v8745_v18  ;;  %v2691_v18 = vadd.f32 %v8302_v63, %v8412_v49  ;;  %v2692_v63 = vadd.f32 %v8309_v17, %v8423_v22  ;;  %v3194_v49 = vld [vmem:[#allocation2 + $0x10a] sm:$0xff] }
 0x535   :  { %v2217_v25 = vpop.f32.mrf.mxu3  ;;  %v2975_v19 = vpop.f32.mrf.mxu1 }
 0x536   :  { %v8873_v61 = vadd.f32 %v2217_v25, %v8676_v52  ;;  %v8881_v15 = vadd.f32 %v2975_v19, %v2690_v59  ;;  %v8885_v52 = vpack.c.bf16 %v2771_v26, %v2770_v9  ;;  %v3247_v25 = vpack.c.bf16 %v3193_v27, %v3192_v36  ;;  %v3611_v59 = vld [vmem:[#allocation2 + $0x78] sm:$0xff]  ;;  %v3612_v36 = vld [vmem:[#allocation2 + $0x80] sm:$0xff] }
 0x537   :  { %v2773_v27 = vld [vmem:[#allocation2 + $0x171] sm:$0xff]  ;;  %v3672_v19 = vpack.c.bf16 %v3612_v36, %v3611_v59 }
 0x538   :  { %v8883_v20 = vpop.f32.mrf.mxu0  ;;  %6350 = vmatmul.msk.bf16.gmra.mxu1 %vm430_vm2, %v8885_v52 }
 0x539   :  { %11723 = vst [vmem:[#allocation85_spill] sm:$0xff] %v8883_v20  ;;  %v11737_v20 = vld [vmem:[#allocation5_spill] sm:$0xff] }
 0x53a   :  { %6405 = vmatmul.msk.bf16.gmra.mxu3 %vm430_vm2, %v3671_v4  ;;  %6379 = vmatmul.msk.bf16.gmra.mxu2 %vm430_vm2, %v3247_v25 }
 0x53b   :  { %6444 = vmatmul.msk.bf16.gmra.mxu0 %vm430_vm2, %v8763_v7 }
 0x53d   :  { %v2220_v2 = vpop.f32.mrf.mxu3  ;;  %v3385_v31 = vpop.f32.mrf.mxu2 }
 0x53e   :  { %v8893_v50 = vadd.f32 %v2220_v2, %v8691_v37  ;;  %v8898_v62 = vadd.f32 %v3385_v31, %v8761_v53  ;;  %v2977_v9 = vpop.f32.mrf.mxu1  ;;  %v2772_v37 = vld [vmem:[#allocation2 + $0x169] sm:$0xff]  ;;  %v3195_v53 = vld [vmem:[#allocation2 + $0x112] sm:$0xff] }
 0x53f   :  { %v8900_v26 = vadd.f32 %v2977_v9, %v2691_v18 }
 0x540   :  { %v8902_v4 = vpop.f32.mrf.mxu0 }
 0x541   :  { %11724 = vst [vmem:[#allocation86_spill] sm:$0xff] %v8902_v4  ;;  %v3198_v4 = vld [vmem:[#allocation2 + $0x13a] sm:$0xff] }
 0x545   :  { %v2222_v47 = vpop.f32.mrf.mxu3  ;;  %v3387_v25 = vpop.f32.mrf.mxu2 }
 0x546   :  { %v8905_v7 = vadd.f32 %v2222_v47, %v8698_v39  ;;  %v8910_v2 = vadd.f32 %v3387_v25, %v8779_v46  ;;  %v2980_v31 = vpop.f32.mrf.mxu1  ;;  %v8917_v39 = vpack.c.bf16 %v2773_v27, %v2772_v37  ;;  %v3248_v47 = vpack.c.bf16 %v3195_v53, %v3194_v49  ;;  %v3614_v49 = vld [vmem:[#allocation2 + $0x98] sm:$0xff]  ;;  %v2775_v53 = vld [vmem:[#allocation2 + $0x189] sm:$0xff] }
 0x547   :  { %v8913_v18 = vadd.f32 %v2980_v31, %v2692_v63  ;;  %v2693_v46 = vadd.f32 %v8319_v14, %v8430_v29  ;;  %v3613_v63 = vld [vmem:[#allocation2 + $0x90] sm:$0xff]  ;;  %v11727_v14 = vld [vmem:[#allocation11_spill] sm:$0xff] }
 0x548   :  { %v8915_v9 = vpop.f32.mrf.mxu0  ;;  %6351 = vmatmul.msk.bf16.gmra.mxu1 %vm430_vm2, %v8917_v39  ;;  %v3673_v31 = vpack.c.bf16 %v3614_v49, %v3613_v63  ;;  %v2694_v29 = vadd.f32 %v11727_v14, %v8445_v6  ;;  %v11729_v63 = vld [vmem:[#allocation3_spill] sm:$0xff]  ;;  %v11731_v14 = vld [vmem:[#allocation12_spill] sm:$0xff] }
 0x549   :  { %11725 = vst [vmem:[#allocation87_spill] sm:$0xff] %v8915_v9  ;;  %v1865_v49 = vadd.f32 %v8739_v10, %v11729_v63  ;;  %v3615_v63 = vld [vmem:[#allocation2 + $0xa8] sm:$0xff] }
 0x54a   :  { %6406 = vmatmul.msk.bf16.gmra.mxu3 %vm430_vm2, %v3672_v19  ;;  %6380 = vmatmul.msk.bf16.gmra.mxu2 %vm430_vm2, %v3248_v47 }
 0x54b   :  { %6445 = vmatmul.msk.bf16.gmra.mxu0 %vm430_vm2, %v8793_v51 }
 0x54d   :  { %v2225_v59 = vpop.f32.mrf.mxu3  ;;  %v3390_v22 = vpop.f32.mrf.mxu2 }
 0x54e   :  { %v8925_v17 = vadd.f32 %v2225_v59, %v8713_v55  ;;  %v8930_v36 = vadd.f32 %v3390_v22, %v8791_v13  ;;  %v2982_v37 = vpop.f32.mrf.mxu1  ;;  %v2774_v55 = vld [vmem:[#allocation2 + $0x181] sm:$0xff]  ;;  %v3197_v59 = vld [vmem:[#allocation2 + $0x12a] sm:$0xff] }
 0x54f   :  { %v8932_v27 = vadd.f32 %v2982_v37, %v2693_v46  ;;  %v3196_v13 = vld [vmem:[#allocation2 + $0x122] sm:$0xff] }
 0x550   :  { %v8934_v19 = vpop.f32.mrf.mxu0 }
 0x551   :  { %11726 = vst [vmem:[#allocation88_spill] sm:$0xff] %v8934_v19 }
 0x555   :  { %v2227_v25 = vpop.f32.mrf.mxu3  ;;  %v3392_v47 = vpop.f32.mrf.mxu2 }
 0x556   :  { %v8937_v51 = vadd.f32 %v2227_v25, %v8722_v8  ;;  %v8942_v22 = vadd.f32 %v3392_v47, %v8809_v16  ;;  %v2985_v46 = vpop.f32.mrf.mxu1  ;;  %v8949_v8 = vpack.c.bf16 %v2775_v53, %v2774_v55  ;;  %v3249_v25 = vpack.c.bf16 %v3197_v59, %v3196_v13  ;;  %v11730_v47 = vld [vmem:[#allocation25_spill] sm:$0xff]  ;;  %v11733_v59 = vld [vmem:[#allocation4_spill] sm:$0xff] }
 0x557   :  { %v8945_v37 = vadd.f32 %v2985_v46, %v2694_v29  ;;  %v2695_v55 = vadd.f32 %v11731_v14, %v11730_v47  ;;  %v1867_v46 = vadd.f32 %v8754_v42, %v11733_v59  ;;  %v11734_v14 = vld [vmem:[#allocation27_spill] sm:$0xff] }
 0x558   :  { %v8947_v19 = vpop.f32.mrf.mxu0  ;;  %6352 = vmatmul.msk.bf16.gmra.mxu1 %vm430_vm2, %v8949_v8 }
 0x559   :  { %11728 = vst [vmem:[#allocation11_spill] sm:$0xff] %v8947_v19  ;;  %v2777_v19 = vld [vmem:[#allocation2 + $0x1d1] sm:$0xff] }
 0x55a   :  { %6407 = vmatmul.msk.bf16.gmra.mxu3 %vm430_vm2, %v3673_v31  ;;  %6381 = vmatmul.msk.bf16.gmra.mxu2 %vm430_vm2, %v3249_v25 }
 0x55b   :  { %6446 = vmatmul.msk.bf16.gmra.mxu0 %vm430_vm2, %v8823_v58  ;;  %v3616_v58 = vld [vmem:[#allocation2 + $0xb0] sm:$0xff] }
 0x55c   :  { %v3674_v9 = vpack.c.bf16 %v3616_v58, %v3615_v63  ;;  %v1870_v63 = vadd.f32 %v8773_v43, %v11737_v20  ;;  %v11741_v20 = vld [vmem:[#allocation6_spill] sm:$0xff] }
 0x55d   :  { %v2230_v6 = vpop.f32.mrf.mxu3  ;;  %v3395_v31 = vpop.f32.mrf.mxu2 }
 0x55e   :  { %v8958_v16 = vadd.f32 %v2230_v6, %v1865_v49  ;;  %v8963_v53 = vadd.f32 %v3395_v31, %v8821_v21  ;;  %v2987_v29 = vpop.f32.mrf.mxu1  ;;  %v2776_v6 = vld [vmem:[#allocation2 + $0x1c9] sm:$0xff] }
 0x55f   :  { %v8965_v10 = vadd.f32 %v2987_v29, %v2695_v55  ;;  %v11735_v21 = vld [vmem:[#allocation13_spill] sm:$0xff]  ;;  %v3199_v55 = vld [vmem:[#allocation2 + $0x142] sm:$0xff] }
 0x560   :  { %v8967_v13 = vpop.f32.mrf.mxu0  ;;  %v2696_v31 = vadd.f32 %v11735_v21, %v11734_v14  ;;  %v1872_v21 = vadd.f32 %v8784_v23, %v11741_v20 }
 0x561   :  { %11732 = vst [vmem:[#allocation3_spill] sm:$0xff] %v8967_v13 }
 0x565   :  { %v2232_v25 = vpop.f32.mrf.mxu3  ;;  %v3397_v47 = vpop.f32.mrf.mxu2 }
 0x566   :  { %v8971_v49 = vadd.f32 %v2232_v25, %v1867_v46  ;;  %v8976_v29 = vadd.f32 %v3397_v47, %v8839_v11  ;;  %v2990_v13 = vpop.f32.mrf.mxu1  ;;  %v2824_v46 = vpack.c.bf16 %v2777_v19, %v2776_v6  ;;  %v3250_v25 = vpack.c.bf16 %v3199_v55, %v3198_v4  ;;  %v11739_v47 = vld [vmem:[#allocation14_spill] sm:$0xff]  ;;  %v3617_v55 = vld [vmem:[#allocation2 + $0xc0] sm:$0xff] }
 0x567   :  { %v8979_v42 = vadd.f32 %v2990_v13, %v2696_v31  ;;  %v11738_v13 = vld [vmem:[#allocation29_spill] sm:$0xff] }
 0x568   :  { %v8981_v59 = vpop.f32.mrf.mxu0  ;;  %6353 = vmatmul.msk.bf16.gmra.mxu1 %vm430_vm2, %v2824_v46  ;;  %v2697_v14 = vadd.f32 %v11739_v47, %v11738_v13  ;;  %v11743_v47 = vld [vmem:[#allocation31_spill] sm:$0xff] }
 0x569   :  { %11736 = vst [vmem:[#allocation25_spill] sm:$0xff] %v8981_v59  ;;  %v3200_v59 = vld [vmem:[#allocation2 + $0x152] sm:$0xff] }
 0x56a   :  { %6408 = vmatmul.msk.bf16.gmra.mxu3 %vm430_vm2, %v3674_v9  ;;  %6382 = vmatmul.msk.bf16.gmra.mxu2 %vm430_vm2, %v3250_v25  ;;  %v2778_v25 = vld [vmem:[#allocation2 + $0x1e1] sm:$0xff] }
 0x56b   :  { %6447 = vmatmul.msk.bf16.gmra.mxu0 %vm430_vm2, %v8853_v40  ;;  %v3618_v40 = vld [vmem:[#allocation2 + $0xc8] sm:$0xff] }
 0x56d   :  { %v2235_v58 = vpop.f32.mrf.mxu3  ;;  %v3400_v9 = vpop.f32.mrf.mxu2 }
 0x56e   :  { %v8989_v11 = vadd.f32 %v2235_v58, %v1870_v63  ;;  %v8994_v19 = vadd.f32 %v3400_v9, %v8851_v56  ;;  %v2992_v4 = vpop.f32.mrf.mxu1  ;;  %v2779_v63 = vld [vmem:[#allocation2 + $0x1e9] sm:$0xff]  ;;  %v3675_v58 = vpack.c.bf16 %v3618_v40, %v3617_v55  ;;  %v11744_v56 = vld [vmem:[#allocation15_spill] sm:$0xff] }
 0x56f   :  { %v8996_v6 = vadd.f32 %v2992_v4, %v2697_v14  ;;  %v2698_v9 = vadd.f32 %v11744_v56, %v11743_v47  ;;  %v3201_v14 = vld [vmem:[#allocation2 + $0x15a] sm:$0xff]  ;;  %v9012_v20 = vpack.c.bf16 %v2779_v63, %v2778_v25  ;;  %v11748_v25 = vld [vmem:[#allocation33_spill] sm:$0xff]  ;;  %v11749_v63 = vld [vmem:[#allocation16_spill] sm:$0xff] }
 0x570   :  { %v8998_v43 = vpop.f32.mrf.mxu0  ;;  %v11746_v55 = vld [vmem:[#allocation7_spill] sm:$0xff]  ;;  %v11750_v56 = vld [vmem:[#allocation8_spill] sm:$0xff] }
 0x571   :  { %11740 = vst [vmem:[#allocation12_spill] sm:$0xff] %v8998_v43  ;;  %v1875_v40 = vadd.f32 %v8803_v34, %v11746_v55  ;;  %v3620_v55 = vld [vmem:[#allocation2 + $0xe0] sm:$0xff] }
 0x575   :  { %v2237_v31 = vpop.f32.mrf.mxu3  ;;  %v3402_v13 = vpop.f32.mrf.mxu2 }
 0x576   :  { %v9002_v46 = vadd.f32 %v2237_v31, %v1872_v21  ;;  %v9007_v4 = vadd.f32 %v3402_v13, %v8870_v24  ;;  %v2995_v43 = vpop.f32.mrf.mxu1  ;;  %v3251_v31 = vpack.c.bf16 %v3201_v14, %v3200_v59 }
 0x577   :  { %v9010_v23 = vadd.f32 %v2995_v43, %v2698_v9  ;;  %v1877_v9 = vadd.f32 %v8814_v33, %v11750_v56 }
 0x578   :  { %11742 = vst [vmem:[#allocation4_spill] sm:$0xff] %v9002_v46  ;;  %v9014_v21 = vpop.f32.mrf.mxu0  ;;  %6354 = vmatmul.msk.bf16.gmra.mxu1 %vm430_vm2, %v9012_v20 }
 0x579   :  { %11745 = vst [vmem:[#allocation27_spill] sm:$0xff] %v9014_v21 }
 0x57a   :  { %6409 = vmatmul.msk.bf16.gmra.mxu3 %vm430_vm2, %v3675_v58  ;;  %6383 = vmatmul.msk.bf16.gmra.mxu2 %vm430_vm2, %v3251_v31  ;;  %v2699_v58 = vadd.f32 %v11749_v63, %v11748_v25  ;;  %v3619_v31 = vld [vmem:[#allocation2 + $0xd8] sm:$0xff]  ;;  %v11753_v63 = vld [vmem:[#allocation35_spill] sm:$0xff] }
 0x57b   :  { %6448 = vmatmul.msk.bf16.gmra.mxu0 %vm430_vm2, %v8885_v52  ;;  %v3676_v41 = vpack.c.bf16 %v3620_v55, %v3619_v31 }
 0x57d   :  { %v2240_v47 = vpop.f32.mrf.mxu3  ;;  %v3405_v43 = vpop.f32.mrf.mxu2 }
 0x57e   :  { %v9023_v24 = vadd.f32 %v2240_v47, %v1875_v40  ;;  %v9028_v59 = vadd.f32 %v3405_v43, %v8881_v15  ;;  %v2997_v13 = vpop.f32.mrf.mxu1  ;;  %v2780_v40 = vld [vmem:[#allocation2 + $0x1f9] sm:$0xff]  ;;  %v2781_v47 = vld [vmem:[#allocation2 + $0x201] sm:$0xff]  ;;  %v11754_v15 = vld [vmem:[#allocation17_spill] sm:$0xff] }
 0x57f   :  { %v9030_v34 = vadd.f32 %v2997_v13, %v2699_v58  ;;  %v2700_v43 = vadd.f32 %v11754_v15, %v11753_v63  ;;  %v3203_v58 = vld [vmem:[#allocation2 + $0x172] sm:$0xff] }
 0x580   :  { %11747 = vst [vmem:[#allocation13_spill] sm:$0xff] %v9023_v24  ;;  %v9034_v21 = vpop.f32.mrf.mxu0  ;;  %v3202_v24 = vld [vmem:[#allocation2 + $0x16a] sm:$0xff] }
 0x581   :  { %11751 = vst [vmem:[#allocation5_spill] sm:$0xff] %v9034_v21  ;;  %v9046_v21 = vpack.c.bf16 %v2781_v47, %v2780_v40  ;;  %v11758_v40 = vld [vmem:[#allocation37_spill] sm:$0xff]  ;;  %v11759_v47 = vld [vmem:[#allocation18_spill] sm:$0xff] }
 0x585   :  { %v2242_v14 = vpop.f32.mrf.mxu3  ;;  %v3407_v25 = vpop.f32.mrf.mxu2 }
 0x586   :  { %v9036_v52 = vadd.f32 %v2242_v14, %v1877_v9  ;;  %v9041_v13 = vadd.f32 %v3407_v25, %v8900_v26  ;;  %v3000_v33 = vpop.f32.mrf.mxu1  ;;  %v3252_v9 = vpack.c.bf16 %v3203_v58, %v3202_v24  ;;  %v11755_v14 = vld [vmem:[#allocation9_spill] sm:$0xff]  ;;  %v2701_v24 = vadd.f32 %v11759_v47, %v11758_v40  ;;  %v11763_v40 = vld [vmem:[#allocation19_spill] sm:$0xff] }
 0x587   :  { %v9044_v56 = vadd.f32 %v3000_v33, %v2700_v43  ;;  %v1880_v31 = vadd.f32 %v8833_v54, %v11755_v14  ;;  %v11760_v43 = vld [vmem:[#allocation10_spill] sm:$0xff] }
 0x588   :  { %11752 = vst [vmem:[#allocation29_spill] sm:$0xff] %v9036_v52  ;;  %6355 = vmatmul.msk.bf16.gmra.mxu1 %vm430_vm2, %v9046_v21  ;;  %v1882_v58 = vadd.f32 %v8844_v48, %v11760_v43  ;;  %v11762_v52 = vld [vmem:[#allocation39_spill] sm:$0xff] }
 0x589   :  { %v2702_v47 = vadd.f32 %v11763_v40, %v11762_v52 }
 0x58a   :  { %6410 = vmatmul.msk.bf16.gmra.mxu3 %vm430_vm2, %v3676_v41  ;;  %6384 = vmatmul.msk.bf16.gmra.mxu2 %vm430_vm2, %v3252_v9  ;;  %v9057_v41 = vpop.f32.mrf.mxu0  ;;  %v3621_v9 = vld [vmem:[#allocation2 + $0xf0] sm:$0xff] }
 0x58b   :  { %6449 = vmatmul.msk.bf16.gmra.mxu0 %vm430_vm2, %v8917_v39  ;;  %11757 = vst [vmem:[#allocation6_spill] sm:$0xff] %v9057_v41  ;;  %v3622_v39 = vld [vmem:[#allocation2 + $0xf8] sm:$0xff] }
 0x58c   :  { %v3677_v41 = vpack.c.bf16 %v3622_v39, %v3621_v9 }
 0x58d   :  { %v2245_v55 = vpop.f32.mrf.mxu3  ;;  %v3410_v25 = vpop.f32.mrf.mxu2 }
 0x58e   :  { %v9055_v26 = vadd.f32 %v2245_v55, %v1880_v31  ;;  %v9062_v63 = vadd.f32 %v3410_v25, %v8913_v18  ;;  %v3002_v54 = vpop.f32.mrf.mxu1  ;;  %v2782_v31 = vld [vmem:[#allocation2 + $0x211] sm:$0xff]  ;;  %v2783_v55 = vld [vmem:[#allocation2 + $0x219] sm:$0xff]  ;;  %v3204_v18 = vld [vmem:[#allocation2 + $0x182] sm:$0xff] }
 0x58f   :  { %v9064_v15 = vadd.f32 %v3002_v54, %v2701_v24  ;;  %v3205_v25 = vld [vmem:[#allocation2 + $0x18a] sm:$0xff]  ;;  %v9080_v43 = vpack.c.bf16 %v2783_v55, %v2782_v31 }
 0x590   :  { %11756 = vst [vmem:[#allocation14_spill] sm:$0xff] %v9055_v26 }
 0x592   :  { %v9072_v46 = vpop.f32.mrf.mxu0 }
 0x593   :  { %11764 = vst [vmem:[#allocation15_spill] sm:$0xff] %v9072_v46  ;;  %v11770_v46 = vld [vmem:[#allocation43_spill] sm:$0xff] }
 0x595   :  { %v2247_v33 = vpop.f32.mrf.mxu3  ;;  %v3412_v26 = vpop.f32.mrf.mxu2 }
 0x596   :  { %v9068_v14 = vadd.f32 %v2247_v33, %v1882_v58  ;;  %v9075_v24 = vadd.f32 %v3412_v26, %v8932_v27  ;;  %v3005_v48 = vpop.f32.mrf.mxu1  ;;  %v3253_v58 = vpack.c.bf16 %v3205_v25, %v3204_v18  ;;  %v11766_v26 = vld [vmem:[#allocation41_spill] sm:$0xff]  ;;  %v3623_v18 = vld [vmem:[#allocation2 + $0x108] sm:$0xff] }
 0x597   :  { %v9078_v54 = vadd.f32 %v3005_v48, %v2702_v47  ;;  %v3624_v25 = vld [vmem:[#allocation2 + $0x110] sm:$0xff] }
 0x598   :  { %11761 = vst [vmem:[#allocation31_spill] sm:$0xff] %v9068_v14  ;;  %6356 = vmatmul.msk.bf16.gmra.mxu1 %vm430_vm2, %v9080_v43  ;;  %v2785_v48 = vld [vmem:[#allocation2 + $0x231] sm:$0xff] }
 0x59a   :  { %6411 = vmatmul.msk.bf16.gmra.mxu3 %vm430_vm2, %v3677_v41  ;;  %6385 = vmatmul.msk.bf16.gmra.mxu2 %vm430_vm2, %v3253_v58  ;;  %v11767_v41 = vld [vmem:[#allocation20_spill] sm:$0xff]  ;;  %v9097_v40 = vpop.f32.mrf.mxu0  ;;  %v3678_v58 = vpack.c.bf16 %v3624_v25, %v3623_v18 }
 0x59b   :  { %6450 = vmatmul.msk.bf16.gmra.mxu0 %vm430_vm2, %v8949_v8  ;;  %v2703_v9 = vadd.f32 %v11767_v41, %v11766_v26  ;;  %11768 = vst [vmem:[#allocation33_spill] sm:$0xff] %v9097_v40  ;;  %v11771_v26 = vld [vmem:[#allocation21_spill] sm:$0xff] }
 0x59c   :  { %v2704_v41 = vadd.f32 %v11771_v26, %v11770_v46 }
 0x59d   :  { %v3811_v33 = vpop.f32.mrf.mxu3  ;;  %v3415_v52 = vpop.f32.mrf.mxu2 }
 0x59e   :  { %v9088_v27 = vadd.f32 %v3811_v33, %v8866_v45  ;;  %v9093_v39 = vadd.f32 %v3415_v52, %v8945_v37  ;;  %v3007_v31 = vpop.f32.mrf.mxu1  ;;  %v2784_v45 = vld [vmem:[#allocation2 + $0x229] sm:$0xff]  ;;  %v3207_v52 = vld [vmem:[#allocation2 + $0x1d2] sm:$0xff] }
 0x59f   :  { %v9095_v55 = vadd.f32 %v3007_v31, %v2703_v9  ;;  %v3206_v37 = vld [vmem:[#allocation2 + $0x1ca] sm:$0xff] }
 0x5a0   :  { %11765 = vst [vmem:[#allocation7_spill] sm:$0xff] %v9088_v27  ;;  %v9110_v27 = vpack.c.bf16 %v2785_v48, %v2784_v45  ;;  %v11774_v45 = vld [vmem:[#allocation45_spill] sm:$0xff]  ;;  %v11775_v48 = vld [vmem:[#allocation22_spill] sm:$0xff] }
 0x5a2   :  { %v9114_v25 = vpop.f32.mrf.mxu0 }
 0x5a3   :  { %11772 = vst [vmem:[#allocation8_spill] sm:$0xff] %v9114_v25 }
 0x5a5   :  { %v3813_v47 = vpop.f32.mrf.mxu3  ;;  %v3417_v33 = vpop.f32.mrf.mxu2 }
 0x5a6   :  { %v9100_v8 = vadd.f32 %v3813_v47, %v8878_v32  ;;  %v9105_v9 = vadd.f32 %v3417_v33, %v8965_v10  ;;  %v3010_v31 = vpop.f32.mrf.mxu1  ;;  %v4065_v32 = vld [vmem:[#allocation2 + $0x199] sm:$0xff]  ;;  %v4066_v47 = vld [vmem:[#allocation2 + $0x1a1] sm:$0xff]  ;;  %v2705_v33 = vadd.f32 %v11775_v48, %v11774_v45 }
 0x5a7   :  { %v9108_v40 = vadd.f32 %v3010_v31, %v2704_v41  ;;  %v4114_v18 = vpack.c.bf16 %v4066_v47, %v4065_v32  ;;  %v3625_v31 = vld [vmem:[#allocation2 + $0x120] sm:$0xff]  ;;  %v3626_v32 = vld [vmem:[#allocation2 + $0x128] sm:$0xff] }
 0x5a8   :  { %11769 = vst [vmem:[#allocation16_spill] sm:$0xff] %v9100_v8  ;;  %v3254_v8 = vpack.c.bf16 %v3207_v52, %v3206_v37  ;;  %6357 = vmatmul.msk.bf16.gmra.mxu1 %vm430_vm2, %v9110_v27  ;;  %v11779_v45 = vld [vmem:[#allocation23_spill] sm:$0xff] }
 0x5aa   :  { %6412 = vmatmul.msk.bf16.gmra.mxu3 %vm430_vm2, %v3678_v58  ;;  %6386 = vmatmul.msk.bf16.gmra.mxu2 %vm430_vm2, %v3254_v8  ;;  %v9131_v47 = vpop.f32.mrf.mxu0 }
 0x5ab   :  { %6451 = vmatmul.msk.bf16.gmra.mxu0 %vm430_vm2, %v4114_v18  ;;  %11777 = vst [vmem:[#allocation9_spill] sm:$0xff] %v9131_v47  ;;  %v2787_v18 = vld [vmem:[#allocation2 + $0x249] sm:$0xff] }
 0x5ad   :  { %v3816_v46 = vpop.f32.mrf.mxu3  ;;  %v3420_v58 = vpop.f32.mrf.mxu2 }
 0x5ae   :  { %v9119_v10 = vadd.f32 %v3816_v46, %v8898_v62  ;;  %v9124_v26 = vadd.f32 %v3420_v58, %v8979_v42  ;;  %v3012_v41 = vpop.f32.mrf.mxu1  ;;  %v2786_v62 = vld [vmem:[#allocation2 + $0x241] sm:$0xff]  ;;  %v3679_v46 = vpack.c.bf16 %v3626_v32, %v3625_v31  ;;  %v3209_v58 = vld [vmem:[#allocation2 + $0x1ea] sm:$0xff] }
 0x5af   :  { %v9126_v37 = vadd.f32 %v3012_v41, %v2705_v33  ;;  %v3208_v42 = vld [vmem:[#allocation2 + $0x1e2] sm:$0xff] }
 0x5b0   :  { %11773 = vst [vmem:[#allocation35_spill] sm:$0xff] %v9119_v10  ;;  %v11778_v10 = vld [vmem:[#allocation47_spill] sm:$0xff]  ;;  %v11782_v32 = vld [vmem:[#allocation24_spill] sm:$0xff] }
 0x5b1   :  { %v2706_v48 = vadd.f32 %v11779_v45, %v11778_v10  ;;  %v11781_v10 = vld [vmem:[#allocation49_spill] sm:$0xff] }
 0x5b2   :  { %v9153_v45 = vpop.f32.mrf.mxu0 }
 0x5b3   :  { %11783 = vst [vmem:[#allocation18_spill] sm:$0xff] %v9153_v45  ;;  %v3210_v45 = vld [vmem:[#allocation2 + $0x1fa] sm:$0xff] }
 0x5b5   :  { %v3818_v52 = vpop.f32.mrf.mxu3  ;;  %v3422_v25 = vpop.f32.mrf.mxu2 }
 0x5b6   :  { %v9129_v8 = vadd.f32 %v3818_v52, %v8910_v2  ;;  %v9136_v33 = vadd.f32 %v3422_v25, %v8996_v6  ;;  %v3015_v41 = vpop.f32.mrf.mxu1  ;;  %v9141_v2 = vpack.c.bf16 %v2787_v18, %v2786_v62  ;;  %v3255_v52 = vpack.c.bf16 %v3209_v58, %v3208_v42  ;;  %v3627_v58 = vld [vmem:[#allocation2 + $0x138] sm:$0xff] }
 0x5b7   :  { %v9139_v14 = vadd.f32 %v3015_v41, %v2706_v48  ;;  %v3628_v41 = vld [vmem:[#allocation2 + $0x140] sm:$0xff] }
 0x5b8   :  { %11776 = vst [vmem:[#allocation17_spill] sm:$0xff] %v9129_v8  ;;  %6358 = vmatmul.msk.bf16.gmra.mxu1 %vm430_vm2, %v9141_v2  ;;  %v3211_v8 = vld [vmem:[#allocation2 + $0x202] sm:$0xff] }
 0x5ba   :  { %6413 = vmatmul.msk.bf16.gmra.mxu3 %vm430_vm2, %v3679_v46  ;;  %6387 = vmatmul.msk.bf16.gmra.mxu2 %vm430_vm2, %v3255_v52  ;;  %v2707_v46 = vadd.f32 %v11782_v32, %v11781_v10  ;;  %v2789_v52 = vld [vmem:[#allocation2 + $0x261] sm:$0xff]  ;;  %v11786_v10 = vld [vmem:[#allocation26_spill] sm:$0xff] }
 0x5bb   :  { %6452 = vmatmul.msk.bf16.gmra.mxu0 %vm430_vm2, %v9012_v20 }
 0x5bd   :  { %v3821_v31 = vpop.f32.mrf.mxu3  ;;  %v3425_v25 = vpop.f32.mrf.mxu2 }
 0x5be   :  { %v9149_v6 = vadd.f32 %v3821_v31, %v8930_v36  ;;  %v9156_v62 = vadd.f32 %v3425_v25, %v9010_v23  ;;  %v3017_v18 = vpop.f32.mrf.mxu1  ;;  %v2788_v36 = vld [vmem:[#allocation2 + $0x259] sm:$0xff]  ;;  %v3680_v31 = vpack.c.bf16 %v3628_v41, %v3627_v58  ;;  %v3256_v58 = vpack.c.bf16 %v3211_v8, %v3210_v45  ;;  %v11789_v8 = vld [vmem:[#allocation53_spill] sm:$0xff]  ;;  %v11790_v45 = vld [vmem:[#allocation28_spill] sm:$0xff] }
 0x5bf   :  { %v9158_v48 = vadd.f32 %v3017_v18, %v2707_v46  ;;  %v5891_v23 = vld [vmem:[%s11505_s12] sm:$0x3]  ;;  %v9174_v18 = vpack.c.bf16 %v2789_v52, %v2788_v36  ;;  %v2709_v52 = vadd.f32 %v11790_v45, %v11789_v8  ;;  %v11794_v8 = vld [vmem:[#allocation30_spill] sm:$0xff] }
 0x5c0   :  { %11780 = vst [vmem:[#allocation37_spill] sm:$0xff] %v9149_v6  ;;  %v11785_v6 = vld [vmem:[#allocation51_spill] sm:$0xff] }
 0x5c1   :  { %v2708_v32 = vadd.f32 %v11786_v10, %v11785_v6  ;;  %v6468_v6 = vld [vmem:[%s11502_s5 + $0x20] sm:$0xf]  ;;  %v5921_v10 = vsel %vm255_vm0, %v5891_v23, 0 }
 0x5c2   :  { %v4660_v41 = vsel %vm1443_vm4, %v6468_v6, 0  ;;  %v3629_v6 = vld [vmem:[#allocation2 + $0x150] sm:$0xff] }
 0x5c3   :  { %4669 = vmatpush.bf16.msra.mxu1 %v4660_v41  ;;  %v2791_v41 = vld [vmem:[#allocation2 + $0x279] sm:$0xff] }
 0x5c5   :  { %v3823_v42 = vpop.f32.mrf.mxu3  ;;  %v3427_v47 = vpop.f32.mrf.mxu2 }
 0x5c6   :  { %v9161_v20 = vadd.f32 %v3823_v42, %v8942_v22  ;;  %v9169_v25 = vadd.f32 %v3427_v47, %v9030_v34  ;;  %v3020_v46 = vpop.f32.mrf.mxu1  ;;  %v9179_v42 = vpop.f32.mrf.mxu0 }
 0x5c7   :  { %v9172_v22 = vadd.f32 %v3020_v46, %v2708_v32  ;;  %11787 = vst [vmem:[#allocation39_spill] sm:$0xff] %v9179_v42  ;;  %5930 = vmatpush.bf16.msrb.mxu1 %v5921_v10 }
 0x5c8   :  { %11784 = vst [vmem:[#allocation10_spill] sm:$0xff] %v9161_v20  ;;  %6359 = vmatmul.msk.bf16.gmra.mxu1 %vm430_vm2, %v9174_v18 }
 0x5ca   :  { %6414 = vmatmul.msk.bf16.gmra.mxu3 %vm430_vm2, %v3680_v31  ;;  %6388 = vmatmul.msk.bf16.gmra.mxu2 %vm430_vm2, %v3256_v58  ;;  %v3630_v58 = vld [vmem:[#allocation2 + $0x158] sm:$0xff] }
 0x5cb   :  { %6453 = vmatmul.msk.bf16.gmra.mxu0 %vm430_vm2, %v9046_v21  ;;  %v2790_v21 = vld [vmem:[#allocation2 + $0x271] sm:$0xff]  ;;  %v3681_v10 = vpack.c.bf16 %v3630_v58, %v3629_v6 }
 0x5cc   :  { %v11797_v58 = vld [vmem:[#allocation57_spill] sm:$0xff] }
 0x5cd   :  { %v3826_v34 = vpop.f32.mrf.mxu3  ;;  %v3430_v36 = vpop.f32.mrf.mxu2 }
 0x5ce   :  { %v9189_v47 = vadd.f32 %v3826_v34, %v8963_v53  ;;  %v9194_v31 = vadd.f32 %v3430_v36, %v9044_v56  ;;  %v3022_v32 = vpop.f32.mrf.mxu1  ;;  %v9198_v42 = vpop.f32.mrf.mxu0  ;;  %v3212_v56 = vld [vmem:[#allocation2 + $0x212] sm:$0xff]  ;;  %v3213_v36 = vld [vmem:[#allocation2 + $0x21a] sm:$0xff] }
 0x5cf   :  { %v9196_v23 = vadd.f32 %v3022_v32, %v2709_v52  ;;  %11791 = vst [vmem:[#allocation41_spill] sm:$0xff] %v9198_v42  ;;  %v9211_v42 = vpack.c.bf16 %v2791_v41, %v2790_v21 }
 0x5d0   :  { %11788 = vst [vmem:[#allocation19_spill] sm:$0xff] %v9189_v47  ;;  %v11793_v47 = vld [vmem:[#allocation55_spill] sm:$0xff] }
 0x5d1   :  { %v2710_v45 = vadd.f32 %v11794_v8, %v11793_v47 }
 0x5d5   :  { %v3828_v46 = vpop.f32.mrf.mxu3  ;;  %v3432_v34 = vpop.f32.mrf.mxu2 }
 0x5d6   :  { %v9201_v53 = vadd.f32 %v3828_v46, %v8976_v29  ;;  %v9206_v52 = vadd.f32 %v3432_v34, %v9064_v15  ;;  %v3025_v32 = vpop.f32.mrf.mxu1  ;;  %v3257_v29 = vpack.c.bf16 %v3213_v36, %v3212_v56  ;;  %v9221_v47 = vpop.f32.mrf.mxu0  ;;  %v3631_v56 = vld [vmem:[#allocation2 + $0x168] sm:$0xff]  ;;  %v3632_v36 = vld [vmem:[#allocation2 + $0x170] sm:$0xff] }
 0x5d7   :  { %v9209_v20 = vadd.f32 %v3025_v32, %v2710_v45  ;;  %11796 = vst [vmem:[#allocation21_spill] sm:$0xff] %v9221_v47  ;;  %v2793_v32 = vld [vmem:[#allocation2 + $0x291] sm:$0xff]  ;;  %v11800_v47 = vld [vmem:[#allocation59_spill] sm:$0xff] }
 0x5d8   :  { %11792 = vst [vmem:[#allocation20_spill] sm:$0xff] %v9201_v53  ;;  %6360 = vmatmul.msk.bf16.gmra.mxu1 %vm430_vm2, %v9211_v42 }
 0x5da   :  { %6415 = vmatmul.msk.bf16.gmra.mxu3 %vm430_vm2, %v3681_v10  ;;  %6389 = vmatmul.msk.bf16.gmra.mxu2 %vm430_vm2, %v3257_v29  ;;  %v11798_v10 = vld [vmem:[#allocation32_spill] sm:$0xff]  ;;  %v3682_v29 = vpack.c.bf16 %v3632_v36, %v3631_v56 }
 0x5db   :  { %6454 = vmatmul.msk.bf16.gmra.mxu0 %vm430_vm2, %v9080_v43  ;;  %v2711_v21 = vadd.f32 %v11798_v10, %v11797_v58  ;;  %v3214_v58 = vld [vmem:[#allocation2 + $0x22a] sm:$0xff]  ;;  %v3215_v10 = vld [vmem:[#allocation2 + $0x232] sm:$0xff] }
 0x5dc   :  { %v11805_v36 = vld [vmem:[#allocation36_spill] sm:$0xff] }
 0x5dd   :  { %v3831_v46 = vpop.f32.mrf.mxu3  ;;  %v3435_v6 = vpop.f32.mrf.mxu2 }
 0x5de   :  { %v9219_v15 = vadd.f32 %v3831_v46, %v8994_v19  ;;  %v9226_v41 = vadd.f32 %v3435_v6, %v9078_v54  ;;  %v3027_v34 = vpop.f32.mrf.mxu1  ;;  %v2792_v19 = vld [vmem:[#allocation2 + $0x289] sm:$0xff]  ;;  %v9235_v54 = vpop.f32.mrf.mxu0 }
 0x5df   :  { %v9228_v8 = vadd.f32 %v3027_v34, %v2711_v21  ;;  %11802 = vst [vmem:[#allocation22_spill] sm:$0xff] %v9235_v54 }
 0x5e0   :  { %11795 = vst [vmem:[#allocation43_spill] sm:$0xff] %v9219_v15  ;;  %v11801_v15 = vld [vmem:[#allocation34_spill] sm:$0xff] }
 0x5e1   :  { %v2712_v53 = vadd.f32 %v11801_v15, %v11800_v47  ;;  %v11804_v47 = vld [vmem:[#allocation61_spill] sm:$0xff] }
 0x5e5   :  { %v3833_v45 = vpop.f32.mrf.mxu3  ;;  %v3437_v46 = vpop.f32.mrf.mxu2 }
 0x5e6   :  { %v9231_v43 = vadd.f32 %v3833_v45, %v9007_v4  ;;  %v9238_v6 = vadd.f32 %v3437_v46, %v9095_v55  ;;  %v3030_v21 = vpop.f32.mrf.mxu1  ;;  %v9243_v4 = vpack.c.bf16 %v2793_v32, %v2792_v19  ;;  %v3258_v45 = vpack.c.bf16 %v3215_v10, %v3214_v58  ;;  %v9260_v46 = vpop.f32.mrf.mxu0  ;;  %v3633_v10 = vld [vmem:[#allocation2 + $0x180] sm:$0xff] }
 0x5e7   :  { %v9241_v34 = vadd.f32 %v3030_v21, %v2712_v53  ;;  %v2713_v53 = vadd.f32 %v11805_v36, %v11804_v47  ;;  %11806 = vst [vmem:[#allocation23_spill] sm:$0xff] %v9260_v46  ;;  %v3634_v21 = vld [vmem:[#allocation2 + $0x188] sm:$0xff]  ;;  %v11809_v47 = vld [vmem:[#allocation38_spill] sm:$0xff] }
 0x5e8   :  { %11799 = vst [vmem:[#allocation45_spill] sm:$0xff] %v9231_v43  ;;  %6361 = vmatmul.msk.bf16.gmra.mxu1 %vm430_vm2, %v9243_v4  ;;  %v11808_v43 = vld [vmem:[#allocation63_spill] sm:$0xff] }
 0x5e9   :  { %v2714_v36 = vadd.f32 %v11809_v47, %v11808_v43 }
 0x5ea   :  { %6416 = vmatmul.msk.bf16.gmra.mxu3 %vm430_vm2, %v3682_v29  ;;  %6390 = vmatmul.msk.bf16.gmra.mxu2 %vm430_vm2, %v3258_v45  ;;  %v2795_v45 = vld [vmem:[#allocation2 + $0x2a9] sm:$0xff] }
 0x5eb   :  { %6455 = vmatmul.msk.bf16.gmra.mxu0 %vm430_vm2, %v9110_v27 }
 0x5ed   :  { %v3836_v56 = vpop.f32.mrf.mxu3  ;;  %v3440_v15 = vpop.f32.mrf.mxu2 }
 0x5ee   :  { %v9251_v55 = vadd.f32 %v3836_v56, %v9028_v59  ;;  %v9256_v19 = vadd.f32 %v3440_v15, %v9108_v40  ;;  %v3032_v32 = vpop.f32.mrf.mxu1  ;;  %v2794_v59 = vld [vmem:[#allocation2 + $0x2a1] sm:$0xff]  ;;  %v3683_v56 = vpack.c.bf16 %v3634_v21, %v3633_v10  ;;  %v3217_v15 = vld [vmem:[#allocation2 + $0x24a] sm:$0xff]  ;;  %v9277_v10 = vpop.f32.mrf.mxu0 }
 0x5ef   :  { %v9258_v29 = vadd.f32 %v3032_v32, %v2713_v53  ;;  %v3216_v40 = vld [vmem:[#allocation2 + $0x242] sm:$0xff]  ;;  %11810 = vst [vmem:[#allocation24_spill] sm:$0xff] %v9277_v10 }
 0x5f0   :  { %11803 = vst [vmem:[#allocation47_spill] sm:$0xff] %v9251_v55  ;;  %v9273_v55 = vpack.c.bf16 %v2795_v45, %v2794_v59  ;;  %v11813_v21 = vld [vmem:[#allocation40_spill] sm:$0xff] }
 0x5f5   :  { %v3838_v58 = vpop.f32.mrf.mxu3  ;;  %v3442_v54 = vpop.f32.mrf.mxu2 }
 0x5f6   :  { %v9263_v27 = vadd.f32 %v3838_v58, %v9041_v13  ;;  %v9268_v53 = vadd.f32 %v3442_v54, %v9126_v37  ;;  %v3035_v32 = vpop.f32.mrf.mxu1  ;;  %v3259_v13 = vpack.c.bf16 %v3217_v15, %v3216_v40  ;;  %v11812_v54 = vld [vmem:[#allocation65_spill] sm:$0xff]  ;;  %v3636_v40 = vld [vmem:[#allocation2 + $0x1a0] sm:$0xff] }
 0x5f7   :  { %v9271_v46 = vadd.f32 %v3035_v32, %v2714_v36  ;;  %v2715_v59 = vadd.f32 %v11813_v21, %v11812_v54  ;;  %v3635_v36 = vld [vmem:[#allocation2 + $0x198] sm:$0xff] }
 0x5f8   :  { %11807 = vst [vmem:[#allocation49_spill] sm:$0xff] %v9263_v27  ;;  %6362 = vmatmul.msk.bf16.gmra.mxu1 %vm430_vm2, %v9273_v55  ;;  %v11816_v27 = vld [vmem:[#allocation67_spill] sm:$0xff]  ;;  %v11817_v54 = vld [vmem:[#allocation42_spill] sm:$0xff] }
 0x5f9   :  { %v2716_v21 = vadd.f32 %v11817_v54, %v11816_v27 }
 0x5fa   :  { %6417 = vmatmul.msk.bf16.gmra.mxu3 %vm430_vm2, %v3683_v56  ;;  %6391 = vmatmul.msk.bf16.gmra.mxu2 %vm430_vm2, %v3259_v13  ;;  %v9295_v13 = vpop.f32.mrf.mxu0 }
 0x5fb   :  { %6456 = vmatmul.msk.bf16.gmra.mxu0 %vm430_vm2, %v9141_v2  ;;  %v3684_v2 = vpack.c.bf16 %v3636_v40, %v3635_v36  ;;  %11815 = vst [vmem:[#allocation53_spill] sm:$0xff] %v9295_v13 }
 0x5fd   :  { %v3841_v58 = vpop.f32.mrf.mxu3  ;;  %v3445_v43 = vpop.f32.mrf.mxu2 }
 0x5fe   :  { %v9283_v37 = vadd.f32 %v3841_v58, %v9062_v63  ;;  %v9288_v45 = vadd.f32 %v3445_v43, %v9139_v14  ;;  %v3037_v56 = vpop.f32.mrf.mxu1  ;;  %v2796_v63 = vld [vmem:[#allocation2 + $0x2b9] sm:$0xff]  ;;  %v2797_v58 = vld [vmem:[#allocation2 + $0x2c1] sm:$0xff] }
 0x5ff   :  { %v9290_v47 = vadd.f32 %v3037_v56, %v2715_v59  ;;  %v3218_v14 = vld [vmem:[#allocation2 + $0x25a] sm:$0xff]  ;;  %v3219_v43 = vld [vmem:[#allocation2 + $0x262] sm:$0xff] }
 0x600   :  { %11811 = vst [vmem:[#allocation51_spill] sm:$0xff] %v9283_v37  ;;  %v3260_v36 = vpack.c.bf16 %v3219_v43, %v3218_v14  ;;  %v3637_v43 = vld [vmem:[#allocation2 + $0x1e0] sm:$0xff] }
 0x602   :  { %v9317_v54 = vpop.f32.mrf.mxu0 }
 0x603   :  { %11821 = vst [vmem:[#allocation55_spill] sm:$0xff] %v9317_v54  ;;  %v3220_v54 = vld [vmem:[#allocation2 + $0x272] sm:$0xff] }
 0x605   :  { %v3843_v15 = vpop.f32.mrf.mxu3  ;;  %v3447_v10 = vpop.f32.mrf.mxu2 }
 0x606   :  { %v9293_v32 = vadd.f32 %v3843_v15, %v9075_v24  ;;  %v9300_v59 = vadd.f32 %v3447_v10, %v9158_v48  ;;  %v3040_v56 = vpop.f32.mrf.mxu1  ;;  %v9305_v24 = vpack.c.bf16 %v2797_v58, %v2796_v63  ;;  %v11819_v10 = vld [vmem:[#allocation69_spill] sm:$0xff]  ;;  %v11820_v15 = vld [vmem:[#allocation44_spill] sm:$0xff] }
 0x607   :  { %v9303_v37 = vadd.f32 %v3040_v56, %v2716_v21  ;;  %v3638_v56 = vld [vmem:[#allocation2 + $0x1e8] sm:$0xff] }
 0x608   :  { %11814 = vst [vmem:[#allocation26_spill] sm:$0xff] %v9293_v32  ;;  %6363 = vmatmul.msk.bf16.gmra.mxu1 %vm430_vm2, %v9305_v24  ;;  %v3221_v32 = vld [vmem:[#allocation2 + $0x27a] sm:$0xff] }
 0x60a   :  { %6418 = vmatmul.msk.bf16.gmra.mxu3 %vm430_vm2, %v3684_v2  ;;  %6392 = vmatmul.msk.bf16.gmra.mxu2 %vm430_vm2, %v3260_v36  ;;  %v2717_v2 = vadd.f32 %v11820_v15, %v11819_v10  ;;  %v2799_v36 = vld [vmem:[#allocation2 + $0x2d9] sm:$0xff] }
 0x60b   :  { %6457 = vmatmul.msk.bf16.gmra.mxu0 %vm430_vm2, %v9174_v18  ;;  %v11822_v10 = vld [vmem:[#allocation46_spill] sm:$0xff] }
 0x60c   :  { %v2718_v15 = vadd.f32 %v11822_v10, %v8689_v44 }
 0x60d   :  { %v3846_v40 = vpop.f32.mrf.mxu3  ;;  %v3450_v27 = vpop.f32.mrf.mxu2 }
 0x60e   :  { %v9313_v48 = vadd.f32 %v3846_v40, %v9093_v39  ;;  %v9320_v63 = vadd.f32 %v3450_v27, %v9172_v22  ;;  %v3042_v58 = vpop.f32.mrf.mxu1  ;;  %v2798_v39 = vld [vmem:[#allocation2 + $0x2d1] sm:$0xff]  ;;  %v3685_v40 = vpack.c.bf16 %v3638_v56, %v3637_v43  ;;  %v11826_v56 = vld [vmem:[#allocation48_spill] sm:$0xff] }
 0x60f   :  { %v9322_v21 = vadd.f32 %v3042_v58, %v2717_v2  ;;  %v9335_v58 = vpack.c.bf16 %v2799_v36, %v2798_v39 }
 0x610   :  { %11818 = vst [vmem:[#allocation28_spill] sm:$0xff] %v9313_v48 }
 0x615   :  { %v3848_v14 = vpop.f32.mrf.mxu3  ;;  %v3452_v13 = vpop.f32.mrf.mxu2 }
 0x616   :  { %v9325_v18 = vadd.f32 %v3848_v14, %v9105_v9  ;;  %v9330_v22 = vadd.f32 %v3452_v13, %v9196_v23  ;;  %v3045_v27 = vpop.f32.mrf.mxu1  ;;  %v9337_v9 = vpop.f32.mrf.mxu0  ;;  %v3261_v14 = vpack.c.bf16 %v3221_v32, %v3220_v54  ;;  %v11825_v13 = vld [vmem:[#allocation72_spill] sm:$0xff] }
 0x617   :  { %v9333_v2 = vadd.f32 %v3045_v27, %v2718_v15  ;;  %11823 = vst [vmem:[#allocation30_spill] sm:$0xff] %v9337_v9  ;;  %v2719_v39 = vadd.f32 %v11826_v56, %v11825_v13  ;;  %v3639_v15 = vld [vmem:[#allocation2 + $0x1f8] sm:$0xff]  ;;  %v3640_v27 = vld [vmem:[#allocation2 + $0x200] sm:$0xff] }
 0x618   :  { %6364 = vmatmul.msk.bf16.gmra.mxu1 %vm430_vm2, %v9335_v58  ;;  %v11829_v13 = vld [vmem:[#allocation50_spill] sm:$0xff] }
 0x61a   :  { %6419 = vmatmul.msk.bf16.gmra.mxu3 %vm430_vm2, %v3685_v40  ;;  %6393 = vmatmul.msk.bf16.gmra.mxu2 %vm430_vm2, %v3261_v14  ;;  %v2801_v14 = vld [vmem:[#allocation2 + $0x2f1] sm:$0xff] }
 0x61b   :  { %6458 = vmatmul.msk.bf16.gmra.mxu0 %vm430_vm2, %v9211_v42 }
 0x61d   :  { %v3851_v43 = vpop.f32.mrf.mxu3  ;;  %v3455_v23 = vpop.f32.mrf.mxu2 }
 0x61e   :  { %v9345_v44 = vadd.f32 %v3851_v43, %v9124_v26  ;;  %v9350_v36 = vadd.f32 %v3455_v23, %v9209_v20  ;;  %v3047_v32 = vpop.f32.mrf.mxu1  ;;  %v9354_v40 = vpop.f32.mrf.mxu0  ;;  %v2800_v26 = vld [vmem:[#allocation2 + $0x2e9] sm:$0xff]  ;;  %v3686_v43 = vpack.c.bf16 %v3640_v27, %v3639_v15  ;;  %v3223_v23 = vld [vmem:[#allocation2 + $0x292] sm:$0xff] }
 0x61f   :  { %v9352_v54 = vadd.f32 %v3047_v32, %v2719_v39  ;;  %11827 = vst [vmem:[#allocation32_spill] sm:$0xff] %v9354_v40  ;;  %v3222_v20 = vld [vmem:[#allocation2 + $0x28a] sm:$0xff]  ;;  %v9367_v48 = vpack.c.bf16 %v2801_v14, %v2800_v26 }
 0x620   :  { %11824 = vst [vmem:[#allocation57_spill] sm:$0xff] %v9345_v44  ;;  %v11828_v44 = vld [vmem:[#allocation74_spill] sm:$0xff]  ;;  %v11831_v15 = vld [vmem:[#allocation52_spill] sm:$0xff] }
 0x621   :  { %v2720_v56 = vadd.f32 %v11829_v13, %v11828_v44  ;;  %v2721_v27 = vadd.f32 %v11831_v15, %v8718_v5  ;;  %v3224_v5 = vld [vmem:[#allocation2 + $0x2a2] sm:$0xff]  ;;  %v3225_v15 = vld [vmem:[#allocation2 + $0x2aa] sm:$0xff] }
 0x625   :  { %v3853_v10 = vpop.f32.mrf.mxu3  ;;  %v3457_v9 = vpop.f32.mrf.mxu2 }
 0x626   :  { %v9357_v42 = vadd.f32 %v3853_v10, %v9136_v33  ;;  %v9362_v39 = vadd.f32 %v3457_v9, %v9228_v8  ;;  %v3050_v32 = vpop.f32.mrf.mxu1  ;;  %v3262_v33 = vpack.c.bf16 %v3223_v23, %v3222_v20  ;;  %v9377_v9 = vpop.f32.mrf.mxu0  ;;  %v3642_v20 = vld [vmem:[#allocation2 + $0x218] sm:$0xff]  ;;  %v2803_v23 = vld [vmem:[#allocation2 + $0x309] sm:$0xff] }
 0x627   :  { %v9365_v40 = vadd.f32 %v3050_v32, %v2720_v56  ;;  %11830 = vst [vmem:[#allocation59_spill] sm:$0xff] %v9377_v9  ;;  %v3641_v56 = vld [vmem:[#allocation2 + $0x210] sm:$0xff] }
 0x628   :  { %6365 = vmatmul.msk.bf16.gmra.mxu1 %vm430_vm2, %v9367_v48  ;;  %v3687_v32 = vpack.c.bf16 %v3642_v20, %v3641_v56  ;;  %v11835_v20 = vld [vmem:[#allocation56_spill] sm:$0xff] }
 0x62a   :  { %6420 = vmatmul.msk.bf16.gmra.mxu3 %vm430_vm2, %v3686_v43  ;;  %6394 = vmatmul.msk.bf16.gmra.mxu2 %vm430_vm2, %v3262_v33 }
 0x62b   :  { %6459 = vmatmul.msk.bf16.gmra.mxu0 %vm430_vm2, %v9243_v4 }
 0x62d   :  { %v3856_v10 = vpop.f32.mrf.mxu3  ;;  %v3460_v44 = vpop.f32.mrf.mxu2 }
 0x62e   :  { %v9375_v8 = vadd.f32 %v3856_v10, %v9156_v62  ;;  %v9382_v26 = vadd.f32 %v3460_v44, %v9241_v34  ;;  %v3052_v14 = vpop.f32.mrf.mxu1  ;;  %v2802_v62 = vld [vmem:[#allocation2 + $0x301] sm:$0xff]  ;;  %v11833_v10 = vld [vmem:[#allocation54_spill] sm:$0xff]  ;;  %v9391_v34 = vpop.f32.mrf.mxu0 }
 0x62f   :  { %v9384_v43 = vadd.f32 %v3052_v14, %v2721_v27  ;;  %v2722_v9 = vadd.f32 %v11833_v10, %v8737_v28 }
 0x631   :  { %11832 = vst [vmem:[#allocation34_spill] sm:$0xff] %v9384_v43 }
 0x635   :  { %v3858_v13 = vpop.f32.mrf.mxu3  ;;  %v3462_v33 = vpop.f32.mrf.mxu2 }
 0x636   :  { %v9387_v4 = vadd.f32 %v3858_v13, %v9169_v25  ;;  %v9394_v44 = vadd.f32 %v3462_v33, %v9258_v29  ;;  %v3055_v27 = vpop.f32.mrf.mxu1  ;;  %v9399_v25 = vpack.c.bf16 %v2803_v23, %v2802_v62  ;;  %v3263_v13 = vpack.c.bf16 %v3225_v15, %v3224_v5  ;;  %v9416_v33 = vpop.f32.mrf.mxu0  ;;  %v3643_v5 = vld [vmem:[#allocation2 + $0x228] sm:$0xff]  ;;  %v3644_v15 = vld [vmem:[#allocation2 + $0x230] sm:$0xff] }
 0x637   :  { %v9397_v14 = vadd.f32 %v3055_v27, %v2722_v9  ;;  %v2723_v9 = vadd.f32 %v11835_v20, %v8748_v60  ;;  %v2805_v27 = vld [vmem:[#allocation2 + $0x321] sm:$0xff]  ;;  %v11837_v60 = vld [vmem:[#allocation58_spill] sm:$0xff] }
 0x638   :  { %6366 = vmatmul.msk.bf16.gmra.mxu1 %vm430_vm2, %v9399_v25  ;;  %v2724_v20 = vadd.f32 %v11837_v60, %v8771_v57 }
 0x639   :  { %11834 = vst [vmem:[#allocation61_spill] sm:$0xff] %v9397_v14 }
 0x63a   :  { %6421 = vmatmul.msk.bf16.gmra.mxu3 %vm430_vm2, %v3687_v32  ;;  %6395 = vmatmul.msk.bf16.gmra.mxu2 %vm430_vm2, %v3263_v13  ;;  %v3688_v13 = vpack.c.bf16 %v3644_v15, %v3643_v5  ;;  %v11839_v15 = vld [vmem:[#allocation60_spill] sm:$0xff] }
 0x63b   :  { %6460 = vmatmul.msk.bf16.gmra.mxu0 %vm430_vm2, %v9273_v55 }
 0x63d   :  { %v3861_v56 = vpop.f32.mrf.mxu3  ;;  %v3465_v29 = vpop.f32.mrf.mxu2 }
 0x63e   :  { %v9407_v28 = vadd.f32 %v3861_v56, %v9194_v31  ;;  %v9412_v62 = vadd.f32 %v3465_v29, %v9271_v46  ;;  %v3057_v23 = vpop.f32.mrf.mxu1  ;;  %v2804_v31 = vld [vmem:[#allocation2 + $0x319] sm:$0xff]  ;;  %v3227_v29 = vld [vmem:[#allocation2 + $0x2c2] sm:$0xff] }
 0x63f   :  { %v9414_v32 = vadd.f32 %v3057_v23, %v2723_v9  ;;  %v3226_v46 = vld [vmem:[#allocation2 + $0x2ba] sm:$0xff]  ;;  %v9429_v14 = vpack.c.bf16 %v2805_v27, %v2804_v31  ;;  %v2725_v31 = vadd.f32 %v11839_v15, %v8782_v0 }
 0x640   :  { %v11841_v0 = vld [vmem:[#allocation62_spill] sm:$0xff] }
 0x641   :  { %11836 = vst [vmem:[#allocation36_spill] sm:$0xff] %v9414_v32  ;;  %v2726_v15 = vadd.f32 %v11841_v0, %v8801_v38 }
 0x645   :  { %v3863_v10 = vpop.f32.mrf.mxu3  ;;  %v3467_v56 = vpop.f32.mrf.mxu2 }
 0x646   :  { %v9419_v55 = vadd.f32 %v3863_v10, %v9206_v52  ;;  %v9424_v9 = vadd.f32 %v3467_v56, %v9290_v47  ;;  %v3060_v23 = vpop.f32.mrf.mxu1  ;;  %v3264_v52 = vpack.c.bf16 %v3227_v29, %v3226_v46  ;;  %v9433_v10 = vpop.f32.mrf.mxu0  ;;  %v3646_v46 = vld [vmem:[#allocation2 + $0x248] sm:$0xff] }
 0x647   :  { %v9427_v43 = vadd.f32 %v3060_v23, %v2724_v20  ;;  %v3645_v20 = vld [vmem:[#allocation2 + $0x240] sm:$0xff] }
 0x648   :  { %6367 = vmatmul.msk.bf16.gmra.mxu1 %vm430_vm2, %v9429_v14  ;;  %v2807_v23 = vld [vmem:[#allocation2 + $0x339] sm:$0xff] }
 0x649   :  { %11838 = vst [vmem:[#allocation63_spill] sm:$0xff] %v9427_v43  ;;  %v3230_v43 = vld [vmem:[#allocation2 + $0x2ea] sm:$0xff] }
 0x64a   :  { %6422 = vmatmul.msk.bf16.gmra.mxu3 %vm430_vm2, %v3688_v13  ;;  %6396 = vmatmul.msk.bf16.gmra.mxu2 %vm430_vm2, %v3264_v52  ;;  %v3689_v52 = vpack.c.bf16 %v3646_v46, %v3645_v20  ;;  %v11843_v46 = vld [vmem:[#allocation64_spill] sm:$0xff] }
 0x64b   :  { %6461 = vmatmul.msk.bf16.gmra.mxu0 %vm430_vm2, %v9305_v24 }
 0x64d   :  { %v3866_v5 = vpop.f32.mrf.mxu3  ;;  %v3470_v47 = vpop.f32.mrf.mxu2 }
 0x64e   :  { %v9439_v57 = vadd.f32 %v3866_v5, %v9226_v41  ;;  %v9444_v27 = vadd.f32 %v3470_v47, %v9303_v37  ;;  %v3062_v13 = vpop.f32.mrf.mxu1  ;;  %v9451_v24 = vpop.f32.mrf.mxu0  ;;  %v2806_v41 = vld [vmem:[#allocation2 + $0x331] sm:$0xff]  ;;  %v3229_v47 = vld [vmem:[#allocation2 + $0x2da] sm:$0xff] }
 0x64f   :  { %v9446_v56 = vadd.f32 %v3062_v13, %v2725_v31  ;;  %v3228_v37 = vld [vmem:[#allocation2 + $0x2d2] sm:$0xff] }
 0x651   :  { %11840 = vst [vmem:[#allocation38_spill] sm:$0xff] %v9446_v56  ;;  %v3231_v56 = vld [vmem:[#allocation2 + $0x2f2] sm:$0xff] }
 0x655   :  { %v3868_v60 = vpop.f32.mrf.mxu3  ;;  %v3472_v5 = vpop.f32.mrf.mxu2 }
 0x656   :  { %v9449_v29 = vadd.f32 %v3868_v60, %v9238_v6  ;;  %v9456_v31 = vadd.f32 %v3472_v5, %v9322_v21  ;;  %v3065_v13 = vpop.f32.mrf.mxu1  ;;  %v9461_v6 = vpack.c.bf16 %v2807_v23, %v2806_v41  ;;  %v3265_v60 = vpack.c.bf16 %v3229_v47, %v3228_v37  ;;  %v9473_v5 = vpop.f32.mrf.mxu0  ;;  %v3647_v37 = vld [vmem:[#allocation2 + $0x258] sm:$0xff]  ;;  %v3648_v47 = vld [vmem:[#allocation2 + $0x260] sm:$0xff] }
 0x657   :  { %v9459_v32 = vadd.f32 %v3065_v13, %v2726_v15  ;;  %v4466_v13 = vld [vmem:[#allocation2 + $0x3a] sm:$0xff] }
 0x658   :  { %6368 = vmatmul.msk.bf16.gmra.mxu1 %vm430_vm2, %v9461_v6 }
 0x659   :  { %11842 = vst [vmem:[#allocation65_spill] sm:$0xff] %v9459_v32  ;;  %v3668_v32 = vld [vmem:[#allocation2 + $0x350] sm:$0xff] }
 0x65a   :  { %6423 = vmatmul.msk.bf16.gmra.mxu3 %vm430_vm2, %v3689_v52  ;;  %6397 = vmatmul.msk.bf16.gmra.mxu2 %vm430_vm2, %v3265_v60  ;;  %v2727_v52 = vadd.f32 %v11843_v46, %v8812_v30  ;;  %v3690_v60 = vpack.c.bf16 %v3648_v47, %v3647_v37  ;;  %v11845_v30 = vld [vmem:[#allocation66_spill] sm:$0xff]  ;;  %v11847_v47 = vld [vmem:[#allocation68_spill] sm:$0xff] }
 0x65b   :  { %6462 = vmatmul.msk.bf16.gmra.mxu0 %vm430_vm2, %v9335_v58  ;;  %v2728_v46 = vadd.f32 %v11845_v30, %v8831_v12  ;;  %v3649_v30 = vld [vmem:[#allocation2 + $0x270] sm:$0xff] }
 0x65d   :  { %v3871_v20 = vpop.f32.mrf.mxu3  ;;  %v3475_v21 = vpop.f32.mrf.mxu2 }
 0x65e   :  { %v9469_v38 = vadd.f32 %v3871_v20, %v9256_v19  ;;  %v9476_v41 = vadd.f32 %v3475_v21, %v9333_v2  ;;  %v3067_v23 = vpop.f32.mrf.mxu1  ;;  %v4465_v19 = vld [vmem:[#allocation2 + $0x32] sm:$0xff] }
 0x65f   :  { %v9478_v0 = vadd.f32 %v3067_v23, %v2727_v52  ;;  %v4529_v23 = vpack.c.bf16 %v4466_v13, %v4465_v19 }
 0x661   :  { %11844 = vst [vmem:[#allocation40_spill] sm:$0xff] %v9478_v0 }
 0x665   :  { %v3873_v15 = vpop.f32.mrf.mxu3  ;;  %v3477_v20 = vpop.f32.mrf.mxu2 }
 0x666   :  { %v9481_v58 = vadd.f32 %v3873_v15, %v9268_v53  ;;  %v9486_v2 = vadd.f32 %v3477_v20, %v9352_v54  ;;  %v3070_v21 = vpop.f32.mrf.mxu1  ;;  %v9491_v53 = vpop.f32.mrf.mxu0  ;;  %v3266_v15 = vpack.c.bf16 %v3231_v56, %v3230_v43 }
 0x667   :  { %v9489_v52 = vadd.f32 %v3070_v21, %v2728_v46  ;;  %v3650_v46 = vld [vmem:[#allocation2 + $0x278] sm:$0xff] }
 0x668   :  { %6469 = vmatmul.msk.bf16.vlgmr.msra.gmra.mxu1 %vm430_vm2, %v4529_v23  ;;  %v4468_v21 = vld [vmem:[#allocation2 + $0x52] sm:$0xff]  ;;  %v3691_v23 = vpack.c.bf16 %v3650_v46, %v3649_v30  ;;  %v11854_v46 = vld [vmem:[#allocation71_spill] sm:$0xff] }
 0x669   :  { %11846 = vst [vmem:[#allocation67_spill] sm:$0xff] %v9489_v52 }
 0x66a   :  { %6424 = vmatmul.msk.bf16.gmra.mxu3 %vm430_vm2, %v3690_v60  ;;  %6398 = vmatmul.msk.bf16.gmra.mxu2 %vm430_vm2, %v3266_v15  ;;  %v2729_v60 = vadd.f32 %v11847_v47, %v8842_v1  ;;  %v11850_v1 = vld [vmem:[#allocation70_spill] sm:$0xff] }
 0x66b   :  { %6463 = vmatmul.msk.bf16.gmra.mxu0 %vm430_vm2, %v9367_v48 }
 0x66d   :  { %v3876_v37 = vpop.f32.mrf.mxu3  ;;  %v3480_v54 = vpop.f32.mrf.mxu2 }
 0x66e   :  { %v9498_v12 = vadd.f32 %v3876_v37, %v9288_v45  ;;  %v9503_v19 = vadd.f32 %v3480_v54, %v9365_v40  ;;  %v3072_v13 = vpop.f32.mrf.mxu1  ;;  %v9507_v56 = vpop.f32.mrf.mxu0  ;;  %v4467_v45 = vld [vmem:[#allocation2 + $0x4a] sm:$0xff]  ;;  %v2730_v40 = vadd.f32 %v11850_v1, %v8861_v3  ;;  %v3232_v37 = vld [vmem:[#allocation2 + $0x302] sm:$0xff] }
 0x66f   :  { %v9505_v43 = vadd.f32 %v3072_v13, %v2729_v60  ;;  %v3233_v54 = vld [vmem:[#allocation2 + $0x30a] sm:$0xff]  ;;  %v4530_v13 = vpack.c.bf16 %v4468_v21, %v4467_v45  ;;  %v2731_v45 = vadd.f32 %v11854_v46, %v8873_v61 }
 0x671   :  { %11848 = vst [vmem:[#allocation42_spill] sm:$0xff] %v9505_v43  ;;  %v9519_v43 = vpack.c.bf16 %v3233_v54, %v3232_v37  ;;  %v3652_v37 = vld [vmem:[#allocation2 + $0x290] sm:$0xff] }
 0x673   :  { %11852 = vst [vmem:[#allocation46_spill] sm:$0xff] %v9519_v43 }
 0x675   :  { %v3878_v20 = vpop.f32.mrf.mxu3  ;;  %v9512_v15 = vpop.f32.mrf.mxu2 }
 0x676   :  { %v9510_v48 = vadd.f32 %v3878_v20, %v9300_v59  ;;  %11849 = vst [vmem:[#allocation69_spill] sm:$0xff] %v9512_v15  ;;  %v3075_v47 = vpop.f32.mrf.mxu1  ;;  %v9529_v20 = vpop.f32.mrf.mxu0  ;;  %v3234_v15 = vld [vmem:[#allocation2 + $0x31a] sm:$0xff] }
 0x677   :  { %v9517_v60 = vadd.f32 %v3075_v47, %v2730_v40  ;;  %v3651_v40 = vld [vmem:[#allocation2 + $0x288] sm:$0xff] }
 0x678   :  { %6470 = vmatmul.msk.bf16.gmra.mxu1 %vm430_vm2, %v4530_v13  ;;  %v4470_v47 = vld [vmem:[#allocation2 + $0x6a] sm:$0xff] }
 0x679   :  { %11851 = vst [vmem:[#allocation44_spill] sm:$0xff] %v9517_v60 }
 0x67a   :  { %6425 = vmatmul.msk.bf16.gmra.mxu3 %vm430_vm2, %v3691_v23  ;;  %6399 = vmatmul.msk.bf16.gmra.mxu2 %vm430_vm2, %v9519_v43 }
 0x67b   :  { %6464 = vmatmul.msk.bf16.gmra.mxu0 %vm430_vm2, %v9399_v25  ;;  %v4469_v25 = vld [vmem:[#allocation2 + $0x62] sm:$0xff] }
 0x67d   :  { %v3881_v59 = vpop.f32.mrf.mxu3  ;;  %v9531_v30 = vpop.f32.mrf.mxu2 }
 0x67e   :  { %v9527_v3 = vadd.f32 %v3881_v59, %v9320_v63  ;;  %11853 = vst [vmem:[#allocation72_spill] sm:$0xff] %v9531_v30  ;;  %v3077_v21 = vpop.f32.mrf.mxu1  ;;  %v3692_v63 = vpack.c.bf16 %v3652_v37, %v3651_v40  ;;  %v11857_v59 = vld [vmem:[#allocation73_spill] sm:$0xff]  ;;  %v3235_v30 = vld [vmem:[#allocation2 + $0x322] sm:$0xff]  ;;  %v9544_v61 = vpop.f32.mrf.mxu0 }
 0x67f   :  { %v9535_v23 = vadd.f32 %v3077_v21, %v2731_v45  ;;  %v2732_v60 = vadd.f32 %v11857_v59, %v8893_v50  ;;  %11858 = vst [vmem:[#allocation50_spill] sm:$0xff] %v9544_v61  ;;  %v4531_v21 = vpack.c.bf16 %v4470_v47, %v4469_v25  ;;  %v3654_v59 = vld [vmem:[#allocation2 + $0x2a8] sm:$0xff] }
 0x681   :  { %11855 = vst [vmem:[#allocation48_spill] sm:$0xff] %v9535_v23  ;;  %v2734_v23 = vadd.f32 %v8725_v35, %v8925_v17 }
 0x685   :  { %v3883_v1 = vpop.f32.mrf.mxu3  ;;  %v9540_v13 = vpop.f32.mrf.mxu2 }
 0x686   :  { %v9538_v54 = vadd.f32 %v3883_v1, %v9330_v22  ;;  %11856 = vst [vmem:[#allocation74_spill] sm:$0xff] %v9540_v13  ;;  %v3080_v46 = vpop.f32.mrf.mxu1  ;;  %v9549_v22 = vpack.c.bf16 %v3235_v30, %v3234_v15  ;;  %v9565_v30 = vpop.f32.mrf.mxu0  ;;  %v11908_v13 = vld [vmem:[#allocation16_spill] sm:$0xff] }
 0x687   :  { %v9547_v45 = vadd.f32 %v3080_v46, %v2732_v60  ;;  %v11862_v60 = vld [vmem:[#allocation75_spill] sm:$0xff]  ;;  %11864 = vst [vmem:[#allocation60_spill] sm:$0xff] %v9565_v30  ;;  %v11949_v30 = vld [vmem:[#allocation49_spill] sm:$0xff] }
 0x688   :  { %11860 = vst [vmem:[#allocation54_spill] sm:$0xff] %v9549_v22  ;;  %6471 = vmatmul.msk.bf16.gmra.mxu1 %vm430_vm2, %v4531_v21  ;;  %v2733_v37 = vadd.f32 %v11862_v60, %v8905_v7  ;;  %v4472_v21 = vld [vmem:[#allocation2 + $0x82] sm:$0xff]  ;;  %v3236_v7 = vld [vmem:[#allocation2 + $0x332] sm:$0xff]  ;;  %v3237_v60 = vld [vmem:[#allocation2 + $0x33a] sm:$0xff] }
 0x689   :  { %11859 = vst [vmem:[#allocation52_spill] sm:$0xff] %v9547_v45  ;;  %v9577_v45 = vpack.c.bf16 %v3237_v60, %v3236_v7  ;;  %v4473_v60 = vld [vmem:[#allocation2 + $0x92] sm:$0xff] }
 0x68a   :  { %6426 = vmatmul.msk.bf16.gmra.mxu3 %vm430_vm2, %v3692_v63  ;;  %6400 = vmatmul.msk.bf16.gmra.mxu2 %vm430_vm2, %v9549_v22  ;;  %v3653_v63 = vld [vmem:[#allocation2 + $0x2a0] sm:$0xff]  ;;  %v4489_v22 = vld [vmem:[#allocation2 + $0x152] sm:$0xff] }
 0x68b   :  { %6465 = vmatmul.msk.bf16.gmra.mxu0 %vm430_vm2, %v9429_v14  ;;  %v4471_v14 = vld [vmem:[#allocation2 + $0x7a] sm:$0xff]  ;;  %11867 = vst [vmem:[#allocation66_spill] sm:$0xff] %v9577_v45 }
 0x68d   :  { %v3886_v1 = vpop.f32.mrf.mxu3  ;;  %v9559_v40 = vpop.f32.mrf.mxu2 }
 0x68e   :  { %v9557_v50 = vadd.f32 %v3886_v1, %v9350_v36  ;;  %11861 = vst [vmem:[#allocation56_spill] sm:$0xff] %v9559_v40  ;;  %v3082_v25 = vpop.f32.mrf.mxu1  ;;  %v3693_v36 = vpack.c.bf16 %v3654_v59, %v3653_v63  ;;  %v11909_v40 = vld [vmem:[#allocation86_spill] sm:$0xff] }
 0x68f   :  { %v9563_v15 = vadd.f32 %v3082_v25, %v2733_v37 }
 0x691   :  { %11863 = vst [vmem:[#allocation58_spill] sm:$0xff] %v9563_v15  ;;  %v4532_v15 = vpack.c.bf16 %v4472_v21, %v4471_v14  ;;  %v3655_v21 = vld [vmem:[#allocation2 + $0x2b8] sm:$0xff] }
 0x695   :  { %v3888_v47 = vpop.f32.mrf.mxu3  ;;  %v9570_v1 = vpop.f32.mrf.mxu2 }
 0x696   :  { %v9568_v46 = vadd.f32 %v3888_v47, %v9362_v39  ;;  %11865 = vst [vmem:[#allocation62_spill] sm:$0xff] %v9570_v1  ;;  %v3085_v37 = vpop.f32.mrf.mxu1  ;;  %v9580_v39 = vpop.f32.mrf.mxu0 }
 0x697   :  { %v9575_v25 = vadd.f32 %v3085_v37, %v2734_v23  ;;  %11868 = vst [vmem:[#allocation68_spill] sm:$0xff] %v9580_v39  ;;  %v11870_v23 = vld [vmem:[#allocation76_spill] sm:$0xff]  ;;  %v4474_v37 = vld [vmem:[#allocation2 + $0x9a] sm:$0xff] }
 0x698   :  { %6472 = vmatmul.msk.bf16.gmra.mxu1 %vm430_vm2, %v4532_v15  ;;  %v2735_v63 = vadd.f32 %v11870_v23, %v8937_v51  ;;  %v4533_v23 = vpack.c.bf16 %v4474_v37, %v4473_v60  ;;  %v4475_v60 = vld [vmem:[#allocation2 + $0xaa] sm:$0xff]  ;;  %v4476_v37 = vld [vmem:[#allocation2 + $0xb2] sm:$0xff] }
 0x699   :  { %11866 = vst [vmem:[#allocation64_spill] sm:$0xff] %v9575_v25 }
 0x69a   :  { %6427 = vmatmul.msk.bf16.gmra.mxu3 %vm430_vm2, %v3693_v36  ;;  %6401 = vmatmul.msk.bf16.gmra.mxu2 %vm430_vm2, %v9577_v45  ;;  %v3656_v36 = vld [vmem:[#allocation2 + $0x2c0] sm:$0xff] }
 0x69b   :  { %6466 = vmatmul.msk.bf16.gmra.mxu0 %vm430_vm2, %v9461_v6  ;;  %v3694_v6 = vpack.c.bf16 %v3656_v36, %v3655_v21 }
 0x69d   :  { %v3891_v47 = vpop.f32.mrf.mxu3  ;;  %v9589_v17 = vpop.f32.mrf.mxu2 }
 0x69e   :  { %v9587_v35 = vadd.f32 %v3891_v47, %v9382_v26  ;;  %11869 = vst [vmem:[#allocation70_spill] sm:$0xff] %v9589_v17  ;;  %v3087_v59 = vpop.f32.mrf.mxu1  ;;  %v11873_v26 = vld [vmem:[#allocation77_spill] sm:$0xff]  ;;  %v3667_v17 = vld [vmem:[#allocation2 + $0x348] sm:$0xff] }
 0x69f   :  { %v9593_v14 = vadd.f32 %v3087_v59, %v2735_v63  ;;  %v2736_v47 = vadd.f32 %v11873_v26, %v8958_v16  ;;  %v3657_v26 = vld [vmem:[#allocation2 + $0x2d0] sm:$0xff] }
 0x6a1   :  { %11871 = vst [vmem:[#allocation71_spill] sm:$0xff] %v9593_v14 }
 0x6a5   :  { %v3893_v15 = vpop.f32.mrf.mxu3  ;;  %v9598_v25 = vpop.f32.mrf.mxu2 }
 0x6a6   :  { %v9596_v7 = vadd.f32 %v3893_v15, %v9394_v44  ;;  %11872 = vst [vmem:[#allocation73_spill] sm:$0xff] %v9598_v25  ;;  %v3090_v52 = vpop.f32.mrf.mxu1  ;;  %v11875_v15 = vld [vmem:[#allocation78_spill] sm:$0xff]  ;;  %v4486_v25 = vld [vmem:[#allocation2 + $0x12a] sm:$0xff] }
 0x6a7   :  { %v9603_v51 = vadd.f32 %v3090_v52, %v2736_v47  ;;  %v2737_v21 = vadd.f32 %v11875_v15, %v8971_v49  ;;  %v4534_v15 = vpack.c.bf16 %v4476_v37, %v4475_v60  ;;  %v4477_v60 = vld [vmem:[#allocation2 + $0xc2] sm:$0xff]  ;;  %v4478_v37 = vld [vmem:[#allocation2 + $0xca] sm:$0xff] }
 0x6a8   :  { %6473 = vmatmul.msk.bf16.gmra.mxu1 %vm430_vm2, %v4533_v23 }
 0x6aa   :  { %6428 = vmatmul.msk.bf16.gmra.mxu3 %vm430_vm2, %v3694_v6  ;;  %v3658_v6 = vld [vmem:[#allocation2 + $0x2d8] sm:$0xff] }
 0x6ab   :  { %v3695_v47 = vpack.c.bf16 %v3658_v6, %v3657_v26  ;;  %v11883_v26 = vld [vmem:[#allocation80_spill] sm:$0xff] }
 0x6ad   :  { %v3896_v63 = vpop.f32.mrf.mxu3  ;;  %v9609_v59 = vpop.f32.mrf.mxu2 }
 0x6ae   :  { %v9607_v44 = vadd.f32 %v3896_v63, %v9412_v62  ;;  %11874 = vst [vmem:[#allocation75_spill] sm:$0xff] %v9609_v59  ;;  %v3092_v36 = vpop.f32.mrf.mxu1  ;;  %v11878_v62 = vld [vmem:[#allocation79_spill] sm:$0xff] }
 0x6af   :  { %v9613_v14 = vadd.f32 %v3092_v36, %v2737_v21  ;;  %v2738_v63 = vadd.f32 %v11878_v62, %v8989_v11  ;;  %v3659_v62 = vld [vmem:[#allocation2 + $0x2e8] sm:$0xff] }
 0x6b1   :  { %11876 = vst [vmem:[#allocation76_spill] sm:$0xff] %v9613_v14 }
 0x6b5   :  { %v3898_v16 = vpop.f32.mrf.mxu3  ;;  %v9618_v23 = vpop.f32.mrf.mxu2 }
 0x6b6   :  { %v9616_v52 = vadd.f32 %v3898_v16, %v9424_v9  ;;  %11877 = vst [vmem:[#allocation77_spill] sm:$0xff] %v9618_v23  ;;  %v3095_v59 = vpop.f32.mrf.mxu1  ;;  %v11882_v16 = vld [vmem:[#allocation4_spill] sm:$0xff] }
 0x6b7   :  { %v9623_v49 = vadd.f32 %v3095_v59, %v2738_v63  ;;  %v2739_v6 = vadd.f32 %v11883_v26, %v11882_v16 }
 0x6b8   :  { %6474 = vmatmul.msk.bf16.gmra.mxu1 %vm430_vm2, %v4534_v15 }
 0x6b9   :  { %11879 = vst [vmem:[#allocation78_spill] sm:$0xff] %v9623_v49 }
 0x6ba   :  { %6429 = vmatmul.msk.bf16.gmra.mxu3 %vm430_vm2, %v3695_v47  ;;  %v3660_v47 = vld [vmem:[#allocation2 + $0x2f0] sm:$0xff] }
 0x6bb   :  { %v3696_v63 = vpack.c.bf16 %v3660_v47, %v3659_v62  ;;  %v11893_v62 = vld [vmem:[#allocation82_spill] sm:$0xff] }
 0x6bd   :  { %v3901_v21 = vpop.f32.mrf.mxu3  ;;  %v9629_v36 = vpop.f32.mrf.mxu2 }
 0x6be   :  { %v9627_v9 = vadd.f32 %v3901_v21, %v9444_v27  ;;  %11881 = vst [vmem:[#allocation89_spill] sm:$0xff] %v9629_v36  ;;  %v3097_v23 = vpop.f32.mrf.mxu1  ;;  %v11887_v27 = vld [vmem:[#allocation13_spill] sm:$0xff] }
 0x6bf   :  { %v9633_v14 = vadd.f32 %v3097_v23, %v2739_v6  ;;  %v11888_v21 = vld [vmem:[#allocation81_spill] sm:$0xff]  ;;  %v4535_v23 = vpack.c.bf16 %v4478_v37, %v4477_v60  ;;  %v4480_v60 = vld [vmem:[#allocation2 + $0xe2] sm:$0xff] }
 0x6c0   :  { %11880 = vst [vmem:[#allocation79_spill] sm:$0xff] %v9627_v9  ;;  %v2740_v49 = vadd.f32 %v11888_v21, %v11887_v27  ;;  %v3661_v21 = vld [vmem:[#allocation2 + $0x300] sm:$0xff] }
 0x6c1   :  { %11884 = vst [vmem:[#allocation4_spill] sm:$0xff] %v9633_v14 }
 0x6c5   :  { %v3903_v11 = vpop.f32.mrf.mxu3  ;;  %v9638_v15 = vpop.f32.mrf.mxu2 }
 0x6c6   :  { %v9636_v59 = vadd.f32 %v3903_v11, %v9456_v31  ;;  %11886 = vst [vmem:[#allocation90_spill] sm:$0xff] %v9638_v15  ;;  %v3100_v36 = vpop.f32.mrf.mxu1  ;;  %v11892_v11 = vld [vmem:[#allocation29_spill] sm:$0xff] }
 0x6c7   :  { %v9643_v16 = vadd.f32 %v3100_v36, %v2740_v49  ;;  %v2741_v47 = vadd.f32 %v11893_v62, %v11892_v11  ;;  %v4479_v36 = vld [vmem:[#allocation2 + $0xda] sm:$0xff] }
 0x6c8   :  { %11885 = vst [vmem:[#allocation80_spill] sm:$0xff] %v9636_v59  ;;  %6475 = vmatmul.msk.bf16.gmra.mxu1 %vm430_vm2, %v4535_v23 }
 0x6c9   :  { %11889 = vst [vmem:[#allocation13_spill] sm:$0xff] %v9643_v16 }
 0x6ca   :  { %6430 = vmatmul.msk.bf16.gmra.mxu3 %vm430_vm2, %v3696_v63  ;;  %v3662_v63 = vld [vmem:[#allocation2 + $0x308] sm:$0xff] }
 0x6cb   :  { %v3697_v37 = vpack.c.bf16 %v3662_v63, %v3661_v21  ;;  %v11902_v21 = vld [vmem:[#allocation84_spill] sm:$0xff] }
 0x6cd   :  { %v3906_v26 = vpop.f32.mrf.mxu3  ;;  %v9649_v6 = vpop.f32.mrf.mxu2 }
 0x6ce   :  { %v9647_v31 = vadd.f32 %v3906_v26, %v9476_v41  ;;  %11891 = vst [vmem:[#allocation91_spill] sm:$0xff] %v9649_v6  ;;  %v3102_v15 = vpop.f32.mrf.mxu1  ;;  %v11897_v41 = vld [vmem:[#allocation14_spill] sm:$0xff]  ;;  %v11898_v26 = vld [vmem:[#allocation83_spill] sm:$0xff] }
 0x6cf   :  { %v9653_v14 = vadd.f32 %v3102_v15, %v2741_v47  ;;  %v2742_v16 = vadd.f32 %v11898_v26, %v11897_v41  ;;  %v4536_v15 = vpack.c.bf16 %v4480_v60, %v4479_v36  ;;  %v3663_v41 = vld [vmem:[#allocation2 + $0x318] sm:$0xff]  ;;  %v3664_v26 = vld [vmem:[#allocation2 + $0x320] sm:$0xff] }
 0x6d0   :  { %11890 = vst [vmem:[#allocation81_spill] sm:$0xff] %v9647_v31  ;;  %v3698_v36 = vpack.c.bf16 %v3664_v26, %v3663_v41  ;;  %v4402_v41 = vadd.f32 %v11909_v40, %v11908_v13  ;;  %v11946_v31 = vld [vmem:[#allocation8_spill] sm:$0xff] }
 0x6d1   :  { %11894 = vst [vmem:[#allocation29_spill] sm:$0xff] %v9653_v14 }
 0x6d5   :  { %v3908_v27 = vpop.f32.mrf.mxu3  ;;  %v9658_v23 = vpop.f32.mrf.mxu2 }
 0x6d6   :  { %v9656_v49 = vadd.f32 %v3908_v27, %v9486_v2  ;;  %11896 = vst [vmem:[#allocation92_spill] sm:$0xff] %v9658_v23  ;;  %v3105_v6 = vpop.f32.mrf.mxu1  ;;  %v11901_v27 = vld [vmem:[#allocation31_spill] sm:$0xff] }
 0x6d7   :  { %v9663_v11 = vadd.f32 %v3105_v6, %v2742_v16  ;;  %v2743_v63 = vadd.f32 %v11902_v21, %v11901_v27  ;;  %v4481_v16 = vld [vmem:[#allocation2 + $0xf2] sm:$0xff]  ;;  %v4482_v6 = vld [vmem:[#allocation2 + $0xfa] sm:$0xff] }
 0x6d8   :  { %11895 = vst [vmem:[#allocation82_spill] sm:$0xff] %v9656_v49  ;;  %6476 = vmatmul.msk.bf16.gmra.mxu1 %vm430_vm2, %v4536_v15  ;;  %v11906_v15 = vld [vmem:[#allocation7_spill] sm:$0xff]  ;;  %v4537_v27 = vpack.c.bf16 %v4482_v6, %v4481_v16  ;;  %v4098_v21 = vld [vmem:[#allocation2 + $0x351] sm:$0xff] }
 0x6d9   :  { %11899 = vst [vmem:[#allocation14_spill] sm:$0xff] %v9663_v11  ;;  %v3665_v16 = vld [vmem:[#allocation2 + $0x330] sm:$0xff]  ;;  %v3666_v6 = vld [vmem:[#allocation2 + $0x338] sm:$0xff] }
 0x6da   :  { %6431 = vmatmul.msk.bf16.gmra.mxu3 %vm430_vm2, %v3697_v37  ;;  %v9675_v37 = vpop.f32.mrf.mxu0 }
 0x6db   :  { %11904 = vst [vmem:[#allocation84_spill] sm:$0xff] %v9675_v37  ;;  %v11945_v37 = vld [vmem:[#allocation26_spill] sm:$0xff] }
 0x6dc   :  { %v4414_v39 = vadd.f32 %v11946_v31, %v11945_v37  ;;  %v11954_v37 = vld [vmem:[#allocation6_spill] sm:$0xff] }
 0x6dd   :  { %v3911_v62 = vpop.f32.mrf.mxu3  ;;  %v9669_v47 = vpop.f32.mrf.mxu2 }
 0x6de   :  { %v9667_v2 = vadd.f32 %v3911_v62, %v9503_v19  ;;  %11900 = vst [vmem:[#allocation83_spill] sm:$0xff] %v9669_v47  ;;  %v3107_v23 = vpop.f32.mrf.mxu1  ;;  %v11907_v19 = vld [vmem:[#allocation85_spill] sm:$0xff] }
 0x6df   :  { %v9673_v14 = vadd.f32 %v3107_v23, %v2743_v63  ;;  %v4401_v62 = vadd.f32 %v11907_v19, %v11906_v15  ;;  %v4097_v23 = vld [vmem:[#allocation2 + $0x349] sm:$0xff]  ;;  %v4484_v19 = vld [vmem:[#allocation2 + $0x112] sm:$0xff] }
 0x6e0   :  { %v4130_v63 = vpack.c.bf16 %v4098_v21, %v4097_v23  ;;  %v11912_v23 = vld [vmem:[#allocation87_spill] sm:$0xff] }
 0x6e1   :  { %11903 = vst [vmem:[#allocation31_spill] sm:$0xff] %v9673_v14 }
 0x6e2   :  { %v9687_v26 = vpop.f32.mrf.mxu0  ;;  %6467 = vmatmul.msk.bf16.gmra.mxu0 %vm430_vm2, %v4130_v63 }
 0x6e3   :  { %11910 = vst [vmem:[#allocation7_spill] sm:$0xff] %v9687_v26  ;;  %v11944_v26 = vld [vmem:[#allocation9_spill] sm:$0xff] }
 0x6e5   :  { %v9677_v60 = vpop.f32.mrf.mxu2 }
 0x6e6   :  { %11905 = vst [vmem:[#allocation93_spill] sm:$0xff] %v9677_v60  ;;  %v4671_v11 = vpop.f32.mrf.mxu1 }
 0x6e7   :  { %v9682_v47 = vadd.f32 %v4671_v11, %v4401_v62  ;;  %v3699_v62 = vpack.c.bf16 %v3666_v6, %v3665_v16  ;;  %v3700_v16 = vpack.c.bf16 %v3668_v32, %v3667_v17  ;;  %v4485_v6 = vld [vmem:[#allocation2 + $0x122] sm:$0xff]  ;;  %v9715_v32 = vpop.f32.mrf.mxu3  ;;  %v4487_v17 = vld [vmem:[#allocation2 + $0x13a] sm:$0xff] }
 0x6e8   :  { %6477 = vmatmul.msk.bf16.gmra.mxu1 %vm430_vm2, %v4537_v27  ;;  %v11911_v27 = vld [vmem:[#allocation35_spill] sm:$0xff]  ;;  %11919 = vst [vmem:[#allocation85_spill] sm:$0xff] %v9715_v32 }
 0x6e9   :  { %v4403_v21 = vadd.f32 %v11912_v23, %v11911_v27  ;;  %v11915_v27 = vld [vmem:[#allocation37_spill] sm:$0xff]  ;;  %v11916_v23 = vld [vmem:[#allocation11_spill] sm:$0xff] }
 0x6ea   :  { %6432 = vmatmul.msk.bf16.gmra.mxu3 %vm430_vm2, %v3698_v36  ;;  %v4483_v36 = vld [vmem:[#allocation2 + $0x10a] sm:$0xff]  ;;  %v4405_v0 = vadd.f32 %v11916_v23, %v11915_v27  ;;  %v11920_v27 = vld [vmem:[#allocation19_spill] sm:$0xff] }
 0x6eb   :  { %v4538_v40 = vpack.c.bf16 %v4484_v19, %v4483_v36  ;;  %v4539_v36 = vpack.c.bf16 %v4486_v25, %v4485_v6  ;;  %v11917_v19 = vld [vmem:[#allocation10_spill] sm:$0xff]  ;;  %v11921_v23 = vld [vmem:[#allocation25_spill] sm:$0xff] }
 0x6ec   :  { %v4407_v45 = vadd.f32 %v11921_v23, %v11920_v27  ;;  %v4490_v27 = vld [vmem:[#allocation2 + $0x15a] sm:$0xff] }
 0x6ed   :  { %v3520_v14 = vpop.f32.mrf.mxu2  ;;  %v11927_v23 = vld [vmem:[#allocation43_spill] sm:$0xff] }
 0x6ee   :  { %v9690_v60 = vadd.f32 %v3520_v14, %v9603_v51  ;;  %v4673_v15 = vpop.f32.mrf.mxu1  ;;  %v11913_v14 = vld [vmem:[#allocation17_spill] sm:$0xff]  ;;  %v11914_v51 = vld [vmem:[#allocation88_spill] sm:$0xff] }
 0x6ef   :  { %v9693_v11 = vadd.f32 %v4673_v15, %v4402_v41  ;;  %v4404_v63 = vadd.f32 %v11914_v51, %v11913_v14  ;;  %v4341_v51 = vpop.f32.mrf.mxu0 }
 0x6f6   :  { %v4676_v1 = vpop.f32.mrf.mxu1 }
 0x6f7   :  { %v9698_v13 = vadd.f32 %v4676_v1, %v4403_v21  ;;  %v11918_v21 = vld [vmem:[#allocation3_spill] sm:$0xff]  ;;  %v9721_v6 = vpop.f32.mrf.mxu0 }
 0x6f8   :  { %6478 = vmatmul.msk.bf16.gmra.mxu1 %vm430_vm2, %v4538_v40  ;;  %v4406_v40 = vadd.f32 %v11918_v21, %v11917_v19  ;;  %11922 = vst [vmem:[#allocation16_spill] sm:$0xff] %v9721_v6  ;;  %v11925_v19 = vld [vmem:[#allocation12_spill] sm:$0xff] }
 0x6fa   :  { %6433 = vmatmul.msk.bf16.gmra.mxu3 %vm430_vm2, %v3699_v62 }
 0x6fe   :  { %v4678_v41 = vpop.f32.mrf.mxu1 }
 0x6ff   :  { %v9703_v15 = vadd.f32 %v4678_v41, %v4404_v63  ;;  %v4488_v41 = vld [vmem:[#allocation2 + $0x142] sm:$0xff]  ;;  %v9730_v32 = vpop.f32.mrf.mxu0 }
 0x700   :  { %v4540_v25 = vpack.c.bf16 %v4488_v41, %v4487_v17  ;;  %11926 = vst [vmem:[#allocation35_spill] sm:$0xff] %v9730_v32  ;;  %v4492_v32 = vld [vmem:[#allocation2 + $0x172] sm:$0xff] }
 0x706   :  { %v4681_v62 = vpop.f32.mrf.mxu1 }
 0x707   :  { %v9708_v1 = vadd.f32 %v4681_v62, %v4405_v0  ;;  %v9724_v62 = vpop.f32.mrf.mxu3 }
 0x708   :  { %6479 = vmatmul.msk.bf16.gmra.mxu1 %vm430_vm2, %v4539_v36  ;;  %11923 = vst [vmem:[#allocation86_spill] sm:$0xff] %v9724_v62  ;;  %v11924_v36 = vld [vmem:[#allocation20_spill] sm:$0xff]  ;;  %v9739_v62 = vpop.f32.mrf.mxu0 }
 0x709   :  { %v4408_v21 = vadd.f32 %v11925_v19, %v11924_v36  ;;  %11930 = vst [vmem:[#allocation17_spill] sm:$0xff] %v9739_v62  ;;  %v9742_v19 = vadd.f32 %v4341_v51, %v9667_v2 }
 0x70a   :  { %6434 = vmatmul.msk.bf16.gmra.mxu3 %vm430_vm2, %v3700_v16 }
 0x70b   :  { %11931 = vst [vmem:[#allocation88_spill] sm:$0xff] %v9742_v19 }
 0x70e   :  { %v4683_v14 = vpop.f32.mrf.mxu1 }
 0x70f   :  { %v9713_v63 = vadd.f32 %v4683_v14, %v4406_v40  ;;  %v9734_v41 = vpop.f32.mrf.mxu3 }
 0x710   :  { %11929 = vst [vmem:[#allocation87_spill] sm:$0xff] %v9734_v41 }
 0x716   :  { %v4686_v16 = vpop.f32.mrf.mxu1 }
 0x717   :  { %v9719_v0 = vadd.f32 %v4686_v16, %v4407_v45  ;;  %v11928_v45 = vld [vmem:[#allocation27_spill] sm:$0xff] }
 0x718   :  { %6480 = vmatmul.msk.bf16.gmra.mxu1 %vm430_vm2, %v4540_v25  ;;  %v4409_v16 = vadd.f32 %v11928_v45, %v11927_v23  ;;  %v4541_v25 = vpack.c.bf16 %v4490_v27, %v4489_v22  ;;  %v9746_v23 = vpop.f32.mrf.mxu0 }
 0x719   :  { %11933 = vst [vmem:[#allocation11_spill] sm:$0xff] %v9746_v23 }
 0x71e   :  { %v4688_v40 = vpop.f32.mrf.mxu1 }
 0x71f   :  { %v9728_v14 = vadd.f32 %v4688_v40, %v4408_v21  ;;  %v9744_v21 = vpop.f32.mrf.mxu3  ;;  %v4491_v40 = vld [vmem:[#allocation2 + $0x16a] sm:$0xff] }
 0x720   :  { %11932 = vst [vmem:[#allocation37_spill] sm:$0xff] %v9744_v21  ;;  %v4542_v45 = vpack.c.bf16 %v4492_v32, %v4491_v40  ;;  %v9751_v27 = vpop.f32.mrf.mxu0  ;;  %v4495_v32 = vld [vmem:[#allocation2 + $0x19a] sm:$0xff]  ;;  %v4496_v40 = vld [vmem:[#allocation2 + $0x1a2] sm:$0xff] }
 0x721   :  { %11935 = vst [vmem:[#allocation3_spill] sm:$0xff] %v9751_v27 }
 0x726   :  { %v4691_v17 = vpop.f32.mrf.mxu1 }
 0x727   :  { %v9736_v6 = vadd.f32 %v4691_v17, %v4409_v16  ;;  %v9749_v16 = vpop.f32.mrf.mxu3  ;;  %v4493_v17 = vld [vmem:[#allocation2 + $0x182] sm:$0xff] }
 0x728   :  { %6481 = vmatmul.msk.bf16.gmra.mxu1 %vm430_vm2, %v4541_v25  ;;  %11934 = vst [vmem:[#allocation10_spill] sm:$0xff] %v9749_v16  ;;  %v4494_v25 = vld [vmem:[#allocation2 + $0x18a] sm:$0xff]  ;;  %v9756_v41 = vpop.f32.mrf.mxu0  ;;  %v4544_v16 = vpack.c.bf16 %v4496_v40, %v4495_v32  ;;  %v11947_v40 = vld [vmem:[#allocation51_spill] sm:$0xff] }
 0x729   :  { %v4543_v51 = vpack.c.bf16 %v4494_v25, %v4493_v17  ;;  %11937 = vst [vmem:[#allocation25_spill] sm:$0xff] %v9756_v41  ;;  %v11943_v41 = vld [vmem:[#allocation28_spill] sm:$0xff] }
 0x72a   :  { %v4415_v49 = vadd.f32 %v11944_v26, %v11943_v41  ;;  %v11951_v26 = vld [vmem:[#allocation57_spill] sm:$0xff]  ;;  %v11952_v41 = vld [vmem:[#allocation39_spill] sm:$0xff] }
 0x72e   :  { %v4693_v36 = vpop.f32.mrf.mxu1 }
 0x72f   :  { %v9753_v62 = vpop.f32.mrf.mxu3 }
 0x730   :  { %11936 = vst [vmem:[#allocation19_spill] sm:$0xff] %v9753_v62  ;;  %v11941_v62 = vld [vmem:[#allocation18_spill] sm:$0xff] }
 0x731   :  { %v4416_v17 = vadd.f32 %v11941_v62, %v9325_v18  ;;  %v4497_v18 = vld [vmem:[#allocation2 + $0x1e2] sm:$0xff]  ;;  %v4498_v62 = vld [vmem:[#allocation2 + $0x1ea] sm:$0xff] }
 0x736   :  { %v4696_v43 = vpop.f32.mrf.mxu1 }
 0x737   :  { %v9758_v23 = vpop.f32.mrf.mxu3 }
 0x738   :  { %6482 = vmatmul.msk.bf16.gmra.mxu1 %vm430_vm2, %v4542_v45  ;;  %11938 = vst [vmem:[#allocation20_spill] sm:$0xff] %v9758_v23  ;;  %v9760_v45 = vpop.f32.mrf.mxu0 }
 0x739   :  { %11939 = vst [vmem:[#allocation12_spill] sm:$0xff] %v9760_v45 }
 0x73e   :  { %v4698_v22 = vpop.f32.mrf.mxu1 }
 0x73f   :  { %v9762_v27 = vpop.f32.mrf.mxu3 }
 0x740   :  { %11940 = vst [vmem:[#allocation43_spill] sm:$0xff] %v9762_v27  ;;  %v11948_v27 = vld [vmem:[#allocation33_spill] sm:$0xff] }
 0x746   :  { %v4701_v2 = vpop.f32.mrf.mxu1 }
 0x747   :  { %v9773_v32 = vpop.f32.mrf.mxu3 }
 0x748   :  { %6483 = vmatmul.msk.bf16.gmra.mxu1 %vm430_vm2, %v4543_v51  ;;  %v9767_v51 = vpop.f32.mrf.mxu0 }
 0x749   :  { %11942 = vst [vmem:[#allocation27_spill] sm:$0xff] %v9767_v51  ;;  %v11950_v51 = vld [vmem:[#allocation15_spill] sm:$0xff] }
 0x74a   :  { %v4412_v9 = vadd.f32 %v11950_v51, %v11949_v30 }
 0x74e   :  { %v4703_v21 = vpop.f32.mrf.mxu1 }
 0x74f   :  { %v4844_v59 = vadd.f32 %v4703_v21, %v4414_v39  ;;  %v4545_v39 = vpack.c.bf16 %v4498_v62, %v4497_v18  ;;  %v11958_v18 = vld [vmem:[#allocation21_spill] sm:$0xff] }
 0x750   :  { %v9785_v21 = vpop.f32.mrf.mxu0  ;;  %v4419_v62 = vadd.f32 %v11958_v18, %v9375_v8  ;;  %v11959_v8 = vld [vmem:[#allocation22_spill] sm:$0xff] }
 0x756   :  { %v4706_v19 = vpop.f32.mrf.mxu1 }
 0x757   :  { %v4845_v45 = vadd.f32 %v4706_v19, %v4415_v49  ;;  %v11953_v49 = vld [vmem:[#allocation47_spill] sm:$0xff] }
 0x758   :  { %6484 = vmatmul.msk.bf16.gmra.mxu1 %vm430_vm2, %v4544_v16  ;;  %v4413_v16 = vadd.f32 %v11948_v27, %v11947_v40  ;;  %v4411_v19 = vadd.f32 %v11954_v37, %v11953_v49  ;;  %v11955_v27 = vld [vmem:[#allocation45_spill] sm:$0xff]  ;;  %v4502_v49 = vld [vmem:[#allocation2 + $0x21a] sm:$0xff] }
 0x75a   :  { %v4843_v61 = vadd.f32 %v4701_v2, %v4413_v16  ;;  %v4841_v30 = vadd.f32 %v4696_v43, %v4411_v19  ;;  %v9790_v2 = vpop.f32.mrf.mxu3  ;;  %v9798_v16 = vpop.f32.mrf.mxu0  ;;  %v4499_v43 = vld [vmem:[#allocation2 + $0x1fa] sm:$0xff] }
 0x75e   :  { %v4708_v25 = vpop.f32.mrf.mxu1 }
 0x75f   :  { %v4846_v23 = vadd.f32 %v4708_v25, %v4416_v17  ;;  %v4417_v17 = vadd.f32 %v11952_v41, %v11951_v26 }
 0x761   :  { %4959 = vmatpush.msrb.mxu2 %v4846_v23  ;;  %v4842_v23 = vadd.f32 %v4698_v22, %v4412_v9  ;;  %v11957_v9 = vld [vmem:[#allocation41_spill] sm:$0xff] }
 0x762   :  { %v4418_v22 = vadd.f32 %v11957_v9, %v9357_v42  ;;  %v9804_v42 = vpop.f32.mrf.mxu3  ;;  %v11962_v9 = vld [vmem:[#allocation53_spill] sm:$0xff] }
 0x763   :  { %4960 = vmatpush.msrb.mxu2 %v4845_v45  ;;  %v11956_v45 = vld [vmem:[#allocation5_spill] sm:$0xff] }
 0x764   :  { %v4410_v40 = vadd.f32 %v11956_v45, %v11955_v27 }
 0x765   :  { %4961 = vmatpush.msrb.mxu2 %v4844_v59 }
 0x766   :  { %v4711_v31 = vpop.f32.mrf.mxu1  ;;  %v4840_v59 = vadd.f32 %v4693_v36, %v4410_v40  ;;  %v4500_v36 = vld [vmem:[#allocation2 + $0x202] sm:$0xff] }
 0x767   :  { %v9783_v25 = vadd.f32 %v4711_v31, %v4417_v17  ;;  %4962 = vmatpush.msrb.mxu2 %v4843_v61  ;;  %v4501_v31 = vld [vmem:[#allocation2 + $0x212] sm:$0xff] }
 0x768   :  { %6485 = vmatmul.msk.bf16.gmra.mxu1 %vm430_vm2, %v4545_v39  ;;  %v11961_v39 = vld [vmem:[#allocation24_spill] sm:$0xff] }
 0x769   :  { %4963 = vmatpush.msrb.mxu2 %v4842_v23 }
 0x76b   :  { %4964 = vmatpush.msrb.mxu2 %v4841_v30  ;;  %v4503_v30 = vld [vmem:[#allocation2 + $0x22a] sm:$0xff] }
 0x76d   :  { %4965 = vmatpush.msrb.mxu2 %v4840_v59 }
 0x76e   :  { %v4713_v51 = vpop.f32.mrf.mxu1 }
 0x76f   :  { %v9794_v61 = vadd.f32 %v4713_v51, %v4418_v22  ;;  %4966 = vmatpush.msrb.mxu2 %v9736_v6  ;;  %v4546_v6 = vpack.c.bf16 %v4500_v36, %v4499_v43  ;;  %v4423_v22 = vadd.f32 %v11962_v9, %v9439_v57  ;;  %v11964_v57 = vld [vmem:[#allocation30_spill] sm:$0xff] }
 0x771   :  { %4967 = vmatpush.msrb.mxu2 %v9728_v14 }
 0x773   :  { %4968 = vmatpush.msrb.mxu2 %v9719_v0  ;;  %v9812_v0 = vpop.f32.mrf.mxu0 }
 0x775   :  { %4969 = vmatpush.msrb.mxu2 %v9713_v63  ;;  %v4420_v63 = vadd.f32 %v11959_v8, %v9387_v4 }
 0x776   :  { %v4716_v26 = vpop.f32.mrf.mxu1 }
 0x777   :  { %v9806_v41 = vadd.f32 %v4716_v26, %v4419_v62  ;;  %4970 = vmatpush.msrb.mxu2 %v9708_v1  ;;  %v9820_v1 = vpop.f32.mrf.mxu3 }
 0x778   :  { %6486 = vmatmul.msk.bf16.gmra.mxu1 %vm430_vm2, %v4546_v6 }
 0x779   :  { %4971 = vmatpush.msrb.mxu2 %v9703_v15  ;;  %v11960_v15 = vld [vmem:[#allocation23_spill] sm:$0xff] }
 0x77a   :  { %v4421_v37 = vadd.f32 %v11960_v15, %v9407_v28  ;;  %v4504_v28 = vld [vmem:[#allocation2 + $0x232] sm:$0xff] }
 0x77b   :  { %4972 = vmatpush.msrb.mxu2 %v9698_v13  ;;  %v9824_v19 = vpop.f32.mrf.mxu0  ;;  %v4548_v36 = vpack.c.bf16 %v4504_v28, %v4503_v30  ;;  %v4507_v30 = vld [vmem:[#allocation2 + $0x25a] sm:$0xff]  ;;  %v4508_v28 = vld [vmem:[#allocation2 + $0x262] sm:$0xff] }
 0x77d   :  { %4973 = vmatpush.msrb.mxu2 %v9693_v11  ;;  %v4547_v11 = vpack.c.bf16 %v4502_v49, %v4501_v31  ;;  %v4425_v49 = vadd.f32 %v11964_v57, %v9469_v38  ;;  %v4509_v38 = vld [vmem:[#allocation2 + $0x272] sm:$0xff] }
 0x77e   :  { %v4718_v14 = vpop.f32.mrf.mxu1 }
 0x77f   :  { %v9817_v17 = vadd.f32 %v4718_v14, %v4420_v63  ;;  %4974 = vmatpush.msrb.mxu2 %v9682_v47  ;;  %v9829_v4 = vpop.f32.mrf.mxu3  ;;  %v4422_v47 = vadd.f32 %v11961_v39, %v9419_v55  ;;  %v11963_v55 = vld [vmem:[#allocation55_spill] sm:$0xff]  ;;  %v4506_v14 = vld [vmem:[#allocation2 + $0x24a] sm:$0xff] }
 0x780   :  { %v4424_v62 = vadd.f32 %v11963_v55, %v9449_v29  ;;  %v4505_v63 = vld [vmem:[#allocation2 + $0x242] sm:$0xff] }
 0x783   :  { %v9835_v40 = vpop.f32.mrf.mxu0 }
 0x786   :  { %v4721_v13 = vpop.f32.mrf.mxu1 }
 0x787   :  { %v9826_v23 = vadd.f32 %v4721_v13, %v4421_v37  ;;  %v9837_v59 = vpop.f32.mrf.mxu3  ;;  %v4549_v13 = vpack.c.bf16 %v4506_v14, %v4505_v63  ;;  %v4511_v63 = vld [vmem:[#allocation2 + $0x28a] sm:$0xff] }
 0x788   :  { %6487 = vmatmul.msk.bf16.gmra.mxu1 %vm430_vm2, %v4547_v11 }
 0x78b   :  { %v9844_v18 = vpop.f32.mrf.mxu0 }
 0x78e   :  { %v4723_v27 = vpop.f32.mrf.mxu1 }
 0x78f   :  { %v9833_v45 = vadd.f32 %v4723_v27, %v4422_v47  ;;  %v9848_v6 = vpop.f32.mrf.mxu3 }
 0x793   :  { %v9852_v31 = vpop.f32.mrf.mxu0 }
 0x796   :  { %v4726_v51 = vpop.f32.mrf.mxu1 }
 0x797   :  { %v9841_v43 = vadd.f32 %v4726_v51, %v4423_v22  ;;  %v3951_v11 = vpop.f32.mrf.mxu3  ;;  %v4550_v22 = vpack.c.bf16 %v4508_v28, %v4507_v30  ;;  %v4429_v30 = vadd.f32 %v9416_v33, %v9527_v3  ;;  %v11966_v3 = vld [vmem:[#allocation32_spill] sm:$0xff] }
 0x798   :  { %6488 = vmatmul.msk.bf16.gmra.mxu1 %vm430_vm2, %v4548_v36  ;;  %v4027_v29 = vadd.f32 %v3951_v11, %v9690_v60  ;;  %v4510_v36 = vld [vmem:[#allocation2 + $0x27a] sm:$0xff]  ;;  %v4512_v60 = vld [vmem:[#allocation2 + $0x292] sm:$0xff] }
 0x799   :  { %v4552_v57 = vpack.c.bf16 %v4512_v60, %v4511_v63 }
 0x79b   :  { %v4381_v47 = vpop.f32.mrf.mxu0 }
 0x79c   :  { %v9858_v27 = vadd.f32 %v4381_v47, %v4027_v29  ;;  %v4430_v29 = vadd.f32 %v9433_v10, %v9538_v54  ;;  %v11965_v10 = vld [vmem:[#allocation59_spill] sm:$0xff] }
 0x79d   :  { %v4427_v54 = vadd.f32 %v11965_v10, %v9498_v12  ;;  %v11976_v10 = vld [vmem:[#allocation88_spill] sm:$0xff] }
 0x79e   :  { %v4728_v26 = vpop.f32.mrf.mxu1 }
 0x79f   :  { %v9850_v8 = vadd.f32 %v4728_v26, %v4424_v62  ;;  %v4551_v62 = vpack.c.bf16 %v4510_v36, %v4509_v38  ;;  %v4514_v38 = vld [vmem:[#allocation2 + $0x2aa] sm:$0xff] }
 0x7a6   :  { %v4731_v15 = vpop.f32.mrf.mxu1 }
 0x7a7   :  { %v4855_v37 = vadd.f32 %v4731_v15, %v4425_v49  ;;  %v4432_v49 = vadd.f32 %v9473_v5, %v9568_v46  ;;  %v4428_v5 = vadd.f32 %v9391_v34, %v9510_v48 }
 0x7a8   :  { %6489 = vmatmul.msk.bf16.gmra.mxu1 %vm430_vm2, %v4549_v13  ;;  %v4431_v13 = vadd.f32 %v9451_v24, %v9557_v50  ;;  %v4433_v24 = vadd.f32 %v9491_v53, %v9587_v35  ;;  %v4434_v53 = vadd.f32 %v9507_v56, %v9596_v7  ;;  %v4515_v35 = vld [vmem:[#allocation2 + $0x2ba] sm:$0xff] }
 0x7a9   :  { %v11967_v7 = vld [vmem:[#allocation50_spill] sm:$0xff] }
 0x7ae   :  { %v4733_v39 = vpop.f32.mrf.mxu1 }
 0x7b6   :  { %v4736_v9 = vpop.f32.mrf.mxu1 }
 0x7b7   :  { %v4857_v63 = vadd.f32 %v4736_v9, %v4427_v54 }
 0x7b8   :  { %6490 = vmatmul.msk.bf16.gmra.mxu1 %vm430_vm2, %v4550_v22  ;;  %v4513_v22 = vld [vmem:[#allocation2 + $0x2a2] sm:$0xff] }
 0x7b9   :  { %v4553_v33 = vpack.c.bf16 %v4514_v38, %v4513_v22  ;;  %v11974_v22 = vld [vmem:[#allocation82_spill] sm:$0xff]  ;;  %v11975_v38 = vld [vmem:[#allocation7_spill] sm:$0xff] }
 0x7be   :  { %v4738_v51 = vpop.f32.mrf.mxu1 }
 0x7bf   :  { %v4858_v36 = vadd.f32 %v4738_v51, %v4428_v5  ;;  %v4440_v5 = vadd.f32 %v11975_v38, %v11974_v22 }
 0x7c6   :  { %v4741_v55 = vpop.f32.mrf.mxu1 }
 0x7c7   :  { %v4859_v46 = vadd.f32 %v4741_v55, %v4429_v30 }
 0x7c8   :  { %6491 = vmatmul.msk.bf16.gmra.mxu1 %vm430_vm2, %v4551_v62 }
 0x7ce   :  { %v4743_v26 = vpop.f32.mrf.mxu1 }
 0x7cf   :  { %v4860_v28 = vadd.f32 %v4743_v26, %v4430_v29  ;;  %v4426_v26 = vadd.f32 %v11966_v3, %v9481_v58  ;;  %v4516_v58 = vld [vmem:[#allocation2 + $0x2c2] sm:$0xff] }
 0x7d0   :  { %v4554_v56 = vpack.c.bf16 %v4516_v58, %v4515_v35  ;;  %v4527_v35 = vld [vmem:[#allocation2 + $0x34a] sm:$0xff]  ;;  %v4528_v58 = vld [vmem:[#allocation2 + $0x352] sm:$0xff] }
 0x7d1   :  { %v4856_v34 = vadd.f32 %v4733_v39, %v4426_v26  ;;  %v4435_v39 = vadd.f32 %v9529_v20, %v9607_v44  ;;  %v4517_v20 = vld [vmem:[#allocation2 + $0x2d2] sm:$0xff]  ;;  %v4518_v44 = vld [vmem:[#allocation2 + $0x2da] sm:$0xff] }
 0x7d2   :  { %v11978_v26 = vld [vmem:[#allocation54_spill] sm:$0xff] }
 0x7d6   :  { %v4746_v14 = vpop.f32.mrf.mxu1 }
 0x7d7   :  { %v4861_v47 = vadd.f32 %v4746_v14, %v4431_v13  ;;  %v4520_v13 = vld [vmem:[#allocation2 + $0x2f2] sm:$0xff] }
 0x7d8   :  { %6492 = vmatmul.msk.bf16.gmra.mxu1 %vm430_vm2, %v4552_v57 }
 0x7de   :  { %v4748_v15 = vpop.f32.mrf.mxu1 }
 0x7df   :  { %v4862_v11 = vadd.f32 %v4748_v15, %v4432_v49  ;;  %v4519_v15 = vld [vmem:[#allocation2 + $0x2ea] sm:$0xff] }
 0x7e1   :  { %5024 = vmatpush.msrb.mxu3 %v4862_v11  ;;  %v11973_v11 = vld [vmem:[#allocation84_spill] sm:$0xff] }
 0x7e3   :  { %5025 = vmatpush.msrb.mxu3 %v4861_v47 }
 0x7e5   :  { %5026 = vmatpush.msrb.mxu3 %v4860_v28  ;;  %v4556_v28 = vpack.c.bf16 %v4520_v13, %v4519_v15  ;;  %v11990_v13 = vld [vmem:[#allocation10_spill] sm:$0xff] }
 0x7e6   :  { %v4751_v50 = vpop.f32.mrf.mxu1 }
 0x7e7   :  { %v9877_v62 = vadd.f32 %v4751_v50, %v4433_v24  ;;  %5027 = vmatpush.msrb.mxu3 %v4859_v46 }
 0x7e8   :  { %6493 = vmatmul.msk.bf16.gmra.mxu1 %vm430_vm2, %v4553_v33 }
 0x7e9   :  { %5028 = vmatpush.msrb.mxu3 %v4858_v36  ;;  %v11977_v36 = vld [vmem:[#allocation46_spill] sm:$0xff] }
 0x7eb   :  { %5029 = vmatpush.msrb.mxu3 %v4857_v63 }
 0x7ed   :  { %5030 = vmatpush.msrb.mxu3 %v4856_v34 }
 0x7ee   :  { %v4753_v48 = vpop.f32.mrf.mxu1 }
 0x7ef   :  { %v9884_v12 = vadd.f32 %v4753_v48, %v4434_v53  ;;  %5031 = vmatpush.msrb.mxu3 %v4855_v37  ;;  %v11969_v37 = vld [vmem:[#allocation60_spill] sm:$0xff]  ;;  %v11979_v53 = vld [vmem:[#allocation66_spill] sm:$0xff] }
 0x7f1   :  { %5032 = vmatpush.msrb.mxu3 %v9850_v8 }
 0x7f3   :  { %5033 = vmatpush.msrb.mxu3 %v9841_v43 }
 0x7f5   :  { %5034 = vmatpush.msrb.mxu3 %v9833_v45  ;;  %v4436_v45 = vadd.f32 %v11967_v7, %v9616_v52  ;;  %v11981_v7 = vld [vmem:[#allocation73_spill] sm:$0xff] }
 0x7f6   :  { %v4756_v9 = vpop.f32.mrf.mxu1 }
 0x7f7   :  { %v9891_v51 = vadd.f32 %v4756_v9, %v4435_v39  ;;  %5035 = vmatpush.msrb.mxu3 %v9826_v23  ;;  %v11968_v23 = vld [vmem:[#allocation79_spill] sm:$0xff]  ;;  %v4560_v39 = vpack.c.bf16 %v4528_v58, %v4527_v35 }
 0x7f8   :  { %6494 = vmatmul.msk.bf16.gmra.mxu1 %vm430_vm2, %v4554_v56  ;;  %v4437_v55 = vadd.f32 %v11969_v37, %v11968_v23  ;;  %v11980_v56 = vld [vmem:[#allocation40_spill] sm:$0xff]  ;;  %v9952_v58 = vld [vmem:[%s11506_s16] sm:$0xff] }
 0x7f9   :  { %5036 = vmatpush.msrb.mxu3 %v9817_v17  ;;  %v4555_v17 = vpack.c.bf16 %v4518_v44, %v4517_v20  ;;  %v11983_v20 = vld [vmem:[#allocation70_spill] sm:$0xff]  ;;  %v11984_v23 = vld [vmem:[#allocation20_spill] sm:$0xff]  ;;  %4975 = vmatmul.f32.vlgmr.msrb.gmra.mxu2 %v9952_v58 }
 0x7fb   :  { %5037 = vmatpush.msrb.mxu3 %v9806_v41  ;;  %v11971_v41 = vld [vmem:[#allocation68_spill] sm:$0xff] }
 0x7fd   :  { %5038 = vmatpush.msrb.mxu3 %v9794_v61  ;;  %v11970_v61 = vld [vmem:[#allocation80_spill] sm:$0xff] }
 0x7fe   :  { %v4758_v43 = vpop.f32.mrf.mxu1  ;;  %v4438_v57 = vadd.f32 %v11971_v41, %v11970_v61  ;;  %v11987_v61 = vld [vmem:[#allocation19_spill] sm:$0xff] }
 0x7ff   :  { %v9900_v8 = vadd.f32 %v4758_v43, %v4436_v45  ;;  %5039 = vmatpush.msrb.mxu3 %v9783_v25  ;;  %v11972_v25 = vld [vmem:[#allocation81_spill] sm:$0xff]  ;;  %v3587_v45 = vadd.f32 %v11981_v7, %v11980_v56  ;;  %v12000_v7 = vld [vmem:[#allocation72_spill] sm:$0xff] }
 0x800   :  { %v4439_v29 = vadd.f32 %v11973_v11, %v11972_v25  ;;  %v11982_v43 = vld [vmem:[#allocation65_spill] sm:$0xff]  ;;  %v11991_v11 = vld [vmem:[#allocation12_spill] sm:$0xff] }
 0x801   :  { %v3586_v44 = vadd.f32 %v11983_v20, %v11982_v43  ;;  %v4018_v37 = vadd.f32 %v11984_v23, %v3587_v45  ;;  %v11999_v56 = vld [vmem:[#allocation61_spill] sm:$0xff]  ;;  %v12001_v43 = vld [vmem:[#allocation87_spill] sm:$0xff] }
 0x802   :  { %v3582_v45 = vadd.f32 %v12000_v7, %v11999_v56  ;;  %v12014_v7 = vld [vmem:[#allocation44_spill] sm:$0xff] }
 0x803   :  { %v4017_v41 = vadd.f32 %v11987_v61, %v3586_v44  ;;  %v12002_v44 = vld [vmem:[#allocation43_spill] sm:$0xff]  ;;  %v12005_v61 = vld [vmem:[#allocation69_spill] sm:$0xff] }
 0x806   :  { %v4761_v60 = vpop.f32.mrf.mxu1 }
 0x807   :  { %v9905_v14 = vadd.f32 %v4761_v60, %v4437_v55  ;;  %v11985_v55 = vld [vmem:[#allocation38_spill] sm:$0xff] }
 0x808   :  { %6495 = vmatmul.msk.bf16.gmra.mxu1 %vm430_vm2, %v4555_v17  ;;  %v11986_v60 = vld [vmem:[#allocation62_spill] sm:$0xff] }
 0x809   :  { %v3585_v17 = vadd.f32 %v11986_v60, %v11985_v55 }
 0x80b   :  { %v4016_v25 = vadd.f32 %v11990_v13, %v3585_v17  ;;  %v12004_v17 = vld [vmem:[#allocation34_spill] sm:$0xff] }
 0x80e   :  { %v4763_v52 = vpop.f32.mrf.mxu1 }
 0x80f   :  { %v9910_v49 = vadd.f32 %v4763_v52, %v4438_v57  ;;  %v11988_v57 = vld [vmem:[#allocation63_spill] sm:$0xff]  ;;  %v11989_v52 = vld [vmem:[#allocation56_spill] sm:$0xff] }
 0x810   :  { %v3584_v15 = vadd.f32 %v11989_v52, %v11988_v57  ;;  %v12006_v57 = vld [vmem:[#allocation86_spill] sm:$0xff] }
 0x811   :  { %v4013_v52 = vadd.f32 %v12006_v57, %v3582_v45  ;;  %v12015_v45 = vld [vmem:[#allocation89_spill] sm:$0xff]  ;;  %v6535_v57 = vld [vmem:[%s11596_s29 + $0x58] sm:$0xff] }
 0x816   :  { %v4766_v47 = vpop.f32.mrf.mxu1 }
 0x817   :  { %v9914_v30 = vadd.f32 %v4766_v47, %v4439_v29  ;;  %v4448_v29 = vadd.f32 %v11991_v11, %v4018_v37  ;;  %v11992_v47 = vld [vmem:[#allocation36_spill] sm:$0xff]  ;;  %v12003_v37 = vld [vmem:[#allocation3_spill] sm:$0xff] }
 0x818   :  { %6496 = vmatmul.msk.bf16.gmra.mxu1 %vm430_vm2, %v4556_v28  ;;  %v11993_v28 = vld [vmem:[#allocation74_spill] sm:$0xff]  ;;  %v4446_v55 = vadd.f32 %v12003_v37, %v4016_v25  ;;  %v10017_v37 = vld [vmem:[%s11506_s16 + $0x60] sm:$0xff] }
 0x819   :  { %v3583_v22 = vadd.f32 %v11993_v28, %v11992_v47  ;;  %v12009_v28 = vld [vmem:[#allocation17_spill] sm:$0xff] }
 0x81b   :  { %v4014_v20 = vadd.f32 %v12001_v43, %v3583_v22  ;;  %v3590_v43 = vadd.f32 %v12015_v45, %v12014_v7  ;;  %v10135_v7 = vpop.f32.mrf.mxu3  ;;  %v6544_v45 = vld [vmem:[%s11596_s29 + $0x10] sm:$0xff] }
 0x81e   :  { %v4768_v46 = vpop.f32.mrf.mxu1 }
 0x81f   :  { %v9919_v24 = vadd.f32 %v4768_v46, %v4440_v5  ;;  %v11994_v5 = vld [vmem:[#allocation67_spill] sm:$0xff] }
 0x820   :  { %v11995_v46 = vld [vmem:[#allocation75_spill] sm:$0xff] }
 0x826   :  { %v4771_v50 = vpop.f32.mrf.mxu1 }
 0x827   :  { %v9922_v54 = vadd.f32 %v4771_v50, %v11976_v10  ;;  %v3588_v50 = vadd.f32 %v11995_v46, %v11994_v5  ;;  %v11996_v10 = vld [vmem:[#allocation37_spill] sm:$0xff]  ;;  %v12010_v5 = vld [vmem:[#allocation27_spill] sm:$0xff] }
 0x828   :  { %6497 = vmatmul.msk.bf16.gmra.mxu1 %vm430_vm2, %v11977_v36  ;;  %v4015_v36 = vadd.f32 %v11996_v10, %v3584_v15  ;;  %v12007_v15 = vld [vmem:[#allocation11_spill] sm:$0xff] }
 0x829   :  { %v4019_v23 = vadd.f32 %v12002_v44, %v3588_v50 }
 0x82a   :  { %v4445_v13 = vadd.f32 %v12007_v15, %v4015_v36  ;;  %v9984_v36 = vld [vmem:[%s11506_s16 + $0x28] sm:$0xff] }
 0x82b   :  { %v4449_v46 = vadd.f32 %v12010_v5, %v4019_v23  ;;  %12012 = vst [vmem:[#allocation28_spill] sm:$0xff] %v9984_v36  ;;  %v6537_v15 = vld [vmem:[%s11596_s29 + $0x48] sm:$0xff] }
 0x82e   :  { %v4773_v33 = vpop.f32.mrf.mxu1 }
 0x836   :  { %v4776_v3 = vpop.f32.mrf.mxu1 }
 0x838   :  { %6498 = vmatmul.msk.bf16.gmra.mxu1 %vm430_vm2, %v11978_v26  ;;  %v11997_v26 = vld [vmem:[#allocation25_spill] sm:$0xff] }
 0x83e   :  { %v4778_v63 = vpop.f32.mrf.mxu1 }
 0x846   :  { %v4781_v34 = vpop.f32.mrf.mxu1 }
 0x847   :  { %v4875_v22 = vadd.f32 %v4781_v34, %v4445_v13  ;;  %v12013_v34 = vld [vmem:[#allocation16_spill] sm:$0xff] }
 0x848   :  { %6499 = vmatmul.msk.bf16.gmra.mxu1 %vm430_vm2, %v11979_v53  ;;  %v4447_v53 = vadd.f32 %v11997_v26, %v4017_v41  ;;  %v3581_v41 = vadd.f32 %v12005_v61, %v12004_v17 }
 0x84e   :  { %v4783_v48 = vpop.f32.mrf.mxu1 }
 0x84f   :  { %v4876_v11 = vadd.f32 %v4783_v48, %v4446_v55  ;;  %v9979_v48 = vld [vmem:[%s11506_s16 + $0x20] sm:$0xff] }
 0x850   :  { %4978 = vmatmul.f32.gmra.mxu2 %v9979_v48 }
 0x856   :  { %v4786_v9 = vpop.f32.mrf.mxu1 }
 0x857   :  { %v4877_v60 = vadd.f32 %v4786_v9, %v4447_v53  ;;  %v12011_v9 = vld [vmem:[#allocation35_spill] sm:$0xff] }
 0x858   :  { %6500 = vmatmul.msk.bf16.gmra.mxu1 %vm430_vm2, %v4560_v39  ;;  %v9957_v39 = vld [vmem:[%s11506_s16 + $0x8] sm:$0xff]  ;;  %v4443_v50 = vadd.f32 %v12011_v9, %v4013_v52  ;;  %v6536_v52 = vld [vmem:[%s11596_s29 + $0x50] sm:$0xff] }
 0x859   :  { %11998 = vst [vmem:[#allocation18_spill] sm:$0xff] %v9957_v39  ;;  %5040 = vmatmul.f32.vlgmr.msrb.gmra.mxu3 %v9957_v39 }
 0x85e   :  { %v4788_v38 = vpop.f32.mrf.mxu1 }
 0x85f   :  { %v4878_v35 = vadd.f32 %v4788_v38, %v4448_v29  ;;  %v12008_v29 = vld [vmem:[#allocation85_spill] sm:$0xff]  ;;  %v4444_v38 = vadd.f32 %v12009_v28, %v4014_v20  ;;  %v9997_v20 = vld [vmem:[%s11506_s16 + $0x40] sm:$0xff] }
 0x860   :  { %v4012_v47 = vadd.f32 %v12008_v29, %v3581_v41  ;;  %4981 = vmatmul.f32.gmra.mxu2 %v9997_v20  ;;  %v10067_v41 = vld [vmem:[%s11506_s16 + $0xa8] sm:$0xff]  ;;  %v12025_v29 = vld [vmem:[#allocation83_spill] sm:$0xff] }
 0x861   :  { %5089 = vmatpush.msra.mxu2 %v4878_v35  ;;  %v4874_v10 = vadd.f32 %v4778_v63, %v4444_v38  ;;  %5043 = vmatmul.f32.gmra.mxu3 %v9984_v36  ;;  %v4873_v63 = vadd.f32 %v4776_v3, %v4443_v50  ;;  %v10002_v3 = vld [vmem:[%s11506_s16 + $0x48] sm:$0xff]  ;;  %12023 = vst [vmem:[#allocation49_spill] sm:$0xff] %v10067_v41  ;;  %v10090_v28 = vld [vmem:[%s11506_s16 + $0xc0] sm:$0xff] }
 0x862   :  { %v4442_v53 = vadd.f32 %v12013_v34, %v4012_v47  ;;  %12016 = vst [vmem:[#allocation9_spill] sm:$0xff] %v10002_v3  ;;  %v10095_v38 = vld [vmem:[%s11506_s16 + $0xc8] sm:$0xff] }
 0x863   :  { %5090 = vmatpush.msra.mxu2 %v4877_v60  ;;  %v6533_v60 = vld [vmem:[%s11596_s29 + $0x68] sm:$0xff]  ;;  %12026 = vst [vmem:[#allocation15_spill] sm:$0xff] %v10090_v28 }
 0x864   :  { %v4872_v35 = vadd.f32 %v4773_v33, %v4442_v53  ;;  %v4021_v33 = vadd.f32 %v9790_v2, %v3590_v43  ;;  %v10022_v2 = vld [vmem:[%s11506_s16 + $0x68] sm:$0xff]  ;;  %12027 = vst [vmem:[#allocation57_spill] sm:$0xff] %v10095_v38 }
 0x865   :  { %5091 = vmatpush.msra.mxu2 %v4876_v11  ;;  %12017 = vst [vmem:[#allocation26_spill] sm:$0xff] %v10022_v2  ;;  %v12024_v11 = vld [vmem:[#allocation64_spill] sm:$0xff] }
 0x866   :  { %v4791_v25 = vpop.f32.mrf.mxu1  ;;  %v3594_v47 = vadd.f32 %v12025_v29, %v12024_v11  ;;  %v6541_v50 = vld [vmem:[%s11596_s29 + $0x28] sm:$0xff] }
 0x867   :  { %v9974_v26 = vadd.f32 %v4791_v25, %v4449_v46  ;;  %5092 = vmatpush.msra.mxu2 %v4875_v22  ;;  %v6538_v22 = vld [vmem:[%s11596_s29 + $0x40] sm:$0xff]  ;;  %v6539_v46 = vld [vmem:[%s11596_s29 + $0x38] sm:$0xff]  ;;  %v6540_v25 = vld [vmem:[%s11596_s29 + $0x30] sm:$0xff] }
 0x868   :  { %4984 = vmatmul.f32.gmra.mxu2 %v10017_v37  ;;  %v4025_v5 = vadd.f32 %v9837_v59, %v3594_v47  ;;  %v10118_v59 = vld [vmem:[%s11506_s16 + $0xe0] sm:$0xff]  ;;  %v10123_v53 = vld [vmem:[%s11506_s16 + $0xe8] sm:$0xff] }
 0x869   :  { %5093 = vmatpush.msra.mxu2 %v4874_v10  ;;  %5046 = vmatmul.f32.gmra.mxu3 %v10002_v3  ;;  %12028 = vst [vmem:[#allocation39_spill] sm:$0xff] %v10118_v59  ;;  %v6545_v43 = vld [vmem:[%s11596_s29 + $0x8] sm:$0xff] }
 0x86a   :  { %v4455_v9 = vadd.f32 %v9844_v18, %v4025_v5  ;;  %12029 = vst [vmem:[#allocation47_spill] sm:$0xff] %v10123_v53  ;;  %v6542_v18 = vld [vmem:[%s11596_s29 + $0x20] sm:$0xff]  ;;  %v10209_v5 = vld [vmem:[%s11506_s16 + $0x168] sm:$0xff] }
 0x86b   :  { %5094 = vmatpush.msra.mxu2 %v4873_v63  ;;  %v10128_v63 = vpop.f32.mrf.mxu2  ;;  %12037 = vst [vmem:[#allocation24_spill] sm:$0xff] %v10209_v5 }
 0x86d   :  { %5095 = vmatpush.msra.mxu2 %v4872_v35  ;;  %v6543_v35 = vld [vmem:[%s11596_s29 + $0x18] sm:$0xff] }
 0x86e   :  { %v9989_v56 = vpop.f32.mrf.mxu1 }
 0x86f   :  { %5096 = vmatpush.msra.mxu2 %v9922_v54  ;;  %v4451_v54 = vadd.f32 %v9798_v16, %v4021_v33 }
 0x871   :  { %5097 = vmatpush.msra.mxu2 %v9919_v24  ;;  %5049 = vmatmul.f32.gmra.mxu3 %v10022_v2  ;;  %v10037_v24 = vld [vmem:[%s11506_s16 + $0x80] sm:$0xff] }
 0x872   :  { %12020 = vst [vmem:[#allocation8_spill] sm:$0xff] %v10037_v24  ;;  %4987 = vmatmul.f32.gmra.mxu2 %v10037_v24 }
 0x873   :  { %5098 = vmatpush.msra.mxu2 %v9914_v30 }
 0x875   :  { %5099 = vmatpush.msra.mxu2 %v9910_v49  ;;  %v12019_v49 = vld [vmem:[#allocation91_spill] sm:$0xff] }
 0x876   :  { %v4796_v44 = vpop.f32.mrf.mxu1 }
 0x877   :  { %v10011_v23 = vadd.f32 %v4796_v44, %v4451_v54  ;;  %5100 = vmatpush.msra.mxu2 %v9905_v14  ;;  %v12018_v14 = vld [vmem:[#allocation52_spill] sm:$0xff]  ;;  %v10148_v54 = vld [vmem:[%s11506_s16 + $0x100] sm:$0xff] }
 0x878   :  { %v3592_v30 = vadd.f32 %v12019_v49, %v12018_v14  ;;  %12030 = vst [vmem:[#allocation6_spill] sm:$0xff] %v10148_v54  ;;  %v10153_v44 = vld [vmem:[%s11506_s16 + $0x108] sm:$0xff]  ;;  %v6546_v14 = vld [vmem:[%s11596_s29] sm:$0xff]  ;;  %v10158_v49 = vpop.f32.mrf.mxu0 }
 0x879   :  { %5101 = vmatpush.msra.mxu2 %v9900_v8  ;;  %v10042_v8 = vld [vmem:[%s11506_s16 + $0x88] sm:$0xff]  ;;  %12031 = vst [vmem:[#allocation45_spill] sm:$0xff] %v10153_v44 }
 0x87a   :  { %12021 = vst [vmem:[#allocation51_spill] sm:$0xff] %v10042_v8  ;;  %5052 = vmatmul.f32.gmra.mxu3 %v10042_v8  ;;  %v12048_v8 = vld [vmem:[#allocation29_spill] sm:$0xff] }
 0x87b   :  { %5102 = vmatpush.msra.mxu2 %v9891_v51  ;;  %v6532_v51 = vld [vmem:[%s11596_s29 + $0x70] sm:$0xff] }
 0x87d   :  { %5103 = vmatpush.msra.mxu2 %v9884_v12  ;;  %v4023_v12 = vadd.f32 %v9820_v1, %v3592_v30  ;;  %v10062_v1 = vld [vmem:[%s11506_s16 + $0xa0] sm:$0xff]  ;;  %v10162_v30 = vpop.f32.mrf.mxu2 }
 0x87e   :  { %v10029_v16 = vpop.f32.mrf.mxu1  ;;  %12022 = vst [vmem:[#allocation33_spill] sm:$0xff] %v10062_v1  ;;  %4990 = vmatmul.f32.gmra.mxu2 %v10062_v1 }
 0x87f   :  { %5104 = vmatpush.msra.mxu2 %v9877_v62  ;;  %v6531_v62 = vld [vmem:[%s11596_s29 + $0x78] sm:$0xff]  ;;  %v4453_v55 = vadd.f32 %v9824_v19, %v4023_v12  ;;  %v6534_v19 = vld [vmem:[%s11596_s29 + $0x60] sm:$0xff]  ;;  %v10164_v12 = vpop.f32.mrf.mxu3 }
 0x881   :  { %5219 = vmatpush.msrb.mxu2 %v6531_v62 }
 0x882   :  { %5055 = vmatmul.f32.gmra.mxu3 %v10067_v41 }
 0x883   :  { %5220 = vmatpush.msrb.mxu2 %v6532_v51 }
 0x885   :  { %5221 = vmatpush.msrb.mxu2 %v6533_v60  ;;  %v10177_v60 = vld [vmem:[%s11506_s16 + $0x128] sm:$0xff] }
 0x886   :  { %v4801_v17 = vpop.f32.mrf.mxu1  ;;  %4993 = vmatmul.f32.gmra.mxu2 %v10090_v28  ;;  %12033 = vst [vmem:[#allocation41_spill] sm:$0xff] %v10177_v60  ;;  %v12049_v28 = vld [vmem:[#allocation13_spill] sm:$0xff] }
 0x887   :  { %v10057_v61 = vadd.f32 %v4801_v17, %v4453_v55  ;;  %5222 = vmatpush.msrb.mxu2 %v6534_v19  ;;  %v10172_v55 = vld [vmem:[%s11506_s16 + $0x120] sm:$0xff]  ;;  %v10181_v17 = vpop.f32.mrf.mxu0  ;;  %v3527_v19 = vpop.f32.mrf.mxu2 }
 0x888   :  { %12032 = vst [vmem:[#allocation5_spill] sm:$0xff] %v10172_v55 }
 0x889   :  { %5223 = vmatpush.msrb.mxu2 %v6535_v57  ;;  %v3958_v57 = vpop.f32.mrf.mxu3 }
 0x88a   :  { %5058 = vmatmul.f32.gmra.mxu3 %v10095_v38 }
 0x88b   :  { %5224 = vmatpush.msrb.mxu2 %v6536_v52  ;;  %v10188_v52 = vld [vmem:[%s11506_s16 + $0x140] sm:$0xff] }
 0x88c   :  { %12034 = vst [vmem:[#allocation21_spill] sm:$0xff] %v10188_v52 }
 0x88d   :  { %5225 = vmatpush.msrb.mxu2 %v6537_v15  ;;  %v10193_v15 = vld [vmem:[%s11506_s16 + $0x148] sm:$0xff] }
 0x88e   :  { %v10083_v13 = vpop.f32.mrf.mxu1  ;;  %4996 = vmatmul.f32.gmra.mxu2 %v10118_v59  ;;  %12035 = vst [vmem:[#allocation22_spill] sm:$0xff] %v10193_v15 }
 0x88f   :  { %5226 = vmatpush.msrb.mxu2 %v6538_v22  ;;  %v10197_v11 = vpop.f32.mrf.mxu0  ;;  %v3530_v29 = vpop.f32.mrf.mxu2  ;;  %v10204_v22 = vld [vmem:[%s11506_s16 + $0x160] sm:$0xff] }
 0x890   :  { %12036 = vst [vmem:[#allocation23_spill] sm:$0xff] %v10204_v22  ;;  %v3600_v3 = vadd.f32 %v3530_v29, %v12049_v28 }
 0x891   :  { %5227 = vmatpush.msrb.mxu2 %v6539_v46  ;;  %v3961_v46 = vpop.f32.mrf.mxu3 }
 0x892   :  { %5061 = vmatmul.f32.gmra.mxu3 %v10123_v53 }
 0x893   :  { %5228 = vmatpush.msrb.mxu2 %v6540_v25 }
 0x895   :  { %5229 = vmatpush.msrb.mxu2 %v6541_v50  ;;  %v10218_v50 = vld [vmem:[%s11506_s16 + $0x180] sm:$0xff] }
 0x896   :  { %v4806_v10 = vpop.f32.mrf.mxu1  ;;  %4999 = vmatmul.f32.gmra.mxu2 %v10148_v54  ;;  %12038 = vst [vmem:[#allocation53_spill] sm:$0xff] %v10218_v50 }
 0x897   :  { %v10113_v34 = vadd.f32 %v4806_v10, %v4455_v9  ;;  %5230 = vmatpush.msrb.mxu2 %v6542_v18  ;;  %v4391_v25 = vpop.f32.mrf.mxu0  ;;  %v10223_v10 = vld [vmem:[%s11506_s16 + $0x188] sm:$0xff]  ;;  %v3532_v18 = vpop.f32.mrf.mxu2 }
 0x898   :  { %12039 = vst [vmem:[#allocation55_spill] sm:$0xff] %v10223_v10  ;;  %v3601_v59 = vadd.f32 %v3532_v18, %v12048_v8 }
 0x899   :  { %5231 = vmatpush.msrb.mxu2 %v6543_v35  ;;  %v3963_v35 = vpop.f32.mrf.mxu3 }
 0x89a   :  { %5064 = vmatmul.f32.gmra.mxu3 %v10153_v44  ;;  %v4032_v1 = vadd.f32 %v3963_v35, %v3601_v59 }
 0x89b   :  { %5232 = vmatpush.msrb.mxu2 %v6544_v45  ;;  %v10230_v45 = vld [vmem:[%s11506_s16 + $0x1a0] sm:$0xff] }
 0x89c   :  { %12040 = vst [vmem:[#allocation30_spill] sm:$0xff] %v10230_v45 }
 0x89d   :  { %5233 = vmatpush.msrb.mxu2 %v6545_v43 }
 0x89e   :  { %v10143_v33 = vpop.f32.mrf.mxu1  ;;  %5002 = vmatmul.f32.gmra.mxu2 %v10172_v55  ;;  %v10260_v55 = vld [vmem:[%s11506_s16 + $0x1e8] sm:$0xff] }
 0x89f   :  { %5234 = vmatpush.msrb.mxu2 %v6546_v14  ;;  %v10235_v14 = vld [vmem:[%s11506_s16 + $0x1a8] sm:$0xff]  ;;  %12046 = vst [vmem:[#allocation60_spill] sm:$0xff] %v10260_v55 }
 0x8a0   :  { %12041 = vst [vmem:[#allocation59_spill] sm:$0xff] %v10235_v14 }
 0x8a2   :  { %5067 = vmatmul.f32.gmra.mxu3 %v10177_v60 }
 0x8a6   :  { %v4811_v62 = vpop.f32.mrf.mxu1  ;;  %5005 = vmatmul.f32.gmra.mxu2 %v10188_v52  ;;  %v12045_v52 = vld [vmem:[#allocation31_spill] sm:$0xff] }
 0x8a7   :  { %v10167_v51 = vadd.f32 %v4811_v62, %v9858_v27  ;;  %v4393_v62 = vpop.f32.mrf.mxu0 }
 0x8a8   :  { %v4462_v28 = vadd.f32 %v4393_v62, %v4032_v1  ;;  %v12058_v62 = vld [vmem:[#allocation90_spill] sm:$0xff] }
 0x8aa   :  { %5070 = vmatmul.f32.gmra.mxu3 %v10193_v15  ;;  %v3966_v15 = vpop.f32.mrf.mxu3 }
 0x8ae   :  { %v10183_v27 = vpop.f32.mrf.mxu1  ;;  %5008 = vmatmul.f32.gmra.mxu2 %v10204_v22 }
 0x8af   :  { %v4396_v44 = vpop.f32.mrf.mxu0 }
 0x8b2   :  { %5073 = vmatmul.f32.gmra.mxu3 %v10209_v5  ;;  %v3535_v5 = vpop.f32.mrf.mxu2  ;;  %v3968_v22 = vpop.f32.mrf.mxu3 }
 0x8b6   :  { %v10199_v47 = vpop.f32.mrf.mxu1  ;;  %5011 = vmatmul.f32.gmra.mxu2 %v10218_v50  ;;  %v10247_v50 = vld [vmem:[%s11506_s16 + $0x1c8] sm:$0xff] }
 0x8b7   :  { %12043 = vst [vmem:[#allocation50_spill] sm:$0xff] %v10247_v50  ;;  %v4398_v54 = vpop.f32.mrf.mxu0 }
 0x8ba   :  { %5076 = vmatmul.f32.gmra.mxu3 %v10223_v10  ;;  %v10242_v10 = vld [vmem:[%s11506_s16 + $0x1c0] sm:$0xff] }
 0x8bb   :  { %12042 = vst [vmem:[#allocation32_spill] sm:$0xff] %v10242_v10 }
 0x8be   :  { %v10213_v9 = vpop.f32.mrf.mxu1  ;;  %5014 = vmatmul.f32.gmra.mxu2 %v10230_v45  ;;  %v3537_v45 = vpop.f32.mrf.mxu2 }
 0x8bf   :  { %v3603_v38 = vadd.f32 %v3537_v45, %v12045_v52  ;;  %v10270_v45 = vld [vmem:[%s11506_s16 + $0x10] sm:$0xff] }
 0x8c1   :  { %v4034_v41 = vadd.f32 %v3968_v22, %v3603_v38  ;;  %v12051_v38 = vld [vmem:[#allocation78_spill] sm:$0xff] }
 0x8c2   :  { %5079 = vmatmul.f32.gmra.mxu3 %v10235_v14  ;;  %v10254_v14 = vld [vmem:[%s11506_s16 + $0x1e0] sm:$0xff]  ;;  %v3598_v22 = vadd.f32 %v10162_v30, %v12051_v38 }
 0x8c3   :  { %12044 = vst [vmem:[#allocation79_spill] sm:$0xff] %v10254_v14  ;;  %v4464_v52 = vadd.f32 %v4398_v54, %v4034_v41  ;;  %v6547_v41 = vld [vmem:[%s11596_s29 + $0x178] sm:$0xff]  ;;  %v12052_v54 = vld [vmem:[#allocation76_spill] sm:$0xff] }
 0x8c6   :  { %v4821_v43 = vpop.f32.mrf.mxu1  ;;  %5017 = vmatmul.f32.gmra.mxu2 %v10242_v10 }
 0x8ca   :  { %5082 = vmatmul.f32.gmra.mxu3 %v10247_v50  ;;  %v12047_v50 = vld [vmem:[#allocation14_spill] sm:$0xff] }
 0x8cb   :  { %v3602_v10 = vadd.f32 %v3535_v5, %v12047_v50  ;;  %v12056_v50 = vld [vmem:[#allocation92_spill] sm:$0xff] }
 0x8cd   :  { %v4033_v2 = vadd.f32 %v3966_v15, %v3602_v10 }
 0x8ce   :  { %v4823_v60 = vpop.f32.mrf.mxu1  ;;  %5020 = vmatmul.f32.gmra.mxu2 %v10254_v14  ;;  %v12050_v14 = vld [vmem:[#allocation4_spill] sm:$0xff] }
 0x8cf   :  { %v3599_v24 = vadd.f32 %v3527_v19, %v12050_v14  ;;  %v4463_v39 = vadd.f32 %v4396_v44, %v4033_v2  ;;  %v3597_v19 = vadd.f32 %v10128_v63, %v12052_v54  ;;  %v4892_v2 = vadd.f32 %v4823_v60, %v4462_v28  ;;  %v10282_v44 = vpop.f32.mrf.mxu2  ;;  %v10294_v63 = vld [vmem:[%s11506_s16 + $0x30] sm:$0xff]  ;;  %v12057_v14 = vld [vmem:[#allocation48_spill] sm:$0xff] }
 0x8d0   :  { %v12054_v60 = vld [vmem:[#allocation93_spill] sm:$0xff] }
 0x8d1   :  { %v4030_v8 = vadd.f32 %v3958_v57, %v3599_v24  ;;  %v4028_v24 = vadd.f32 %v10135_v7, %v3597_v19  ;;  %v10360_v19 = vld [vmem:[%s11506_s16 + $0x70] sm:$0xff] }
 0x8d2   :  { %5085 = vmatmul.f32.gmra.mxu3 %v10260_v55  ;;  %v4031_v55 = vadd.f32 %v3961_v46, %v3600_v3  ;;  %v4029_v3 = vadd.f32 %v10164_v12, %v3598_v22  ;;  %v6549_v12 = vld [vmem:[%s11596_s29 + $0x168] sm:$0xff] }
 0x8d3   :  { %v4460_v1 = vadd.f32 %v10197_v11, %v4030_v8  ;;  %v6550_v11 = vld [vmem:[%s11596_s29 + $0x160] sm:$0xff]  ;;  %v4458_v46 = vadd.f32 %v10158_v49, %v4028_v24  ;;  %v12060_v8 = vld [vmem:[#allocation77_spill] sm:$0xff]  ;;  %v6563_v24 = vld [vmem:[%s11596_s29 + $0xf8] sm:$0xff] }
 0x8d4   :  { %v4459_v7 = vadd.f32 %v10181_v17, %v4029_v3  ;;  %v6551_v17 = vld [vmem:[%s11596_s29 + $0x158] sm:$0xff] }
 0x8d5   :  { %v4890_v15 = vadd.f32 %v10213_v9, %v4460_v1  ;;  %v12055_v9 = vld [vmem:[#allocation58_spill] sm:$0xff]  ;;  %v4888_v18 = vadd.f32 %v10183_v27, %v4458_v46  ;;  %v6553_v27 = vld [vmem:[%s11596_s29 + $0x148] sm:$0xff] }
 0x8d6   :  { %v4826_v53 = vpop.f32.mrf.mxu1  ;;  %5105 = vmatmul.f32.vlgmr.msra.gmra.mxu2 %v10270_v45  ;;  %v3593_v10 = vadd.f32 %v12056_v50, %v12055_v9  ;;  %v6570_v9 = vld [vmem:[%s11596_s29 + $0xc0] sm:$0xff]  ;;  %v6571_v50 = vld [vmem:[%s11596_s29 + $0xb8] sm:$0xff] }
 0x8d7   :  { %v4893_v59 = vadd.f32 %v4826_v53, %v4463_v39  ;;  %5349 = vmatpush.msra.mxu2 %v6547_v41  ;;  %v6548_v39 = vld [vmem:[%s11596_s29 + $0x170] sm:$0xff]  ;;  %v10316_v35 = vpop.f32.mrf.mxu2 }
 0x8d8   :  { %v4024_v49 = vadd.f32 %v9829_v4, %v3593_v10 }
 0x8d9   :  { %5350 = vmatpush.msra.mxu2 %v6548_v39  ;;  %v10392_v39 = vld [vmem:[%s11506_s16 + $0x90] sm:$0xff] }
 0x8da   :  { %v4454_v22 = vadd.f32 %v9835_v40, %v4024_v49  ;;  %v10475_v49 = vld [vmem:[%s11506_s16 + $0xf0] sm:$0xff] }
 0x8db   :  { %5351 = vmatpush.msra.mxu2 %v6549_v12  ;;  %v10416_v12 = vld [vmem:[%s11506_s16 + $0x38] sm:$0xff] }
 0x8dc   :  { %v10289_v30 = vpop.f32.mrf.mxu3 }
 0x8dd   :  { %5352 = vmatpush.msra.mxu2 %v6550_v11  ;;  %v6568_v11 = vld [vmem:[%s11596_s29 + $0xd0] sm:$0xff] }
 0x8de   :  { %v4828_v36 = vpop.f32.mrf.mxu1  ;;  %5108 = vmatmul.f32.gmra.mxu2 %v10294_v63 }
 0x8df   :  { %v4894_v5 = vadd.f32 %v4828_v36, %v4464_v52  ;;  %v4461_v36 = vadd.f32 %v4391_v25, %v4031_v55  ;;  %v12053_v55 = vld [vmem:[#allocation71_spill] sm:$0xff]  ;;  %v4889_v25 = vadd.f32 %v10199_v47, %v4459_v7  ;;  %5353 = vmatpush.msra.mxu2 %v6551_v17  ;;  %v3591_v52 = vadd.f32 %v12058_v62, %v12057_v14  ;;  %v6567_v7 = vld [vmem:[%s11596_s29 + $0xd8] sm:$0xff]  ;;  %v6569_v17 = vld [vmem:[%s11596_s29 + $0xc8] sm:$0xff] }
 0x8e0   :  { %v3595_v57 = vadd.f32 %v12054_v60, %v12053_v55  ;;  %v10421_v55 = vld [vmem:[%s11506_s16 + $0xb0] sm:$0xff]  ;;  %v6565_v60 = vld [vmem:[%s11596_s29 + $0xe8] sm:$0xff]  ;;  %v6574_v14 = vld [vmem:[%s11596_s29 + $0xa0] sm:$0xff] }
 0x8e1   :  { %5154 = vmatpush.msra.mxu3 %v4894_v5  ;;  %v4891_v53 = vadd.f32 %v4821_v43, %v4461_v36  ;;  %v10326_v43 = vld [vmem:[%s11506_s16 + $0x50] sm:$0xff]  ;;  %v4022_v38 = vadd.f32 %v9804_v42, %v3591_v52  ;;  %v6559_v36 = vld [vmem:[%s11596_s29 + $0x118] sm:$0xff] }
 0x8e2   :  { %v4026_v29 = vadd.f32 %v9848_v6, %v3595_v57  ;;  %v6552_v6 = vld [vmem:[%s11596_s29 + $0x150] sm:$0xff]  ;;  %v6566_v57 = vld [vmem:[%s11596_s29 + $0xe0] sm:$0xff]  ;;  %v6575_v62 = vld [vmem:[%s11596_s29 + $0x98] sm:$0xff] }
 0x8e3   :  { %5155 = vmatpush.msra.mxu3 %v4893_v59  ;;  %5354 = vmatpush.msra.mxu2 %v6552_v6  ;;  %v4884_v59 = vadd.f32 %v10083_v13, %v4454_v22  ;;  %v10350_v41 = vpop.f32.mrf.mxu2  ;;  %v6556_v42 = vld [vmem:[%s11596_s29 + $0x130] sm:$0xff]  ;;  %v4452_v54 = vadd.f32 %v9812_v0, %v4022_v38  ;;  %v6557_v13 = vld [vmem:[%s11596_s29 + $0x128] sm:$0xff]  ;;  %v10470_v6 = vld [vmem:[%s11506_s16 + $0x78] sm:$0xff] }
 0x8e4   :  { %v4456_v47 = vadd.f32 %v9852_v31, %v4026_v29  ;;  %v10335_v4 = vpop.f32.mrf.mxu3  ;;  %v6554_v31 = vld [vmem:[%s11596_s29 + $0x140] sm:$0xff]  ;;  %v10442_v29 = vld [vmem:[%s11506_s16 + $0x58] sm:$0xff]  ;;  %v10503_v38 = vld [vmem:[%s11506_s16 + $0x110] sm:$0xff] }
 0x8e5   :  { %5156 = vmatpush.msra.mxu3 %v4892_v2  ;;  %5355 = vmatpush.msra.mxu2 %v6553_v27  ;;  %v6560_v2 = vld [vmem:[%s11596_s29 + $0x110] sm:$0xff]  ;;  %12062 = vst [vmem:[#allocation68_spill] sm:$0xff] %v10503_v38  ;;  %v6577_v22 = vld [vmem:[%s11596_s29 + $0x88] sm:$0xff] }
 0x8e6   :  { %v4886_v5 = vadd.f32 %v10143_v33, %v4456_v47  ;;  %5111 = vmatmul.f32.gmra.mxu2 %v10326_v43  ;;  %v6555_v33 = vld [vmem:[%s11596_s29 + $0x138] sm:$0xff]  ;;  %v6573_v47 = vld [vmem:[%s11596_s29 + $0xa8] sm:$0xff] }
 0x8e7   :  { %5157 = vmatpush.msra.mxu3 %v4891_v53  ;;  %5356 = vmatpush.msra.mxu2 %v6554_v31  ;;  %v10498_v31 = vld [vmem:[%s11506_s16 + $0x98] sm:$0xff] }
 0x8e8   :  { %12061 = vst [vmem:[#allocation80_spill] sm:$0xff] %v10498_v31 }
 0x8e9   :  { %5158 = vmatpush.msra.mxu3 %v4890_v15  ;;  %5357 = vmatpush.msra.mxu2 %v6555_v33  ;;  %v6578_v33 = vld [vmem:[%s11596_s29 + $0x80] sm:$0xff] }
 0x8eb   :  { %5159 = vmatpush.msra.mxu3 %v4889_v25  ;;  %5358 = vmatpush.msra.mxu2 %v6556_v42  ;;  %v10449_v25 = vld [vmem:[%s11506_s16 + $0xd0] sm:$0xff]  ;;  %v10526_v42 = vld [vmem:[%s11506_s16 + $0xb8] sm:$0xff] }
 0x8ec   :  { %v10372_v3 = vpop.f32.mrf.mxu3  ;;  %12063 = vst [vmem:[#allocation81_spill] sm:$0xff] %v10526_v42 }
 0x8ed   :  { %5160 = vmatpush.msra.mxu3 %v4888_v18  ;;  %5359 = vmatpush.msra.mxu2 %v6557_v13  ;;  %v6572_v18 = vld [vmem:[%s11596_s29 + $0xb0] sm:$0xff]  ;;  %v6582_v13 = vld [vmem:[%s11596_s29 + $0x1e0] sm:$0xff] }
 0x8ee   :  { %5114 = vmatmul.f32.gmra.mxu2 %v10360_v19 }
 0x8ef   :  { %5161 = vmatpush.msra.mxu3 %v10167_v51  ;;  %v12059_v51 = vld [vmem:[#allocation42_spill] sm:$0xff] }
 0x8f0   :  { %v3589_v28 = vadd.f32 %v12060_v8, %v12059_v51  ;;  %v6579_v8 = vld [vmem:[%s11596_s29 + $0x1f8] sm:$0xff] }
 0x8f1   :  { %5162 = vmatpush.msra.mxu3 %v4886_v5  ;;  %v6576_v5 = vld [vmem:[%s11596_s29 + $0x90] sm:$0xff] }
 0x8f2   :  { %v4020_v40 = vadd.f32 %v9773_v32, %v3589_v28  ;;  %v6558_v32 = vld [vmem:[%s11596_s29 + $0x120] sm:$0xff] }
 0x8f3   :  { %5163 = vmatpush.msra.mxu3 %v10113_v34  ;;  %v4882_v34 = vadd.f32 %v10029_v16, %v4452_v54  ;;  %5360 = vmatpush.msra.mxu2 %v6558_v32  ;;  %v6581_v54 = vld [vmem:[%s11596_s29 + $0x1e8] sm:$0xff] }
 0x8f4   :  { %v4450_v0 = vadd.f32 %v9785_v21, %v4020_v40  ;;  %v10387_v21 = vld [vmem:[%s11506_s16 + $0x18] sm:$0xff]  ;;  %v10406_v1 = vpop.f32.mrf.mxu3  ;;  %v10531_v40 = vld [vmem:[%s11506_s16 + $0x130] sm:$0xff] }
 0x8f5   :  { %5164 = vmatpush.msra.mxu3 %v4884_v59  ;;  %5361 = vmatpush.msra.mxu2 %v6559_v36  ;;  %v6580_v59 = vld [vmem:[%s11596_s29 + $0x1f0] sm:$0xff]  ;;  %12064 = vst [vmem:[#allocation84_spill] sm:$0xff] %v10531_v40 }
 0x8f6   :  { %v4880_v16 = vadd.f32 %v9989_v56, %v4450_v0  ;;  %v6561_v56 = vld [vmem:[%s11596_s29 + $0x108] sm:$0xff]  ;;  %5117 = vmatmul.f32.gmra.mxu2 %v10392_v39  ;;  %v6584_v36 = vld [vmem:[%s11596_s29 + $0x1d0] sm:$0xff] }
 0x8f7   :  { %5165 = vmatpush.msra.mxu3 %v10057_v61  ;;  %v10379_v61 = vpop.f32.mrf.mxu2  ;;  %5362 = vmatpush.msra.mxu2 %v6560_v2  ;;  %v10559_v2 = vld [vmem:[%s11506_s16 + $0x150] sm:$0xff] }
 0x8f8   :  { %12066 = vst [vmem:[#allocation7_spill] sm:$0xff] %v10559_v2 }
 0x8f9   :  { %5166 = vmatpush.msra.mxu3 %v4882_v34  ;;  %5363 = vmatpush.msra.mxu2 %v6561_v56  ;;  %v6583_v34 = vld [vmem:[%s11596_s29 + $0x1d8] sm:$0xff]  ;;  %v6585_v56 = vld [vmem:[%s11596_s29 + $0x1c8] sm:$0xff] }
 0x8fb   :  { %5167 = vmatpush.msra.mxu3 %v10011_v23  ;;  %v6562_v23 = vld [vmem:[%s11596_s29 + $0x100] sm:$0xff] }
 0x8fc   :  { %5364 = vmatpush.msra.mxu2 %v6562_v23  ;;  %v6586_v23 = vld [vmem:[%s11596_s29 + $0x1c0] sm:$0xff] }
 0x8fd   :  { %5168 = vmatpush.msra.mxu3 %v4880_v16  ;;  %v10444_v46 = vpop.f32.mrf.mxu3  ;;  %v10554_v16 = vld [vmem:[%s11506_s16 + $0xd8] sm:$0xff] }
 0x8fe   :  { %5120 = vmatmul.f32.gmra.mxu2 %v10421_v55  ;;  %12065 = vst [vmem:[#allocation82_spill] sm:$0xff] %v10554_v16 }
 0x8ff   :  { %5169 = vmatpush.msra.mxu3 %v9974_v26  ;;  %v10408_v53 = vpop.f32.mrf.mxu2  ;;  %v6564_v26 = vld [vmem:[%s11596_s29 + $0xf0] sm:$0xff] }
 0x900   :  { %5170 = vmatmul.f32.vlgmr.msra.gmra.mxu3 %v10387_v21 }
 0x901   :  { %5284 = vmatpush.msrb.mxu3 %v6563_v24  ;;  %v6587_v24 = vld [vmem:[%s11596_s29 + $0x1b8] sm:$0xff] }
 0x903   :  { %5285 = vmatpush.msrb.mxu3 %v6564_v26 }
 0x905   :  { %5286 = vmatpush.msrb.mxu3 %v6565_v60  ;;  %v10480_v27 = vpop.f32.mrf.mxu3  ;;  %v6588_v60 = vld [vmem:[%s11596_s29 + $0x1b0] sm:$0xff] }
 0x906   :  { %5123 = vmatmul.f32.gmra.mxu2 %v10449_v25 }
 0x907   :  { %5287 = vmatpush.msrb.mxu3 %v6566_v57  ;;  %v10434_v15 = vpop.f32.mrf.mxu2  ;;  %v10580_v57 = vld [vmem:[%s11506_s16 + $0xf8] sm:$0xff] }
 0x908   :  { %5173 = vmatmul.f32.gmra.mxu3 %v10416_v12  ;;  %12067 = vst [vmem:[#allocation88_spill] sm:$0xff] %v10580_v57 }
 0x909   :  { %5288 = vmatpush.msrb.mxu3 %v6567_v7 }
 0x90b   :  { %5289 = vmatpush.msrb.mxu3 %v6568_v11  ;;  %v10587_v11 = vld [vmem:[%s11506_s16 + $0x170] sm:$0xff] }
 0x90c   :  { %12068 = vst [vmem:[#allocation46_spill] sm:$0xff] %v10587_v11 }
 0x90d   :  { %5290 = vmatpush.msrb.mxu3 %v6569_v17  ;;  %v10513_v51 = vpop.f32.mrf.mxu3  ;;  %v6589_v17 = vld [vmem:[%s11596_s29 + $0x1a8] sm:$0xff] }
 0x90e   :  { %5126 = vmatmul.f32.gmra.mxu2 %v10475_v49 }
 0x90f   :  { %5291 = vmatpush.msrb.mxu3 %v6570_v9  ;;  %v10462_v10 = vpop.f32.mrf.mxu2  ;;  %v6590_v9 = vld [vmem:[%s11596_s29 + $0x1a0] sm:$0xff] }
 0x910   :  { %5176 = vmatmul.f32.gmra.mxu3 %v10442_v29 }
 0x911   :  { %5292 = vmatpush.msrb.mxu3 %v6571_v50  ;;  %v6591_v50 = vld [vmem:[%s11596_s29 + $0x198] sm:$0xff] }
 0x913   :  { %5293 = vmatpush.msrb.mxu3 %v6572_v18 }
 0x915   :  { %5294 = vmatpush.msrb.mxu3 %v6573_v47  ;;  %v10544_v32 = vpop.f32.mrf.mxu3  ;;  %v6592_v47 = vld [vmem:[%s11596_s29 + $0x190] sm:$0xff] }
 0x916   :  { %5129 = vmatmul.f32.gmra.mxu2 %v10503_v38 }
 0x917   :  { %5295 = vmatpush.msrb.mxu3 %v6574_v14  ;;  %v10490_v52 = vpop.f32.mrf.mxu2  ;;  %v10608_v14 = vld [vmem:[%s11506_s16 + $0x118] sm:$0xff] }
 0x918   :  { %5179 = vmatmul.f32.gmra.mxu3 %v10470_v6  ;;  %12069 = vst [vmem:[#allocation54_spill] sm:$0xff] %v10608_v14 }
 0x919   :  { %5296 = vmatpush.msrb.mxu3 %v6575_v62  ;;  %v10613_v62 = vld [vmem:[%s11506_s16 + $0x190] sm:$0xff] }
 0x91a   :  { %12070 = vst [vmem:[#allocation66_spill] sm:$0xff] %v10613_v62 }
 0x91b   :  { %5297 = vmatpush.msrb.mxu3 %v6576_v5  ;;  %v6593_v5 = vld [vmem:[%s11596_s29 + $0x188] sm:$0xff] }
 0x91d   :  { %5298 = vmatpush.msrb.mxu3 %v6577_v22  ;;  %v10582_v7 = vpop.f32.mrf.mxu3 }
 0x91e   :  { %5132 = vmatmul.f32.gmra.mxu2 %v10531_v40 }
 0x91f   :  { %5299 = vmatpush.msrb.mxu3 %v6578_v33  ;;  %v10518_v28 = vpop.f32.mrf.mxu2  ;;  %v6594_v33 = vld [vmem:[%s11596_s29 + $0x180] sm:$0xff] }
 0x920   :  { %5182 = vmatmul.f32.gmra.mxu3 %v10498_v31 }
 0x921   :  { %5414 = vmatpush.msra.mxu3 %v6579_v8 }
 0x923   :  { %5415 = vmatpush.msra.mxu3 %v6580_v59  ;;  %v10630_v59 = vld [vmem:[%s11506_s16 + $0x138] sm:$0xff] }
 0x924   :  { %12071 = vst [vmem:[#allocation40_spill] sm:$0xff] %v10630_v59 }
 0x925   :  { %5416 = vmatpush.msra.mxu3 %v6581_v54  ;;  %v10618_v22 = vpop.f32.mrf.mxu3  ;;  %v10635_v54 = vld [vmem:[%s11506_s16 + $0x1b0] sm:$0xff] }
 0x926   :  { %5135 = vmatmul.f32.gmra.mxu2 %v10559_v2  ;;  %12072 = vst [vmem:[#allocation73_spill] sm:$0xff] %v10635_v54 }
 0x927   :  { %5417 = vmatpush.msra.mxu3 %v6582_v13  ;;  %v10546_v0 = vpop.f32.mrf.mxu2 }
 0x928   :  { %5185 = vmatmul.f32.gmra.mxu3 %v10526_v42 }
 0x929   :  { %5418 = vmatpush.msra.mxu3 %v6583_v34 }
 0x92b   :  { %5419 = vmatpush.msra.mxu3 %v6584_v36  ;;  %v10646_v36 = vld [vmem:[%s11506_s16 + $0x158] sm:$0xff] }
 0x92c   :  { %12073 = vst [vmem:[#allocation65_spill] sm:$0xff] %v10646_v36 }
 0x92d   :  { %5420 = vmatpush.msra.mxu3 %v6585_v56  ;;  %v10639_v13 = vpop.f32.mrf.mxu3  ;;  %v10651_v56 = vld [vmem:[%s11506_s16 + $0x1d0] sm:$0xff] }
 0x92e   :  { %5138 = vmatmul.f32.gmra.mxu2 %v10587_v11  ;;  %12074 = vst [vmem:[#allocation70_spill] sm:$0xff] %v10651_v56 }
 0x92f   :  { %5421 = vmatpush.msra.mxu3 %v6586_v23  ;;  %v10572_v26 = vpop.f32.mrf.mxu2 }
 0x930   :  { %5188 = vmatmul.f32.gmra.mxu3 %v10554_v16  ;;  %v12105_v16 = vld [vmem:[#allocation24_spill] sm:$0xff] }
 0x931   :  { %5422 = vmatpush.msra.mxu3 %v6587_v24 }
 0x933   :  { %5423 = vmatpush.msra.mxu3 %v6588_v60  ;;  %v10662_v60 = vld [vmem:[%s11506_s16 + $0x178] sm:$0xff] }
 0x934   :  { %12075 = vst [vmem:[#allocation20_spill] sm:$0xff] %v10662_v60 }
 0x935   :  { %5424 = vmatpush.msra.mxu3 %v6589_v17  ;;  %v10655_v23 = vpop.f32.mrf.mxu3  ;;  %v10667_v17 = vld [vmem:[%s11506_s16 + $0x1f0] sm:$0xff] }
 0x936   :  { %5141 = vmatmul.f32.gmra.mxu2 %v10613_v62  ;;  %12076 = vst [vmem:[#allocation38_spill] sm:$0xff] %v10667_v17  ;;  %v12097_v62 = vld [vmem:[#allocation47_spill] sm:$0xff] }
 0x937   :  { %5425 = vmatpush.msra.mxu3 %v6590_v9  ;;  %v10600_v18 = vpop.f32.mrf.mxu2 }
 0x938   :  { %5191 = vmatmul.f32.gmra.mxu3 %v10580_v57  ;;  %v12103_v57 = vld [vmem:[#allocation22_spill] sm:$0xff] }
 0x939   :  { %5426 = vmatpush.msra.mxu3 %v6591_v50  ;;  %v10676_v50 = vld [vmem:[%s11506_s16 + $0x198] sm:$0xff] }
 0x93a   :  { %12077 = vst [vmem:[#allocation62_spill] sm:$0xff] %v10676_v50 }
 0x93b   :  { %5427 = vmatpush.msra.mxu3 %v6592_v47 }
 0x93d   :  { %5428 = vmatpush.msra.mxu3 %v6593_v5  ;;  %v10678_v47 = vpop.f32.mrf.mxu3  ;;  %v5042_v5 = vadd.f32 %v10289_v30, %v10282_v44 }
 0x93e   :  { %5144 = vmatmul.f32.gmra.mxu2 %v10635_v54 }
 0x93f   :  { %5429 = vmatpush.msra.mxu3 %v6594_v33  ;;  %v10625_v8 = vpop.f32.mrf.mxu2 }
 0x940   :  { %5194 = vmatmul.f32.gmra.mxu3 %v10608_v14 }
 0x946   :  { %5147 = vmatmul.f32.gmra.mxu2 %v10651_v56  ;;  %v10689_v56 = vpop.f32.mrf.mxu3 }
 0x947   :  { %v10641_v34 = vpop.f32.mrf.mxu2 }
 0x948   :  { %5197 = vmatmul.f32.gmra.mxu3 %v10630_v59 }
 0x94e   :  { %5150 = vmatmul.f32.gmra.mxu2 %v10667_v17  ;;  %v10687_v17 = vld [vmem:[%s11506_s16 + $0x1b8] sm:$0xff] }
 0x94f   :  { %v10657_v24 = vpop.f32.mrf.mxu2  ;;  %12078 = vst [vmem:[#allocation19_spill] sm:$0xff] %v10687_v17 }
 0x950   :  { %5200 = vmatmul.f32.gmra.mxu3 %v10646_v36  ;;  %v5045_v36 = vadd.f32 %v10335_v4, %v10316_v35 }
 0x956   :  { %5235 = vmatmul.f32.vlgmr.msrb.gmra.mxu2 %v9952_v58  ;;  %v10698_v58 = vld [vmem:[%s11506_s16 + $0x1d8] sm:$0xff] }
 0x957   :  { %v10671_v9 = vpop.f32.mrf.mxu2  ;;  %12079 = vst [vmem:[#allocation63_spill] sm:$0xff] %v10698_v58 }
 0x958   :  { %5203 = vmatmul.f32.gmra.mxu3 %v10662_v60 }
 0x95e   :  { %5238 = vmatmul.f32.gmra.mxu2 %v9979_v48  ;;  %v10709_v48 = vld [vmem:[%s11506_s16 + $0x1f8] sm:$0xff] }
 0x95f   :  { %v5106_v33 = vpop.f32.mrf.mxu2  ;;  %12080 = vst [vmem:[#allocation56_spill] sm:$0xff] %v10709_v48 }
 0x960   :  { %5206 = vmatmul.f32.gmra.mxu3 %v10676_v50  ;;  %v5107_v60 = vadd.f32 %v5106_v33, %v5042_v5  ;;  %v5048_v5 = vadd.f32 %v10372_v3, %v10350_v41  ;;  %v10704_v33 = vpop.f32.mrf.mxu3 }
 0x966   :  { %5241 = vmatmul.f32.gmra.mxu2 %v9997_v20 }
 0x967   :  { %v5109_v44 = vpop.f32.mrf.mxu2 }
 0x968   :  { %5209 = vmatmul.f32.gmra.mxu3 %v10687_v17  ;;  %v5110_v30 = vadd.f32 %v5109_v44, %v5045_v36  ;;  %v5051_v36 = vadd.f32 %v10406_v1, %v10379_v61  ;;  %v10715_v41 = vpop.f32.mrf.mxu3  ;;  %v5054_v44 = vadd.f32 %v10444_v46, %v10408_v53  ;;  %v12083_v1 = vld [vmem:[#allocation28_spill] sm:$0xff]  ;;  %v12087_v53 = vld [vmem:[#allocation15_spill] sm:$0xff] }
 0x96e   :  { %5244 = vmatmul.f32.gmra.mxu2 %v10017_v37 }
 0x96f   :  { %v5112_v35 = vpop.f32.mrf.mxu2 }
 0x970   :  { %5212 = vmatmul.f32.gmra.mxu3 %v10698_v58  ;;  %v5113_v4 = vadd.f32 %v5112_v35, %v5048_v5  ;;  %v12081_v5 = vld [vmem:[#allocation18_spill] sm:$0xff]  ;;  %v12082_v35 = vld [vmem:[#allocation8_spill] sm:$0xff] }
 0x976   :  { %5247 = vmatmul.f32.gmra.mxu2 %v12082_v35  ;;  %v12089_v35 = vld [vmem:[#allocation26_spill] sm:$0xff] }
 0x977   :  { %v5115_v3 = vpop.f32.mrf.mxu2 }
 0x978   :  { %5215 = vmatmul.f32.gmra.mxu3 %v10709_v48  ;;  %v5116_v20 = vadd.f32 %v5115_v3, %v5051_v36  ;;  %v12084_v48 = vld [vmem:[#allocation33_spill] sm:$0xff] }
 0x979   :  { %v12086_v36 = vld [vmem:[#allocation9_spill] sm:$0xff] }
 0x97e   :  { %5250 = vmatmul.f32.gmra.mxu2 %v12084_v48 }
 0x97f   :  { %v5118_v17 = vpop.f32.mrf.mxu2 }
 0x980   :  { %5300 = vmatmul.f32.vlgmr.msrb.gmra.mxu3 %v12081_v5  ;;  %v5119_v61 = vadd.f32 %v5118_v17, %v5054_v44  ;;  %v12091_v44 = vld [vmem:[#allocation51_spill] sm:$0xff] }
 0x983   :  { %v5171_v58 = vpop.f32.mrf.mxu3 }
 0x984   :  { %v10721_v50 = vadd.f32 %v5171_v58, %v5107_v60  ;;  %v12090_v60 = vld [vmem:[#allocation39_spill] sm:$0xff] }
 0x986   :  { %5253 = vmatmul.f32.gmra.mxu2 %v12087_v53  ;;  %v12094_v53 = vld [vmem:[#allocation5_spill] sm:$0xff] }
 0x987   :  { %v5121_v54 = vpop.f32.mrf.mxu2 }
 0x988   :  { %5303 = vmatmul.f32.gmra.mxu3 %v12083_v1 }
 0x98b   :  { %v5174_v37 = vpop.f32.mrf.mxu3 }
 0x98c   :  { %v10725_v59 = vadd.f32 %v5174_v37, %v5110_v30  ;;  %v12092_v30 = vld [vmem:[#allocation6_spill] sm:$0xff] }
 0x98e   :  { %12085 = vst [vmem:[#allocation10_spill] sm:$0xff] %v10725_v59  ;;  %5256 = vmatmul.f32.gmra.mxu2 %v12090_v60  ;;  %v12096_v60 = vld [vmem:[#allocation21_spill] sm:$0xff]  ;;  %v5519_v40 = vmul.f32 %v10725_v59, %v10725_v59  ;;  %v5482_v42 = vsel %vm430_vm2, %v10725_v59, 0.0 }
 0x98f   :  { %v5124_v5 = vpop.f32.mrf.mxu2 }
 0x990   :  { %5306 = vmatmul.f32.gmra.mxu3 %v12086_v36  ;;  %v12093_v36 = vld [vmem:[#allocation49_spill] sm:$0xff] }
 0x993   :  { %v5177_v46 = vpop.f32.mrf.mxu3 }
 0x994   :  { %v10729_v3 = vadd.f32 %v5177_v46, %v5113_v4 }
 0x996   :  { %12088 = vst [vmem:[#allocation12_spill] sm:$0xff] %v10729_v3  ;;  %5259 = vmatmul.f32.gmra.mxu2 %v12092_v30  ;;  %v5484_v31 = vsel %vm430_vm2, %v10729_v3, 0.0 }
 0x997   :  { %v5127_v48 = vpop.f32.mrf.mxu2 }
 0x998   :  { %5309 = vmatmul.f32.gmra.mxu3 %v12089_v35  ;;  %v12095_v35 = vld [vmem:[#allocation57_spill] sm:$0xff] }
 0x99b   :  { %v5180_v17 = vpop.f32.mrf.mxu3 }
 0x99c   :  { %v10733_v58 = vadd.f32 %v5180_v17, %v5116_v20 }
 0x99e   :  { %5262 = vmatmul.f32.gmra.mxu2 %v12094_v53 }
 0x99f   :  { %v5130_v4 = vpop.f32.mrf.mxu2 }
 0x9a0   :  { %5312 = vmatmul.f32.gmra.mxu3 %v12091_v44  ;;  %v12098_v44 = vld [vmem:[#allocation23_spill] sm:$0xff] }
 0x9a3   :  { %v5183_v1 = vpop.f32.mrf.mxu3 }
 0x9a4   :  { %v10737_v37 = vadd.f32 %v5183_v1, %v5119_v61  ;;  %v12099_v1 = vld [vmem:[#allocation45_spill] sm:$0xff] }
 0x9a6   :  { %5265 = vmatmul.f32.gmra.mxu2 %v12096_v60  ;;  %v12102_v60 = vld [vmem:[#allocation30_spill] sm:$0xff] }
 0x9a7   :  { %v10743_v20 = vpop.f32.mrf.mxu2 }
 0x9a8   :  { %5315 = vmatmul.f32.gmra.mxu3 %v12093_v36  ;;  %v12100_v36 = vld [vmem:[#allocation53_spill] sm:$0xff] }
 0x9ab   :  { %v5186_v46 = vpop.f32.mrf.mxu3 }
 0x9ae   :  { %5268 = vmatmul.f32.gmra.mxu2 %v12098_v44  ;;  %v12104_v44 = vld [vmem:[#allocation32_spill] sm:$0xff] }
 0x9af   :  { %v10747_v61 = vpop.f32.mrf.mxu2 }
 0x9b0   :  { %5318 = vmatmul.f32.gmra.mxu3 %v12095_v35  ;;  %v12101_v35 = vld [vmem:[#allocation41_spill] sm:$0xff] }
 0x9b3   :  { %v5189_v17 = vpop.f32.mrf.mxu3 }
 0x9b6   :  { %5271 = vmatmul.f32.gmra.mxu2 %v12100_v36 }
 0x9b7   :  { %v10751_v14 = vpop.f32.mrf.mxu2 }
 0x9b8   :  { %5321 = vmatmul.f32.gmra.mxu3 %v12097_v62 }
 0x9bb   :  { %v5192_v30 = vpop.f32.mrf.mxu3 }
 0x9be   :  { %5274 = vmatmul.f32.gmra.mxu2 %v12102_v60 }
 0x9bf   :  { %v10756_v62 = vpop.f32.mrf.mxu2 }
 0x9c0   :  { %5324 = vmatmul.f32.gmra.mxu3 %v12099_v1  ;;  %v5652_v1 = vld [vmem:[%s11507_s8] sm:$0xf] }
 0x9c1   :  { %v5682_v36 = vsel %vm1443_vm4, %v5652_v1, 0  ;;  %v5060_v1 = vadd.f32 %v10513_v51, %v10462_v10  ;;  %v5066_v10 = vadd.f32 %v10582_v7, %v10518_v28  ;;  %v5535_v51 = vsel %vm430_vm2, %v5519_v40, 0.0 }
 0x9c2   :  { %5691 = vmatpush.bf16.msrb.mxu0 %v5682_v36  ;;  %v5518_v36 = vmul.f32 %v10721_v50, %v10721_v50  ;;  %v5486_v40 = vsel %vm430_vm2, %v10733_v58, 0.0 }
 0x9c3   :  { %v5195_v53 = vpop.f32.mrf.mxu3 }
 0x9c6   :  { %5277 = vmatmul.f32.gmra.mxu2 %v12104_v44  ;;  %v5057_v44 = vadd.f32 %v10480_v27, %v10434_v15  ;;  %v12107_v15 = vld [vmem:[#allocation55_spill] sm:$0xff]  ;;  %v5481_v27 = vsel %vm430_vm2, %v10721_v50, 0.0 }
 0x9c7   :  { %v10767_v60 = vpop.f32.mrf.mxu2  ;;  %v5483_v28 = vadd.f32 %v5482_v42, %v5481_v27 }
 0x9c8   :  { %5327 = vmatmul.f32.gmra.mxu3 %v12101_v35  ;;  %v12106_v35 = vld [vmem:[#allocation79_spill] sm:$0xff]  ;;  %v5122_v38 = vadd.f32 %v5121_v54, %v5057_v44  ;;  %v5125_v54 = vadd.f32 %v5124_v5, %v5060_v1  ;;  %v5534_v44 = vsel %vm430_vm2, %v5518_v36, 0.0  ;;  %v5072_v5 = vadd.f32 %v10639_v13, %v10572_v26 }
 0x9c9   :  { %v5131_v1 = vadd.f32 %v5130_v4, %v5066_v10  ;;  %v5488_v36 = vsel %vm430_vm2, %v10737_v37, 0.0  ;;  %v12108_v10 = vld [vmem:[#allocation59_spill] sm:$0xff] }
 0x9ca   :  { %v10806_v59 = vadd.f32 %v5189_v17, %v5125_v54 }
 0x9cb   :  { %v5198_v11 = vpop.f32.mrf.mxu3 }
 0x9cc   :  { %v5524_v4 = vmul.f32 %v10806_v59, %v10806_v59 }
 0x9ce   :  { %5280 = vmatmul.f32.gmra.mxu2 %v12106_v35  ;;  %v5063_v35 = vadd.f32 %v10544_v32, %v10490_v52  ;;  %v5521_v52 = vmul.f32 %v10733_v58, %v10733_v58  ;;  %v10796_v32 = vadd.f32 %v5186_v46, %v5122_v38 }
 0x9cf   :  { %v5148_v46 = vpop.f32.mrf.mxu2 }
 0x9d0   :  { %5330 = vmatmul.f32.gmra.mxu3 %v12103_v57  ;;  %v5128_v38 = vadd.f32 %v5127_v48, %v5063_v35  ;;  %v5539_v42 = vsel %vm430_vm2, %v5521_v52, 0.0  ;;  %v10817_v48 = vadd.f32 %v5195_v53, %v5131_v1  ;;  %v5490_v13 = vsel %vm430_vm2, %v10796_v32, 0.0 }
 0x9d1   :  { %v5137_v52 = vadd.f32 %v10747_v61, %v5072_v5  ;;  %v5084_v61 = vadd.f32 %v10704_v33, %v10657_v24 }
 0x9d2   :  { %v10815_v27 = vadd.f32 %v5192_v30, %v5128_v38  ;;  %v5078_v30 = vadd.f32 %v10678_v47, %v10625_v8  ;;  %v5526_v8 = vmul.f32 %v10817_v48, %v10817_v48  ;;  %v5545_v47 = vsel %vm430_vm2, %v5524_v4, 0.0 }
 0x9d3   :  { %v10763_v2 = vpop.f32.mrf.mxu3 }
 0x9d4   :  { %v5549_v24 = vsel %vm430_vm2, %v5526_v8, 0.0 }
 0x9d6   :  { %5365 = vmatmul.f32.vlgmr.msra.gmra.mxu2 %v10270_v45  ;;  %v5069_v45 = vadd.f32 %v10618_v22, %v10546_v0  ;;  %v5536_v0 = vadd.f32 %v5535_v51, %v5534_v44  ;;  %v5485_v22 = vadd.f32 %v5484_v31, %v5483_v28  ;;  %v5075_v31 = vadd.f32 %v10655_v23, %v10600_v18 }
 0x9d7   :  { %v5492_v23 = vsel %vm430_vm2, %v10806_v59, 0.0  ;;  %v5494_v28 = vsel %vm430_vm2, %v10815_v27, 0.0  ;;  %v5151_v1 = vpop.f32.mrf.mxu2 }
 0x9d8   :  { %5333 = vmatmul.f32.gmra.mxu3 %v12105_v16  ;;  %v5520_v16 = vmul.f32 %v10729_v3, %v10729_v3  ;;  %v5522_v3 = vmul.f32 %v10737_v37, %v10737_v37  ;;  %v5487_v54 = vadd.f32 %v5486_v40, %v5485_v22  ;;  %v5134_v35 = vadd.f32 %v10743_v20, %v5069_v45 }
 0x9d9   :  { %v5140_v40 = vadd.f32 %v10751_v14, %v5075_v31 }
 0x9da   :  { %v5537_v7 = vsel %vm430_vm2, %v5520_v16, 0.0  ;;  %v5523_v16 = vmul.f32 %v10796_v32, %v10796_v32  ;;  %v5541_v26 = vsel %vm430_vm2, %v5522_v3, 0.0  ;;  %v5489_v20 = vadd.f32 %v5488_v36, %v5487_v54  ;;  %v12109_v54 = vld [vmem:[#allocation50_spill] sm:$0xff] }
 0x9db   :  { %v10769_v57 = vpop.f32.mrf.mxu3  ;;  %v5538_v17 = vadd.f32 %v5537_v7, %v5536_v0  ;;  %v10831_v51 = vadd.f32 %v5198_v11, %v5134_v35  ;;  %v5525_v3 = vmul.f32 %v10815_v27, %v10815_v27  ;;  %v10847_v7 = vadd.f32 %v10763_v2, %v5137_v52 }
 0x9dc   :  { %v5543_v18 = vsel %vm430_vm2, %v5523_v16, 0.0  ;;  %v5491_v44 = vadd.f32 %v5490_v13, %v5489_v20  ;;  %v5496_v0 = vsel %vm430_vm2, %v10817_v48, 0.0  ;;  %v10858_v22 = vadd.f32 %v10769_v57, %v5140_v40 }
 0x9dd   :  { %v5540_v53 = vadd.f32 %v5539_v42, %v5538_v17  ;;  %v5527_v38 = vmul.f32 %v10831_v51, %v10831_v51  ;;  %v5547_v5 = vsel %vm430_vm2, %v5525_v3, 0.0  ;;  %v5143_v2 = vadd.f32 %v10756_v62, %v5078_v30 }
 0x9de   :  { %5368 = vmatmul.f32.gmra.mxu2 %v10294_v63  ;;  %v5081_v63 = vadd.f32 %v10689_v56, %v10641_v34  ;;  %v5493_v56 = vadd.f32 %v5492_v23, %v5491_v44  ;;  %v5498_v33 = vsel %vm430_vm2, %v10831_v51, 0.0  ;;  %v5528_v36 = vmul.f32 %v10847_v7, %v10847_v7 }
 0x9df   :  { %v5542_v45 = vadd.f32 %v5541_v26, %v5540_v53  ;;  %v5551_v35 = vsel %vm430_vm2, %v5527_v38, 0.0  ;;  %v5500_v31 = vsel %vm430_vm2, %v10847_v7, 0.0  ;;  %v5529_v26 = vmul.f32 %v10858_v22, %v10858_v22 }
 0x9e0   :  { %5336 = vmatmul.f32.gmra.mxu3 %v12107_v15  ;;  %v5495_v42 = vadd.f32 %v5494_v28, %v5493_v56  ;;  %v5146_v17 = vadd.f32 %v10767_v60, %v5081_v63  ;;  %v5553_v30 = vsel %vm430_vm2, %v5528_v36, 0.0  ;;  %v5087_v3 = vadd.f32 %v10715_v41, %v10671_v9  ;;  %v12110_v9 = vld [vmem:[#allocation60_spill] sm:$0xff] }
 0x9e1   :  { %v5544_v34 = vadd.f32 %v5543_v18, %v5542_v45  ;;  %v5236_v45 = vpop.f32.mrf.mxu2 }
 0x9e2   :  { %v5497_v57 = vadd.f32 %v5496_v0, %v5495_v42  ;;  %v5152_v56 = vadd.f32 %v5151_v1, %v5087_v3 }
 0x9e3   :  { %v5207_v15 = vpop.f32.mrf.mxu3  ;;  %v5546_v14 = vadd.f32 %v5545_v47, %v5544_v34 }
 0x9e4   :  { %v10866_v16 = vadd.f32 %v5207_v15, %v5143_v2  ;;  %v5149_v15 = vadd.f32 %v5148_v46, %v5084_v61  ;;  %v5555_v46 = vsel %vm430_vm2, %v5529_v26, 0.0 }
 0x9e5   :  { %v5548_v62 = vadd.f32 %v5547_v5, %v5546_v14 }
 0x9e6   :  { %5371 = vmatmul.f32.gmra.mxu2 %v10326_v43  ;;  %v5502_v43 = vsel %vm430_vm2, %v10858_v22, 0.0  ;;  %v5530_v53 = vmul.f32 %v10866_v16, %v10866_v16  ;;  %v5504_v52 = vsel %vm430_vm2, %v10866_v16, 0.0 }
 0x9e7   :  { %v5550_v4 = vadd.f32 %v5549_v24, %v5548_v62 }
 0x9e8   :  { %5339 = vmatmul.f32.gmra.mxu3 %v12108_v10  ;;  %v5499_v10 = vadd.f32 %v5498_v33, %v5497_v57 }
 0x9e9   :  { %v5552_v18 = vadd.f32 %v5551_v35, %v5550_v4  ;;  %v5239_v36 = vpop.f32.mrf.mxu2 }
 0x9ea   :  { %v5501_v23 = vadd.f32 %v5500_v31, %v5499_v10 }
 0x9eb   :  { %v5210_v11 = vpop.f32.mrf.mxu3  ;;  %v5554_v44 = vadd.f32 %v5553_v30, %v5552_v18 }
 0x9ec   :  { %v10876_v13 = vadd.f32 %v5210_v11, %v5146_v17  ;;  %v5503_v8 = vadd.f32 %v5502_v43, %v5501_v23  ;;  %v5557_v11 = vsel %vm430_vm2, %v5530_v53, 0.0 }
 0x9ed   :  { %v5556_v41 = vadd.f32 %v5555_v46, %v5554_v44 }
 0x9ee   :  { %v5531_v63 = vmul.f32 %v10876_v13, %v10876_v13  ;;  %v5506_v47 = vsel %vm430_vm2, %v10876_v13, 0.0  ;;  %5374 = vmatmul.f32.gmra.mxu2 %v10360_v19  ;;  %v5505_v40 = vadd.f32 %v5504_v52, %v5503_v8 }
 0x9ef   :  { %v5558_v38 = vadd.f32 %v5557_v11, %v5556_v41 }
 0x9f0   :  { %5342 = vmatmul.f32.gmra.mxu3 %v12109_v54  ;;  %v5559_v61 = vsel %vm430_vm2, %v5531_v63, 0.0  ;;  %v5507_v5 = vadd.f32 %v5506_v47, %v5505_v40  ;;  %v12112_v40 = vld [vmem:[#allocation68_spill] sm:$0xff] }
 0x9f1   :  { %v5560_v42 = vadd.f32 %v5559_v61, %v5558_v38  ;;  %v5242_v4 = vpop.f32.mrf.mxu2 }
 0x9f3   :  { %v5213_v60 = vpop.f32.mrf.mxu3 }
 0x9f4   :  { %v10883_v20 = vadd.f32 %v5213_v60, %v5149_v15 }
 0x9f6   :  { %v5532_v28 = vmul.f32 %v10883_v20, %v10883_v20  ;;  %v5508_v34 = vsel %vm430_vm2, %v10883_v20, 0.0  ;;  %5377 = vmatmul.f32.gmra.mxu2 %v10392_v39 }
 0x9f7   :  { %v5509_v24 = vadd.f32 %v5508_v34, %v5507_v5 }
 0x9f8   :  { %5345 = vmatmul.f32.gmra.mxu3 %v12110_v9  ;;  %v5561_v2 = vsel %vm430_vm2, %v5532_v28, 0.0 }
 0x9f9   :  { %v5562_v17 = vadd.f32 %v5561_v2, %v5560_v42  ;;  %v5245_v39 = vpop.f32.mrf.mxu2  ;;  %v12114_v2 = vld [vmem:[#allocation84_spill] sm:$0xff] }
 0x9fb   :  { %v5216_v0 = vpop.f32.mrf.mxu3 }
 0x9fc   :  { %v10903_v14 = vadd.f32 %v5216_v0, %v5152_v56  ;;  %v12113_v0 = vld [vmem:[#allocation81_spill] sm:$0xff] }
 0x9fe   :  { %v5510_v19 = vsel %vm430_vm2, %v10903_v14, 0.0  ;;  %v5533_v33 = vmul.f32 %v10903_v14, %v10903_v14  ;;  %5380 = vmatmul.f32.gmra.mxu2 %v10421_v55 }
 0x9ff   :  { %v5511_v54 = vadd.f32 %v5510_v19, %v5509_v24  ;;  %v5480_v24 = vld [vmem:[%s11509_s7] sm:$0x1] }
 0xa00   :  { %v5563_v1 = vsel %vm430_vm2, %v5533_v33, 0.0  ;;  %5430 = vmatmul.f32.vlgmr.msra.gmra.mxu3 %v10387_v21 }
 0xa01   :  { %v5512_v62 = vrot.slane %v5511_v54, 4  ;;  %v5564_v57 = vadd.f32 %v5563_v1, %v5562_v17  ;;  %v5248_v55 = vpop.f32.mrf.mxu2 }
 0xa03   :  { %v5513_v35 = vadd.f32 %v5512_v62, %v5511_v54  ;;  %v5565_v31 = vrot.slane %v5564_v57, 4  ;;  %v5301_v44 = vpop.f32.mrf.mxu3 }
 0xa04   :  { %v10916_v8 = vadd.f32 %v5301_v44, %v5236_v45 }
 0xa05   :  { %v5514_v26 = vrot.slane %v5513_v35, 2  ;;  %v5566_v15 = vadd.f32 %v5565_v31, %v5564_v57 }
 0xa06   :  { %5383 = vmatmul.f32.gmra.mxu2 %v10449_v25  ;;  %v12111_v25 = vld [vmem:[#allocation80_spill] sm:$0xff] }
 0xa07   :  { %v5515_v10 = vadd.f32 %v5514_v26, %v5513_v35  ;;  %v5567_v60 = vrot.slane %v5566_v15, 2  ;;  %v12115_v35 = vld [vmem:[#allocation10_spill] sm:$0xff] }
 0xa08   :  { %5433 = vmatmul.f32.gmra.mxu3 %v10416_v12  ;;  %v12116_v26 = vld [vmem:[#allocation82_spill] sm:$0xff] }
 0xa09   :  { %v5516_v30 = vrot.slane %v5515_v10, 1  ;;  %v5568_v43 = vadd.f32 %v5567_v60, %v5566_v15  ;;  %v12117_v15 = vld [vmem:[#allocation7_spill] sm:$0xff] }
 0xa0b   :  { %v5517_v53 = vadd.f32 %v5516_v30, %v5515_v10  ;;  %v5569_v18 = vrot.slane %v5568_v43, 1  ;;  %v5304_v11 = vpop.f32.mrf.mxu3 }
 0xa0c   :  { %v10920_v47 = vadd.f32 %v5304_v11, %v5239_v36  ;;  %v12121_v11 = vld [vmem:[#allocation54_spill] sm:$0xff] }
 0xa0d   :  { %v5570_v21 = vadd.f32 %v5569_v18, %v5568_v43  ;;  %v5571_v23 = vmul.f32 0.0078125, %v5517_v53 }
 0xa0e   :  { %5386 = vmatmul.f32.gmra.mxu2 %v10475_v49 }
 0xa0f   :  { %v5572_v3 = vmul.f32 0.0078125, %v5570_v21  ;;  %v5573_v46 = vmul.f32 %v5571_v23, %v5571_v23 }
 0xa10   :  { %5436 = vmatmul.f32.gmra.mxu3 %v10442_v29  ;;  %v5251_v29 = vpop.f32.mrf.mxu2 }
 0xa11   :  { %v5574_v52 = vsub.f32 %v5572_v3, %v5573_v46  ;;  %v12120_v3 = vld [vmem:[#allocation12_spill] sm:$0xff] }
 0xa13   :  { %v5575_v63 = vmax.f32 %v5574_v52, 0.0  ;;  %v5307_v61 = vpop.f32.mrf.mxu3 }
 0xa14   :  { %v10924_v56 = vadd.f32 %v5307_v61, %v5242_v4 }
 0xa15   :  { %v5576_v12 = vadd.f32 1e-05, %v5575_v63 }
 0xa16   :  { %5389 = vmatmul.f32.gmra.mxu2 %v12112_v40 }
 0xa17   :  { %6525 = vrsqrt.f32 %v5576_v12  ;;  %vm5583_vm9 = vweird.f32 %v5576_v12 }
 0xa18   :  { %5439 = vmatmul.f32.gmra.mxu3 %v10470_v6  ;;  %v5479_v6 = vld [vmem:[%s11508_s6] sm:$0x1]  ;;  %v5254_v38 = vpop.f32.mrf.mxu2 }
 0xa1b   :  { %v5310_v36 = vpop.f32.mrf.mxu3 }
 0xa1c   :  { %v10936_v17 = vadd.f32 %v5310_v36, %v5245_v39 }
 0xa1d   :  { %v6526_v28 = vpop.eup %6525 }
 0xa1e   :  { %v5578_v9 = vmul.f32 %v6526_v28, %v5576_v12  ;;  %vm5584_vm8 = vweird.f32 %v6526_v28  ;;  %5392 = vmatmul.f32.gmra.mxu2 %v12114_v2 }
 0xa1f   :  { %vm5585_vm10 = vmor %vm5583_vm9, %vm5584_vm8 }
 0xa20   :  { %v5579_v41 = vmul.f32 %v6526_v28, %v5578_v9  ;;  %5442 = vmatmul.f32.gmra.mxu3 %v12111_v25  ;;  %v5257_v1 = vpop.f32.mrf.mxu2 }
 0xa22   :  { %v5580_v45 = vmul.f32 0.5, %v5579_v41 }
 0xa23   :  { %v5313_v60 = vpop.f32.mrf.mxu3 }
 0xa24   :  { %v5581_v34 = vsub.f32 1.5, %v5580_v45  ;;  %v10948_v53 = vadd.f32 %v5313_v60, %v5248_v55 }
 0xa26   :  { %v5582_v49 = vmul.f32 %v6526_v28, %v5581_v34  ;;  %5395 = vmatmul.f32.gmra.mxu2 %v12117_v15 }
 0xa28   :  { %v5586_v5 = vsel %vm5585_vm10, %v6526_v28, %v5582_v49  ;;  %5445 = vmatmul.f32.gmra.mxu3 %v12113_v0  ;;  %v5260_v21 = vpop.f32.mrf.mxu2  ;;  %v12122_v28 = vld [vmem:[#allocation66_spill] sm:$0xff] }
 0xa29   :  { %v5587_v42 = vmul.f32 %v5586_v5, %v5479_v6 }
 0xa2b   :  { %v5588_v19 = vmul.f32 %v5587_v42, %v5571_v23  ;;  %v10934_v33 = vperm.slane %v5587_v42, 0  ;;  %v12119_v23 = vld [vmem:[#allocation46_spill] sm:$0xff]  ;;  %v5316_v39 = vpop.f32.mrf.mxu3  ;;  %v12125_v42 = vld [vmem:[#allocation65_spill] sm:$0xff] }
 0xa2c   :  { %v10957_v63 = vadd.f32 %v5316_v39, %v5251_v29  ;;  %v12124_v29 = vld [vmem:[#allocation73_spill] sm:$0xff] }
 0xa2d   :  { %v5589_v54 = vsub.f32 %v5480_v24, %v5588_v19  ;;  %v5593_v57 = vmul.f32 %v10934_v33, %v10721_v50  ;;  %v5594_v31 = vmul.f32 %v10934_v33, %v12115_v35  ;;  %v12118_v50 = vld [vmem:[#allocation88_spill] sm:$0xff]  ;;  %v5595_v46 = vmul.f32 %v10934_v33, %v12120_v3  ;;  %v12126_v24 = vld [vmem:[#allocation70_spill] sm:$0xff] }
 0xa2e   :  { %5398 = vmatmul.f32.gmra.mxu2 %v12119_v23  ;;  %v5596_v52 = vmul.f32 %v10934_v33, %v10733_v58  ;;  %v12123_v58 = vld [vmem:[#allocation40_spill] sm:$0xff]  ;;  %v5597_v6 = vmul.f32 %v10934_v33, %v10737_v37  ;;  %v5598_v49 = vmul.f32 %v10934_v33, %v10796_v32  ;;  %v5600_v15 = vmul.f32 %v10934_v33, %v10815_v27 }
 0xa2f   :  { %v10938_v62 = vperm.slane %v5589_v54, 0  ;;  %v12127_v32 = vld [vmem:[#allocation20_spill] sm:$0xff] }
 0xa30   :  { %5448 = vmatmul.f32.gmra.mxu3 %v12116_v26  ;;  %v5263_v55 = vpop.f32.mrf.mxu2  ;;  %v5599_v26 = vmul.f32 %v10934_v33, %v10806_v59  ;;  %v12130_v59 = vld [vmem:[#allocation19_spill] sm:$0xff] }
 0xa31   :  { %v5612_v4 = vadd.f32 %v10938_v62, %v5593_v57  ;;  %v5613_v10 = vadd.f32 %v10938_v62, %v5594_v31  ;;  %v5614_v44 = vadd.f32 %v10938_v62, %v5595_v46  ;;  %v5615_v12 = vadd.f32 %v10938_v62, %v5596_v52 }
 0xa32   :  { %v5617_v0 = vadd.f32 %v10938_v62, %v5598_v49  ;;  %v5619_v60 = vadd.f32 %v10938_v62, %v5600_v15  ;;  %v5601_v46 = vmul.f32 %v10934_v33, %v10817_v48  ;;  %v5602_v52 = vmul.f32 %v10934_v33, %v10831_v51  ;;  %v12132_v48 = vld [vmem:[#allocation56_spill] sm:$0xff] }
 0xa33   :  { %v5628_v30 = vmax.f32 %v5612_v4, 0.0  ;;  %v5629_v43 = vmax.f32 %v5613_v10, 0.0  ;;  %v5630_v9 = vmax.f32 %v5614_v44, 0.0  ;;  %v5631_v41 = vmax.f32 %v5615_v12, 0.0  ;;  %v5319_v25 = vpop.f32.mrf.mxu3 }
 0xa34   :  { %v10963_v40 = vadd.f32 %v5319_v25, %v5254_v38  ;;  %v5616_v38 = vadd.f32 %v10938_v62, %v5597_v6  ;;  %v5633_v36 = vmax.f32 %v5617_v0, 0.0  ;;  %v5618_v10 = vadd.f32 %v10938_v62, %v5599_v26 }
 0xa35   :  { %v5644_v18 = vpack.c.bf16 %v5629_v43, %v5628_v30  ;;  %v5645_v45 = vpack.c.bf16 %v5631_v41, %v5630_v9  ;;  %v12129_v43 = vld [vmem:[#allocation62_spill] sm:$0xff]  ;;  %v5620_v12 = vadd.f32 %v10938_v62, %v5601_v46 }
 0xa36   :  { %5401 = vmatmul.f32.gmra.mxu2 %v12122_v28  ;;  %v5632_v19 = vmax.f32 %v5616_v38, 0.0  ;;  %v12131_v28 = vld [vmem:[#allocation63_spill] sm:$0xff] }
 0xa37   :  { %6501 = vmatmul.msk.bf16.vlgmr.msrb.gmra.mxu0 %vm430_vm2, %v5644_v18  ;;  %v5634_v18 = vmax.f32 %v5618_v10, 0.0  ;;  %v5636_v9 = vmax.f32 %v5620_v12, 0.0 }
 0xa38   :  { %5451 = vmatmul.f32.gmra.mxu3 %v12118_v50  ;;  %v5266_v61 = vpop.f32.mrf.mxu2  ;;  %v5646_v37 = vpack.c.bf16 %v5633_v36, %v5632_v19 }
 0xa3b   :  { %v5322_v34 = vpop.f32.mrf.mxu3 }
 0xa3c   :  { %v10972_v5 = vadd.f32 %v5322_v34, %v5257_v1  ;;  %v12128_v1 = vld [vmem:[#allocation38_spill] sm:$0xff]  ;;  %v5604_v34 = vmul.f32 %v10934_v33, %v10858_v22  ;;  %v5605_v22 = vmul.f32 %v10934_v33, %v10866_v16 }
 0xa3e   :  { %5404 = vmatmul.f32.gmra.mxu2 %v12124_v29  ;;  %v5603_v29 = vmul.f32 %v10934_v33, %v10847_v7  ;;  %v5623_v38 = vadd.f32 %v10938_v62, %v5604_v34 }
 0xa40   :  { %5454 = vmatmul.f32.gmra.mxu3 %v12121_v11  ;;  %v5269_v2 = vpop.f32.mrf.mxu2  ;;  %v5622_v49 = vadd.f32 %v10938_v62, %v5603_v29 }
 0xa43   :  { %v5325_v54 = vpop.f32.mrf.mxu3 }
 0xa44   :  { %v10978_v57 = vadd.f32 %v5325_v54, %v5260_v21  ;;  %v5635_v21 = vmax.f32 %v5619_v60, 0.0 }
 0xa46   :  { %5407 = vmatmul.f32.gmra.mxu2 %v12126_v24  ;;  %v5647_v39 = vpack.c.bf16 %v5635_v21, %v5634_v18  ;;  %v5607_v21 = vmul.f32 %v10934_v33, %v10883_v20 }
 0xa47   :  { %6502 = vmatmul.msk.bf16.gmra.mxu0 %vm430_vm2, %v5645_v45 }
 0xa48   :  { %5457 = vmatmul.f32.gmra.mxu3 %v12123_v58  ;;  %v5272_v35 = vpop.f32.mrf.mxu2 }
 0xa4b   :  { %v5328_v31 = vpop.f32.mrf.mxu3 }
 0xa4c   :  { %v10987_v4 = vadd.f32 %v5328_v31, %v5263_v55  ;;  %v5621_v55 = vadd.f32 %v10938_v62, %v5602_v52 }
 0xa4e   :  { %5410 = vmatmul.f32.gmra.mxu2 %v12128_v1  ;;  %v5637_v41 = vmax.f32 %v5621_v55, 0.0 }
 0xa50   :  { %5460 = vmatmul.f32.gmra.mxu3 %v12125_v42  ;;  %v5275_v30 = vpop.f32.mrf.mxu2  ;;  %v5639_v42 = vmax.f32 %v5623_v38, 0.0 }
 0xa53   :  { %v5331_v50 = vpop.f32.mrf.mxu3 }
 0xa54   :  { %v10992_v23 = vadd.f32 %v5331_v50, %v5266_v61  ;;  %v5648_v61 = vpack.c.bf16 %v5637_v41, %v5636_v9 }
 0xa57   :  { %6503 = vmatmul.msk.bf16.gmra.mxu0 %vm430_vm2, %v5646_v37  ;;  %v5606_v37 = vmul.f32 %v10934_v33, %v10876_v13  ;;  %v5608_v13 = vmul.f32 %v10934_v33, %v10903_v14 }
 0xa58   :  { %5463 = vmatmul.f32.gmra.mxu3 %v12127_v32  ;;  %v5278_v3 = vpop.f32.mrf.mxu2  ;;  %v5624_v32 = vadd.f32 %v10938_v62, %v5605_v22 }
 0xa59   :  { %v5625_v1 = vadd.f32 %v10938_v62, %v5606_v37 }
 0xa5a   :  { %v5640_v26 = vmax.f32 %v5624_v32, 0.0 }
 0xa5b   :  { %v5334_v27 = vpop.f32.mrf.mxu3  ;;  %v5641_v15 = vmax.f32 %v5625_v1, 0.0 }
 0xa5c   :  { %v11000_v44 = vadd.f32 %v5334_v27, %v5269_v2  ;;  %v5638_v2 = vmax.f32 %v5622_v49, 0.0 }
 0xa5d   :  { %v5650_v60 = vpack.c.bf16 %v5641_v15, %v5640_v26 }
 0xa5e   :  { %v5649_v36 = vpack.c.bf16 %v5639_v42, %v5638_v2 }
 0xa60   :  { %5466 = vmatmul.f32.gmra.mxu3 %v12129_v43  ;;  %v5281_v11 = vpop.f32.mrf.mxu2 }
 0xa63   :  { %v5337_v25 = vpop.f32.mrf.mxu3 }
 0xa64   :  { %v11005_v45 = vadd.f32 %v5337_v25, %v5272_v35 }
 0xa67   :  { %6504 = vmatmul.msk.bf16.gmra.mxu0 %vm430_vm2, %v5647_v39 }
 0xa68   :  { %5469 = vmatmul.f32.gmra.mxu3 %v12130_v59  ;;  %v5366_v58 = vpop.f32.mrf.mxu2  ;;  %v5626_v59 = vadd.f32 %v10938_v62, %v5607_v21 }
 0xa69   :  { %v5367_v43 = vadd.f32 %v5366_v58, %v10916_v8 }
 0xa6a   :  { %v5642_v8 = vmax.f32 %v5626_v59, 0.0 }
 0xa6b   :  { %v5340_v51 = vpop.f32.mrf.mxu3 }
 0xa6c   :  { %v11013_v6 = vadd.f32 %v5340_v51, %v5275_v30 }
 0xa70   :  { %5472 = vmatmul.f32.gmra.mxu3 %v12131_v28  ;;  %v5369_v0 = vpop.f32.mrf.mxu2 }
 0xa71   :  { %v5370_v16 = vadd.f32 %v5369_v0, %v10920_v47 }
 0xa73   :  { %v5343_v24 = vpop.f32.mrf.mxu3 }
 0xa74   :  { %v11017_v19 = vadd.f32 %v5343_v24, %v5278_v3  ;;  %v5627_v3 = vadd.f32 %v10938_v62, %v5608_v13 }
 0xa76   :  { %v5643_v46 = vmax.f32 %v5627_v3, 0.0 }
 0xa77   :  { %6505 = vmatmul.msk.bf16.gmra.mxu0 %vm430_vm2, %v5648_v61 }
 0xa78   :  { %5475 = vmatmul.f32.gmra.mxu3 %v12132_v48  ;;  %v5372_v54 = vpop.f32.mrf.mxu2  ;;  %v5651_v12 = vpack.c.bf16 %v5643_v46, %v5642_v8 }
 0xa79   :  { %v5373_v14 = vadd.f32 %v5372_v54, %v10924_v56 }
 0xa7b   :  { %v5346_v7 = vpop.f32.mrf.mxu3 }
 0xa7c   :  { %v11024_v35 = vadd.f32 %v5346_v7, %v5281_v11 }
 0xa80   :  { %v5375_v31 = vpop.f32.mrf.mxu2 }
 0xa81   :  { %v5376_v20 = vadd.f32 %v5375_v31, %v10936_v17 }
 0xa83   :  { %v5431_v10 = vpop.f32.mrf.mxu3 }
 0xa84   :  { %v5432_v50 = vadd.f32 %v5431_v10, %v5367_v43 }
 0xa87   :  { %6506 = vmatmul.msk.bf16.gmra.mxu0 %vm430_vm2, %v5649_v36 }
 0xa88   :  { %v5378_v30 = vpop.f32.mrf.mxu2 }
 0xa89   :  { %v5379_v25 = vadd.f32 %v5378_v30, %v10948_v53 }
 0xa8b   :  { %v5434_v18 = vpop.f32.mrf.mxu3 }
 0xa8c   :  { %v5435_v39 = vadd.f32 %v5434_v18, %v5370_v16 }
 0xa8e   :  { %v5883_v27 = vpack.c.bf16 %v5435_v39, %v5432_v50 }
 0xa90   :  { %6509 = vmatmul.msk.bf16.vlgmr.msrb.gmra.mxu1 %vm158_vm1, %v5883_v27  ;;  %v5381_v47 = vpop.f32.mrf.mxu2 }
 0xa91   :  { %v5382_v61 = vadd.f32 %v5381_v47, %v10957_v63 }
 0xa93   :  { %v5437_v52 = vpop.f32.mrf.mxu3 }
 0xa94   :  { %v5438_v55 = vadd.f32 %v5437_v52, %v5373_v14 }
 0xa97   :  { %6507 = vmatmul.msk.bf16.gmra.mxu0 %vm430_vm2, %v5650_v60 }
 0xa98   :  { %v5384_v28 = vpop.f32.mrf.mxu2 }
 0xa99   :  { %v5385_v34 = vadd.f32 %v5384_v28, %v10963_v40 }
 0xa9b   :  { %v5440_v33 = vpop.f32.mrf.mxu3 }
 0xa9c   :  { %v5441_v11 = vadd.f32 %v5440_v33, %v5376_v20 }
 0xa9e   :  { %v5884_v9 = vpack.c.bf16 %v5441_v11, %v5438_v55 }
 0xaa0   :  { %6510 = vmatmul.msk.bf16.gmra.mxu1 %vm158_vm1, %v5884_v9  ;;  %v5387_v41 = vpop.f32.mrf.mxu2 }
 0xaa1   :  { %v5388_v49 = vadd.f32 %v5387_v41, %v10972_v5 }
 0xaa3   :  { %v5443_v62 = vpop.f32.mrf.mxu3 }
 0xaa4   :  { %v5444_v48 = vadd.f32 %v5443_v62, %v5379_v25 }
 0xaa7   :  { %6508 = vmatmul.msk.bf16.gmra.mxu0 %vm430_vm2, %v5651_v12 }
 0xaa8   :  { %v5390_v56 = vpop.f32.mrf.mxu2 }
 0xaa9   :  { %v5391_v54 = vadd.f32 %v5390_v56, %v10978_v57 }
 0xaab   :  { %v5446_v58 = vpop.f32.mrf.mxu3 }
 0xaac   :  { %v5447_v51 = vadd.f32 %v5446_v58, %v5382_v61 }
 0xaae   :  { %v5885_v29 = vpack.c.bf16 %v5447_v51, %v5444_v48  ;;  %v11075_v48 = vld [vmem:[%s11510_s9] ss:$0 sm:$0xff] }
 0xab0   :  { %6511 = vmatmul.msk.bf16.gmra.mxu1 %vm158_vm1, %v5885_v29  ;;  %v5393_v0 = vpop.f32.mrf.mxu2 }
 0xab1   :  { %v5394_v7 = vadd.f32 %v5393_v0, %v10987_v4 }
 0xab3   :  { %v5449_v17 = vpop.f32.mrf.mxu3 }
 0xab4   :  { %v5450_v2 = vadd.f32 %v5449_v17, %v5385_v34  ;;  %v5693_v53 = vpop.f32.mrf.mxu0 }
 0xab5   :  { %v11081_v29 = vadd.f32 %v11075_v48, %v5693_v53 }
 0xab7   :  { %v5773_v0 = vmul.f32 %v11081_v29, %v11081_v29 }
 0xab8   :  { %v5396_v36 = vpop.f32.mrf.mxu2 }
 0xab9   :  { %v5397_v10 = vadd.f32 %v5396_v36, %v10992_v23 }
 0xabb   :  { %v5452_v38 = vpop.f32.mrf.mxu3 }
 0xabc   :  { %v5453_v42 = vadd.f32 %v5452_v38, %v5388_v49  ;;  %v5695_v22 = vpop.f32.mrf.mxu0 }
 0xabd   :  { %v11078_v51 = vadd.f32 %v11075_v48, %v5695_v22 }
 0xabe   :  { %v5886_v24 = vpack.c.bf16 %v5453_v42, %v5450_v2  ;;  %v5736_v42 = vsel %vm5735_vm11, %v11081_v29, 0.0 }
 0xabf   :  { %v5737_v34 = vsel %vm5735_vm11, %v11078_v51, 0.0  ;;  %v5774_v49 = vmul.f32 %v11078_v51, %v11078_v51 }
 0xac0   :  { %6512 = vmatmul.msk.bf16.gmra.mxu1 %vm158_vm1, %v5886_v24  ;;  %v5399_v5 = vpop.f32.mrf.mxu2  ;;  %v5738_v36 = vadd.f32 %v5737_v34, %v5736_v42 }
 0xac1   :  { %v5400_v60 = vadd.f32 %v5399_v5, %v11000_v44 }
 0xac3   :  { %v5455_v63 = vpop.f32.mrf.mxu3 }
 0xac4   :  { %v5456_v32 = vadd.f32 %v5455_v63, %v5391_v54  ;;  %v5698_v26 = vpop.f32.mrf.mxu0  ;;  %v5790_v54 = vsel %vm5735_vm11, %v5774_v49, 0.0 }
 0xac5   :  { %v11086_v17 = vadd.f32 %v11075_v48, %v5698_v26 }
 0xac7   :  { %v5739_v24 = vsel %vm5735_vm11, %v11086_v17, 0.0  ;;  %v5775_v53 = vmul.f32 %v11086_v17, %v11086_v17 }
 0xac8   :  { %v5402_v15 = vpop.f32.mrf.mxu2 }
 0xac9   :  { %v5403_v50 = vadd.f32 %v5402_v15, %v11005_v45  ;;  %v5792_v5 = vsel %vm5735_vm11, %v5775_v53, 0.0 }
 0xacb   :  { %v5458_v37 = vpop.f32.mrf.mxu3 }
 0xacc   :  { %v5459_v40 = vadd.f32 %v5458_v37, %v5394_v7  ;;  %v5700_v4 = vpop.f32.mrf.mxu0 }
 0xacd   :  { %v11093_v38 = vadd.f32 %v11075_v48, %v5700_v4 }
 0xace   :  { %v5887_v1 = vpack.c.bf16 %v5459_v40, %v5456_v32  ;;  %v5789_v32 = vsel %vm5735_vm11, %v5773_v0, 0.0  ;;  %v5740_v40 = vadd.f32 %v5739_v24, %v5738_v36 }
 0xacf   :  { %v5741_v7 = vsel %vm5735_vm11, %v11093_v38, 0.0  ;;  %v5776_v22 = vmul.f32 %v11093_v38, %v11093_v38 }
 0xad0   :  { %6513 = vmatmul.msk.bf16.gmra.mxu1 %vm158_vm1, %v5887_v1  ;;  %v5405_v18 = vpop.f32.mrf.mxu2 }
 0xad1   :  { %v5406_v39 = vadd.f32 %v5405_v18, %v11013_v6 }
 0xad3   :  { %v5461_v31 = vpop.f32.mrf.mxu3 }
 0xad4   :  { %v5462_v43 = vadd.f32 %v5461_v31, %v5397_v10  ;;  %v5703_v21 = vpop.f32.mrf.mxu0  ;;  %v5791_v10 = vadd.f32 %v5790_v54, %v5789_v32 }
 0xad5   :  { %v11104_v63 = vadd.f32 %v11075_v48, %v5703_v21 }
 0xad6   :  { %v5793_v4 = vadd.f32 %v5792_v5, %v5791_v10 }
 0xad7   :  { %v5743_v31 = vsel %vm5735_vm11, %v11104_v63, 0.0  ;;  %v5777_v26 = vmul.f32 %v11104_v63, %v11104_v63 }
 0xad8   :  { %v5408_v23 = vpop.f32.mrf.mxu2 }
 0xad9   :  { %v5409_v47 = vadd.f32 %v5408_v23, %v11017_v19  ;;  %v5796_v18 = vsel %vm5735_vm11, %v5777_v26, 0.0 }
 0xadb   :  { %v5464_v30 = vpop.f32.mrf.mxu3 }
 0xadc   :  { %v5465_v57 = vadd.f32 %v5464_v30, %v5400_v60  ;;  %v5705_v44 = vpop.f32.mrf.mxu0  ;;  %v5742_v60 = vadd.f32 %v5741_v7, %v5740_v40  ;;  %v5794_v30 = vsel %vm5735_vm11, %v5776_v22, 0.0 }
 0xadd   :  { %v11112_v37 = vadd.f32 %v11075_v48, %v5705_v44 }
 0xade   :  { %v5888_v16 = vpack.c.bf16 %v5465_v57, %v5462_v43 }
 0xadf   :  { %v5745_v43 = vsel %vm5735_vm11, %v11112_v37, 0.0  ;;  %v5778_v57 = vmul.f32 %v11112_v37, %v11112_v37 }
 0xae0   :  { %6514 = vmatmul.msk.bf16.gmra.mxu1 %vm158_vm1, %v5888_v16  ;;  %v5411_v52 = vpop.f32.mrf.mxu2 }
 0xae1   :  { %v5412_v12 = vadd.f32 %v5411_v52, %v11024_v35  ;;  %v5798_v23 = vsel %vm5735_vm11, %v5778_v57, 0.0 }
 0xae3   :  { %v5467_v13 = vpop.f32.mrf.mxu3 }
 0xae4   :  { %v5468_v59 = vadd.f32 %v5467_v13, %v5403_v50  ;;  %v5708_v45 = vpop.f32.mrf.mxu0  ;;  %v5744_v13 = vadd.f32 %v5743_v31, %v5742_v60 }
 0xae5   :  { %v11123_v15 = vadd.f32 %v11075_v48, %v5708_v45 }
 0xae7   :  { %v5747_v21 = vsel %vm5735_vm11, %v11123_v15, 0.0  ;;  %v5779_v50 = vmul.f32 %v11123_v15, %v11123_v15 }
 0xaeb   :  { %v5470_v3 = vpop.f32.mrf.mxu3 }
 0xaec   :  { %v5471_v27 = vadd.f32 %v5470_v3, %v5406_v39  ;;  %v5710_v6 = vpop.f32.mrf.mxu0  ;;  %v5795_v3 = vadd.f32 %v5794_v30, %v5793_v4 }
 0xaed   :  { %v11131_v16 = vadd.f32 %v11075_v48, %v5710_v6 }
 0xaee   :  { %v5889_v46 = vpack.c.bf16 %v5471_v27, %v5468_v59  ;;  %v5746_v59 = vadd.f32 %v5745_v43, %v5744_v13  ;;  %v5797_v52 = vadd.f32 %v5796_v18, %v5795_v3 }
 0xaef   :  { %v5780_v44 = vmul.f32 %v11131_v16, %v11131_v16 }
 0xaf0   :  { %6515 = vmatmul.msk.bf16.gmra.mxu1 %vm158_vm1, %v5889_v46  ;;  %v5749_v46 = vsel %vm5735_vm11, %v11131_v16, 0.0 }
 0xaf3   :  { %v5473_v8 = vpop.f32.mrf.mxu3 }
 0xaf4   :  { %v5474_v20 = vadd.f32 %v5473_v8, %v5409_v47  ;;  %v5713_v28 = vpop.f32.mrf.mxu0  ;;  %v5748_v47 = vadd.f32 %v5747_v21, %v5746_v59 }
 0xaf5   :  { %v11139_v39 = vadd.f32 %v11075_v48, %v5713_v28  ;;  %v5802_v28 = vsel %vm5735_vm11, %v5780_v44, 0.0 }
 0xaf6   :  { %v5750_v6 = vadd.f32 %v5749_v46, %v5748_v47 }
 0xafb   :  { %v5476_v14 = vpop.f32.mrf.mxu3 }
 0xafc   :  { %v5477_v33 = vadd.f32 %v5476_v14, %v5412_v12  ;;  %v5715_v62 = vpop.f32.mrf.mxu0  ;;  %v5800_v14 = vsel %vm5735_vm11, %v5779_v50, 0.0 }
 0xafd   :  { %v11147_v8 = vadd.f32 %v11075_v48, %v5715_v62 }
 0xafe   :  { %v5890_v55 = vpack.c.bf16 %v5477_v33, %v5474_v20  ;;  %v5751_v20 = vsel %vm5735_vm11, %v11139_v39, 0.0  ;;  %v5781_v33 = vmul.f32 %v11139_v39, %v11139_v39 }
 0xaff   :  { %v5753_v62 = vsel %vm5735_vm11, %v11147_v8, 0.0  ;;  %v5782_v34 = vmul.f32 %v11147_v8, %v11147_v8  ;;  %v5752_v42 = vadd.f32 %v5751_v20, %v5750_v6 }
 0xb00   :  { %6516 = vmatmul.msk.bf16.gmra.mxu1 %vm158_vm1, %v5890_v55  ;;  %v5799_v55 = vadd.f32 %v5798_v23, %v5797_v52  ;;  %v5804_v24 = vsel %vm5735_vm11, %v5781_v33, 0.0 }
 0xb01   :  { %v5754_v7 = vadd.f32 %v5753_v62, %v5752_v42  ;;  %v5806_v22 = vsel %vm5735_vm11, %v5782_v34, 0.0 }
 0xb02   :  { %v5801_v0 = vadd.f32 %v5800_v14, %v5799_v55 }
 0xb04   :  { %v5718_v25 = vpop.f32.mrf.mxu0  ;;  %v5803_v54 = vadd.f32 %v5802_v28, %v5801_v0 }
 0xb05   :  { %v11157_v45 = vadd.f32 %v11075_v48, %v5718_v25 }
 0xb06   :  { %v5805_v5 = vadd.f32 %v5804_v24, %v5803_v54  ;;  %v11217_v54 = vld [vmem:[%s11511_s13] ss:$0 sm:$0xff] }
 0xb07   :  { %v5755_v25 = vsel %vm5735_vm11, %v11157_v45, 0.0  ;;  %v5783_v53 = vmul.f32 %v11157_v45, %v11157_v45 }
 0xb08   :  { %v5756_v31 = vadd.f32 %v5755_v25, %v5754_v7  ;;  %v5807_v57 = vadd.f32 %v5806_v22, %v5805_v5 }
 0xb0c   :  { %v5720_v35 = vpop.f32.mrf.mxu0 }
 0xb0d   :  { %v11060_v11 = vpop.f32.mrf.mxu1  ;;  %v11165_v49 = vadd.f32 %v11075_v48, %v5720_v35 }
 0xb0f   :  { %v5757_v35 = vsel %vm5735_vm11, %v11165_v49, 0.0  ;;  %v5784_v32 = vmul.f32 %v11165_v49, %v11165_v49 }
 0xb10   :  { %v5758_v4 = vadd.f32 %v5757_v35, %v5756_v31 }
 0xb14   :  { %v11070_v58 = vpop.f32.mrf.mxu0 }
 0xb15   :  { %v11062_v9 = vpop.f32.mrf.mxu1  ;;  %v11174_v36 = vadd.f32 %v11075_v48, %v11070_v58  ;;  %v5808_v58 = vsel %vm5735_vm11, %v5783_v53, 0.0 }
 0xb16   :  { %v5809_v50 = vadd.f32 %v5808_v58, %v5807_v57  ;;  %v11221_v35 = vadd.f32 %v11217_v54, %v11062_v9 }
 0xb17   :  { %v5759_v60 = vsel %vm5735_vm11, %v11174_v36, 0.0  ;;  %v5785_v30 = vmul.f32 %v11174_v36, %v11174_v36 }
 0xb18   :  { %v5760_v3 = vadd.f32 %v5759_v60, %v5758_v4  ;;  %v6012_v60 = vmul.f32 %v11221_v35, %v11221_v35 }
 0xb19   :  { %v5812_v59 = vsel %vm5735_vm11, %v5785_v30, 0.0 }
 0xb1c   :  { %v5725_v2 = vpop.f32.mrf.mxu0 }
 0xb1d   :  { %v11064_v41 = vpop.f32.mrf.mxu1  ;;  %v11182_v40 = vadd.f32 %v11075_v48, %v5725_v2  ;;  %v5810_v2 = vsel %vm5735_vm11, %v5784_v32, 0.0  ;;  %v11225_v32 = vadd.f32 %v11217_v54, %v11060_v11  ;;  %v5975_v11 = vsel %vm5735_vm11, %v11221_v35, 0.0 }
 0xb1e   :  { %v5811_v46 = vadd.f32 %v5810_v2, %v5809_v50  ;;  %v11229_v31 = vadd.f32 %v11217_v54, %v11064_v41 }
 0xb1f   :  { %v5761_v13 = vsel %vm5735_vm11, %v11182_v40, 0.0  ;;  %v5786_v18 = vmul.f32 %v11182_v40, %v11182_v40  ;;  %v6011_v9 = vmul.f32 %v11225_v32, %v11225_v32  ;;  %v5974_v4 = vsel %vm5735_vm11, %v11225_v32, 0.0 }
 0xb20   :  { %v5762_v44 = vadd.f32 %v5761_v13, %v5760_v3  ;;  %v5813_v14 = vadd.f32 %v5812_v59, %v5811_v46  ;;  %v6013_v57 = vmul.f32 %v11229_v31, %v11229_v31  ;;  %v5976_v59 = vadd.f32 %v5975_v11, %v5974_v4 }
 0xb21   :  { %v5814_v52 = vsel %vm5735_vm11, %v5786_v18, 0.0  ;;  %v5977_v18 = vsel %vm5735_vm11, %v11229_v31, 0.0 }
 0xb22   :  { %v5815_v6 = vadd.f32 %v5814_v52, %v5813_v14 }
 0xb24   :  { %v5728_v27 = vpop.f32.mrf.mxu0 }
 0xb25   :  { %v11066_v19 = vpop.f32.mrf.mxu1  ;;  %v11192_v43 = vadd.f32 %v11075_v48, %v5728_v27 }
 0xb26   :  { %v11235_v30 = vadd.f32 %v11217_v54, %v11066_v19  ;;  %v6028_v19 = vsel %vm5735_vm11, %v6012_v60, 0.0 }
 0xb27   :  { %v5763_v27 = vsel %vm5735_vm11, %v11192_v43, 0.0  ;;  %v5787_v23 = vmul.f32 %v11192_v43, %v11192_v43 }
 0xb28   :  { %v5764_v20 = vadd.f32 %v5763_v27, %v5762_v44  ;;  %v6014_v50 = vmul.f32 %v11235_v30, %v11235_v30  ;;  %v5979_v46 = vsel %vm5735_vm11, %v11235_v30, 0.0 }
 0xb29   :  { %v5816_v55 = vsel %vm5735_vm11, %v5787_v23, 0.0  ;;  %v6030_v23 = vsel %vm5735_vm11, %v6013_v57, 0.0 }
 0xb2a   :  { %v5817_v34 = vadd.f32 %v5816_v55, %v5815_v6 }
 0xb2c   :  { %v5730_v26 = vpop.f32.mrf.mxu0 }
 0xb2d   :  { %v11068_v61 = vpop.f32.mrf.mxu1  ;;  %v11200_v21 = vadd.f32 %v11075_v48, %v5730_v26 }
 0xb2e   :  { %v11245_v41 = vadd.f32 %v11217_v54, %v11068_v61  ;;  %v6027_v61 = vsel %vm5735_vm11, %v6011_v9, 0.0 }
 0xb2f   :  { %v5765_v47 = vsel %vm5735_vm11, %v11200_v21, 0.0  ;;  %v5788_v48 = vmul.f32 %v11200_v21, %v11200_v21 }
 0xb30   :  { %v5766_v28 = vadd.f32 %v5765_v47, %v5764_v20  ;;  %v6015_v44 = vmul.f32 %v11245_v41, %v11245_v41  ;;  %v6029_v47 = vadd.f32 %v6028_v19, %v6027_v61  ;;  %v6032_v20 = vsel %vm5735_vm11, %v6014_v50, 0.0 }
 0xb31   :  { %v5818_v62 = vsel %vm5735_vm11, %v5788_v48, 0.0  ;;  %v5978_v48 = vadd.f32 %v5977_v18, %v5976_v59  ;;  %v5981_v55 = vsel %vm5735_vm11, %v11245_v41, 0.0 }
 0xb32   :  { %v5767_v0 = vrot.slane %v5766_v28, 4  ;;  %v5819_v42 = vadd.f32 %v5818_v62, %v5817_v34  ;;  %v6031_v62 = vadd.f32 %v6030_v23, %v6029_v47 }
 0xb33   :  { %v5980_v34 = vadd.f32 %v5979_v46, %v5978_v48 }
 0xb34   :  { %v5768_v25 = vadd.f32 %v5767_v0, %v5766_v28  ;;  %v5820_v53 = vrot.slane %v5819_v42, 4 }
 0xb35   :  { %v11083_v56 = vpop.f32.mrf.mxu1 }
 0xb36   :  { %v5769_v7 = vrot.slane %v5768_v25, 2  ;;  %v5821_v22 = vadd.f32 %v5820_v53, %v5819_v42  ;;  %v11256_v3 = vadd.f32 %v11217_v54, %v11083_v56  ;;  %v6033_v53 = vadd.f32 %v6032_v20, %v6031_v62 }
 0xb38   :  { %v5770_v26 = vadd.f32 %v5769_v7, %v5768_v25  ;;  %v5822_v58 = vrot.slane %v5821_v22, 2  ;;  %v6016_v6 = vmul.f32 %v11256_v3, %v11256_v3  ;;  %v5983_v0 = vsel %vm5735_vm11, %v11256_v3, 0.0 }
 0xb3a   :  { %v5771_v2 = vrot.slane %v5770_v26, 1  ;;  %v5823_v13 = vadd.f32 %v5822_v58, %v5821_v22 }
 0xb3c   :  { %v5772_v56 = vadd.f32 %v5771_v2, %v5770_v26  ;;  %v5824_v14 = vrot.slane %v5823_v13, 1  ;;  %v6036_v26 = vsel %vm5735_vm11, %v6016_v6, 0.0 }
 0xb3d   :  { %v11115_v1 = vpop.f32.mrf.mxu1 }
 0xb3e   :  { %v11266_v52 = vadd.f32 %v11217_v54, %v11115_v1  ;;  %v6034_v1 = vsel %vm5735_vm11, %v6015_v44, 0.0  ;;  %v5825_v7 = vadd.f32 %v5824_v14, %v5823_v13  ;;  %v11286_v22 = vmul.f32 0.0078125, %v5772_v56 }
 0xb3f   :  { %v6035_v11 = vadd.f32 %v6034_v1, %v6033_v53 }
 0xb40   :  { %v6017_v42 = vmul.f32 %v11266_v52, %v11266_v52  ;;  %v5985_v58 = vsel %vm5735_vm11, %v11266_v52, 0.0  ;;  %v5827_v18 = vmul.f32 0.0078125, %v5825_v7  ;;  %v5828_v50 = vmul.f32 %v11286_v22, %v11286_v22 }
 0xb42   :  { %v6038_v4 = vsel %vm5735_vm11, %v6017_v42, 0.0 }
 0xb45   :  { %v11149_v12 = vpop.f32.mrf.mxu1 }
 0xb46   :  { %v11275_v28 = vadd.f32 %v11217_v54, %v11149_v12  ;;  %v5982_v12 = vadd.f32 %v5981_v55, %v5980_v34  ;;  %v5829_v55 = vsub.f32 %v5827_v18, %v5828_v50 }
 0xb48   :  { %v6018_v60 = vmul.f32 %v11275_v28, %v11275_v28  ;;  %v5984_v57 = vadd.f32 %v5983_v0, %v5982_v12  ;;  %v5987_v2 = vsel %vm5735_vm11, %v11275_v28, 0.0 }
 0xb4a   :  { %v5986_v61 = vadd.f32 %v5985_v58, %v5984_v57  ;;  %v6040_v59 = vsel %vm5735_vm11, %v6018_v60, 0.0  ;;  %v5830_v57 = vmax.f32 %v5829_v55, 0.0 }
 0xb4d   :  { %v11184_v10 = vpop.f32.mrf.mxu1 }
 0xb4e   :  { %v11284_v25 = vadd.f32 %v11217_v54, %v11184_v10 }
 0xb50   :  { %v6019_v13 = vmul.f32 %v11284_v25, %v11284_v25  ;;  %v5989_v23 = vsel %vm5735_vm11, %v11284_v25, 0.0 }
 0xb52   :  { %v6042_v48 = vsel %vm5735_vm11, %v6019_v13, 0.0 }
 0xb55   :  { %v5954_v33 = vpop.f32.mrf.mxu1 }
 0xb56   :  { %v11294_v9 = vadd.f32 %v11217_v54, %v5954_v33  ;;  %v6037_v33 = vadd.f32 %v6036_v26, %v6035_v11 }
 0xb58   :  { %v6020_v46 = vmul.f32 %v11294_v9, %v11294_v9  ;;  %v6039_v47 = vadd.f32 %v6038_v4, %v6037_v33  ;;  %v5991_v56 = vsel %vm5735_vm11, %v11294_v9, 0.0 }
 0xb5a   :  { %v6041_v6 = vadd.f32 %v6040_v59, %v6039_v47  ;;  %v6044_v34 = vsel %vm5735_vm11, %v6020_v46, 0.0  ;;  %v5831_v46 = vadd.f32 1e-05, %v5830_v57 }
 0xb5c   :  { %v6043_v42 = vadd.f32 %v6042_v48, %v6041_v6  ;;  %6527 = vrsqrt.f32 %v5831_v46  ;;  %vm5838_vm13 = vweird.f32 %v5831_v46 }
 0xb5d   :  { %v5957_v24 = vpop.f32.mrf.mxu1 }
 0xb5e   :  { %v11302_v19 = vadd.f32 %v11217_v54, %v5957_v24  ;;  %v5988_v24 = vadd.f32 %v5987_v2, %v5986_v61  ;;  %v6045_v60 = vadd.f32 %v6044_v34, %v6043_v42 }
 0xb60   :  { %v6021_v14 = vmul.f32 %v11302_v19, %v11302_v19  ;;  %v5990_v62 = vadd.f32 %v5989_v23, %v5988_v24 }
 0xb62   :  { %v5992_v53 = vadd.f32 %v5991_v56, %v5990_v62 }
 0xb65   :  { %v5959_v5 = vpop.f32.mrf.mxu1 }
 0xb66   :  { %v11312_v44 = vadd.f32 %v11217_v54, %v5959_v5  ;;  %v5993_v5 = vsel %vm5735_vm11, %v11302_v19, 0.0 }
 0xb67   :  { %v5994_v11 = vadd.f32 %v5993_v5, %v5992_v53 }
 0xb68   :  { %v6022_v1 = vmul.f32 %v11312_v44, %v11312_v44  ;;  %v5995_v12 = vsel %vm5735_vm11, %v11312_v44, 0.0 }
 0xb69   :  { %v5996_v18 = vadd.f32 %v5995_v12, %v5994_v11  ;;  %v6528_v11 = vpop.eup %6527 }
 0xb6a   :  { %vm5839_vm12 = vweird.f32 %v6528_v11 }
 0xb6b   :  { %vm5840_vm14 = vmor %vm5838_vm13, %vm5839_vm12 }
 0xb6d   :  { %v5962_v27 = vpop.f32.mrf.mxu1 }
 0xb6e   :  { %v11320_v20 = vadd.f32 %v11217_v54, %v5962_v27  ;;  %v6046_v27 = vsel %vm5735_vm11, %v6021_v14, 0.0 }
 0xb6f   :  { %v6047_v13 = vadd.f32 %v6046_v27, %v6045_v60 }
 0xb70   :  { %v6023_v26 = vmul.f32 %v11320_v20, %v11320_v20  ;;  %v5997_v4 = vsel %vm5735_vm11, %v11320_v20, 0.0 }
 0xb71   :  { %v5998_v23 = vadd.f32 %v5997_v4, %v5996_v18 }
 0xb72   :  { %v6050_v50 = vsel %vm5735_vm11, %v6023_v26, 0.0 }
 0xb75   :  { %v5964_v10 = vpop.f32.mrf.mxu1 }
 0xb76   :  { %v11328_v0 = vadd.f32 %v11217_v54, %v5964_v10  ;;  %v6048_v10 = vsel %vm5735_vm11, %v6022_v1, 0.0 }
 0xb77   :  { %v6049_v59 = vadd.f32 %v6048_v10, %v6047_v13  ;;  %v5833_v10 = vmul.f32 %v6528_v11, %v5831_v46 }
 0xb78   :  { %v6024_v2 = vmul.f32 %v11328_v0, %v11328_v0  ;;  %v5999_v33 = vsel %vm5735_vm11, %v11328_v0, 0.0 }
 0xb79   :  { %v6051_v48 = vadd.f32 %v6050_v50, %v6049_v59  ;;  %v6000_v56 = vadd.f32 %v5999_v33, %v5998_v23  ;;  %v5834_v50 = vmul.f32 %v6528_v11, %v5833_v10  ;;  %v5972_v10 = vld [vmem:[%s11514_s14] sm:$0x1] }
 0xb7a   :  { %v6052_v47 = vsel %vm5735_vm11, %v6024_v2, 0.0 }
 0xb7b   :  { %v6053_v62 = vadd.f32 %v6052_v47, %v6051_v48  ;;  %v5835_v47 = vmul.f32 0.5, %v5834_v50 }
 0xb7d   :  { %v5967_v7 = vpop.f32.mrf.mxu1 }
 0xb7e   :  { %v11336_v58 = vadd.f32 %v11217_v54, %v5967_v7 }
 0xb80   :  { %v6025_v61 = vmul.f32 %v11336_v58, %v11336_v58  ;;  %v6001_v24 = vsel %vm5735_vm11, %v11336_v58, 0.0 }
 0xb81   :  { %v6002_v34 = vadd.f32 %v6001_v24, %v6000_v56 }
 0xb82   :  { %v6054_v55 = vsel %vm5735_vm11, %v6025_v61, 0.0 }
 0xb83   :  { %v6055_v42 = vadd.f32 %v6054_v55, %v6053_v62 }
 0xb85   :  { %v5969_v14 = vpop.f32.mrf.mxu1 }
 0xb86   :  { %v11353_v6 = vadd.f32 %v11217_v54, %v5969_v14  ;;  %v5836_v14 = vsub.f32 1.5, %v5835_v47 }
 0xb88   :  { %v6003_v5 = vsel %vm5735_vm11, %v11353_v6, 0.0  ;;  %v6026_v1 = vmul.f32 %v11353_v6, %v11353_v6 }
 0xb89   :  { %v6004_v53 = vadd.f32 %v6003_v5, %v6002_v34  ;;  %v5837_v34 = vmul.f32 %v6528_v11, %v5836_v14  ;;  %v5733_v5 = vld [vmem:[%s11512_s10] sm:$0x1] }
 0xb8a   :  { %v6056_v7 = vsel %vm5735_vm11, %v6026_v1, 0.0 }
 0xb8b   :  { %v6005_v27 = vrot.slane %v6004_v53, 4  ;;  %v6057_v12 = vadd.f32 %v6056_v7, %v6055_v42  ;;  %v5841_v1 = vsel %vm5840_vm14, %v6528_v11, %v5837_v34 }
 0xb8d   :  { %v6006_v26 = vadd.f32 %v6005_v27, %v6004_v53  ;;  %v6058_v60 = vrot.slane %v6057_v12, 4  ;;  %v5842_v53 = vmul.f32 %v5841_v1, %v5733_v5 }
 0xb8f   :  { %v6007_v54 = vrot.slane %v6006_v26, 2  ;;  %v6059_v57 = vadd.f32 %v6058_v60, %v6057_v12  ;;  %v5843_v12 = vmul.f32 %v5842_v53, %v11286_v22  ;;  %v5734_v60 = vld [vmem:[%s11513_s11] sm:$0x1]  ;;  %v5846_v46 = vperm.slane %v5842_v53, 0 }
 0xb91   :  { %v6008_v4 = vadd.f32 %v6007_v54, %v6006_v26  ;;  %v6060_v2 = vrot.slane %v6059_v57, 2  ;;  %v5851_v50 = vmul.f32 %v5846_v46, %v11093_v38  ;;  %v5853_v47 = vmul.f32 %v5846_v46, %v11112_v37 }
 0xb92   :  { %v11386_v38 = vmul.f32 %v5846_v46, %v11157_v45  ;;  %v11392_v14 = vmul.f32 %v5846_v46, %v11174_v36 }
 0xb93   :  { %v6009_v13 = vrot.slane %v6008_v4, 1  ;;  %v6061_v18 = vadd.f32 %v6060_v2, %v6059_v57  ;;  %v5844_v57 = vsub.f32 %v5734_v60, %v5843_v12  ;;  %v5848_v2 = vmul.f32 %v5846_v46, %v11081_v29 }
 0xb95   :  { %v6010_v33 = vadd.f32 %v6009_v13, %v6008_v4  ;;  %v6062_v61 = vrot.slane %v6061_v18, 1  ;;  %v5849_v13 = vmul.f32 %v5846_v46, %v11078_v51  ;;  %v5856_v51 = vmul.f32 %v5846_v46, %v11139_v39 }
 0xb96   :  { %v5863_v39 = vmul.f32 %v5846_v46, %v11200_v21 }
 0xb97   :  { %v6063_v59 = vadd.f32 %v6062_v61, %v6061_v18  ;;  %v6064_v23 = vmul.f32 0.0078125, %v6010_v33  ;;  %v5850_v18 = vmul.f32 %v5846_v46, %v11086_v17  ;;  %v11374_v33 = vperm.slane %v5844_v57, 0  ;;  %v5973_v61 = vld [vmem:[%s11515_s15] sm:$0x1] }
 0xb98   :  { %v5857_v17 = vmul.f32 %v5846_v46, %v11147_v8 }
 0xb99   :  { %v6065_v24 = vmul.f32 0.0078125, %v6063_v59  ;;  %v6066_v48 = vmul.f32 %v6064_v23, %v6064_v23  ;;  %v5852_v59 = vmul.f32 %v5846_v46, %v11104_v63  ;;  %v5867_v8 = vadd.f32 %v11374_v33, %v5848_v2 }
 0xb9a   :  { %v5868_v45 = vadd.f32 %v11374_v33, %v5849_v13 }
 0xb9b   :  { %v6067_v56 = vsub.f32 %v6065_v24, %v6066_v48  ;;  %v5854_v24 = vmul.f32 %v5846_v46, %v11123_v15  ;;  %v5855_v48 = vmul.f32 %v5846_v46, %v11131_v16  ;;  %v11395_v15 = vmul.f32 %v5846_v46, %v11182_v40 }
 0xb9c   :  { %v5862_v16 = vmul.f32 %v5846_v46, %v11192_v43  ;;  %v5871_v36 = vadd.f32 %v11374_v33, %v5852_v59  ;;  %v5875_v43 = vadd.f32 %v11374_v33, %v5856_v51 }
 0xb9d   :  { %v6068_v55 = vmax.f32 %v6067_v56, 0.0  ;;  %v11389_v56 = vmul.f32 %v5846_v46, %v11165_v49  ;;  %v5870_v49 = vadd.f32 %v11374_v33, %v5851_v50  ;;  %v5874_v40 = vadd.f32 %v11374_v33, %v5855_v48 }
 0xb9e   :  { %v5881_v53 = vadd.f32 %v11374_v33, %v5862_v16 }
 0xb9f   :  { %v6069_v62 = vadd.f32 1e-05, %v6068_v55  ;;  %v5872_v55 = vadd.f32 %v11374_v33, %v5853_v47 }
 0xba1   :  { %6529 = vrsqrt.f32 %v6069_v62  ;;  %vm6076_vm0 = vweird.f32 %v6069_v62 }
 0xba7   :  { %v6530_v42 = vpop.eup %6529 }
 0xba8   :  { %v6071_v7 = vmul.f32 %v6530_v42, %v6069_v62  ;;  %vm6077_vm15 = vweird.f32 %v6530_v42  ;;  %v5873_v62 = vadd.f32 %v11374_v33, %v5854_v24 }
 0xba9   :  { %vm6078_vm1 = vmor %vm6076_vm0, %vm6077_vm15 }
 0xbaa   :  { %v6072_v27 = vmul.f32 %v6530_v42, %v6071_v7  ;;  %v5882_v7 = vadd.f32 %v11374_v33, %v5863_v39 }
 0xbac   :  { %v6073_v26 = vmul.f32 0.5, %v6072_v27 }
 0xbae   :  { %v6074_v54 = vsub.f32 1.5, %v6073_v26 }
 0xbb0   :  { %v6075_v11 = vmul.f32 %v6530_v42, %v6074_v54 }
 0xbb2   :  { %v6079_v4 = vsel %vm6078_vm1, %v6530_v42, %v6075_v11  ;;  %v5876_v42 = vadd.f32 %v11374_v33, %v5857_v17 }
 0xbb3   :  { %v6080_v22 = vmul.f32 %v6079_v4, %v5972_v10 }
 0xbb5   :  { %v6081_v29 = vmul.f32 %v6080_v22, %v6064_v23  ;;  %v6084_v37 = vperm.slane %v6080_v22, 0  ;;  %v5869_v23 = vadd.f32 %v11374_v33, %v5850_v18 }
 0xbb7   :  { %v6082_v63 = vsub.f32 %v5973_v61, %v6081_v29  ;;  %v6086_v21 = vmul.f32 %v6084_v37, %v11225_v32  ;;  %v6087_v34 = vmul.f32 %v6084_v37, %v11221_v35  ;;  %v6088_v5 = vmul.f32 %v6084_v37, %v11229_v31 }
 0xbb8   :  { %v6089_v27 = vmul.f32 %v6084_v37, %v11235_v30  ;;  %v6090_v12 = vmul.f32 %v6084_v37, %v11245_v41  ;;  %v6091_v32 = vmul.f32 %v6084_v37, %v11256_v3  ;;  %v6100_v35 = vmul.f32 %v6084_v37, %v11336_v58 }
 0xbb9   :  { %v6103_v1 = vperm.slane %v6082_v63, 0  ;;  %v6101_v31 = vmul.f32 %v6084_v37, %v11353_v6  ;;  %v6092_v57 = vmul.f32 %v6084_v37, %v11266_v52  ;;  %v6093_v10 = vmul.f32 %v6084_v37, %v11275_v28 }
 0xbba   :  { %v6094_v11 = vmul.f32 %v6084_v37, %v11284_v25  ;;  %v6095_v30 = vmul.f32 %v6084_v37, %v11294_v9  ;;  %v6096_v58 = vmul.f32 %v6084_v37, %v11302_v19  ;;  %v6097_v6 = vmul.f32 %v6084_v37, %v11312_v44 }
 0xbbb   :  { %v6105_v26 = vadd.f32 %v6103_v1, %v6086_v21  ;;  %v6106_v60 = vadd.f32 %v6103_v1, %v6087_v34  ;;  %v6107_v54 = vadd.f32 %v6103_v1, %v6088_v5  ;;  %v6108_v46 = vadd.f32 %v6103_v1, %v6089_v27 }
 0xbbc   :  { %v6109_v4 = vadd.f32 %v6103_v1, %v6090_v12  ;;  %v6110_v41 = vadd.f32 %v6103_v1, %v6091_v32  ;;  %v6119_v2 = vadd.f32 %v6103_v1, %v6100_v35  ;;  %v6120_v22 = vadd.f32 %v6103_v1, %v6101_v31 }
 0xbbd   :  { %v6111_v13 = vadd.f32 %v6103_v1, %v6092_v57  ;;  %v6121_v18 = vadd.f32 %v6105_v26, %v5867_v8  ;;  %v6122_v3 = vadd.f32 %v6106_v60, %v5868_v45  ;;  %v6123_v50 = vadd.f32 %v6107_v54, %v5869_v23 }
 0xbbe   :  { %v6112_v61 = vadd.f32 %v6103_v1, %v6093_v10  ;;  %v6124_v52 = vadd.f32 %v6108_v46, %v5870_v49  ;;  %v6098_v28 = vmul.f32 %v6084_v37, %v11320_v20  ;;  %v6113_v59 = vadd.f32 %v6103_v1, %v6094_v11 }
 0xbbf   :  { %v6114_v25 = vadd.f32 %v6103_v1, %v6095_v30  ;;  %v6125_v47 = vadd.f32 %v6109_v4, %v5871_v36  ;;  %v6115_v24 = vadd.f32 %v6103_v1, %v6096_v58  ;;  %v6126_v9 = vadd.f32 %v6110_v41, %v5872_v55 }
 0xbc0   :  { %v6135_v29 = vadd.f32 %v6119_v2, %v5881_v53  ;;  %v6136_v48 = vadd.f32 %v6120_v22, %v5882_v7  ;;  %v6127_v51 = vadd.f32 %v6111_v13, %v5873_v62  ;;  %v6137_v17 = vmax.f32 %v6121_v18, 0.0 }
 0xbc1   :  { %v6138_v63 = vmax.f32 %v6122_v3, 0.0  ;;  %v6139_v16 = vmax.f32 %v6123_v50, 0.0  ;;  %v6099_v39 = vmul.f32 %v6084_v37, %v11328_v0  ;;  %v6116_v19 = vadd.f32 %v6103_v1, %v6097_v6 }
 0xbc2   :  { %v6128_v8 = vadd.f32 %v6112_v61, %v5874_v40  ;;  %v6140_v44 = vmax.f32 %v6124_v52, 0.0  ;;  %v5877_v45 = vadd.f32 %v11374_v33, %v11386_v38  ;;  %v6117_v20 = vadd.f32 %v6103_v1, %v6098_v28  ;;  %6153 = vst.msk [vmem:[%s11516_s17] sm:$0xff] %vm5735_vm11, %v6137_v17 }
 0xbc3   :  { %v6129_v23 = vadd.f32 %v6113_v59, %v5875_v43  ;;  %v6141_v49 = vmax.f32 %v6125_v47, 0.0  ;;  %v5878_v36 = vadd.f32 %v11374_v33, %v11389_v56  ;;  %v6118_v55 = vadd.f32 %v6103_v1, %v6099_v39  ;;  %6154 = vst.msk [vmem:[%s11516_s17 + $0x8] sm:$0xff] %vm5735_vm11, %v6138_v63 }
 0xbc4   :  { %v6130_v62 = vadd.f32 %v6114_v25, %v5876_v42  ;;  %v6142_v0 = vmax.f32 %v6126_v9, 0.0  ;;  %v5879_v38 = vadd.f32 %v11374_v33, %v11392_v14  ;;  %v6131_v37 = vadd.f32 %v6115_v24, %v5877_v45  ;;  %6155 = vst.msk [vmem:[%s11516_s17 + $0x10] sm:$0xff] %vm5735_vm11, %v6139_v16 }
 0xbc5   :  { %v6143_v40 = vmax.f32 %v6127_v51, 0.0  ;;  %v5880_v56 = vadd.f32 %v11374_v33, %v11395_v15  ;;  %v6132_v43 = vadd.f32 %v6116_v19, %v5878_v36  ;;  %v6144_v21 = vmax.f32 %v6128_v8, 0.0  ;;  %6156 = vst.msk [vmem:[%s11516_s17 + $0x18] sm:$0xff] %vm5735_vm11, %v6140_v44 }
 0xbc6   :  { %v6133_v34 = vadd.f32 %v6117_v20, %v5879_v38  ;;  %v6145_v5 = vmax.f32 %v6129_v23, 0.0  ;;  %6157 = vst.msk [vmem:[%s11516_s17 + $0x20] sm:$0xff] %vm5735_vm11, %v6141_v49  ;;  %v6146_v1 = vmax.f32 %v6130_v62, 0.0  ;;  %v6147_v33 = vmax.f32 %v6131_v37, 0.0 }
 0xbc7   :  { %v6134_v14 = vadd.f32 %v6118_v55, %v5880_v56  ;;  %6158 = vst.msk [vmem:[%s11516_s17 + $0x28] sm:$0xff] %vm5735_vm11, %v6142_v0  ;;  %v6148_v15 = vmax.f32 %v6132_v43, 0.0  ;;  %v6151_v7 = vmax.f32 %v6135_v29, 0.0  ;;  %v6152_v27 = vmax.f32 %v6136_v48, 0.0 }
 0xbc8   :  { %6159 = vst.msk [vmem:[%s11516_s17 + $0x30] sm:$0xff] %vm5735_vm11, %v6143_v40  ;;  %v6149_v42 = vmax.f32 %v6133_v34, 0.0 }
 0xbc9   :  { %6160 = vst.msk [vmem:[%s11516_s17 + $0x38] sm:$0xff] %vm5735_vm11, %v6144_v21  ;;  %v6150_v53 = vmax.f32 %v6134_v14, 0.0 }
 0xbca   :  { %6161 = vst.msk [vmem:[%s11516_s17 + $0x40] sm:$0xff] %vm5735_vm11, %v6145_v5 }
 0xbcb   :  { %6162 = vst.msk [vmem:[%s11516_s17 + $0x48] sm:$0xff] %vm5735_vm11, %v6146_v1 }
 0xbcc   :  { %6163 = vst.msk [vmem:[%s11516_s17 + $0x50] sm:$0xff] %vm5735_vm11, %v6147_v33 }
 0xbcd   :  { %6164 = vst.msk [vmem:[%s11516_s17 + $0x58] sm:$0xff] %vm5735_vm11, %v6148_v15 }
 0xbce   :  { %6165 = vst.msk [vmem:[%s11516_s17 + $0x60] sm:$0xff] %vm5735_vm11, %v6149_v42 }
 0xbcf   :  { %6166 = vst.msk [vmem:[%s11516_s17 + $0x68] sm:$0xff] %vm5735_vm11, %v6150_v53 }
 0xbd0   :  { %6167 = vst.msk [vmem:[%s11516_s17 + $0x70] sm:$0xff] %vm5735_vm11, %v6151_v7 }
 0xbd1   :  { %6168 = vst.msk [vmem:[%s11516_s17 + $0x78] sm:$0xff] %vm5735_vm11, %v6152_v27 }

</bundles_post_ra>
